<compile_context>
chip_gen: v7x
topology: tpu7x:2x2x1
jax: 0.10.0
libtpu: 0.0.40
codegen_flags: <defaults>
</compile_context>

<pallas_src>
import functools

import jax
import jax.numpy as jnp
from jax.experimental import pallas as pl
from jax.experimental.pallas import tpu as pltpu


def _round_up(x, m):
    return (x + m - 1) // m * m


# ---------------------------------------------------------------------------
# Fused kernel: 3x3 conv + ReLU + 1x1 conv + log-softmax NLL + pixel accuracy
# ---------------------------------------------------------------------------
def _fused_seg_kernel(x_ref, lab_ref, we_ref, be_ref, wd_ref, bd_ref,
                      nll_out_ref, acc_out_ref,
                      im2col_ref, nll_acc, cor_acc, pix_acc,
                      *, W, WS, TR, Cin):
    # x_ref   : (TPH, Cin) bf16      halo tile: TR+2 padded rows, flattened space
    # lab_ref : (TR, WL)  int32      labels, lane-dense; junk cols hold a sentinel
    # we_ref  : (9*Cin, CE) bf16     3x3 conv weights in im2col order (tap-major)
    # be_ref  : (1, CE)   f32
    # wd_ref  : (CE, CP)  bf16       1x1 decoder conv weights
    # bd_ref  : (1, CP)   f32        padded classes carry -1e30 bias
    # im2col_ref : (TP, 9*Cin) bf16  scratch, rebuilt every tile
    # outputs : (8, 128) f32 per sample; [0,0] = per-sample NLL sum / accuracy
    CP = wd_ref.shape[1]
    TP = TR * WS
    r = pl.program_id(1)
    R = pl.num_programs(1)

    @pl.when(r == 0)
    def _init():
        nll_acc[...] = jnp.zeros_like(nll_acc)
        cor_acc[...] = jnp.zeros_like(cor_acc)
        pix_acc[...] = jnp.zeros_like(pix_acc)

    # ---- im2col: nine STATIC shifted slab copies out of the bf16 halo tile --
    for i in range(9):
        dy, dx = i // 3, i % 3
        im2col_ref[:, i * Cin:(i + 1) * Cin] = x_ref[pl.ds(dy * WS + dx, TP), :]

    # ---- encoder: 3x3 conv as ONE K=9*Cin matmul, bias + ReLU ---------------
    h = jnp.dot(im2col_ref[...], we_ref[...], preferred_element_type=jnp.float32)
    h = jnp.maximum(h + be_ref[...], 0.0)                          # (TP, CE) f32

    # ---- decoder: 1x1 conv -> logits (bf16 MXU, f32 accumulation) -----------
    logits = jnp.dot(h.astype(jnp.bfloat16), wd_ref[...],
                     preferred_element_type=jnp.float32) + bd_ref[...]  # (TP, CP)

    # ---- loss + pixel accuracy, reduced to scalars ---------------------------
    # WS is a multiple of 8, so this reshape is sublane-tile aligned (cheap).
    l3 = logits.reshape(TR, WS, CP)
    m = jnp.max(l3, axis=-1, keepdims=True)                         # (TR, WS, 1)
    z = l3 - m                                                      # z <= 0
    lse = jnp.log(jnp.sum(jnp.exp(z), axis=-1))                     # (TR, WS)

    lab = lab_ref[:, :WS]                                           # (TR, WS)
    cls = jax.lax.broadcasted_iota(jnp.int32, (TR, WS, CP), 2)
    # z at the label class (0 if label is the junk sentinel - masked below)
    z_lab = jnp.sum(jnp.where(cls == lab[:, :, None], z, 0.0), axis=-1)
    # max of z over classes < 50 (padded classes sit at ~-1e30, never the max)
    z_lo = jnp.max(jnp.where(cls < 50, z, jnp.float32(-1e30)), axis=-1)

    inb = jax.lax.broadcasted_iota(jnp.int32, (TR, WS), 1) < W      # real columns
    valid = (lab < 50) & inb
    correct = valid & (z_lab >= 0.0)        # label attains the max (ties: measure 0)
    valid1 = (z_lo >= 0.0) & inb            # first-argmax class < 50

    nll_tile = jnp.sum(jnp.where(inb, lse - z_lab, 0.0))
    cor_tile = jnp.sum(correct.astype(jnp.float32))
    pix_tile = jnp.sum((valid | valid1).astype(jnp.float32))

    nll_acc[...] = nll_acc[...] + nll_tile
    cor_acc[...] = cor_acc[...] + cor_tile
    pix_acc[...] = pix_acc[...] + pix_tile

    @pl.when(r == R - 1)
    def _finalize():
        nll_out_ref[...] = jnp.broadcast_to(nll_acc[...], nll_out_ref.shape)
        acc_out_ref[...] = jnp.broadcast_to(
            cor_acc[...] / (pix_acc[...] + 1e-10), acc_out_ref.shape)


# ---------------------------------------------------------------------------
# Wrapper: feed_dict = {'img_data': img_nchw, 'seg_label': seg_label} -> (loss, acc)
# ---------------------------------------------------------------------------
def segmentation_module_forward(img_nchw, seg_label, params, *, row_tile=16):
    w_enc, b_enc, w_dec, b_dec = params      # (9*Cin, Ce), (Ce,), (Ce, Cn), (Cn,)
    N, Cin, H, W = img_nchw.shape
    K9 = 9 * Cin
    Ce = w_enc.shape[1]
    Cn = w_dec.shape[1]
    CE = _round_up(Ce, 128)                  # lane-dense encoder channels
    CP = _round_up(Cn, 128)                  # lane-dense classes
    TR = row_tile
    assert H % TR == 0 and TR % 8 == 0, "row_tile must divide H and be a multiple of 8"
    R = H // TR
    WS = _round_up(W + 2, 8)                 # padded row stride (sublane aligned)
    WL = _round_up(WS, 128)                  # lane-dense label width
    TP = TR * WS                             # pixels per tile (padded-W layout)
    TPH = _round_up((TR + 2) * WS + 2, 16)   # halo tile flat length (+2 tap slack)

    # bf16 NHWC image, spatial zero-pad (1 row top/bot, 1 + (WS-W-2) cols right).
    x = jnp.transpose(img_nchw, (0, 2, 3, 1)).astype(jnp.bfloat16)   # (N, H, W, Cin)
    xp = jnp.pad(x, ((0, 0), (1, 1), (1, WS - W - 1), (0, 0)))        # (N, H+2, WS, Cin)

    # Overlapping halo row-tiles (TR+2 rows each), flattened over space.
    row_idx = jnp.arange(R)[:, None] * TR + jnp.arange(TR + 2)[None, :]   # (R, TR+2)
    x_tiles = xp[:, row_idx].reshape(N, R, (TR + 2) * WS, Cin)
    x_tiles = jnp.pad(x_tiles, ((0, 0), (0, 0), (0, TPH - (TR + 2) * WS), (0, 0)))

    # Labels padded to a lane-dense width with a large sentinel in junk columns.
    lab_pad = jnp.pad(seg_label.astype(jnp.int32), ((0, 0), (0, 0), (0, WL - W)),
                      constant_values=1 << 20)                         # (N, H, WL)

    # Channel/class-padded parameters (zero weights; padded classes get -1e30 bias).
    w_enc_p = jnp.zeros((K9, CE), jnp.bfloat16).at[:, :Ce].set(
        w_enc.astype(jnp.bfloat16))
    b_enc_p = jnp.zeros((1, CE), jnp.float32).at[:, :Ce].set(b_enc.reshape(1, Ce))
    w_dec_p = jnp.zeros((CE, CP), jnp.bfloat16).at[:Ce, :Cn].set(
        w_dec.astype(jnp.bfloat16))
    b_dec_p = jnp.full((1, CP), -1e30, jnp.float32).at[:, :Cn].set(
        b_dec.reshape(1, Cn))

    kern = functools.partial(_fused_seg_kernel, W=W, WS=WS, TR=TR, Cin=Cin)

    # Explicit VMEM budget: double-buffered blocks + scratch + headroom for the
    # (TP, CP) f32 intermediates; clamped so it is safe on v5e/v6e/v7x.
    blk_bytes = (TPH * Cin * 2 + TR * WL * 4 + K9 * CE * 2 + CE * 4
                 + CE * CP * 2 + CP * 4 + 2 * 8 * 128 * 4)
    interm_bytes = 8 * TP * CP * 4 + TP * K9 * 2
    vmem_limit = int(min(max(2 * blk_bytes + interm_bytes + (8 << 20), 16 << 20),
                         32 << 20))

    nll_out, acc_out = pl.pallas_call(
        kern,
        out_shape=(jax.ShapeDtypeStruct((N, 8, 128), jnp.float32),
                   jax.ShapeDtypeStruct((N, 8, 128), jnp.float32)),
        grid=(N, R),
        in_specs=[
            # per-(sample, row-tile) halo image block (bf16, O(tile) VMEM)
            pl.BlockSpec((None, None, TPH, Cin), lambda n, r: (n, r, 0, 0)),
            # per-tile labels (lane-dense 128-wide last dim)
            pl.BlockSpec((None, TR, WL), lambda n, r: (n, r, 0)),
            # weights / biases: constant index maps -> resident for the whole grid
            pl.BlockSpec((K9, CE), lambda n, r: (0, 0)),
            pl.BlockSpec((1, CE), lambda n, r: (0, 0)),
            pl.BlockSpec((CE, CP), lambda n, r: (0, 0)),
            pl.BlockSpec((1, CP), lambda n, r: (0, 0)),
        ],
        out_specs=(pl.BlockSpec((None, 8, 128), lambda n, r: (n, 0, 0)),
                   pl.BlockSpec((None, 8, 128), lambda n, r: (n, 0, 0))),
        scratch_shapes=[pltpu.VMEM((TP, K9), jnp.bfloat16),   # im2col tile
                        pltpu.VMEM((1, 1), jnp.float32),      # NLL accumulator
                        pltpu.VMEM((1, 1), jnp.float32),      # correct-pixel acc
                        pltpu.VMEM((1, 1), jnp.float32)],     # denominator acc
        compiler_params=pltpu.CompilerParams(
            dimension_semantics=("parallel", "arbitrary"),
            vmem_limit_bytes=vmem_limit),
    )(x_tiles, lab_pad, w_enc_p, b_enc_p, w_dec_p, b_dec_p)

    nll_per_sample = nll_out[:, 0, 0]        # (N,) per-sample NLL sums
    acc_per_sample = acc_out[:, 0, 0]        # (N,) per-sample pixel accuracies
    loss = jnp.sum(nll_per_sample) / float(N * H * W)
    acc = jnp.mean(acc_per_sample)
    return loss, acc


# ---------------------------------------------------------------------------
# Pure-JAX reference (same bf16 rounding of the MXU operands as the kernel)
# ---------------------------------------------------------------------------
def reference_forward(img_nchw, seg_label, params):
    w_enc, b_enc, w_dec, b_dec = params
    N, Cin, H, W = img_nchw.shape
    x = jnp.transpose(img_nchw, (0, 2, 3, 1)).astype(jnp.float32)
    xp = jnp.pad(x, ((0, 0), (1, 1), (1, 1), (0, 0)))
    cols = [xp[:, dy:dy + H, dx:dx + W, :] for dy in range(3) for dx in range(3)]
    patches = jnp.concatenate(cols, axis=-1).reshape(N * H * W, 9 * Cin)

    hi = jax.lax.Precision.HIGHEST
    pb = patches.astype(jnp.bfloat16).astype(jnp.float32)
    web = w_enc.astype(jnp.bfloat16).astype(jnp.float32)
    h = jnp.maximum(jnp.dot(pb, web, precision=hi) + b_enc[None, :], 0.0)
    hb = h.astype(jnp.bfloat16).astype(jnp.float32)
    wdb = w_dec.astype(jnp.bfloat16).astype(jnp.float32)
    logits = (jnp.dot(hb, wdb, precision=hi) + b_dec[None, :]).reshape(N, H * W, -1)

    logp = jax.nn.log_softmax(logits, axis=-1)
    lbl = seg_label.reshape(N, H * W)
    nll = -jnp.take_along_axis(logp, lbl[..., None], axis=-1)[..., 0]
    loss = jnp.mean(nll)

    preds = jnp.argmax(logits, axis=-1)
    valid = lbl < 50
    valid1 = preds < 50
    acc_sum = jnp.sum(valid & (preds == lbl), axis=1).astype(jnp.float32)
    pix_final = jnp.sum(valid | valid1, axis=1).astype(jnp.float32)
    acc = jnp.mean(acc_sum / (pix_final + 1e-10))
    return loss, acc


if __name__ == "__main__":
    # Small shapes consistent with the module: batch=2, 4 input channels, 16x16
    # images, encoder width 32, 64 classes (so the `label < 50` branches matter).
    N, Cin, H, W = 2, 4, 16, 16
    Cenc, Cnum = 32, 64

    key = jax.random.PRNGKey(0)
    k_img, k_lbl, k_we, k_be, k_wd, k_bd = jax.random.split(key, 6)

    img = jax.random.normal(k_img, (N, Cin, H, W), dtype=jnp.float32)      # NCHW
    seg_label = jax.random.randint(k_lbl, (N, H, W), 0, Cnum, dtype=jnp.int32)

    # Synthetic parameters: encoder 3x3 conv in im2col form, decoder 1x1 conv.
    w_enc = jax.random.normal(k_we, (9 * Cin, Cenc), dtype=jnp.float32) * 0.1
    b_enc = jax.random.normal(k_be, (Cenc,), dtype=jnp.float32) * 0.1
    w_dec = jax.random.normal(k_wd, (Cenc, Cnum), dtype=jnp.float32) * 0.1
    b_dec = jax.random.normal(k_bd, (Cnum,), dtype=jnp.float32) * 0.1
    params = (w_enc, b_enc, w_dec, b_dec)

    loss, acc = segmentation_module_forward(img, seg_label, params, row_tile=16)
    loss, acc = jax.block_until_ready((loss, acc))

    ref_loss, ref_acc = reference_forward(img, seg_label, params)
    assert jnp.allclose(loss, ref_loss, rtol=2e-3, atol=2e-3), (loss, ref_loss)
    assert jnp.allclose(acc, ref_acc, rtol=2e-3, atol=8e-3), (acc, ref_acc)

    print("KERNEL_OK")
</pallas_src>

<mosaic_0001>
module attributes {stable_mosaic.version = 11 : i64} {
  func.func @_fused_seg_kernel(%arg0: i32, %arg1: i32, %arg2: memref<1x1x448x4xbf16, #tpu.memory_space<vmem>>, %arg3: memref<1x16x128xi32, #tpu.memory_space<vmem>>, %arg4: memref<36x128xbf16, #tpu.memory_space<vmem>>, %arg5: memref<1x128xf32, #tpu.memory_space<vmem>>, %arg6: memref<128x128xbf16, #tpu.memory_space<vmem>>, %arg7: memref<1x128xf32, #tpu.memory_space<vmem>>, %arg8: memref<1x8x128xf32, #tpu.memory_space<vmem>>, %arg9: memref<1x8x128xf32, #tpu.memory_space<vmem>>, %arg10: memref<384x36xbf16, #tpu.memory_space<vmem>>, %arg11: memref<1x1xf32, #tpu.memory_space<vmem>>, %arg12: memref<1x1xf32, #tpu.memory_space<vmem>>, %arg13: memref<1x1xf32, #tpu.memory_space<vmem>>) attributes {dimension_semantics = [#tpu.dimension_semantics<parallel>, #tpu.dimension_semantics<arbitrary>], iteration_bounds = array<i64: 2, 1>, scalar_prefetch = 0 : i64, scratch_operands = 4 : i64, tpu.core_type = #tpu.core_type<tc>, window_params = [{transform_indices = @transform_0, window_bounds = array<i64: 1, 1, 448, 4>}, {transform_indices = @transform_1, window_bounds = array<i64: 1, 16, 128>}, {pipeline_mode = #tpu.pipeline_mode<synchronous>, transform_indices = @transform_2, window_bounds = array<i64: 36, 128>}, {pipeline_mode = #tpu.pipeline_mode<synchronous>, transform_indices = @transform_3, window_bounds = array<i64: 1, 128>}, {pipeline_mode = #tpu.pipeline_mode<synchronous>, transform_indices = @transform_4, window_bounds = array<i64: 128, 128>}, {pipeline_mode = #tpu.pipeline_mode<synchronous>, transform_indices = @transform_5, window_bounds = array<i64: 1, 128>}, {transform_indices = @transform_6, window_bounds = array<i64: 1, 8, 128>}, {transform_indices = @transform_7, window_bounds = array<i64: 1, 8, 128>}]} {
    %c0_i32 = arith.constant 0 : i32
    %0 = arith.cmpi eq, %arg1, %c0_i32 : i32
    %1 = arith.extui %0 : i1 to i32
    %c0_i32_0 = arith.constant 0 : i32
    %2 = arith.cmpi ne, %1, %c0_i32_0 : i32
    scf.if %2 {
      %cst_81 = arith.constant 0.000000e+00 : f32
      %113 = vector.broadcast %cst_81 : f32 to vector<1x1xf32>
      %c0_82 = arith.constant 0 : index
      %c0_83 = arith.constant 0 : index
      %114 = vector.load %arg11[%c0_82, %c0_83] : memref<1x1xf32, #tpu.memory_space<vmem>>, vector<1x1xf32>
      tpu.vector_store %arg11[%c0_82, %c0_83], %113 {strides = array<i32>} : memref<1x1xf32, #tpu.memory_space<vmem>>, vector<1x1xf32>,
      %cst_84 = arith.constant 0.000000e+00 : f32
      %115 = vector.broadcast %cst_84 : f32 to vector<1x1xf32>
      %c0_85 = arith.constant 0 : index
      %c0_86 = arith.constant 0 : index
      %116 = vector.load %arg12[%c0_85, %c0_86] : memref<1x1xf32, #tpu.memory_space<vmem>>, vector<1x1xf32>
      tpu.vector_store %arg12[%c0_85, %c0_86], %115 {strides = array<i32>} : memref<1x1xf32, #tpu.memory_space<vmem>>, vector<1x1xf32>,
      %cst_87 = arith.constant 0.000000e+00 : f32
      %117 = vector.broadcast %cst_87 : f32 to vector<1x1xf32>
      %c0_88 = arith.constant 0 : index
      %c0_89 = arith.constant 0 : index
      %118 = vector.load %arg13[%c0_88, %c0_89] : memref<1x1xf32, #tpu.memory_space<vmem>>, vector<1x1xf32>
      tpu.vector_store %arg13[%c0_88, %c0_89], %117 {strides = array<i32>} : memref<1x1xf32, #tpu.memory_space<vmem>>, vector<1x1xf32>,
    } else {
    }
    %c0 = arith.constant 0 : index
    %c0_1 = arith.constant 0 : index
    %c0_2 = arith.constant 0 : index
    %c0_3 = arith.constant 0 : index
    %3 = vector.load %arg2[%c0, %c0_1, %c0_2, %c0_3] : memref<1x1x448x4xbf16, #tpu.memory_space<vmem>>, vector<1x1x384x4xbf16>
    %4 = vector.shape_cast %3 : vector<1x1x384x4xbf16> to vector<384x4xbf16>
    %c0_4 = arith.constant 0 : index
    %c0_5 = arith.constant 0 : index
    %5 = vector.load %arg10[%c0_4, %c0_5] : memref<384x36xbf16, #tpu.memory_space<vmem>>, vector<384x4xbf16>
    tpu.vector_store %arg10[%c0_4, %c0_5], %4 {strides = array<i32>} : memref<384x36xbf16, #tpu.memory_space<vmem>>, vector<384x4xbf16>,
    %c0_6 = arith.constant 0 : index
    %c0_7 = arith.constant 0 : index
    %c1 = arith.constant 1 : index
    %c0_8 = arith.constant 0 : index
    %6 = vector.load %arg2[%c0_6, %c0_7, %c1, %c0_8] : memref<1x1x448x4xbf16, #tpu.memory_space<vmem>>, vector<1x1x384x4xbf16>
    %7 = vector.shape_cast %6 : vector<1x1x384x4xbf16> to vector<384x4xbf16>
    %c0_9 = arith.constant 0 : index
    %c4 = arith.constant 4 : index
    %8 = vector.load %arg10[%c0_9, %c4] : memref<384x36xbf16, #tpu.memory_space<vmem>>, vector<384x4xbf16>
    tpu.vector_store %arg10[%c0_9, %c4], %7 {strides = array<i32>} : memref<384x36xbf16, #tpu.memory_space<vmem>>, vector<384x4xbf16>,
    %c0_10 = arith.constant 0 : index
    %c0_11 = arith.constant 0 : index
    %c2 = arith.constant 2 : index
    %c0_12 = arith.constant 0 : index
    %9 = vector.load %arg2[%c0_10, %c0_11, %c2, %c0_12] : memref<1x1x448x4xbf16, #tpu.memory_space<vmem>>, vector<1x1x384x4xbf16>
    %10 = vector.shape_cast %9 : vector<1x1x384x4xbf16> to vector<384x4xbf16>
    %c0_13 = arith.constant 0 : index
    %c8 = arith.constant 8 : index
    %11 = vector.load %arg10[%c0_13, %c8] : memref<384x36xbf16, #tpu.memory_space<vmem>>, vector<384x4xbf16>
    tpu.vector_store %arg10[%c0_13, %c8], %10 {strides = array<i32>} : memref<384x36xbf16, #tpu.memory_space<vmem>>, vector<384x4xbf16>,
    %c0_14 = arith.constant 0 : index
    %c0_15 = arith.constant 0 : index
    %c24 = arith.constant 24 : index
    %c0_16 = arith.constant 0 : index
    %12 = vector.load %arg2[%c0_14, %c0_15, %c24, %c0_16] : memref<1x1x448x4xbf16, #tpu.memory_space<vmem>>, vector<1x1x384x4xbf16>
    %13 = vector.shape_cast %12 : vector<1x1x384x4xbf16> to vector<384x4xbf16>
    %c0_17 = arith.constant 0 : index
    %c12 = arith.constant 12 : index
    %14 = vector.load %arg10[%c0_17, %c12] : memref<384x36xbf16, #tpu.memory_space<vmem>>, vector<384x4xbf16>
    tpu.vector_store %arg10[%c0_17, %c12], %13 {strides = array<i32>} : memref<384x36xbf16, #tpu.memory_space<vmem>>, vector<384x4xbf16>,
    %c0_18 = arith.constant 0 : index
    %c0_19 = arith.constant 0 : index
    %c25 = arith.constant 25 : index
    %c0_20 = arith.constant 0 : index
    %15 = vector.load %arg2[%c0_18, %c0_19, %c25, %c0_20] : memref<1x1x448x4xbf16, #tpu.memory_space<vmem>>, vector<1x1x384x4xbf16>
    %16 = vector.shape_cast %15 : vector<1x1x384x4xbf16> to vector<384x4xbf16>
    %c0_21 = arith.constant 0 : index
    %c16 = arith.constant 16 : index
    %17 = vector.load %arg10[%c0_21, %c16] : memref<384x36xbf16, #tpu.memory_space<vmem>>, vector<384x4xbf16>
    tpu.vector_store %arg10[%c0_21, %c16], %16 {strides = array<i32>} : memref<384x36xbf16, #tpu.memory_space<vmem>>, vector<384x4xbf16>,
    %c0_22 = arith.constant 0 : index
    %c0_23 = arith.constant 0 : index
    %c26 = arith.constant 26 : index
    %c0_24 = arith.constant 0 : index
    %18 = vector.load %arg2[%c0_22, %c0_23, %c26, %c0_24] : memref<1x1x448x4xbf16, #tpu.memory_space<vmem>>, vector<1x1x384x4xbf16>
    %19 = vector.shape_cast %18 : vector<1x1x384x4xbf16> to vector<384x4xbf16>
    %c0_25 = arith.constant 0 : index
    %c20 = arith.constant 20 : index
    %20 = vector.load %arg10[%c0_25, %c20] : memref<384x36xbf16, #tpu.memory_space<vmem>>, vector<384x4xbf16>
    tpu.vector_store %arg10[%c0_25, %c20], %19 {strides = array<i32>} : memref<384x36xbf16, #tpu.memory_space<vmem>>, vector<384x4xbf16>,
    %c0_26 = arith.constant 0 : index
    %c0_27 = arith.constant 0 : index
    %c48 = arith.constant 48 : index
    %c0_28 = arith.constant 0 : index
    %21 = vector.load %arg2[%c0_26, %c0_27, %c48, %c0_28] : memref<1x1x448x4xbf16, #tpu.memory_space<vmem>>, vector<1x1x384x4xbf16>
    %22 = vector.shape_cast %21 : vector<1x1x384x4xbf16> to vector<384x4xbf16>
    %c0_29 = arith.constant 0 : index
    %c24_30 = arith.constant 24 : index
    %23 = vector.load %arg10[%c0_29, %c24_30] : memref<384x36xbf16, #tpu.memory_space<vmem>>, vector<384x4xbf16>
    tpu.vector_store %arg10[%c0_29, %c24_30], %22 {strides = array<i32>} : memref<384x36xbf16, #tpu.memory_space<vmem>>, vector<384x4xbf16>,
    %c0_31 = arith.constant 0 : index
    %c0_32 = arith.constant 0 : index
    %c49 = arith.constant 49 : index
    %c0_33 = arith.constant 0 : index
    %24 = vector.load %arg2[%c0_31, %c0_32, %c49, %c0_33] : memref<1x1x448x4xbf16, #tpu.memory_space<vmem>>, vector<1x1x384x4xbf16>
    %25 = vector.shape_cast %24 : vector<1x1x384x4xbf16> to vector<384x4xbf16>
    %c0_34 = arith.constant 0 : index
    %c28 = arith.constant 28 : index
    %26 = vector.load %arg10[%c0_34, %c28] : memref<384x36xbf16, #tpu.memory_space<vmem>>, vector<384x4xbf16>
    tpu.vector_store %arg10[%c0_34, %c28], %25 {strides = array<i32>} : memref<384x36xbf16, #tpu.memory_space<vmem>>, vector<384x4xbf16>,
    %c0_35 = arith.constant 0 : index
    %c0_36 = arith.constant 0 : index
    %c50 = arith.constant 50 : index
    %c0_37 = arith.constant 0 : index
    %27 = vector.load %arg2[%c0_35, %c0_36, %c50, %c0_37] : memref<1x1x448x4xbf16, #tpu.memory_space<vmem>>, vector<1x1x384x4xbf16>
    %28 = vector.shape_cast %27 : vector<1x1x384x4xbf16> to vector<384x4xbf16>
    %c0_38 = arith.constant 0 : index
    %c32 = arith.constant 32 : index
    %29 = vector.load %arg10[%c0_38, %c32] : memref<384x36xbf16, #tpu.memory_space<vmem>>, vector<384x4xbf16>
    tpu.vector_store %arg10[%c0_38, %c32], %28 {strides = array<i32>} : memref<384x36xbf16, #tpu.memory_space<vmem>>, vector<384x4xbf16>,
    %c0_39 = arith.constant 0 : index
    %c0_40 = arith.constant 0 : index
    %30 = vector.load %arg10[%c0_39, %c0_40] : memref<384x36xbf16, #tpu.memory_space<vmem>>, vector<384x36xbf16>
    %c0_41 = arith.constant 0 : index
    %c0_42 = arith.constant 0 : index
    %31 = vector.load %arg4[%c0_41, %c0_42] : memref<36x128xbf16, #tpu.memory_space<vmem>>, vector<36x128xbf16>
    %cst = arith.constant dense<0.000000e+00> : vector<384x128xf32>
    %32 = tpu.matmul %30, %31, %cst {dimension_numbers = #tpu.dot_dimension_numbers<[1], [0], [0], [1], [0, 0, 1, 1], [], []>} : vector<384x36xbf16>, vector<36x128xbf16>, vector<384x128xf32> -> vector<384x128xf32>
    %c0_43 = arith.constant 0 : index
    %c0_44 = arith.constant 0 : index
    %33 = vector.load %arg5[%c0_43, %c0_44] : memref<1x128xf32, #tpu.memory_space<vmem>>, vector<1x128xf32>
    %34 = vector.broadcast %33 : vector<1x128xf32> to vector<384x128xf32>
    %35 = arith.addf %32, %34 : vector<384x128xf32>
    %cst_45 = arith.constant 0.000000e+00 : f32
    %36 = vector.broadcast %cst_45 : f32 to vector<384x128xf32>
    %37 = arith.maximumf %35, %36 : vector<384x128xf32>
    %38 = arith.truncf %37 : vector<384x128xf32> to vector<384x128xbf16>
    %c0_46 = arith.constant 0 : index
    %c0_47 = arith.constant 0 : index
    %39 = vector.load %arg6[%c0_46, %c0_47] : memref<128x128xbf16, #tpu.memory_space<vmem>>, vector<128x128xbf16>
    %cst_48 = arith.constant dense<0.000000e+00> : vector<384x128xf32>
    %40 = tpu.matmul %38, %39, %cst_48 {dimension_numbers = #tpu.dot_dimension_numbers<[1], [0], [0], [1], [0, 0, 1, 1], [], []>} : vector<384x128xbf16>, vector<128x128xbf16>, vector<384x128xf32> -> vector<384x128xf32>
    %c0_49 = arith.constant 0 : index
    %c0_50 = arith.constant 0 : index
    %41 = vector.load %arg7[%c0_49, %c0_50] : memref<1x128xf32, #tpu.memory_space<vmem>>, vector<1x128xf32>
    %42 = vector.broadcast %41 : vector<1x128xf32> to vector<384x128xf32>
    %43 = arith.addf %40, %42 : vector<384x128xf32>
    %44 = vector.shape_cast %43 : vector<384x128xf32> to vector<16x24x128xf32>
    %cst_51 = arith.constant dense<0xFF800000> : vector<16x24xf32>
    %45 = vector.multi_reduction <maximumf>, %44, %cst_51 [2] : vector<16x24x128xf32> to vector<16x24xf32>
    %46 = vector.shape_cast %45 : vector<16x24xf32> to vector<16x24x1xf32>
    %47 = vector.broadcast %46 : vector<16x24x1xf32> to vector<16x24x128xf32>
    %48 = arith.subf %44, %47 : vector<16x24x128xf32>
    %49 = math.exp %48 : vector<16x24x128xf32>
    %cst_52 = arith.constant dense<0.000000e+00> : vector<16x24xf32>
    %50 = vector.multi_reduction <add>, %49, %cst_52 [2] : vector<16x24x128xf32> to vector<16x24xf32>
    %51 = math.log %50 : vector<16x24xf32>
    %c0_53 = arith.constant 0 : index
    %c0_54 = arith.constant 0 : index
    %c0_55 = arith.constant 0 : index
    %52 = vector.load %arg3[%c0_53, %c0_54, %c0_55] : memref<1x16x128xi32, #tpu.memory_space<vmem>>, vector<1x16x24xi32>
    %53 = vector.shape_cast %52 : vector<1x16x24xi32> to vector<16x24xi32>
    %54 = tpu.iota {dimensions = array<i32: 2>} : vector<16x24x128xi32>
    %55 = vector.shape_cast %53 : vector<16x24xi32> to vector<16x24x1xi32>
    %56 = vector.broadcast %55 : vector<16x24x1xi32> to vector<16x24x128xi32>
    %57 = arith.cmpi eq, %54, %56 : vector<16x24x128xi32>
    %cst_56 = arith.constant 0.000000e+00 : f32
    %58 = vector.broadcast %cst_56 : f32 to vector<16x24x128xf32>
    %59 = arith.select %57, %48, %58 : vector<16x24x128xi1>, vector<16x24x128xf32>
    %cst_57 = arith.constant dense<0.000000e+00> : vector<16x24xf32>
    %60 = vector.multi_reduction <add>, %59, %cst_57 [2] : vector<16x24x128xf32> to vector<16x24xf32>
    %c50_i32 = arith.constant 50 : i32
    %61 = vector.broadcast %c50_i32 : i32 to vector<16x24x128xi32>
    %62 = arith.cmpi slt, %54, %61 : vector<16x24x128xi32>
    %cst_58 = arith.constant -1.000000e+30 : f32
    %63 = vector.broadcast %cst_58 : f32 to vector<16x24x128xf32>
    %64 = arith.select %62, %48, %63 : vector<16x24x128xi1>, vector<16x24x128xf32>
    %cst_59 = arith.constant dense<0xFF800000> : vector<16x24xf32>
    %65 = vector.multi_reduction <maximumf>, %64, %cst_59 [2] : vector<16x24x128xf32> to vector<16x24xf32>
    %66 = tpu.iota {dimensions = array<i32: 1>} : vector<16x24xi32>
    %c16_i32 = arith.constant 16 : i32
    %67 = vector.broadcast %c16_i32 : i32 to vector<16x24xi32>
    %68 = arith.cmpi slt, %66, %67 : vector<16x24xi32>
    %c50_i32_60 = arith.constant 50 : i32
    %69 = vector.broadcast %c50_i32_60 : i32 to vector<16x24xi32>
    %70 = arith.cmpi slt, %53, %69 : vector<16x24xi32>
    %71 = arith.andi %70, %68 : vector<16x24xi1>
    %cst_61 = arith.constant 0.000000e+00 : f32
    %72 = vector.broadcast %cst_61 : f32 to vector<16x24xf32>
    %73 = arith.cmpf oge, %60, %72 : vector<16x24xf32>
    %74 = arith.andi %71, %73 : vector<16x24xi1>
    %cst_62 = arith.constant 0.000000e+00 : f32
    %75 = vector.broadcast %cst_62 : f32 to vector<16x24xf32>
    %76 = arith.cmpf oge, %65, %75 : vector<16x24xf32>
    %77 = arith.andi %76, %68 : vector<16x24xi1>
    %78 = arith.subf %51, %60 : vector<16x24xf32>
    %cst_63 = arith.constant 0.000000e+00 : f32
    %79 = vector.broadcast %cst_63 : f32 to vector<16x24xf32>
    %80 = arith.select %68, %78, %79 : vector<16x24xi1>, vector<16x24xf32>
    %81 = vector.shape_cast %80 : vector<16x24xf32> to vector<1x16x24xf32>
    %cst_64 = arith.constant dense<0.000000e+00> : vector<1xf32>
    %82 = vector.multi_reduction <add>, %81, %cst_64 [1, 2] : vector<1x16x24xf32> to vector<1xf32>
    %83 = vector.shape_cast %82 : vector<1xf32> to vector<1x1x1xf32>
    %84 = vector.extract %83[0, 0, 0] : f32 from vector<1x1x1xf32>
    %85 = arith.extui %74 : vector<16x24xi1> to vector<16x24xi32>
    %86 = arith.sitofp %85 : vector<16x24xi32> to vector<16x24xf32>
    %87 = vector.shape_cast %86 : vector<16x24xf32> to vector<1x16x24xf32>
    %cst_65 = arith.constant dense<0.000000e+00> : vector<1xf32>
    %88 = vector.multi_reduction <add>, %87, %cst_65 [1, 2] : vector<1x16x24xf32> to vector<1xf32>
    %89 = vector.shape_cast %88 : vector<1xf32> to vector<1x1x1xf32>
    %90 = vector.extract %89[0, 0, 0] : f32 from vector<1x1x1xf32>
    %91 = arith.ori %71, %77 : vector<16x24xi1>
    %92 = arith.extui %91 : vector<16x24xi1> to vector<16x24xi32>
    %93 = arith.sitofp %92 : vector<16x24xi32> to vector<16x24xf32>
    %94 = vector.shape_cast %93 : vector<16x24xf32> to vector<1x16x24xf32>
    %cst_66 = arith.constant dense<0.000000e+00> : vector<1xf32>
    %95 = vector.multi_reduction <add>, %94, %cst_66 [1, 2] : vector<1x16x24xf32> to vector<1xf32>
    %96 = vector.shape_cast %95 : vector<1xf32> to vector<1x1x1xf32>
    %97 = vector.extract %96[0, 0, 0] : f32 from vector<1x1x1xf32>
    %c0_67 = arith.constant 0 : index
    %c0_68 = arith.constant 0 : index
    %98 = vector.load %arg11[%c0_67, %c0_68] : memref<1x1xf32, #tpu.memory_space<vmem>>, vector<1x1xf32>
    %99 = vector.broadcast %84 : f32 to vector<1x1xf32>
    %100 = arith.addf %98, %99 : vector<1x1xf32>
    %c0_69 = arith.constant 0 : index
    %c0_70 = arith.constant 0 : index
    %101 = vector.load %arg11[%c0_69, %c0_70] : memref<1x1xf32, #tpu.memory_space<vmem>>, vector<1x1xf32>
    tpu.vector_store %arg11[%c0_69, %c0_70], %100 {strides = array<i32>} : memref<1x1xf32, #tpu.memory_space<vmem>>, vector<1x1xf32>,
    %c0_71 = arith.constant 0 : index
    %c0_72 = arith.constant 0 : index
    %102 = vector.load %arg12[%c0_71, %c0_72] : memref<1x1xf32, #tpu.memory_space<vmem>>, vector<1x1xf32>
    %103 = vector.broadcast %90 : f32 to vector<1x1xf32>
    %104 = arith.addf %102, %103 : vector<1x1xf32>
    %c0_73 = arith.constant 0 : index
    %c0_74 = arith.constant 0 : index
    %105 = vector.load %arg12[%c0_73, %c0_74] : memref<1x1xf32, #tpu.memory_space<vmem>>, vector<1x1xf32>
    tpu.vector_store %arg12[%c0_73, %c0_74], %104 {strides = array<i32>} : memref<1x1xf32, #tpu.memory_space<vmem>>, vector<1x1xf32>,
    %c0_75 = arith.constant 0 : index
    %c0_76 = arith.constant 0 : index
    %106 = vector.load %arg13[%c0_75, %c0_76] : memref<1x1xf32, #tpu.memory_space<vmem>>, vector<1x1xf32>
    %107 = vector.broadcast %97 : f32 to vector<1x1xf32>
    %108 = arith.addf %106, %107 : vector<1x1xf32>
    %c0_77 = arith.constant 0 : index
    %c0_78 = arith.constant 0 : index
    %109 = vector.load %arg13[%c0_77, %c0_78] : memref<1x1xf32, #tpu.memory_space<vmem>>, vector<1x1xf32>
    tpu.vector_store %arg13[%c0_77, %c0_78], %108 {strides = array<i32>} : memref<1x1xf32, #tpu.memory_space<vmem>>, vector<1x1xf32>,
    %c0_i32_79 = arith.constant 0 : i32
    %110 = arith.cmpi eq, %arg1, %c0_i32_79 : i32
    %111 = arith.extui %110 : i1 to i32
    %c0_i32_80 = arith.constant 0 : i32
    %112 = arith.cmpi ne, %111, %c0_i32_80 : i32
    scf.if %112 {
      %c0_81 = arith.constant 0 : index
      %c0_82 = arith.constant 0 : index
      %113 = vector.load %arg11[%c0_81, %c0_82] : memref<1x1xf32, #tpu.memory_space<vmem>>, vector<1x1xf32>
      %114 = vector.shape_cast %113 : vector<1x1xf32> to vector<1x1xf32>
      %115 = vector.broadcast %114 : vector<1x1xf32> to vector<8x128xf32>
      %c0_83 = arith.constant 0 : index
      %c0_84 = arith.constant 0 : index
      %c0_85 = arith.constant 0 : index
      %116 = vector.load %arg8[%c0_83, %c0_84, %c0_85] : memref<1x8x128xf32, #tpu.memory_space<vmem>>, vector<1x8x128xf32>
      %117 = vector.shape_cast %116 : vector<1x8x128xf32> to vector<8x128xf32>
      %118 = vector.shape_cast %115 : vector<8x128xf32> to vector<1x8x128xf32>
      tpu.vector_store %arg8[%c0_83, %c0_84, %c0_85], %118 {strides = array<i32>} : memref<1x8x128xf32, #tpu.memory_space<vmem>>, vector<1x8x128xf32>,
      %c0_86 = arith.constant 0 : index
      %c0_87 = arith.constant 0 : index
      %119 = vector.load %arg12[%c0_86, %c0_87] : memref<1x1xf32, #tpu.memory_space<vmem>>, vector<1x1xf32>
      %c0_88 = arith.constant 0 : index
      %c0_89 = arith.constant 0 : index
      %120 = vector.load %arg13[%c0_88, %c0_89] : memref<1x1xf32, #tpu.memory_space<vmem>>, vector<1x1xf32>
      %cst_90 = arith.constant 1.000000e-10 : f32
      %121 = vector.broadcast %cst_90 : f32 to vector<1x1xf32>
      %122 = arith.addf %120, %121 : vector<1x1xf32>
      %123 = arith.divf %119, %122 : vector<1x1xf32>
      %124 = vector.shape_cast %123 : vector<1x1xf32> to vector<1x1xf32>
      %125 = vector.broadcast %124 : vector<1x1xf32> to vector<8x128xf32>
      %c0_91 = arith.constant 0 : index
      %c0_92 = arith.constant 0 : index
      %c0_93 = arith.constant 0 : index
      %126 = vector.load %arg9[%c0_91, %c0_92, %c0_93] : memref<1x8x128xf32, #tpu.memory_space<vmem>>, vector<1x8x128xf32>
      %127 = vector.shape_cast %126 : vector<1x8x128xf32> to vector<8x128xf32>
      %128 = vector.shape_cast %125 : vector<8x128xf32> to vector<1x8x128xf32>
      tpu.vector_store %arg9[%c0_91, %c0_92, %c0_93], %128 {strides = array<i32>} : memref<1x8x128xf32, #tpu.memory_space<vmem>>, vector<1x8x128xf32>,
    } else {
    }
    return
  }
  func.func @transform_0(%arg0: i32, %arg1: i32) -> (i32, i32, i32, i32) {
    %c0_i32 = arith.constant 0 : i32
    %c0_i32_0 = arith.constant 0 : i32
    %c0_i32_1 = arith.constant 0 : i32
    return %arg0, %arg1, %c0_i32, %c0_i32_0 : i32, i32, i32, i32
  }
  func.func @transform_1(%arg0: i32, %arg1: i32) -> (i32, i32, i32) {
    %c0_i32 = arith.constant 0 : i32
    %c0_i32_0 = arith.constant 0 : i32
    return %arg0, %arg1, %c0_i32 : i32, i32, i32
  }
  func.func @transform_2(%arg0: i32, %arg1: i32) -> (i32, i32) {
    %c0_i32 = arith.constant 0 : i32
    %c0_i32_0 = arith.constant 0 : i32
    %c0_i32_1 = arith.constant 0 : i32
    return %c0_i32, %c0_i32_0 : i32, i32
  }
  func.func @transform_3(%arg0: i32, %arg1: i32) -> (i32, i32) {
    %c0_i32 = arith.constant 0 : i32
    %c0_i32_0 = arith.constant 0 : i32
    %c0_i32_1 = arith.constant 0 : i32
    return %c0_i32, %c0_i32_0 : i32, i32
  }
  func.func @transform_4(%arg0: i32, %arg1: i32) -> (i32, i32) {
    %c0_i32 = arith.constant 0 : i32
    %c0_i32_0 = arith.constant 0 : i32
    %c0_i32_1 = arith.constant 0 : i32
    return %c0_i32, %c0_i32_0 : i32, i32
  }
  func.func @transform_5(%arg0: i32, %arg1: i32) -> (i32, i32) {
    %c0_i32 = arith.constant 0 : i32
    %c0_i32_0 = arith.constant 0 : i32
    %c0_i32_1 = arith.constant 0 : i32
    return %c0_i32, %c0_i32_0 : i32, i32
  }
  func.func @transform_6(%arg0: i32, %arg1: i32) -> (i32, i32, i32) {
    %c0_i32 = arith.constant 0 : i32
    %c0_i32_0 = arith.constant 0 : i32
    %c0_i32_1 = arith.constant 0 : i32
    return %arg0, %c0_i32, %c0_i32_0 : i32, i32, i32
  }
  func.func @transform_7(%arg0: i32, %arg1: i32) -> (i32, i32, i32) {
    %c0_i32 = arith.constant 0 : i32
    %c0_i32_0 = arith.constant 0 : i32
    %c0_i32_1 = arith.constant 0 : i32
    return %arg0, %c0_i32, %c0_i32_0 : i32, i32, i32
  }
}

</mosaic_0001>

<bundles_post_ra>
// kernel: tpu_custom_call.1
= control target key start
LH: loop header
LB: loop body
LE: loop exit
PB: predicated region body
PF: predicated region fallthrough
CT: control target
= control target key end

     0   :  { %13 = vsyncpa [#allocation7], 0  ;;  %s11178_s0 = inlined_call_operand.vmem [shape: bf16[2,1,448,4], index: 0, kind: input, shape index: {}]   ;;  %s11179_s1 = inlined_call_operand.vmem [shape: s32[2,16,128], index: 1, kind: input, shape index: {}]   ;;  %s11180_s2 = inlined_call_operand.vmem [shape: bf16[36,128], index: 2, kind: input, shape index: {}]   ;;  %s11181_s3 = inlined_call_operand.vmem [shape: f32[1,128], index: 3, kind: input, shape index: {}]   ;;  %s11182_s4 = inlined_call_operand.vmem [shape: bf16[128,128], index: 4, kind: input, shape index: {}]   ;;  %s11183_s5 = inlined_call_operand.vmem [shape: f32[1,128], index: 5, kind: input, shape index: {}]   ;;  %s11184_s6 = inlined_call_operand.hbm [shape: f32[2,8,128], index: 6, kind: output, shape index: {0}]   ;;  %s11185_s7 = inlined_call_operand.hbm [shape: f32[2,8,128], index: 7, kind: output, shape index: {1}]  }
   0x1   :  { %15 = vsyncpa [#allocation7 + $0x1], 0 }
   0x2   :  { %16 = vsyncpa [#allocation9], 0 }
   0x3   :  { %18 = vsyncpa [#allocation9 + $0x1], 0  ;;  %s7820_s24 = smov 0   ;;  %s7822_s25 = smov 0  }
   0x4   :  { %s7824_s26 = smov 0   ;;  %s7826_s27 = smov 0  }
   0x5   :  { %s7828_s28 = smov 0   ;;  %s7830_s29 = smov 0  }
   0x6 LB: > { %s6673_s30 = sadd.s32 4294967295, %s7766_s29   ;;  %s6674_s8 = sadd.s32 4294967294, %s7766_s29   ;;  %s7766_s29 = sphi %s7830_s29, %s24_s29   ;;  %s7762_s28 = sphi %s7828_s28, %s11663_s28   ;;  %s7758_s27 = sphi %s7826_s27, %s11662_s27   ;;  %s7754_s26 = sphi %s7824_s26, %s11661_s26   ;;  %s7750_s25 = sphi %s7822_s25, %s11660_s25   ;;  %s7746_s24 = sphi %s7820_s24, %s11659_s24  }
   0x7   : > { %s36_s9 = sadd.s32 1, %s7762_s28  ;;  %s183_s10 = sadd.s32 1, %s7754_s26 }
   0x8   : > { %p38_p0 = scmp.ge.s32.totalorder %s36_s9, 2  ;;  %p193_p1 = scmp.ne.s32.totalorder %s7754_s26, %s7750_s25 }
   0x9   : > { %p194_p2 = scmp.eq.s32.totalorder %s6673_s30, 1  ;;  %p199_p3 = scmp.ne.s32.totalorder %s7750_s25, %s7746_s24 }
   0xa   : > { %s11665_s9 = smov (%p38_p0, %s36_s9), 0  ;;  %p200_p5 = scmp.eq.s32.totalorder %s6674_s8, 1 }
   0xb   : > { %p7860_p4 = por %p194_p2, %p193_p1  ;;  %s180_s12 = ssub.s32 %s7762_s28, %s11665_s9 }
   0xc   : > { %p6677_p6 = scmp.ge.s32.totalorder %s7766_s29, 1  ;;  %p181_p7 = scmp.eq.s32.totalorder %s180_s12, 0 }
   0xd   : > { %p7867_p8 = por %p200_p5, %p199_p3  ;;  %p281_p9 = scmp.lt.s32.totalorder %s7766_s29, 3 }
   0xe   : > { %s7873_s14 = scalar_select %p181_p7, %s7754_s26, %s183_s10  }
   0xf   : > { %p282_p10 = pnand %p6677_p6, %p281_p9 }
  0x11   : > { %285 = sbr.rel (%p282_p10) target bundleno = 2039 (0x7f7), region = 44 }
  0x18   : > { %p331_p11 = scmp.lt.s32.totalorder %s7758_s27, 1  ;;  %vm748_vm0 = vsmask.f32 7424  ;;  %s7768_s20 = smov 4   ;;  %vm1214_vm1 = vcmask 1046528   ;;  %vm551_vm2 = vcmask 31744  }
  0x19   : > { %s7769_s21 = smov 8   ;;  %s7770_s22 = smov 12   ;;  %vm1017_vm3 = vcmask 64544   ;;  %vm1336_vm4 = vcmask 97344   ;;  %vm3581_vm5 = vcmask 1041408   ;;  %vm1601_vm6 = vcmask 130144  }
  0x1a   : > { %s7877_s15 = scalar_select %p331_p11, %s7758_s27, 1  ;;  %vm2066_vm7 = vcmask 162944   ;;  %vm2384_vm8 = vcmask 195744   ;;  %vm2649_vm9 = vcmask 228544   ;;  %vm3114_vm10 = vcmask 261344  }
  0x1b   : > { %s7771_s23 = smov 16   ;;  %s7772_s30 = smov 20   ;;  %vm3432_vm11 = vcmask 294144   ;;  %vm3508_vm12 = vcmask 293888  }
  0x1c   : > { %s7148_s16 = smul.u32 224, %s7877_s15  ;;  %s7773_s8 = smov 24  }
  0x1d   : > { %s7774_s10 = smov 28   ;;  %s7775_s12 = smov 32  }
  0x1e   : > { %s7883_s19 = scalar_lea.vmem %s11178_s0, %s7148_s16  ;;  %s11266_s18 = sshll.u32 %s7758_s27, 7 }
  0x1f   : > { %v7227_v0 = vld [vmem:[%s7883_s19] sm:$0xff]   ;;  %v7228_v1 = vld [vmem:[%s7883_s19 + $0x8] sm:$0xff]   ;;  %v7229_v5 = vld [vmem:[%s7883_s19 + $0x10] sm:$0xff]  }
  0x20   : > { %v750_v2 = vshrl.u32 %v7227_v0, 16  ;;  %v752_v3 = vshll.u32 %v7227_v0, 16  ;;  %v757_v4 = vshll.u32 %v7228_v1, 16  ;;  %v7230_v6 = vld [vmem:[%s7883_s19 + $0x18] sm:$0xff]   ;;  %v761_v7 = vshrl.u32 %v7228_v1, 16  ;;  %v7231_v12 = vld [vmem:[%s7883_s19 + $0x20] sm:$0xff]  }
  0x21   : > { %v765_v10 = vshll.u32 %v7229_v5, 16  ;;  %v769_v11 = vshrl.u32 %v7229_v5, 16  ;;  %v7232_v13 = vld [vmem:[%s7883_s19 + $0x28] sm:$0xff]   ;;  %v773_v14 = vshll.u32 %v7230_v6, 16  ;;  %v777_v15 = vshrl.u32 %v7230_v6, 16  ;;  %v7233_v23 = vld [vmem:[%s7883_s19 + $0x30] sm:$0xff]  }
  0x22   : > { %v754_v8 = vrot.slane %v752_v3, 1  ;;  %v759_v9 = vrot.slane %v757_v4, 1  ;;  %v781_v19 = vshll.u32 %v7231_v12, 16  ;;  %v785_v21 = vshrl.u32 %v7231_v12, 16  ;;  %v7234_v25 = vld [vmem:[%s7883_s19 + $0x38] sm:$0xff]   ;;  %v7235_v30 = vld [vmem:[%s7883_s19 + $0x40] sm:$0xff]  }
  0x23   : > { %v767_v17 = vrot.slane %v765_v10, 1  ;;  %v775_v20 = vrot.slane %v773_v14, 1  ;;  %v789_v22 = vshll.u32 %v7232_v13, 16  ;;  %v793_v24 = vshrl.u32 %v7232_v13, 16  ;;  %v7236_v35 = vld [vmem:[%s7883_s19 + $0x48] sm:$0xff]   ;;  %v7237_v46 = vld [vmem:[%s7883_s19 + $0x50] sm:$0xff]  }
  0x24   : > { %v755_v16 = vor.u32 %v754_v8, %v750_v2  ;;  %v763_v18 = vor.u32 %v761_v7, %v759_v9  ;;  %v783_v29 = vrot.slane %v781_v19, 1  ;;  %v797_v33 = vshll.u32 %v7233_v23, 16  ;;  %v7238_v53 = vld [vmem:[%s7883_s19 + $0x58] sm:$0xff]   ;;  %v7239_v55 = vld [vmem:[%s7883_s19 + $0x60] sm:$0xff]   ;;  %v7240_v59 = vld [vmem:[%s7883_s19 + $0x68] sm:$0xff]  }
  0x25   : > { %v771_v27 = vor.u32 %v769_v11, %v767_v17  ;;  %v779_v31 = vor.u32 %v777_v15, %v775_v20  ;;  %v791_v32 = vrot.slane %v789_v22, 1  ;;  %v801_v34 = vshrl.u32 %v7233_v23, 16  ;;  %v7241_v1 = vld [vmem:[%s7883_s19 + $0x70] sm:$0xff]   ;;  %v7242_v4 = vld [vmem:[%s7883_s19 + $0x78] sm:$0xff]   ;;  %v7243_v13 = vld [vmem:[%s7883_s19 + $0x80] sm:$0xff]  }
  0x26   : > { %v760_v26 = vsel %vm748_vm0, %v755_v16, %v759_v9  ;;  %v768_v28 = vsel %vm748_vm0, %v763_v18, %v767_v17  ;;  %v787_v37 = vor.u32 %v785_v21, %v783_v29  ;;  %v805_v38 = vshll.u32 %v7234_v25, 16  ;;  %v7244_v19 = vld [vmem:[%s7883_s19 + $0x88] sm:$0xff]  }
  0x27   : > { %945 = vrot.lane.b32.xlu0 %v760_v26, %s7768_s20  ;;  %v776_v36 = vsel %vm748_vm0, %v771_v27, %v775_v20  ;;  %v809_v39 = vshrl.u32 %v7234_v25, 16  ;;  %v799_v40 = vrot.slane %v797_v33, 1  ;;  %v813_v41 = vshll.u32 %v7235_v30, 16  ;;  %v7245_v25 = vld [vmem:[%s7883_s19 + $0x90] sm:$0xff]   ;;  %v7246_v27 = vld [vmem:[%s7883_s19 + $0x98] sm:$0xff]   ;;  %v7247_v33 = vld [vmem:[%s7883_s19 + $0xa0] sm:$0xff]  }
  0x28   : > { %949 = vrot.lane.b32.xlu1 %v776_v36, %s7768_s20  ;;  %v784_v42 = vsel %vm748_vm0, %v779_v31, %v783_v29  ;;  %v795_v43 = vor.u32 %v793_v24, %v791_v32  ;;  %v807_v44 = vrot.slane %v805_v38, 1  ;;  %v821_v45 = vshll.u32 %v7236_v35, 16 }
  0x29   : > { %v792_v47 = vsel %vm748_vm0, %v787_v37, %v791_v32  ;;  %v817_v48 = vshrl.u32 %v7235_v30, 16  ;;  %v803_v49 = vor.u32 %v801_v34, %v799_v40  ;;  %v815_v50 = vrot.slane %v813_v41, 1 }
  0x2a   : > { %v825_v51 = vshrl.u32 %v7236_v35, 16  ;;  %v829_v52 = vshll.u32 %v7237_v46, 16  ;;  %v823_v54 = vrot.slane %v821_v45, 1  ;;  %v800_v56 = vsel %vm748_vm0, %v795_v43, %v799_v40  ;;  %v7248_v43 = vld [vmem:[%s7883_s19 + $0xa8] sm:$0xff]  }
  0x2b   : > { %947 = vrot.lane.b32.xlu0 %v768_v28, %s7768_s20  ;;  %v811_v57 = vor.u32 %v809_v39, %v807_v44  ;;  %v837_v58 = vshll.u32 %v7238_v53, 16  ;;  %v833_v60 = vshrl.u32 %v7237_v46, 16  ;;  %v845_v61 = vshll.u32 %v7239_v55, 16 }
  0x2c   : > { %951 = vrot.lane.b32.xlu1 %v784_v42, %s7768_s20  ;;  %v808_v62 = vsel %vm748_vm0, %v803_v49, %v807_v44  ;;  %v819_v63 = vor.u32 %v817_v48, %v815_v50  ;;  %v831_v0 = vrot.slane %v829_v52, 1  ;;  %v827_v2 = vor.u32 %v825_v51, %v823_v54  ;;  %v7249_v49 = vld [vmem:[%s7883_s19 + $0xb0] sm:$0xff]  }
  0x2d   : > { %v841_v3 = vshrl.u32 %v7238_v53, 16  ;;  %v816_v5 = vsel %vm748_vm0, %v811_v57, %v815_v50  ;;  %v839_v6 = vrot.slane %v837_v58, 1  ;;  %v853_v7 = vshll.u32 %v7240_v59, 16 }
  0x2e   : > { %v847_v8 = vrot.slane %v845_v61, 1  ;;  %v849_v9 = vshrl.u32 %v7239_v55, 16  ;;  %v824_v10 = vsel %vm748_vm0, %v819_v63, %v823_v54  ;;  %v835_v11 = vor.u32 %v833_v60, %v831_v0  ;;  %v7250_v55 = vld [vmem:[%s7883_s19 + $0xb8] sm:$0xff]   ;;  %v7251_v61 = vld [vmem:[%s7883_s19 + $0xc0] ss:$0 sps:$4 sm:$0x11]  }
  0x2f   : > { %953 = vrot.lane.b32.xlu0 %v792_v47, %s7768_s20  ;;  %v861_v12 = vshll.u32 %v7241_v1, 16  ;;  %v832_v14 = vsel %vm748_vm0, %v827_v2, %v831_v0  ;;  %v843_v15 = vor.u32 %v841_v3, %v839_v6  ;;  %v855_v16 = vrot.slane %v853_v7, 1 }
  0x30   : > { %955 = vrot.lane.b32.xlu1 %v800_v56, %s7768_s20  ;;  %v857_v17 = vshrl.u32 %v7240_v59, 16  ;;  %v869_v18 = vshll.u32 %v7242_v4, 16  ;;  %v865_v20 = vshrl.u32 %v7241_v1, 16  ;;  %v840_v21 = vsel %vm748_vm0, %v835_v11, %v839_v6 }
  0x31   : > { %v851_v22 = vor.u32 %v849_v9, %v847_v8  ;;  %v863_v23 = vrot.slane %v861_v12, 1  ;;  %v877_v24 = vshll.u32 %v7243_v13, 16  ;;  %v873_v26 = vshrl.u32 %v7242_v4, 16  ;;  %v7253_v12 = vld [vmem:[%s7883_s19 + $0x8] sm:$0xff]  }
  0x32   : > { %v848_v28 = vsel %vm748_vm0, %v843_v15, %v847_v8  ;;  %v859_v29 = vor.u32 %v857_v17, %v855_v16  ;;  %v871_v30 = vrot.slane %v869_v18, 1  ;;  %v885_v31 = vshll.u32 %v7244_v19, 16  ;;  %v7252_v15 = vld [vmem:[%s7883_s19] sm:$0xfe]  }
  0x33   : > { %957 = vrot.lane.b32.xlu0 %v808_v62, %s7768_s20  ;;  %v881_v32 = vshrl.u32 %v7243_v13, 16  ;;  %v856_v34 = vsel %vm748_vm0, %v851_v22, %v855_v16  ;;  %v867_v35 = vor.u32 %v865_v20, %v863_v23  ;;  %v879_v36 = vrot.slane %v877_v24, 1 }
  0x34   : > { %959 = vrot.lane.b32.xlu1 %v816_v5, %s7768_s20  ;;  %v893_v37 = vshll.u32 %v7245_v25, 16  ;;  %v889_v38 = vshrl.u32 %v7244_v19, 16  ;;  %v901_v39 = vshll.u32 %v7246_v27, 16  ;;  %v864_v40 = vsel %vm748_vm0, %v859_v29, %v863_v23  ;;  %v7254_v19 = vld [vmem:[%s7883_s19 + $0x10] sm:$0xff]   ;;  %v7255_v23 = vld [vmem:[%s7883_s19 + $0x18] sm:$0xff]   ;;  %v7257_v29 = vld [vmem:[%s7883_s19 + $0x28] sm:$0xff]  }
  0x35   : > { %v875_v41 = vor.u32 %v873_v26, %v871_v30  ;;  %v887_v42 = vrot.slane %v885_v31, 1  ;;  %v897_v44 = vshrl.u32 %v7245_v25, 16  ;;  %v909_v45 = vshll.u32 %v7247_v33, 16  ;;  %v7256_v26 = vld [vmem:[%s7883_s19 + $0x20] sm:$0xff]  }
  0x36   : > { %v872_v46 = vsel %vm748_vm0, %v867_v35, %v871_v30  ;;  %v883_v47 = vor.u32 %v881_v32, %v879_v36  ;;  %v895_v48 = vrot.slane %v893_v37, 1  ;;  %v903_v50 = vrot.slane %v901_v39, 1  ;;  %v7258_v32 = vld [vmem:[%s7883_s19 + $0x30] sm:$0xff]   ;;  %v7259_v35 = vld [vmem:[%s7883_s19 + $0x38] sm:$0xff]  }
  0x37   : > { %961 = vrot.lane.b32.xlu0 %v824_v10, %s7768_s20  ;;  %v905_v51 = vshrl.u32 %v7246_v27, 16  ;;  %v880_v52 = vsel %vm748_vm0, %v875_v41, %v879_v36  ;;  %v891_v53 = vor.u32 %v889_v38, %v887_v42  ;;  %v917_v54 = vshll.u32 %v7248_v43, 16  ;;  %v7260_v38 = vld [vmem:[%s7883_s19 + $0x40] sm:$0xff]   ;;  %v7261_v41 = vld [vmem:[%s7883_s19 + $0x48] sm:$0xff]  }
  0x38   : > { %963 = vrot.lane.b32.xlu1 %v832_v14, %s7768_s20  ;;  %v913_v56 = vshrl.u32 %v7247_v33, 16  ;;  %v888_v57 = vsel %vm748_vm0, %v883_v47, %v887_v42  ;;  %v899_v58 = vor.u32 %v897_v44, %v895_v48  ;;  %v911_v59 = vrot.slane %v909_v45, 1  ;;  %v7262_v44 = vld [vmem:[%s7883_s19 + $0x50] sm:$0xff]   ;;  %v7263_v47 = vld [vmem:[%s7883_s19 + $0x58] sm:$0xff]  }
  0x39   : > { %v925_v60 = vshll.u32 %v7249_v49, 16  ;;  %v921_v62 = vshrl.u32 %v7248_v43, 16  ;;  %v896_v63 = vsel %vm748_vm0, %v891_v53, %v895_v48  ;;  %v907_v0 = vor.u32 %v905_v51, %v903_v50  ;;  %v7264_v48 = vld [vmem:[%s7883_s19 + $0x60] sm:$0xff]  }
  0x3a   : > { %v919_v1 = vrot.slane %v917_v54, 1  ;;  %v933_v2 = vshll.u32 %v7250_v55, 16  ;;  %v904_v3 = vsel %vm748_vm0, %v899_v58, %v903_v50  ;;  %v915_v4 = vor.u32 %v913_v56, %v911_v59  ;;  %v7287_v51 = vld [vmem:[%s7883_s19] sm:$0xff]   ;;  %v7266_v56 = vld [vmem:[%s7883_s19 + $0x70] sm:$0xff]  }
  0x3b   : > { %965 = vrot.lane.b32.xlu0 %v840_v21, %s7768_s20  ;;  %v927_v5 = vrot.slane %v925_v60, 1  ;;  %v929_v6 = vshrl.u32 %v7249_v49, 16  ;;  %v937_v7 = vshrl.u32 %v7250_v55, 16  ;;  %v912_v8 = vsel %vm748_vm0, %v907_v0, %v911_v59  ;;  %v7265_v55 = vld [vmem:[%s7883_s19 + $0x68] sm:$0xff]   ;;  %552 = vst.msk [vmem:[#allocation2] sm:$0xff] %vm551_vm2, %v7287_v51  ;;  %v7292_v60 = vld [vmem:[%s7883_s19 + $0x18] sm:$0xff]  }
  0x3c   : > { %967 = vrot.lane.b32.xlu1 %v848_v28, %s7768_s20  ;;  %v923_v9 = vor.u32 %v921_v62, %v919_v1  ;;  %v935_v10 = vrot.slane %v933_v2, 1  ;;  %v941_v11 = vshll.u32 %v7251_v61, 16  ;;  %v920_v13 = vsel %vm748_vm0, %v915_v4, %v919_v1  ;;  %v7291_v59 = vld [vmem:[%s7883_s19 + $0x8] sm:$0xff]   ;;  %v7268_v0 = vld [vmem:[%s7883_s19 + $0x80] sm:$0xff]   ;;  %555 = vst.msk [vmem:[#allocation2 + $0x18] sm:$0xff] %vm551_vm2, %v7292_v60  ;;  %v7286_v60 = vld [vmem:[%s7883_s19 + $0x54] sm:$0xff]  }
  0x3d   : > { %v931_v14 = vor.u32 %v929_v6, %v927_v5  ;;  %v1216_v20 = vrot.slane %v7253_v12, 1  ;;  %v1215_v22 = vrot.slane %v7252_v15, 1  ;;  %v1218_v25 = vrot.slane %v7254_v19, 1  ;;  %553 = vst.msk [vmem:[#allocation2 + $0x8] sm:$0xff] %vm551_vm2, %v7291_v59  ;;  %v7296_v4 = vld [vmem:[%s7883_s19 + $0x28] sm:$0xff]   ;;  %v7299_v12 = vld [vmem:[%s7883_s19 + $0x30] sm:$0xff]  }
  0x3e   : > { %v928_v16 = vsel %vm748_vm0, %v923_v9, %v927_v5  ;;  %v939_v17 = vor.u32 %v937_v7, %v935_v10  ;;  %v943_v18 = vrot.slane %v941_v11, 1  ;;  %v1220_v28 = vrot.slane %v7255_v23, 1  ;;  %v7269_v7 = vld [vmem:[%s7883_s19 + $0x88] sm:$0xff]   ;;  %557 = vst.msk [vmem:[#allocation2 + $0x28] sm:$0xff] %vm551_vm2, %v7296_v4  ;;  %v7271_v11 = vld [vmem:[%s7883_s19 + $0x98] sm:$0xff]   ;;  %558 = vst.msk [vmem:[#allocation2 + $0x30] sm:$0xff] %vm551_vm2, %v7299_v12 }
  0x3f   : > { %969 = vrot.lane.b32.xlu0 %v856_v34, %s7768_s20  ;;  %v936_v21 = vsel %vm748_vm0, %v931_v14, %v935_v10  ;;  %v1217_v27 = vsel %vm1214_vm1, %v1215_v22, %v1216_v20  ;;  %v1219_v30 = vsel %vm1214_vm1, %v1216_v20, %v1218_v25  ;;  %v1222_v31 = vrot.slane %v7256_v26, 1  ;;  %v7303_v20 = vld [vmem:[%s7883_s19 + $0x40] sm:$0xff]   ;;  %v7274_v26 = vld [vmem:[%s7883_s19 + $0xb0] sm:$0xff]  }
  0x40   : > { %971 = vrot.lane.b32.xlu1 %v864_v40, %s7768_s20  ;;  %v944_v24 = vsel %vm748_vm0, %v939_v17, %v943_v18  ;;  %v1221_v33 = vsel %vm1214_vm1, %v1218_v25, %v1220_v28  ;;  %v1224_v34 = vrot.slane %v7257_v29, 1  ;;  %v1226_v37 = vrot.slane %v7258_v32, 1  ;;  %v7273_v17 = vld [vmem:[%s7883_s19 + $0xa8] sm:$0xff]   ;;  %560 = vst.msk [vmem:[#allocation2 + $0x40] sm:$0xff] %vm551_vm2, %v7303_v20  ;;  %v7308_v29 = vld [vmem:[%s7883_s19 + $0x50] sm:$0xff]   ;;  %v7309_v32 = vld [vmem:[%s7883_s19 + $0x58] sm:$0xff]  }
  0x41   : > { %v1223_v36 = vsel %vm1214_vm1, %v1220_v28, %v1222_v31  ;;  %v1228_v40 = vrot.slane %v7259_v35, 1  ;;  %v1230_v43 = vrot.slane %v7260_v38, 1  ;;  %v1234_v50 = vrot.slane %v7262_v44, 1  ;;  %562 = vst.msk [vmem:[#allocation2 + $0x50] sm:$0xff] %vm551_vm2, %v7308_v29  ;;  %563 = vst.msk [vmem:[#allocation2 + $0x58] sm:$0xff] %vm551_vm2, %v7309_v32  ;;  %v7314_v38 = vld [vmem:[%s7883_s19 + $0x68] sm:$0xff]  }
  0x42   : > { %v1225_v39 = vsel %vm1214_vm1, %v1222_v31, %v1224_v34  ;;  %v1227_v42 = vsel %vm1214_vm1, %v1224_v34, %v1226_v37  ;;  %v1236_v54 = vrot.slane %v7263_v47, 1  ;;  %v1238_v58 = vrot.slane %v7264_v48, 1  ;;  %v7276_v31 = vld [vmem:[%s7883_s19 + $0xc0] ss:$0 sps:$4 sm:$0x11]   ;;  %565 = vst.msk [vmem:[#allocation2 + $0x68] sm:$0xff] %vm551_vm2, %v7314_v38 }
  0x43   : > { %973 = vrot.lane.b32.xlu0 %v872_v46, %s7768_s20  ;;  %v1229_v45 = vsel %vm1214_vm1, %v1226_v37, %v1228_v40  ;;  %v1232_v46 = vrot.slane %v7261_v41, 1  ;;  %v1231_v49 = vsel %vm1214_vm1, %v1228_v40, %v1230_v43  ;;  %v1240_v62 = vrot.slane %v7265_v55, 1  ;;  %v7313_v37 = vld [vmem:[%s7883_s19 + $0x60] sm:$0xff]   ;;  %v7318_v44 = vld [vmem:[%s7883_s19 + $0x78] sm:$0xff]   ;;  %v7323_v48 = vld [vmem:[%s7883_s19 + $0x88] sm:$0xff]  }
  0x44   : > { %975 = vrot.lane.b32.xlu1 %v880_v52, %s7768_s20  ;;  %v7288_v52 = vld [vmem:[%s7883_s19 + $0x10] sm:$0xff]   ;;  %v1237_v61 = vsel %vm1214_vm1, %v1234_v50, %v1236_v54  ;;  %v1239_v1 = vsel %vm1214_vm1, %v1236_v54, %v1238_v58  ;;  %v1242_v2 = vrot.slane %v7266_v56, 1  ;;  %v1246_v10 = vrot.slane %v7268_v0, 1  ;;  %564 = vst.msk [vmem:[#allocation2 + $0x60] sm:$0xff] %vm551_vm2, %v7313_v37  ;;  %567 = vst.msk [vmem:[#allocation2 + $0x78] sm:$0xff] %vm551_vm2, %v7318_v44  ;;  %v7322_v47 = vld [vmem:[%s7883_s19 + $0x80] sm:$0xff]  }
  0x45   : > { %v1233_v53 = vsel %vm1214_vm1, %v1230_v43, %v1232_v46  ;;  %554 = vst.msk [vmem:[#allocation2 + $0x10] sm:$0xff] %vm551_vm2, %v7288_v52  ;;  %v1241_v5 = vsel %vm1214_vm1, %v1238_v58, %v1240_v62  ;;  %v1248_v15 = vrot.slane %v7269_v7, 1  ;;  %v1252_v23 = vrot.slane %v7271_v11, 1  ;;  %568 = vst.msk [vmem:[#allocation2 + $0x80] sm:$0xff] %vm551_vm2, %v7322_v47  ;;  %v7281_v51 = vld [vmem:[%s7883_s19 + $0x2c] sm:$0xff]   ;;  %v7328_v54 = vld [vmem:[%s7883_s19 + $0x98] sm:$0xff]  }
  0x46   : > { %v1243_v9 = vsel %vm1214_vm1, %v1240_v62, %v1242_v2  ;;  %v1256_v28 = vrot.slane %v7273_v17, 1  ;;  %v1258_v34 = vrot.slane %v7274_v26, 1  ;;  %v1262_v40 = vrot.slane %v7276_v31, 1  ;;  %569 = vst.msk [vmem:[#allocation2 + $0x88] sm:$0xff] %vm551_vm2, %v7323_v48  ;;  %v7327_v52 = vld [vmem:[%s7883_s19 + $0x90] sm:$0xff]   ;;  %v7283_v55 = vld [vmem:[%s7883_s19 + $0x3c] sm:$0xff]  }
  0x47   : > { %977 = vrot.lane.b32.xlu0 %v888_v57, %s7768_s20  ;;  %v1235_v57 = vsel %vm1214_vm1, %v1232_v46, %v1234_v50  ;;  %v1249_v22 = vsel %vm1214_vm1, %v1246_v10, %v1248_v15  ;;  %v7278_v46 = vld [vmem:[%s7883_s19 + $0x14] sm:$0xff]   ;;  %v7280_v50 = vld [vmem:[%s7883_s19 + $0x24] sm:$0xff]   ;;  %570 = vst.msk [vmem:[#allocation2 + $0x90] sm:$0xff] %vm551_vm2, %v7327_v52  ;;  %571 = vst.msk [vmem:[#allocation2 + $0x98] sm:$0xff] %vm551_vm2, %v7328_v54 }
  0x48   : > { %979 = vrot.lane.b32.xlu1 %v896_v63, %s7768_s20  ;;  %v7267_v63 = vld [vmem:[%s7883_s19 + $0x78] sm:$0xff]   ;;  %v7284_v56 = vld [vmem:[%s7883_s19 + $0x44] sm:$0xff]   ;;  %v7285_v59 = vld [vmem:[%s7883_s19 + $0x4c] sm:$0xff]  }
  0x49   : > { %v1244_v6 = vrot.slane %v7267_v63, 1  ;;  %v7332_v58 = vld [vmem:[%s7883_s19 + $0xa8] sm:$0xff]   ;;  %v7336_v62 = vld [vmem:[%s7883_s19 + $0xb8] sm:$0xff]  }
  0x4a   : > { %573 = vst.msk [vmem:[#allocation2 + $0xa8] sm:$0xff] %vm551_vm2, %v7332_v58  ;;  %v7289_v63 = vld [vmem:[%s7883_s19 + $0x5c] sm:$0xff]   ;;  %575 = vst.msk [vmem:[#allocation2 + $0xb8] sm:$0xff] %vm551_vm2, %v7336_v62  ;;  %v7290_v0 = vld [vmem:[%s7883_s19 + $0x64] sm:$0xff]  }
  0x4b   : > { %981 = vrot.lane.b32.xlu0 %v904_v3, %s7768_s20  ;;  %v7295_v3 = vld [vmem:[%s7883_s19 + $0x20] sm:$0xff]   ;;  %v1245_v14 = vsel %vm1214_vm1, %v1242_v2, %v1244_v6  ;;  %v1247_v18 = vsel %vm1214_vm1, %v1244_v6, %v1246_v10  ;;  %v7306_v2 = vld [vmem:[%s7883_s19 + $0xc] sm:$0xff]   ;;  %v7294_v7 = vld [vmem:[%s7883_s19 + $0x74] sm:$0xff]  }
  0x4c   : > { %983 = vrot.lane.b32.xlu1 %v912_v8, %s7768_s20  ;;  %556 = vst.msk [vmem:[#allocation2 + $0x20] sm:$0xff] %vm551_vm2, %v7295_v3  ;;  %v7270_v8 = vld [vmem:[%s7883_s19 + $0x90] sm:$0xff]   ;;  %v8113_v12 = vld [vmem:[%s7883_s19 + $0x1c] sm:$0xff]   ;;  %v8140_v38 = vld [vmem:[%s7883_s19 + $0x28] sm:$0xff]  }
  0x4d   : > { %v1250_v19 = vrot.slane %v7270_v8, 1  ;;  %v7307_v3 = vld [vmem:[%s7883_s19 + $0x14] sm:$0xff]   ;;  %v7297_v8 = vld [vmem:[%s7883_s19 + $0x7c] sm:$0xff]   ;;  %v2862_v48 = vshll.u32 %v8140_v38, 16  ;;  %v7330_v54 = vld [vmem:[%s7883_s19 + $0x24] sm:$0xff]  }
  0x4e   : > { %v1806_v10 = vshll.u32 %v7307_v3, 16  ;;  %v1810_v17 = vshrl.u32 %v7307_v3, 16  ;;  %v7320_v26 = vld [vmem:[%s7883_s19 + $0x18] sm:$0xff]   ;;  %v8169_v62 = vld [vmem:[%s7883_s19 + $0x28] sm:$0xff]   ;;  %v1818_v3 = vshrl.u32 %v8113_v12, 16 }
  0x4f   : > { %985 = vrot.lane.b32.xlu0 %v920_v13, %s7768_s20  ;;  %v7300_v13 = vld [vmem:[%s7883_s19 + $0x38] sm:$0xff]   ;;  %v2849_v37 = vshll.u32 %v7320_v26, 16 }
  0x50   : > { %987 = vrot.lane.b32.xlu1 %v928_v16, %s7768_s20  ;;  %v7272_v16 = vld [vmem:[%s7883_s19 + $0xa0] sm:$0xff]   ;;  %559 = vst.msk [vmem:[#allocation2 + $0x38] sm:$0xff] %vm551_vm2, %v7300_v13  ;;  %v7325_v58 = vld [vmem:[%s7883_s19 + $0x18] sm:$0xfe]  }
  0x51   : > { %v1254_v25 = vrot.slane %v7272_v16, 1  ;;  %v7298_v13 = vld [vmem:[%s7883_s19 + $0x84] sm:$0xff]   ;;  %v1799_v16 = vshrl.u32 %v7306_v2, 16  ;;  %v7305_v29 = vld [vmem:[%s7883_s19 + $0x9c] sm:$0xff]   ;;  %v2851_v47 = vrot.slane %v2849_v37, 1 }
  0x53   : > { %989 = vrot.lane.b32.xlu0 %v936_v21, %s7768_s20  ;;  %v7304_v21 = vld [vmem:[%s7883_s19 + $0x48] sm:$0xff]   ;;  %v1257_v35 = vsel %vm1214_vm1, %v1254_v25, %v1256_v28 }
  0x54   : > { %991 = vrot.lane.b32.xlu1 %v944_v24, %s7768_s20  ;;  %561 = vst.msk [vmem:[#allocation2 + $0x48] sm:$0xff] %vm551_vm2, %v7304_v21  ;;  %v1251_v24 = vsel %vm1214_vm1, %v1248_v15, %v1250_v19  ;;  %v7301_v15 = vld [vmem:[%s7883_s19 + $0x8c] sm:$0xff]   ;;  %v7302_v21 = vld [vmem:[%s7883_s19 + $0x94] sm:$0xff]  }
  0x57   : > { %1264 = vrot.lane.b32.xlu0 %v1217_v27, %s7769_s21  ;;  %v7275_v27 = vld [vmem:[%s7883_s19 + $0xb8] sm:$0xff]  }
  0x58   : > { %1266 = vrot.lane.b32.xlu1 %v1219_v30, %s7769_s21  ;;  %v1253_v30 = vsel %vm1214_vm1, %v1250_v19, %v1252_v23  ;;  %v1808_v19 = vrot.slane %v1806_v10, 1 }
  0x5a   : > { %v1812_v31 = vor.u32 %v1810_v17, %v1808_v19  ;;  %v8191_v17 = vld [vmem:[%s7883_s19 + $0x2c] sm:$0xff]  }
  0x5b   : > { %1268 = vrot.lane.b32.xlu0 %v1221_v33, %s7769_s21  ;;  %v1255_v33 = vsel %vm1214_vm1, %v1252_v23, %v1254_v25  ;;  %v7312_v23 = vld [vmem:[%s7883_s19 + $0x14] sm:$0xff]  }
  0x5c   : > { %1270 = vrot.lane.b32.xlu1 %v1223_v36, %s7769_s21  ;;  %v1260_v36 = vrot.slane %v7275_v27, 1 }
  0x5e   : > { %v1261_v41 = vsel %vm1214_vm1, %v1258_v34, %v1260_v36  ;;  %v1263_v43 = vsel %vm1214_vm1, %v1260_v36, %v1262_v40 }
  0x5f   : > { %1272 = vrot.lane.b32.xlu0 %v1225_v39, %s7769_s21  ;;  %v1259_v39 = vsel %vm1214_vm1, %v1256_v28, %v1258_v34  ;;  %v8135_v34 = vld [vmem:[%s7883_s19 + $0x1c] sm:$0xff]  }
  0x60   : > { %1274 = vrot.lane.b32.xlu1 %v1227_v42, %s7769_s21  ;;  %v7317_v42 = vld [vmem:[%s7883_s19 + $0x70] sm:$0xff]  }
  0x61   : > { %566 = vst.msk [vmem:[#allocation2 + $0x70] sm:$0xff] %vm551_vm2, %v7317_v42  ;;  %v2266_v42 = vrot.slane %v8135_v34, 1 }
  0x63   : > { %1276 = vrot.lane.b32.xlu0 %v1229_v45, %s7769_s21  ;;  %v7277_v45 = vld [vmem:[%s7883_s19 + $0xc] sm:$0xff]  }
  0x64   : > { %1278 = vrot.lane.b32.xlu1 %v1231_v49, %s7769_s21  ;;  %v7279_v49 = vld [vmem:[%s7883_s19 + $0x1c] sm:$0xff]  }
  0x67   : > { %1280 = vrot.lane.b32.xlu0 %v1233_v53, %s7769_s21  ;;  %v7282_v53 = vld [vmem:[%s7883_s19 + $0x34] sm:$0xff]  }
  0x68   : > { %1282 = vrot.lane.b32.xlu1 %v1235_v57, %s7769_s21  ;;  %v7331_v57 = vld [vmem:[%s7883_s19 + $0xa0] sm:$0xff]  }
  0x69   : > { %572 = vst.msk [vmem:[#allocation2 + $0xa0] sm:$0xff] %vm551_vm2, %v7331_v57 }
  0x6b   : > { %1284 = vrot.lane.b32.xlu0 %v1237_v61, %s7769_s21  ;;  %v7335_v61 = vld [vmem:[%s7883_s19 + $0xb0] sm:$0xff]  }
  0x6c   : > { %1286 = vrot.lane.b32.xlu1 %v1239_v1, %s7769_s21  ;;  %574 = vst.msk [vmem:[#allocation2 + $0xb0] sm:$0xff] %vm551_vm2, %v7335_v61  ;;  %v8166_v61 = vrot.slane %v2862_v48, 1 }
  0x6f   : > { %1288 = vrot.lane.b32.xlu0 %v1241_v5, %s7769_s21  ;;  %v7293_v5 = vld [vmem:[%s7883_s19 + $0x6c] sm:$0xff]  }
  0x70   : > { %1290 = vrot.lane.b32.xlu1 %v1243_v9, %s7769_s21  ;;  %v1801_v9 = vshll.u32 %v7306_v2, 16 }
  0x73   : > { %1292 = vrot.lane.b32.xlu0 %v1245_v14, %s7769_s21 }
  0x74   : > { %1294 = vrot.lane.b32.xlu1 %v1247_v18, %s7769_s21  ;;  %v1803_v18 = vrot.slane %v1801_v9, 1 }
  0x76   : > { %v1804_v27 = vor.u32 %v1803_v18, %v1799_v16 }
  0x77   : > { %1296 = vrot.lane.b32.xlu0 %v1249_v22, %s7769_s21  ;;  %v1814_v22 = vshll.u32 %v8113_v12, 16 }
  0x78   : > { %1298 = vrot.lane.b32.xlu1 %v1251_v24, %s7769_s21  ;;  %v7311_v24 = vld [vmem:[%s7883_s19 + $0xc] sm:$0xfe]  }
  0x79   : > { %v2263_v32 = vrot.slane %v7311_v24, 1 }
  0x7b   : > { %1300 = vrot.lane.b32.xlu0 %v1253_v30, %s7769_s21  ;;  %v8131_v30 = vrot.slane %v1814_v22, 1 }
  0x7c   : > { %1302 = vrot.lane.b32.xlu1 %v1255_v33, %s7769_s21  ;;  %v2264_v33 = vrot.slane %v7312_v23, 1 }
  0x7d   : > { %v1820_v16 = vor.u32 %v1818_v3, %v8131_v30  ;;  %v8256_v3 = vld [vmem:[%s7883_s19 + $0x3c] sm:$0xff]  }
  0x7f   : > { %1304 = vrot.lane.b32.xlu0 %v1257_v35, %s7769_s21  ;;  %v7321_v35 = vld [vmem:[%s7883_s19 + $0x20] sm:$0xff]  }
  0x80   : > { %1306 = vrot.lane.b32.xlu1 %v1259_v39, %s7769_s21  ;;  %v1809_v39 = vsel %vm748_vm0, %v1804_v27, %v1808_v19  ;;  %v7340_v19 = vld [vmem:[%s7883_s19 + $0x30] sm:$0xff]  }
  0x81   : > { %v2874_v37 = vshrl.u32 %v7340_v19, 16 }
  0x83   : > { %1308 = vrot.lane.b32.xlu0 %v1261_v41, %s7769_s21  ;;  %v1817_v41 = vsel %vm748_vm0, %v1812_v31, %v8131_v30 }
  0x84   : > { %1310 = vrot.lane.b32.xlu1 %v1263_v43, %s7769_s21  ;;  %v2854_v43 = vshll.u32 %v7321_v35, 16 }
  0x86   : > { %v2856_v52 = vrot.slane %v2854_v43, 1 }
  0x87   : > { %1529 = vrot.lane.b32.xlu0 %v7277_v45, %s7770_s22  ;;  %v2847_v45 = vshrl.u32 %v7320_v26, 16  ;;  %v2270_v26 = vrot.slane %v8191_v17, 1 }
  0x88   : > { %1531 = vrot.lane.b32.xlu1 %v7278_v46, %s7770_s22  ;;  %v2265_v46 = vsel %vm1214_vm1, %v2263_v32, %v2264_v33 }
  0x89   : > { %v2852_v57 = vor.u32 %v2851_v47, %v2847_v45 }
  0x8b   : > { %1533 = vrot.lane.b32.xlu0 %v7279_v49, %s7770_s22 }
  0x8c   : > { %1535 = vrot.lane.b32.xlu1 %v7280_v50, %s7770_s22  ;;  %v2267_v50 = vsel %vm1214_vm1, %v2264_v33, %v2266_v42  ;;  %v2866_v33 = vshrl.u32 %v8140_v38, 16 }
  0x8e   : > { %v2868_v43 = vor.u32 %v2866_v33, %v8166_v61 }
  0x8f   : > { %1537 = vrot.lane.b32.xlu0 %v7281_v51, %s7770_s22  ;;  %v7316_v51 = vld [vmem:[%s7883_s19 + $0x18] sm:$0xff]  }
  0x90   : > { %1539 = vrot.lane.b32.xlu1 %v7282_v53, %s7770_s22  ;;  %v2858_v53 = vshrl.u32 %v7321_v35, 16 }
  0x93   : > { %1541 = vrot.lane.b32.xlu0 %v7283_v55, %s7770_s22 }
  0x94   : > { %1543 = vrot.lane.b32.xlu1 %v7284_v56, %s7770_s22  ;;  %v7319_v56 = vld [vmem:[%s7883_s19 + $0x20] sm:$0xff]  }
  0x97   : > { %1545 = vrot.lane.b32.xlu0 %v7285_v59, %s7770_s22  ;;  %v7326_v59 = vld [vmem:[%s7883_s19 + $0x20] sm:$0xff]  }
  0x98   : > { %1547 = vrot.lane.b32.xlu1 %v7286_v60, %s7770_s22 }
  0x99   : > { %v946_v1 = vpop.permute.xlu0 %945 }
  0x9a   : > { %1018 = vst.msk [vmem:[#allocation2] sm:$0xff] %vm1017_vm3, %v946_v1  ;;  %v950_v4 = vpop.permute.xlu1 %949  ;;  %v8173_v1 = vld [vmem:[%s7883_s19 + $0x2c] sm:$0xff]  }
  0x9b   : > { %1549 = vrot.lane.b32.xlu0 %v7289_v63, %s7770_s22  ;;  %1020 = vst.msk [vmem:[#allocation2 + $0x10] sm:$0xff] %vm1017_vm3, %v950_v4  ;;  %v2860_v63 = vor.u32 %v2858_v53, %v2856_v52  ;;  %v2857_v4 = vsel %vm748_vm0, %v2852_v57, %v2856_v52  ;;  %v1830_v12 = vshll.u32 %v8173_v1, 16 }
  0x9c   : > { %1551 = vrot.lane.b32.xlu1 %v7290_v0, %s7770_s22  ;;  %v1822_v0 = vshll.u32 %v7330_v54, 16 }
  0x9d   : > { %v948_v6 = vpop.permute.xlu0 %947  ;;  %v2865_v9 = vsel %vm748_vm0, %v2860_v63, %v8166_v61  ;;  %v1832_v22 = vrot.slane %v1830_v12, 1 }
  0x9e   : > { %1019 = vst.msk [vmem:[#allocation2 + $0x8] sm:$0xff] %vm1017_vm3, %v948_v6  ;;  %v952_v11 = vpop.permute.xlu1 %951  ;;  %v3312_v6 = vrot.slane %v7326_v59, 1  ;;  %v1824_v10 = vrot.slane %v1822_v0, 1 }
  0x9f   : > { %1553 = vrot.lane.b32.xlu0 %v7293_v5, %s7770_s22  ;;  %1021 = vst.msk [vmem:[#allocation2 + $0x18] sm:$0xff] %vm1017_vm3, %v952_v11  ;;  %v3311_v5 = vrot.slane %v7325_v58, 1  ;;  %v1826_v11 = vshrl.u32 %v7330_v54, 16  ;;  %v1834_v54 = vshrl.u32 %v8173_v1, 16  ;;  %v7346_v1 = vld [vmem:[%s7883_s19 + $0x34] sm:$0xff]  }
  0xa0   : > { %1555 = vrot.lane.b32.xlu1 %v7294_v7, %s7770_s22  ;;  %v1825_v24 = vsel %vm748_vm0, %v1820_v16, %v1824_v10  ;;  %v8280_v16 = vld [vmem:[%s7883_s19 + $0x48] sm:$0xff]  }
  0xa1   : > { %v954_v14 = vpop.permute.xlu0 %953  ;;  %v1836_v0 = vor.u32 %v1834_v54, %v1832_v22 }
  0xa2   : > { %1022 = vst.msk [vmem:[#allocation2 + $0x20] sm:$0xff] %vm1017_vm3, %v954_v14  ;;  %v956_v20 = vpop.permute.xlu1 %955 }
  0xa3   : > { %1557 = vrot.lane.b32.xlu0 %v7297_v8, %s7770_s22  ;;  %1023 = vst.msk [vmem:[#allocation2 + $0x28] sm:$0xff] %vm1017_vm3, %v956_v20  ;;  %v3314_v8 = vrot.slane %v8169_v62, 1 }
  0xa4   : > { %1559 = vrot.lane.b32.xlu1 %v7298_v13, %s7770_s22  ;;  %v7334_v13 = vld [vmem:[%s7883_s19 + $0x24] sm:$0xff]  }
  0xa5   : > { %v958_v25 = vpop.permute.xlu0 %957  ;;  %v3315_v20 = vsel %vm1214_vm1, %v3312_v6, %v3314_v8 }
  0xa6   : > { %1024 = vst.msk [vmem:[#allocation2 + $0x30] sm:$0xff] %vm1017_vm3, %v958_v25  ;;  %v960_v28 = vpop.permute.xlu1 %959  ;;  %v2268_v25 = vrot.slane %v7334_v13, 1  ;;  %v2274_v13 = vrot.slane %v8256_v3, 1  ;;  %v7364_v3 = vld [vmem:[%s7883_s19 + $0x54] sm:$0xff]  }
  0xa7   : > { %1561 = vrot.lane.b32.xlu0 %v7301_v15, %s7770_s22  ;;  %1025 = vst.msk [vmem:[#allocation2 + $0x38] sm:$0xff] %vm1017_vm3, %v960_v28  ;;  %v3313_v15 = vsel %vm1214_vm1, %v3311_v5, %v3312_v6  ;;  %v2870_v28 = vshll.u32 %v7340_v19, 16 }
  0xa8   : > { %1563 = vrot.lane.b32.xlu1 %v7302_v21, %s7770_s22  ;;  %v1828_v21 = vor.u32 %v1826_v11, %v1824_v10  ;;  %v2269_v32 = vsel %vm1214_vm1, %v2266_v42, %v2268_v25  ;;  %v7339_v42 = vld [vmem:[%s7883_s19 + $0x30] sm:$0xff]   ;;  %v2272_v11 = vrot.slane %v7346_v1, 1 }
  0xa9   : > { %v962_v36 = vpop.permute.xlu0 %961  ;;  %v2872_v34 = vrot.slane %v2870_v28, 1  ;;  %v2894_v28 = vshll.u32 %v8280_v16, 16 }
  0xaa   : > { %1026 = vst.msk [vmem:[#allocation2 + $0x40] sm:$0xff] %vm1017_vm3, %v962_v36  ;;  %v964_v40 = vpop.permute.xlu1 %963  ;;  %v1833_v30 = vsel %vm748_vm0, %v1828_v21, %v1832_v22  ;;  %v7338_v36 = vld [vmem:[%s7883_s19 + $0x28] sm:$0xff]   ;;  %v2275_v17 = vsel %vm1214_vm1, %v2272_v11, %v2274_v13 }
  0xab   : > { %1565 = vrot.lane.b32.xlu0 %v7305_v29, %s7770_s22  ;;  %1027 = vst.msk [vmem:[#allocation2 + $0x48] sm:$0xff] %vm1017_vm3, %v964_v40  ;;  %v8205_v29 = vld [vmem:[%s7883_s19 + $0x38] sm:$0xff]   ;;  %v2271_v40 = vsel %vm1214_vm1, %v2268_v25, %v2270_v26  ;;  %v2876_v47 = vor.u32 %v2874_v37, %v2872_v34  ;;  %v2873_v52 = vsel %vm748_vm0, %v2868_v43, %v2872_v34  ;;  %v7354_v25 = vld [vmem:[%s7883_s19 + $0x44] sm:$0xff]  }
  0xac   : > { %1994 = vrot.lane.b32.xlu1 %v1809_v39, %s7771_s23  ;;  %v2878_v39 = vshll.u32 %v8205_v29, 16  ;;  %v2882_v21 = vshrl.u32 %v8205_v29, 16 }
  0xad   : > { %v966_v44 = vpop.permute.xlu0 %965 }
  0xae   : > { %1028 = vst.msk [vmem:[#allocation2 + $0x50] sm:$0xff] %vm1017_vm3, %v966_v44  ;;  %v968_v49 = vpop.permute.xlu1 %967  ;;  %v7342_v44 = vld [vmem:[%s7883_s19 + $0x30] sm:$0xff]   ;;  %v8233_v48 = vrot.slane %v2878_v39, 1  ;;  %v2896_v39 = vrot.slane %v2894_v28, 1 }
  0xaf   : > { %1996 = vrot.lane.b32.xlu0 %v1817_v41, %s7771_s23  ;;  %1029 = vst.msk [vmem:[#allocation2 + $0x58] sm:$0xff] %vm1017_vm3, %v968_v49  ;;  %v7344_v41 = vld [vmem:[%s7883_s19 + $0x34] sm:$0xff]   ;;  %v3316_v53 = vrot.slane %v7342_v44, 1 }
  0xb0   : > { %2312 = vrot.lane.b32.xlu1 %v2265_v46, %s7772_s30  ;;  %v8230_v46 = vld [vmem:[%s7883_s19 + $0x38] sm:$0xff]   ;;  %v1838_v49 = vshll.u32 %v7344_v41, 16  ;;  %v2881_v57 = vsel %vm748_vm0, %v2876_v47, %v8233_v48  ;;  %v1842_v59 = vshrl.u32 %v7344_v41, 16 }
  0xb1   : > { %v970_v55 = vpop.permute.xlu0 %969  ;;  %v3317_v63 = vsel %vm1214_vm1, %v3314_v8, %v3316_v53 }
  0xb2   : > { %1030 = vst.msk [vmem:[#allocation2 + $0x60] sm:$0xff] %vm1017_vm3, %v970_v55  ;;  %v972_v60 = vpop.permute.xlu1 %971  ;;  %v1840_v58 = vrot.slane %v1838_v49, 1 }
  0xb3   : > { %2314 = vrot.lane.b32.xlu0 %v2267_v50, %s7772_s30  ;;  %1031 = vst.msk [vmem:[#allocation2 + $0x68] sm:$0xff] %vm1017_vm3, %v972_v60  ;;  %v8236_v50 = vld [vmem:[%s7883_s19 + $0x3c] sm:$0xff]  }
  0xb4   : > { %2577 = vrot.lane.b32.xlu1 %v7316_v51, %s7773_s8  ;;  %v1846_v60 = vshll.u32 %v8236_v50, 16  ;;  %v1844_v62 = vor.u32 %v1842_v59, %v1840_v58  ;;  %v1841_v10 = vsel %vm748_vm0, %v1836_v0, %v1840_v58 }
  0xb5   : > { %v974_v2 = vpop.permute.xlu0 %973 }
  0xb6   : > { %1032 = vst.msk [vmem:[#allocation2 + $0x70] sm:$0xff] %vm1017_vm3, %v974_v2  ;;  %v976_v7 = vpop.permute.xlu1 %975  ;;  %v8265_v6 = vrot.slane %v1846_v60, 1 }
  0xb7   : > { %2579 = vrot.lane.b32.xlu0 %v7319_v56, %s7773_s8  ;;  %1033 = vst.msk [vmem:[#allocation2 + $0x78] sm:$0xff] %vm1017_vm3, %v976_v7  ;;  %v3318_v56 = vrot.slane %v8230_v46, 1  ;;  %v7350_v7 = vld [vmem:[%s7883_s19 + $0x40] sm:$0xff]  }
  0xb8   : > { %3042 = vrot.lane.b32.xlu1 %v2857_v4, %s7774_s10  ;;  %v7389_v4 = vld [vmem:[%s11180_s2] sm:$0xff]   ;;  %v2890_v22 = vshrl.u32 %v7350_v7, 16 }
  0xb9   : > { %v978_v14 = vpop.permute.xlu0 %977  ;;  %v3319_v5 = vsel %vm1214_vm1, %v3316_v53, %v3318_v56  ;;  %7013 = vmatprep.subr.bf16.mxu0 %v7389_v4  ;;  %v8324_v53 = vld [vmem:[%s7883_s19 + $0x4c] sm:$0xff]  }
  0xba   : > { %1034 = vst.msk [vmem:[#allocation2 + $0x80] sm:$0xff] %vm1017_vm3, %v978_v14  ;;  %v980_v18 = vpop.permute.xlu1 %979  ;;  %7014 = vmatpush3.bf16.msra.mxu0 %v7389_v4  ;;  %v1849_v14 = vsel %vm748_vm0, %v1844_v62, %v8265_v6  ;;  %v2898_v62 = vshrl.u32 %v8280_v16, 16  ;;  %v7362_v16 = vld [vmem:[%s7883_s19 + $0x50] sm:$0xff]  }
  0xbb   : > { %3044 = vrot.lane.b32.xlu0 %v2865_v9, %s7774_s10  ;;  %1035 = vst.msk [vmem:[#allocation2 + $0x88] sm:$0xff] %vm1017_vm3, %v980_v18  ;;  %v7392_v9 = vld [vmem:[%s11180_s2 + $0x8] sm:$0xff]   ;;  %v7395_v18 = vld [vmem:[%s11180_s2 + $0x10] ss:$0 sps:$4 sm:$0x33]  }
  0xbc   : > { %3360 = vrot.lane.b32.xlu1 %v3313_v15, %s7775_s12  ;;  %7015 = vmatprep.subr.bf16.mxu0 %v7392_v9  ;;  %v2886_v15 = vshll.u32 %v7350_v7, 16 }
  0xbd   : > { %v982_v23 = vpop.permute.xlu0 %981 }
  0xbe   : > { %1036 = vst.msk [vmem:[#allocation2 + $0x90] sm:$0xff] %vm1017_vm3, %v982_v23  ;;  %v984_v27 = vpop.permute.xlu1 %983  ;;  %7016 = vmatpush3.bf16.msra.mxu0 %v7392_v9 }
  0xbf   : > { %3362 = vrot.lane.b32.xlu0 %v3315_v20, %s7775_s12  ;;  %1037 = vst.msk [vmem:[#allocation2 + $0x98] sm:$0xff] %vm1017_vm3, %v984_v27  ;;  %v2273_v20 = vsel %vm1214_vm1, %v2270_v26, %v2272_v11  ;;  %7147 = vmatprep.subr.msk.bf16.mxu0 %vm3581_vm5, %v7395_v18  ;;  %v3583_v27 = vsel %vm3581_vm5, %v7395_v18, 0  ;;  %v2888_v26 = vrot.slane %v2886_v15, 1  ;;  %v2900_v15 = vor.u32 %v2898_v62, %v2896_v39 }
  0xc0   : > { %1998 = vrot.lane.b32.xlu1 %v1825_v24, %s7771_s23  ;;  %v7348_v24 = vld [vmem:[%s7883_s19 + $0x38] sm:$0xff]  }
  0xc1   : > { %v986_v31 = vpop.permute.xlu0 %985  ;;  %v2892_v37 = vor.u32 %v2890_v22, %v2888_v26  ;;  %v1870_v22 = vshll.u32 %v7364_v3, 16 }
  0xc2   : > { %1038 = vst.msk [vmem:[#allocation2 + $0xa0] sm:$0xff] %vm1017_vm3, %v986_v31  ;;  %v988_v35 = vpop.permute.xlu1 %987  ;;  %v2884_v31 = vor.u32 %v2882_v21, %v8233_v48  ;;  %7018 = vmatpush3.bf16.msra.mxu0 %v3583_v27  ;;  %v1858_v48 = vshrl.u32 %v7354_v25, 16  ;;  %v3324_v27 = vrot.slane %v7362_v16, 1 }
  0xc3   : > { %2000 = vrot.lane.b32.xlu0 %v1833_v30, %s7771_s23  ;;  %1039 = vst.msk [vmem:[#allocation2 + $0xa8] sm:$0xff] %vm1017_vm3, %v988_v35  ;;  %v7349_v30 = vld [vmem:[%s7883_s19 + $0x40] sm:$0xff]   ;;  %v8306_v35 = vld [vmem:[%s7883_s19 + $0x48] sm:$0xff]   ;;  %v2897_v47 = vsel %vm748_vm0, %v2892_v37, %v2896_v39  ;;  %v7366_v39 = vld [vmem:[%s7883_s19 + $0x54] sm:$0xff]  }
  0xc4   : > { %2316 = vrot.lane.b32.xlu1 %v2269_v32, %s7772_s30  ;;  %v7352_v32 = vld [vmem:[%s7883_s19 + $0x40] sm:$0xff]   ;;  %v2889_v41 = vsel %vm748_vm0, %v2884_v31, %v2888_v26  ;;  %v3322_v44 = vrot.slane %v8306_v35, 1  ;;  %v1872_v31 = vrot.slane %v1870_v22, 1 }
  0xc5   : > { %v990_v38 = vpop.permute.xlu0 %989  ;;  %v7370_v35 = vld [vmem:[%s7883_s19 + $0x60] sm:$0xff]  }
  0xc6   : > { %1040 = vst.msk [vmem:[#allocation2 + $0xb0] sm:$0xff] %vm1017_vm3, %v990_v38  ;;  %v992_v45 = vpop.permute.xlu1 %991  ;;  %v3320_v38 = vrot.slane %v7352_v32, 1 }
  0xc7   : > { %2318 = vrot.lane.b32.xlu0 %v2271_v40, %s7772_s30  ;;  %1041 = vst.msk [vmem:[#allocation2 + $0xb8] sm:$0xff] %vm1017_vm3, %v992_v45  ;;  %v8310_v40 = vld [vmem:[%s7883_s19 + $0x4c] sm:$0xff]  }
  0xc8   : > { %2581 = vrot.lane.b32.xlu1 %v7338_v36, %s7773_s8  ;;  %v1854_v36 = vshll.u32 %v7354_v25, 16  ;;  %v1862_v49 = vshll.u32 %v8310_v40, 16  ;;  %v3323_v58 = vsel %vm1214_vm1, %v3320_v38, %v3322_v44 }
  0xc9   : > { %v1265_v51 = vpop.permute.xlu0 %1264 }
  0xca   : > { %1337 = vst.msk [vmem:[#allocation2] sm:$0xff] %vm1336_vm4, %v1265_v51  ;;  %v1267_v55 = vpop.permute.xlu1 %1266  ;;  %v1856_v45 = vrot.slane %v1854_v36, 1  ;;  %v1864_v60 = vrot.slane %v1862_v49, 1  ;;  %v3325_v36 = vsel %vm1214_vm1, %v3322_v44, %v3324_v27 }
  0xcb   : > { %2583 = vrot.lane.b32.xlu0 %v7339_v42, %s7773_s8  ;;  %1338 = vst.msk [vmem:[#allocation2 + $0x8] sm:$0xff] %vm1336_vm4, %v1267_v55  ;;  %v1850_v42 = vshrl.u32 %v8236_v50, 16  ;;  %v3321_v50 = vsel %vm1214_vm1, %v3318_v56, %v3320_v38  ;;  %v7360_v55 = vld [vmem:[%s7883_s19 + $0x50] sm:$0xff]  }
  0xcc   : > { %3046 = vrot.lane.b32.xlu1 %v2873_v52, %s7774_s10  ;;  %v7356_v52 = vld [vmem:[%s7883_s19 + $0x44] sm:$0xff]   ;;  %v1860_v59 = vor.u32 %v1858_v48, %v1856_v45  ;;  %v2902_v1 = vshll.u32 %v7360_v55, 16  ;;  %v2906_v9 = vshrl.u32 %v7360_v55, 16 }
  0xcd   : > { %v1269_v61 = vpop.permute.xlu0 %1268  ;;  %v1852_v54 = vor.u32 %v1850_v42, %v8265_v6 }
  0xce   : > { %1339 = vst.msk [vmem:[#allocation2 + $0x10] sm:$0xff] %vm1336_vm4, %v1269_v61  ;;  %v1271_v2 = vpop.permute.xlu1 %1270  ;;  %v2276_v61 = vrot.slane %v7356_v52, 1  ;;  %v1865_v4 = vsel %vm748_vm0, %v1860_v59, %v1864_v60  ;;  %v8408_v52 = vld [vmem:[%s7883_s19 + $0x68] sm:$0xff]   ;;  %v2922_v59 = vshrl.u32 %v7370_v35, 16 }
  0xcf   : > { %3048 = vrot.lane.b32.xlu0 %v2881_v57, %s7774_s10  ;;  %1340 = vst.msk [vmem:[#allocation2 + $0x18] sm:$0xff] %vm1336_vm4, %v1271_v2  ;;  %v1857_v56 = vsel %vm748_vm0, %v1852_v54, %v1856_v45  ;;  %v8343_v2 = vld [vmem:[%s7883_s19 + $0x58] sm:$0xff]   ;;  %v2280_v45 = vrot.slane %v7366_v39, 1 }
  0xd0   : > { %3364 = vrot.lane.b32.xlu1 %v3317_v63, %s7775_s12  ;;  %v2278_v63 = vrot.slane %v8324_v53, 1  ;;  %v2277_v6 = vsel %vm1214_vm1, %v2274_v13, %v2276_v61  ;;  %v2914_v55 = vshrl.u32 %v8343_v2, 16 }
  0xd1   : > { %v1273_v8 = vpop.permute.xlu0 %1272 }
  0xd2   : > { %1341 = vst.msk [vmem:[#allocation2 + $0x20] sm:$0xff] %vm1336_vm4, %v1273_v8  ;;  %v1275_v12 = vpop.permute.xlu1 %1274  ;;  %v7358_v8 = vld [vmem:[%s7883_s19 + $0x48] sm:$0xff]   ;;  %v2279_v11 = vsel %vm1214_vm1, %v2276_v61, %v2278_v63  ;;  %v2281_v54 = vsel %vm1214_vm1, %v2278_v63, %v2280_v45  ;;  %v7369_v63 = vld [vmem:[%s7883_s19 + $0x60] sm:$0xff]  }
  0xd3   : > { %3366 = vrot.lane.b32.xlu0 %v3319_v5, %s7775_s12  ;;  %1342 = vst.msk [vmem:[#allocation2 + $0x28] sm:$0xff] %vm1336_vm4, %v1275_v12  ;;  %v2904_v12 = vrot.slane %v2902_v1, 1  ;;  %v7372_v1 = vld [vmem:[%s7883_s19 + $0x60] sm:$0xff]  }
  0xd4   : > { %2002 = vrot.lane.b32.xlu1 %v1841_v10, %s7771_s23  ;;  %v2910_v10 = vshll.u32 %v8343_v2, 16 }
  0xd5   : > { %v1277_v19 = vpop.permute.xlu0 %1276  ;;  %v2908_v21 = vor.u32 %v2906_v9, %v2904_v12  ;;  %v2905_v25 = vsel %vm748_vm0, %v2900_v15, %v2904_v12 }
  0xd6   : > { %1343 = vst.msk [vmem:[#allocation2 + $0x30] sm:$0xff] %vm1336_vm4, %v1277_v19  ;;  %v1279_v23 = vpop.permute.xlu1 %1278  ;;  %v8366_v19 = vrot.slane %v2910_v10, 1  ;;  %v3328_v10 = vrot.slane %v7372_v1, 1 }
  0xd7   : > { %2004 = vrot.lane.b32.xlu0 %v1849_v14, %s7771_s23  ;;  %1344 = vst.msk [vmem:[#allocation2 + $0x38] sm:$0xff] %vm1336_vm4, %v1279_v23  ;;  %v7359_v14 = vld [vmem:[%s7883_s19 + $0x50] sm:$0xff]   ;;  %v8373_v23 = vld [vmem:[%s7883_s19 + $0x5c] sm:$0xff]  }
  0xd8   : > { %2320 = vrot.lane.b32.xlu1 %v2273_v20, %s7772_s30  ;;  %v8369_v20 = vld [vmem:[%s7883_s19 + $0x58] sm:$0xff]   ;;  %v1878_v32 = vshll.u32 %v8373_v23, 16 }
  0xd9   : > { %v1281_v29 = vpop.permute.xlu0 %1280  ;;  %v3326_v28 = vrot.slane %v8369_v20, 1 }
  0xda   : > { %1345 = vst.msk [vmem:[#allocation2 + $0x40] sm:$0xff] %vm1336_vm4, %v1281_v29  ;;  %v1283_v33 = vpop.permute.xlu1 %1282  ;;  %v1874_v29 = vshrl.u32 %v7364_v3, 16  ;;  %v1880_v42 = vrot.slane %v1878_v32, 1 }
  0xdb   : > { %2322 = vrot.lane.b32.xlu0 %v2275_v17, %s7772_s30  ;;  %1346 = vst.msk [vmem:[#allocation2 + $0x48] sm:$0xff] %vm1336_vm4, %v1283_v33  ;;  %v1866_v17 = vshrl.u32 %v8310_v40, 16 }
  0xdc   : > { %2585 = vrot.lane.b32.xlu1 %v7348_v24, %s7773_s8  ;;  %v1876_v38 = vor.u32 %v1874_v29, %v1872_v31 }
  0xdd   : > { %v1285_v34 = vpop.permute.xlu0 %1284  ;;  %v1868_v37 = vor.u32 %v1866_v17, %v1864_v60  ;;  %v7374_v60 = vld [vmem:[%s7883_s19 + $0x64] sm:$0xff]  }
  0xde   : > { %1347 = vst.msk [vmem:[#allocation2 + $0x50] sm:$0xff] %vm1336_vm4, %v1285_v34  ;;  %v1287_v43 = vpop.permute.xlu1 %1286  ;;  %v8393_v34 = vld [vmem:[%s7883_s19 + $0x5c] sm:$0xff]   ;;  %v1881_v49 = vsel %vm748_vm0, %v1876_v38, %v1880_v42  ;;  %v1890_v15 = vshrl.u32 %v7374_v60, 16 }
  0xdf   : > { %2587 = vrot.lane.b32.xlu0 %v7349_v30, %s7773_s8  ;;  %1348 = vst.msk [vmem:[#allocation2 + $0x58] sm:$0xff] %vm1336_vm4, %v1287_v43  ;;  %v2913_v30 = vsel %vm748_vm0, %v2908_v21, %v8366_v19  ;;  %v1873_v44 = vsel %vm748_vm0, %v1868_v37, %v1872_v31  ;;  %v2282_v48 = vrot.slane %v8393_v34, 1  ;;  %v3329_v21 = vsel %vm1214_vm1, %v3326_v28, %v3328_v10 }
  0xe0   : > { %3050 = vrot.lane.b32.xlu1 %v2889_v41, %s7774_s10  ;;  %v3327_v41 = vsel %vm1214_vm1, %v3324_v27, %v3326_v28 }
  0xe1   : > { %v1289_v51 = vpop.permute.xlu0 %1288 }
  0xe2   : > { %1349 = vst.msk [vmem:[#allocation2 + $0x60] sm:$0xff] %vm1336_vm4, %v1289_v51  ;;  %v1291_v57 = vpop.permute.xlu1 %1290  ;;  %v2918_v51 = vshll.u32 %v7370_v35, 16 }
  0xe3   : > { %3052 = vrot.lane.b32.xlu0 %v2897_v47, %s7774_s10  ;;  %1350 = vst.msk [vmem:[#allocation2 + $0x68] sm:$0xff] %vm1336_vm4, %v1291_v57 }
  0xe4   : > { %3368 = vrot.lane.b32.xlu1 %v3321_v50, %s7775_s12  ;;  %v2920_v53 = vrot.slane %v2918_v51, 1  ;;  %v7379_v51 = vld [vmem:[%s7883_s19 + $0x70] sm:$0xff]  }
  0xe5   : > { %v1293_v46 = vpop.permute.xlu0 %1292 }
  0xe6   : > { %1351 = vst.msk [vmem:[#allocation2 + $0x70] sm:$0xff] %vm1336_vm4, %v1293_v46  ;;  %v1295_v0 = vpop.permute.xlu1 %1294  ;;  %v2283_v46 = vsel %vm1214_vm1, %v2280_v45, %v2282_v48  ;;  %v2924_v62 = vor.u32 %v2922_v59, %v2920_v53  ;;  %v7378_v45 = vld [vmem:[%s7883_s19 + $0x68] sm:$0xff]  }
  0xe7   : > { %3370 = vrot.lane.b32.xlu0 %v3323_v58, %s7775_s12  ;;  %1352 = vst.msk [vmem:[#allocation2 + $0x78] sm:$0xff] %vm1336_vm4, %v1295_v0  ;;  %v7368_v58 = vld [vmem:[%s7883_s19 + $0x58] sm:$0xff]   ;;  %v2916_v0 = vor.u32 %v2914_v55, %v8366_v19  ;;  %v7376_v19 = vld [vmem:[%s7883_s19 + $0x64] sm:$0xff]  }
  0xe8   : > { %2006 = vrot.lane.b32.xlu1 %v1857_v56, %s7771_s23  ;;  %v2926_v56 = vshll.u32 %v8408_v52, 16  ;;  %v2284_v29 = vrot.slane %v7376_v19, 1  ;;  %v8535_v19 = vld [vmem:[%s7883_s19 + $0x88] sm:$0xff]  }
  0xe9   : > { %v1297_v5 = vpop.permute.xlu0 %1296  ;;  %v2921_v9 = vsel %vm748_vm0, %v2916_v0, %v2920_v53 }
  0xea   : > { %1353 = vst.msk [vmem:[#allocation2 + $0x80] sm:$0xff] %vm1336_vm4, %v1297_v5  ;;  %v1299_v7 = vpop.permute.xlu1 %1298  ;;  %v1886_v5 = vshll.u32 %v7374_v60, 16  ;;  %v2285_v39 = vsel %vm1214_vm1, %v2282_v48, %v2284_v29  ;;  %v7382_v48 = vld [vmem:[%s7883_s19 + $0x70] sm:$0xff]  }
  0xeb   : > { %2008 = vrot.lane.b32.xlu0 %v1865_v4, %s7771_s23  ;;  %1354 = vst.msk [vmem:[#allocation2 + $0x88] sm:$0xff] %vm1336_vm4, %v1299_v7  ;;  %v8431_v4 = vld [vmem:[%s7883_s19 + $0x68] sm:$0xff]   ;;  %v3332_v60 = vrot.slane %v7382_v48, 1 }
  0xec   : > { %2324 = vrot.lane.b32.xlu1 %v2277_v6, %s7772_s30  ;;  %v2928_v6 = vrot.slane %v2926_v56, 1  ;;  %v8435_v7 = vld [vmem:[%s7883_s19 + $0x6c] sm:$0xff]   ;;  %v3330_v3 = vrot.slane %v8431_v4, 1  ;;  %v7391_v4 = vld [vmem:[%s7883_s19 + $0x80] sm:$0xff]  }
  0xed   : > { %v1301_v13 = vpop.permute.xlu0 %1300  ;;  %v1894_v16 = vshll.u32 %v8435_v7, 16 }
  0xee   : > { %1355 = vst.msk [vmem:[#allocation2 + $0x90] sm:$0xff] %vm1336_vm4, %v1301_v13  ;;  %v1303_v18 = vpop.permute.xlu1 %1302  ;;  %v1888_v13 = vrot.slane %v1886_v5, 1  ;;  %v3333_v5 = vsel %vm1214_vm1, %v3330_v3, %v3332_v60 }
  0xef   : > { %2326 = vrot.lane.b32.xlu0 %v2279_v11, %s7772_s30  ;;  %1356 = vst.msk [vmem:[#allocation2 + $0x98] sm:$0xff] %vm1336_vm4, %v1303_v18  ;;  %v1882_v11 = vshrl.u32 %v8373_v23, 16  ;;  %v8453_v23 = vld [vmem:[%s7883_s19 + $0x6c] sm:$0xff]   ;;  %v1896_v17 = vrot.slane %v1894_v16, 1 }
  0xf0   : > { %2589 = vrot.lane.b32.xlu1 %v7358_v8, %s7773_s8  ;;  %v1892_v27 = vor.u32 %v1890_v15, %v1888_v13  ;;  %v2286_v32 = vrot.slane %v8453_v23, 1  ;;  %v2958_v23 = vshll.u32 %v8535_v19, 16 }
  0xf1   : > { %v1305_v24 = vpop.permute.xlu0 %1304  ;;  %v1884_v22 = vor.u32 %v1882_v11, %v1880_v42  ;;  %v8523_v11 = vld [vmem:[%s7883_s19 + $0x7c] sm:$0xff]  }
  0xf2   : > { %1357 = vst.msk [vmem:[#allocation2 + $0xa0] sm:$0xff] %vm1336_vm4, %v1305_v24  ;;  %v1307_v26 = vpop.permute.xlu1 %1306  ;;  %v1897_v31 = vsel %vm748_vm0, %v1892_v27, %v1896_v17  ;;  %v2287_v38 = vsel %vm1214_vm1, %v2284_v29, %v2286_v32  ;;  %v2290_v16 = vrot.slane %v8523_v11, 1  ;;  %v7388_v29 = vld [vmem:[%s7883_s19 + $0x78] sm:$0xff]  }
  0xf3   : > { %2591 = vrot.lane.b32.xlu0 %v7359_v14, %s7773_s8  ;;  %1358 = vst.msk [vmem:[#allocation2 + $0xa8] sm:$0xff] %vm1336_vm4, %v1307_v26  ;;  %v2929_v14 = vsel %vm748_vm0, %v2924_v62, %v2928_v6  ;;  %v7380_v26 = vld [vmem:[%s7883_s19 + $0x70] sm:$0xff]   ;;  %v1889_v28 = vsel %vm748_vm0, %v1884_v22, %v1888_v13 }
  0xf4   : > { %3054 = vrot.lane.b32.xlu1 %v2905_v25, %s7774_s10  ;;  %v3331_v25 = vsel %vm1214_vm1, %v3328_v10, %v3330_v3  ;;  %v2938_v35 = vshrl.u32 %v7380_v26, 16 }
  0xf5   : > { %v1309_v33 = vpop.permute.xlu0 %1308 }
  0xf6   : > { %1359 = vst.msk [vmem:[#allocation2 + $0xb0] sm:$0xff] %vm1336_vm4, %v1309_v33  ;;  %v1311_v40 = vpop.permute.xlu1 %1310  ;;  %v2934_v33 = vshll.u32 %v7380_v26, 16  ;;  %v2954_v26 = vshrl.u32 %v7391_v4, 16 }
  0xf7   : > { %3056 = vrot.lane.b32.xlu0 %v2913_v30, %s7774_s10  ;;  %1360 = vst.msk [vmem:[#allocation2 + $0xb8] sm:$0xff] %vm1336_vm4, %v1311_v40  ;;  %v2930_v40 = vshrl.u32 %v8408_v52, 16  ;;  %v8491_v52 = vld [vmem:[%s7883_s19 + $0x78] sm:$0xff]  }
  0xf8   : > { %3372 = vrot.lane.b32.xlu1 %v3325_v36, %s7775_s12  ;;  %v8469_v36 = vld [vmem:[%s7883_s19 + $0x78] sm:$0xff]   ;;  %v2936_v42 = vrot.slane %v2934_v33, 1  ;;  %v3334_v56 = vrot.slane %v8491_v52, 1  ;;  %v7390_v33 = vld [vmem:[%s7883_s19 + $0x80] sm:$0xff]   ;;  %v7403_v52 = vld [vmem:[%s7883_s19 + $0x90] sm:$0xff]  }
  0xf9   : > { %v1530_v43 = vpop.permute.xlu0 %1529  ;;  %v2942_v34 = vshll.u32 %v8469_v36, 16 }
  0xfa   : > { %1602 = vst.msk [vmem:[#allocation2] sm:$0xff] %vm1601_vm6, %v1530_v43  ;;  %v1532_v47 = vpop.permute.xlu1 %1531  ;;  %v7384_v43 = vld [vmem:[%s7883_s19 + $0x74] sm:$0xff]  }
  0xfb   : > { %3374 = vrot.lane.b32.xlu0 %v3327_v41, %s7775_s12  ;;  %1603 = vst.msk [vmem:[#allocation2 + $0x8] sm:$0xff] %vm1601_vm6, %v1532_v47  ;;  %v2932_v47 = vor.u32 %v2930_v40, %v2928_v6  ;;  %v1902_v55 = vshll.u32 %v7384_v43, 16  ;;  %v1906_v0 = vshrl.u32 %v7384_v43, 16  ;;  %v7386_v6 = vld [vmem:[%s7883_s19 + $0x74] sm:$0xff]  }
  0xfc   : > { %2010 = vrot.lane.b32.xlu1 %v1873_v44, %s7771_s23  ;;  %v2288_v13 = vrot.slane %v7386_v6, 1 }
  0xfd   : > { %v1534_v50 = vpop.permute.xlu0 %1533  ;;  %v2937_v59 = vsel %vm748_vm0, %v2932_v47, %v2936_v42 }
  0xfe   : > { %1604 = vst.msk [vmem:[#allocation2 + $0x10] sm:$0xff] %vm1601_vm6, %v1534_v50  ;;  %v1536_v57 = vpop.permute.xlu1 %1535  ;;  %v2940_v50 = vor.u32 %v2938_v35, %v2936_v42  ;;  %v2289_v22 = vsel %vm1214_vm1, %v2286_v32, %v2288_v13  ;;  %v2291_v27 = vsel %vm1214_vm1, %v2288_v13, %v2290_v16  ;;  %v7407_v13 = vld [vmem:[%s7883_s19 + $0x94] sm:$0xff]  }
  0xff   : > { %2012 = vrot.lane.b32.xlu0 %v1881_v49, %s7771_s23  ;;  %1605 = vst.msk [vmem:[#allocation2 + $0x18] sm:$0xff] %vm1601_vm6, %v1536_v57  ;;  %v8497_v57 = vld [vmem:[%s7883_s19 + $0x7c] sm:$0xff]  }
 0x100   : > { %2328 = vrot.lane.b32.xlu1 %v2281_v54, %s7772_s30  ;;  %v8494_v54 = vrot.slane %v2942_v34, 1  ;;  %v1910_v1 = vshll.u32 %v8497_v57, 16  ;;  %v1914_v34 = vshrl.u32 %v8497_v57, 16 }
 0x101   : > { %v1538_v61 = vpop.permute.xlu0 %1537 }
 0x102   : > { %1606 = vst.msk [vmem:[#allocation2 + $0x20] sm:$0xff] %vm1601_vm6, %v1538_v61  ;;  %v1540_v2 = vpop.permute.xlu1 %1539  ;;  %v2945_v61 = vsel %vm748_vm0, %v2940_v50, %v8494_v54  ;;  %v8520_v10 = vrot.slane %v1910_v1, 1 }
 0x103   : > { %2330 = vrot.lane.b32.xlu0 %v2283_v46, %s7772_s30  ;;  %1607 = vst.msk [vmem:[#allocation2 + $0x28] sm:$0xff] %vm1601_vm6, %v1540_v2  ;;  %v1898_v46 = vshrl.u32 %v8435_v7, 16 }
 0x104   : > { %2593 = vrot.lane.b32.xlu1 %v7368_v58, %s7773_s8 }
 0x105   : > { %v1542_v8 = vpop.permute.xlu0 %1541  ;;  %v1900_v62 = vor.u32 %v1898_v46, %v1896_v17  ;;  %v8591_v46 = vld [vmem:[%s7883_s19 + $0x8c] sm:$0xff]  }
 0x106   : > { %1608 = vst.msk [vmem:[#allocation2 + $0x30] sm:$0xff] %vm1601_vm6, %v1542_v8  ;;  %v1544_v12 = vpop.permute.xlu1 %1543  ;;  %v3335_v8 = vsel %vm1214_vm1, %v3332_v60, %v3334_v56 }
 0x107   : > { %2595 = vrot.lane.b32.xlu0 %v7369_v63, %s7773_s8  ;;  %1609 = vst.msk [vmem:[#allocation2 + $0x38] sm:$0xff] %vm1601_vm6, %v1544_v12  ;;  %v1904_v63 = vrot.slane %v1902_v55, 1  ;;  %v7399_v55 = vld [vmem:[%s7883_s19 + $0x84] sm:$0xff]  }
 0x108   : > { %3058 = vrot.lane.b32.xlu1 %v2921_v9, %s7774_s10 }
 0x109   : > { %v1546_v18 = vpop.permute.xlu0 %1545  ;;  %v1908_v9 = vor.u32 %v1906_v0, %v1904_v63  ;;  %v1905_v3 = vsel %vm748_vm0, %v1900_v62, %v1904_v63  ;;  %v8604_v62 = vld [vmem:[%s7883_s19 + $0x98] sm:$0xff]  }
 0x10a   : > { %1610 = vst.msk [vmem:[#allocation2 + $0x40] sm:$0xff] %vm1601_vm6, %v1546_v18  ;;  %v1548_v24 = vpop.permute.xlu1 %1547  ;;  %v2950_v18 = vshll.u32 %v7391_v4, 16  ;;  %v2974_v11 = vshll.u32 %v8604_v62, 16 }
 0x10b   : > { %3060 = vrot.lane.b32.xlu0 %v2929_v14, %s7774_s10  ;;  %1611 = vst.msk [vmem:[#allocation2 + $0x48] sm:$0xff] %vm1601_vm6, %v1548_v24  ;;  %v1913_v15 = vsel %vm748_vm0, %v1908_v9, %v8520_v10  ;;  %v2946_v24 = vshrl.u32 %v8469_v36, 16  ;;  %v8558_v36 = vld [vmem:[%s7883_s19 + $0x88] sm:$0xff]   ;;  %v2962_v9 = vshrl.u32 %v8535_v19, 16 }
 0x10c   : > { %3376 = vrot.lane.b32.xlu1 %v3329_v21, %s7775_s12  ;;  %v2952_v17 = vrot.slane %v2950_v18, 1  ;;  %v7405_v18 = vld [vmem:[%s7883_s19 + $0x90] sm:$0xff]  }
 0x10d   : > { %v1550_v20 = vpop.permute.xlu0 %1549 }
 0x10e   : > { %1612 = vst.msk [vmem:[#allocation2 + $0x50] sm:$0xff] %vm1601_vm6, %v1550_v20  ;;  %v1552_v30 = vpop.permute.xlu1 %1551  ;;  %v7397_v20 = vld [vmem:[%s7883_s19 + $0x84] sm:$0xff]  }
 0x10f   : > { %3378 = vrot.lane.b32.xlu0 %v3331_v25, %s7775_s12  ;;  %1613 = vst.msk [vmem:[#allocation2 + $0x58] sm:$0xff] %vm1601_vm6, %v1552_v30  ;;  %v2948_v30 = vor.u32 %v2946_v24, %v8494_v54  ;;  %v1918_v40 = vshll.u32 %v7397_v20, 16  ;;  %v1922_v48 = vshrl.u32 %v7397_v20, 16  ;;  %v1916_v54 = vor.u32 %v1914_v34, %v8520_v10 }
 0x110   : > { %2014 = vrot.lane.b32.xlu1 %v1889_v28, %s7771_s23  ;;  %v3340_v20 = vrot.slane %v7405_v18, 1 }
 0x111   : > { %v1554_v37 = vpop.permute.xlu0 %1553  ;;  %v2953_v42 = vsel %vm748_vm0, %v2948_v30, %v2952_v17  ;;  %v1920_v47 = vrot.slane %v1918_v40, 1 }
 0x112   : > { %1614 = vst.msk [vmem:[#allocation2 + $0x60] sm:$0xff] %vm1601_vm6, %v1554_v37  ;;  %v1556_v41 = vpop.permute.xlu1 %1555  ;;  %v2956_v37 = vor.u32 %v2954_v26, %v2952_v17  ;;  %v8634_v17 = vld [vmem:[%s7883_s19 + $0x9c] sm:$0xff]  }
 0x113   : > { %2016 = vrot.lane.b32.xlu0 %v1897_v31, %s7771_s23  ;;  %1615 = vst.msk [vmem:[#allocation2 + $0x68] sm:$0xff] %vm1601_vm6, %v1556_v41  ;;  %v7394_v31 = vld [vmem:[%s7883_s19 + $0x80] sm:$0xff]   ;;  %v8564_v41 = vld [vmem:[%s7883_s19 + $0x8c] sm:$0xff]   ;;  %v1946_v18 = vshrl.u32 %v8634_v17, 16 }
 0x114   : > { %2332 = vrot.lane.b32.xlu1 %v2285_v39, %s7772_s30  ;;  %v8561_v39 = vrot.slane %v2958_v23, 1  ;;  %v3336_v35 = vrot.slane %v7394_v31, 1 }
 0x115   : > { %v1558_v44 = vpop.permute.xlu0 %1557 }
 0x116   : > { %1616 = vst.msk [vmem:[#allocation2 + $0x70] sm:$0xff] %vm1601_vm6, %v1558_v44  ;;  %v1560_v49 = vpop.permute.xlu1 %1559  ;;  %v3338_v44 = vrot.slane %v8558_v36, 1  ;;  %v3337_v50 = vsel %vm1214_vm1, %v3334_v56, %v3336_v35  ;;  %v1921_v56 = vsel %vm748_vm0, %v1916_v54, %v1920_v47  ;;  %v7413_v36 = vld [vmem:[%s7883_s19 + $0xa0] sm:$0xff]  }
 0x117   : > { %2334 = vrot.lane.b32.xlu0 %v2287_v38, %s7772_s30  ;;  %1617 = vst.msk [vmem:[#allocation2 + $0x78] sm:$0xff] %vm1601_vm6, %v1560_v49  ;;  %v1926_v49 = vshll.u32 %v8564_v41, 16 }
 0x118   : > { %2597 = vrot.lane.b32.xlu1 %v7378_v45, %s7773_s8  ;;  %v2961_v45 = vsel %vm748_vm0, %v2956_v37, %v8561_v39  ;;  %v1942_v37 = vshll.u32 %v8634_v17, 16  ;;  %v3341_v40 = vsel %vm1214_vm1, %v3338_v44, %v3340_v20 }
 0x119   : > { %v1562_v58 = vpop.permute.xlu0 %1561  ;;  %v8588_v60 = vrot.slane %v1926_v49, 1 }
 0x11a   : > { %1618 = vst.msk [vmem:[#allocation2 + $0x80] sm:$0xff] %vm1601_vm6, %v1562_v58  ;;  %v1564_v53 = vpop.permute.xlu1 %1563  ;;  %v3339_v58 = vsel %vm1214_vm1, %v3336_v35, %v3338_v44 }
 0x11b   : > { %2599 = vrot.lane.b32.xlu0 %v7379_v51, %s7773_s8  ;;  %1619 = vst.msk [vmem:[#allocation2 + $0x88] sm:$0xff] %vm1601_vm6, %v1564_v53 }
 0x11c   : > { %3062 = vrot.lane.b32.xlu1 %v2937_v59, %s7774_s10  ;;  %v1924_v59 = vor.u32 %v1922_v48, %v1920_v47 }
 0x11d   : > { %v1566_v2 = vpop.permute.xlu0 %1565 }
 0x11e   : > { %1620 = vst.msk [vmem:[#allocation2 + $0x90] sm:$0xff] %vm1601_vm6, %v1566_v2  ;;  %v1995_v7 = vpop.permute.xlu1 %1994  ;;  %v1929_v1 = vsel %vm748_vm0, %v1924_v59, %v8588_v60  ;;  %v2294_v2 = vrot.slane %v8591_v46, 1 }
 0x11f   : > { %3064 = vrot.lane.b32.xlu0 %v2945_v61, %s7774_s10  ;;  %2067 = vst.msk [vmem:[#allocation2] sm:$0xff] %vm2066_vm7, %v1995_v7  ;;  %v2292_v61 = vrot.slane %v7399_v55, 1  ;;  %v2982_v55 = vshll.u32 %v7413_v36, 16 }
 0x120   : > { %3380 = vrot.lane.b32.xlu1 %v3333_v5, %s7775_s12  ;;  %v2966_v5 = vshll.u32 %v7403_v52, 16 }
 0x121   : > { %v1997_v12 = vpop.permute.xlu0 %1996  ;;  %v2295_v4 = vsel %vm1214_vm1, %v2292_v61, %v2294_v2 }
 0x122   : > { %2068 = vst.msk [vmem:[#allocation2 + $0x8] sm:$0xff] %vm2066_vm7, %v1997_v12  ;;  %v2313_v14 = vpop.permute.xlu1 %2312  ;;  %v2968_v12 = vrot.slane %v2966_v5, 1  ;;  %v7415_v5 = vld [vmem:[%s7883_s19 + $0xa0] sm:$0xff]  }
 0x123   : > { %3382 = vrot.lane.b32.xlu0 %v3335_v8, %s7775_s12  ;;  %2385 = vst.msk [vmem:[#allocation2] sm:$0xff] %vm2384_vm8, %v2313_v14  ;;  %v2293_v8 = vsel %vm1214_vm1, %v2290_v16, %v2292_v61  ;;  %v2964_v16 = vor.u32 %v2962_v9, %v8561_v39  ;;  %v2984_v61 = vrot.slane %v2982_v55, 1 }
 0x124   : > { %2018 = vrot.lane.b32.xlu1 %v1905_v3, %s7771_s23  ;;  %v2970_v3 = vshrl.u32 %v7403_v52, 16  ;;  %v2978_v52 = vshrl.u32 %v8604_v62, 16  ;;  %v7418_v62 = vld [vmem:[%s7883_s19 + $0xa4] sm:$0xff]  }
 0x125   : > { %v2315_v21 = vpop.permute.xlu0 %2314  ;;  %v2969_v23 = vsel %vm748_vm0, %v2964_v16, %v2968_v12 }
 0x126   : > { %2386 = vst.msk [vmem:[#allocation2 + $0x8] sm:$0xff] %vm2384_vm8, %v2315_v21  ;;  %v2578_v25 = vpop.permute.xlu1 %2577  ;;  %v7402_v21 = vld [vmem:[%s7883_s19 + $0x90] sm:$0xff]   ;;  %v2972_v24 = vor.u32 %v2970_v3, %v2968_v12  ;;  %v3344_v3 = vrot.slane %v7415_v5, 1 }
 0x127   : > { %2020 = vrot.lane.b32.xlu0 %v1913_v15, %s7771_s23  ;;  %2650 = vst.msk [vmem:[#allocation2] sm:$0xff] %vm2649_vm9, %v2578_v25  ;;  %v7401_v15 = vld [vmem:[%s7883_s19 + $0x88] sm:$0xff]   ;;  %v8631_v25 = vrot.slane %v2974_v11, 1  ;;  %v1950_v11 = vshll.u32 %v7418_v62, 16 }
 0x128   : > { %2336 = vrot.lane.b32.xlu1 %v2289_v22, %s7772_s30  ;;  %v8628_v22 = vld [vmem:[%s7883_s19 + $0x98] sm:$0xff]  }
 0x129   : > { %v2580_v28 = vpop.permute.xlu0 %2579  ;;  %v3342_v30 = vrot.slane %v8628_v22, 1  ;;  %v2977_v31 = vsel %vm748_vm0, %v2972_v24, %v8631_v25  ;;  %v1952_v24 = vrot.slane %v1950_v11, 1  ;;  %v7420_v22 = vld [vmem:[%s7883_s19 + $0xa4] sm:$0xff]  }
 0x12a   : > { %2651 = vst.msk [vmem:[#allocation2 + $0x8] sm:$0xff] %vm2649_vm9, %v2580_v28  ;;  %v3043_v32 = vpop.permute.xlu1 %3042  ;;  %v1930_v28 = vshrl.u32 %v8564_v41, 16 }
 0x12b   : > { %2338 = vrot.lane.b32.xlu0 %v2291_v27, %s7772_s30  ;;  %3115 = vst.msk [vmem:[#allocation2] sm:$0xff] %vm3114_vm10, %v3043_v32  ;;  %v1934_v27 = vshll.u32 %v7407_v13, 16  ;;  %v3343_v35 = vsel %vm1214_vm1, %v3340_v20, %v3342_v30 }
 0x12c   : > { %2601 = vrot.lane.b32.xlu1 %v7388_v29, %s7773_s8  ;;  %v1932_v41 = vor.u32 %v1930_v28, %v8588_v60  ;;  %v7417_v28 = vld [vmem:[%s7883_s19 + $0xa4] sm:$0xff]  }
 0x12d   : > { %v3045_v38 = vpop.permute.xlu0 %3044  ;;  %v1936_v32 = vrot.slane %v1934_v27, 1 }
 0x12e   : > { %3116 = vst.msk [vmem:[#allocation2 + $0x8] sm:$0xff] %vm3114_vm10, %v3045_v38  ;;  %v3361_v43 = vpop.permute.xlu1 %3360  ;;  %v7409_v38 = vld [vmem:[%s7883_s19 + $0x94] sm:$0xff]  }
 0x12f   : > { %2603 = vrot.lane.b32.xlu0 %v7390_v33, %s7773_s8  ;;  %3433 = vst.msk [vmem:[#allocation2] sm:$0xff] %vm3432_vm11, %v3361_v43  ;;  %v1938_v33 = vshrl.u32 %v7407_v13, 16  ;;  %v8658_v43 = vrot.slane %v1942_v37, 1  ;;  %v1937_v47 = vsel %vm748_vm0, %v1932_v41, %v1936_v32  ;;  %v2296_v48 = vrot.slane %v7409_v38, 1  ;;  %v8707_v13 = vld [vmem:[%s7883_s19 + $0xac] sm:$0xff]  }
 0x130   : > { %3066 = vrot.lane.b32.xlu1 %v2953_v42, %s7774_s10  ;;  %v1958_v27 = vshll.u32 %v8707_v13, 16 }
 0x131   : > { %v3363_v51 = vpop.permute.xlu0 %3362  ;;  %v1940_v34 = vor.u32 %v1938_v33, %v1936_v32  ;;  %v2297_v60 = vsel %vm1214_vm1, %v2294_v2, %v2296_v48  ;;  %v2980_v2 = vor.u32 %v2978_v52, %v8631_v25  ;;  %v1954_v25 = vshrl.u32 %v7418_v62, 16  ;;  %v7424_v32 = vld [vmem:[%s7883_s19 + $0xb0] sm:$0xff]  }
 0x132   : > { %3434 = vst.msk [vmem:[#allocation2 + $0x8] sm:$0xff] %vm3432_vm11, %v3363_v51  ;;  %v1999_v57 = vpop.permute.xlu1 %1998 }
 0x133   : > { %3068 = vrot.lane.b32.xlu0 %v2961_v45, %s7774_s10  ;;  %2069 = vst.msk [vmem:[#allocation2 + $0x10] sm:$0xff] %vm2066_vm7, %v1999_v57  ;;  %v8661_v45 = vld [vmem:[%s7883_s19 + $0x9c] sm:$0xff]   ;;  %v8674_v57 = vld [vmem:[%s7883_s19 + $0xa8] sm:$0xff]   ;;  %v2985_v12 = vsel %vm748_vm0, %v2980_v2, %v2984_v61 }
 0x134   : > { %3384 = vrot.lane.b32.xlu1 %v3337_v50, %s7775_s12  ;;  %v1945_v50 = vsel %vm748_vm0, %v1940_v34, %v8658_v43  ;;  %v2298_v54 = vrot.slane %v8661_v45, 1  ;;  %v2990_v46 = vshll.u32 %v8674_v57, 16  ;;  %v2998_v34 = vshll.u32 %v7424_v32, 16 }
 0x135   : > { %v2001_v53 = vpop.permute.xlu0 %2000 }
 0x136   : > { %2070 = vst.msk [vmem:[#allocation2 + $0x18] sm:$0xff] %vm2066_vm7, %v2001_v53  ;;  %v2317_v63 = vpop.permute.xlu1 %2316  ;;  %v3457_v0 = vld [vmem:[#allocation2] sm:$0xff]  ;;  %v8698_v9 = vrot.slane %v2990_v46, 1 }
 0x137   : > { %3386 = vrot.lane.b32.xlu0 %v3339_v58, %s7775_s12  ;;  %2387 = vst.msk [vmem:[#allocation2 + $0x10] sm:$0xff] %vm2384_vm8, %v2317_v63  ;;  %7019 = vmatprep.mubr.msk.bf16.mxu0 %vm3508_vm12, %v3457_v0  ;;  %v2986_v63 = vshrl.u32 %v7413_v36, 16 }
 0x138   : > { %2022 = vrot.lane.b32.xlu1 %v1921_v56, %s7771_s23  ;;  %v2299_v56 = vsel %vm1214_vm1, %v2296_v48, %v2298_v54 }
 0x139   : > { %v2319_v6 = vpop.permute.xlu0 %2318  ;;  %v3458_v7 = vld [vmem:[#allocation2 + $0x8] sm:$0xff] }
 0x13a   : > { %2388 = vst.msk [vmem:[#allocation2 + $0x18] sm:$0xff] %vm2384_vm8, %v2319_v6  ;;  %7020 = vmatmul.mubr.msk.bf16.vlgmr.msra.gmra.mrb[0].mxu0 %vm3508_vm12, %v3458_v7  ;;  %v2582_v10 = vpop.permute.xlu1 %2581  ;;  %v7412_v7 = vld [vmem:[%s7883_s19 + $0xa0] sm:$0xff]  }
 0x13b   : > { %2024 = vrot.lane.b32.xlu0 %v1929_v1, %s7771_s23  ;;  %2652 = vst.msk [vmem:[#allocation2 + $0x10] sm:$0xff] %vm2649_vm9, %v2582_v10  ;;  %v7411_v1 = vld [vmem:[%s7883_s19 + $0x98] sm:$0xff]   ;;  %v8701_v10 = vld [vmem:[%s7883_s19 + $0xa8] sm:$0xff]  }
 0x13c   : > { %2340 = vrot.lane.b32.xlu1 %v2293_v8, %s7772_s30  ;;  %v2988_v8 = vor.u32 %v2986_v63, %v2984_v61  ;;  %v3346_v16 = vrot.slane %v8701_v10, 1  ;;  %v7430_v61 = vld [vmem:[%s7883_s19 + $0xb4] sm:$0xff]  }
 0x13d   : > { %v2584_v14 = vpop.permute.xlu0 %2583  ;;  %v1966_v62 = vshll.u32 %v7430_v61, 16  ;;  %v1970_v11 = vshrl.u32 %v7430_v61, 16  ;;  %v7452_v61 = vld [vmem:[%s11182_s4] sm:$0xff]  }
 0x13e   : > { %2653 = vst.msk [vmem:[#allocation2 + $0x18] sm:$0xff] %vm2649_vm9, %v2584_v14  ;;  %v3047_v19 = vpop.permute.xlu1 %3046  ;;  %v3347_v17 = vsel %vm1214_vm1, %v3344_v3, %v3346_v16  ;;  %7067 = vmatprep.subr.bf16.mxu0 %v7452_v61  ;;  %7131 = vmatprep.subr.bf16.mxu1 %v7452_v61 }
 0x13f   : > { %2342 = vrot.lane.b32.xlu0 %v2295_v4, %s7772_s30  ;;  %3117 = vst.msk [vmem:[#allocation2 + $0x10] sm:$0xff] %vm3114_vm10, %v3047_v19  ;;  %7068 = vmatpush3.bf16.msra.mxu0 %v7452_v61 }
 0x140   : > { %2605 = vrot.lane.b32.xlu1 %v7401_v15, %s7773_s8  ;;  %v2993_v15 = vsel %vm748_vm0, %v2988_v8, %v8698_v9  ;;  %7139 = vmatpush3.bf16.msra.mxu1 %v7452_v61 }
 0x141   : > { %v3049_v26 = vpop.permute.xlu0 %3048 }
 0x142   : > { %3118 = vst.msk [vmem:[#allocation2 + $0x18] sm:$0xff] %vm3114_vm10, %v3049_v26  ;;  %v3365_v29 = vpop.permute.xlu1 %3364 }
 0x143   : > { %2607 = vrot.lane.b32.xlu0 %v7402_v21, %s7773_s8  ;;  %3435 = vst.msk [vmem:[#allocation2 + $0x10] sm:$0xff] %vm3432_vm11, %v3365_v29  ;;  %v3345_v21 = vsel %vm1214_vm1, %v3342_v30, %v3344_v3  ;;  %v1956_v29 = vor.u32 %v1954_v25, %v1952_v24  ;;  %v8731_v30 = vrot.slane %v1958_v27, 1  ;;  %v1968_v3 = vrot.slane %v1966_v62, 1 }
 0x144   : > { %3070 = vrot.lane.b32.xlu1 %v2969_v23, %s7774_s10  ;;  %v1948_v23 = vor.u32 %v1946_v18, %v8658_v43  ;;  %v8748_v43 = vld [vmem:[%s7883_s19 + $0xb8] sm:$0xff]  }
 0x145   : > { %v3367_v39 = vpop.permute.xlu0 %3366  ;;  %v3006_v45 = vshll.u32 %v8748_v43, 16  ;;  %v7432_v18 = vld [vmem:[%s7883_s19 + $0xb4] sm:$0xff]   ;;  %v1972_v25 = vor.u32 %v1970_v11, %v1968_v3 }
 0x146   : > { %3436 = vst.msk [vmem:[#allocation2 + $0x18] sm:$0xff] %vm3432_vm11, %v3367_v39  ;;  %v2003_v42 = vpop.permute.xlu1 %2002  ;;  %v1953_v39 = vsel %vm748_vm0, %v1948_v23, %v1952_v24  ;;  %v7429_v24 = vld [vmem:[%s7883_s19 + $0xb4] sm:$0xff]  }
 0x147   : > { %3072 = vrot.lane.b32.xlu0 %v2977_v31, %s7774_s10  ;;  %2071 = vst.msk [vmem:[#allocation2 + $0x20] sm:$0xff] %vm2066_vm7, %v2003_v42  ;;  %v8734_v31 = vld [vmem:[%s7883_s19 + $0xac] sm:$0xff]   ;;  %v1961_v42 = vsel %vm748_vm0, %v1956_v29, %v8731_v30 }
 0x148   : > { %3388 = vrot.lane.b32.xlu1 %v3341_v40, %s7775_s12  ;;  %v2300_v40 = vrot.slane %v7420_v22, 1 }
 0x149   : > { %v2005_v44 = vpop.permute.xlu0 %2004 }
 0x14a   : > { %2072 = vst.msk [vmem:[#allocation2 + $0x28] sm:$0xff] %vm2066_vm7, %v2005_v44  ;;  %v2321_v49 = vpop.permute.xlu1 %2320  ;;  %v3459_v51 = vld [vmem:[#allocation2 + $0x10] sm:$0xff]  ;;  %v2301_v44 = vsel %vm1214_vm1, %v2298_v54, %v2300_v40  ;;  %v7422_v54 = vld [vmem:[%s7883_s19 + $0xa8] sm:$0xff]  }
 0x14b   : > { %3390 = vrot.lane.b32.xlu0 %v3343_v35, %s7775_s12  ;;  %2389 = vst.msk [vmem:[#allocation2 + $0x20] sm:$0xff] %vm2384_vm8, %v2321_v49  ;;  %7023 = vmatprep.mubr.msk.bf16.mxu0 %vm3508_vm12, %v3459_v51  ;;  %v2302_v35 = vrot.slane %v8734_v31, 1  ;;  %v3000_v51 = vrot.slane %v2998_v34, 1 }
 0x14c   : > { %2026 = vrot.lane.b32.xlu1 %v1937_v47, %s7771_s23  ;;  %v2994_v47 = vshrl.u32 %v8674_v57, 16 }
 0x14d   : > { %v2323_v58 = vpop.permute.xlu0 %2322  ;;  %v3460_v59 = vld [vmem:[#allocation2 + $0x18] sm:$0xff]  ;;  %v2303_v49 = vsel %vm1214_vm1, %v2300_v40, %v2302_v35  ;;  %v3010_v40 = vshrl.u32 %v8748_v43, 16 }
 0x14e   : > { %2390 = vst.msk [vmem:[#allocation2 + $0x28] sm:$0xff] %vm2384_vm8, %v2323_v58  ;;  %7024 = vmatmul.mubr.msk.bf16.gmra.mrb[4].mxu0 %vm3508_vm12, %v3460_v59  ;;  %v2586_v53 = vpop.permute.xlu1 %2585  ;;  %v2996_v57 = vor.u32 %v2994_v47, %v8698_v9  ;;  %v7426_v58 = vld [vmem:[%s7883_s19 + $0xb0] sm:$0xff]   ;;  %v1962_v9 = vshrl.u32 %v8707_v13, 16 }
 0x14f   : > { %2028 = vrot.lane.b32.xlu0 %v1945_v50, %s7771_s23  ;;  %2654 = vst.msk [vmem:[#allocation2 + $0x20] sm:$0xff] %vm2649_vm9, %v2586_v53  ;;  %v3002_v50 = vshrl.u32 %v7424_v32, 16  ;;  %v8770_v53 = vrot.slane %v3006_v45, 1  ;;  %v7442_v45 = vld [vmem:[%s7883_s19 + $0xc4] sm:$0xff]  }
 0x150   : > { %2344 = vrot.lane.b32.xlu1 %v2297_v60, %s7772_s30  ;;  %v7423_v60 = vld [vmem:[%s7883_s19 + $0xb0] sm:$0xff]   ;;  %v3001_v46 = vsel %vm748_vm0, %v2996_v57, %v3000_v51 }
 0x151   : > { %v2588_v0 = vpop.permute.xlu0 %2587  ;;  %v3004_v52 = vor.u32 %v3002_v50, %v3000_v51  ;;  %v3012_v43 = vor.u32 %v3010_v40, %v8770_v53  ;;  %v8849_v50 = vld [vmem:[%s7883_s19 + $0xc8] sm:$0xff]  }
 0x152   : > { %2655 = vst.msk [vmem:[#allocation2 + $0x28] sm:$0xff] %vm2649_vm9, %v2588_v0  ;;  %v3051_v6 = vpop.permute.xlu1 %3050  ;;  %v3348_v0 = vrot.slane %v7426_v58, 1 }
 0x153   : > { %2346 = vrot.lane.b32.xlu0 %v2299_v56, %s7772_s30  ;;  %3119 = vst.msk [vmem:[#allocation2 + $0x20] sm:$0xff] %vm3114_vm10, %v3051_v6  ;;  %v8773_v56 = vld [vmem:[%s7883_s19 + $0xb8] sm:$0xff]   ;;  %v3009_v2 = vsel %vm748_vm0, %v3004_v52, %v8770_v53  ;;  %v1982_v52 = vshll.u32 %v7442_v45, 16  ;;  %v7443_v53 = vld [vmem:[%s7883_s19 + $0xcc] ss:$0 sps:$4 sm:$0x11]  }
 0x154   : > { %2609 = vrot.lane.b32.xlu1 %v7411_v1, %s7773_s8  ;;  %v3350_v5 = vrot.slane %v8773_v56, 1  ;;  %v8785_v6 = vld [vmem:[%s7883_s19 + $0xbc] sm:$0xff]   ;;  %v3349_v8 = vsel %vm1214_vm1, %v3346_v16, %v3348_v0  ;;  %v1964_v16 = vor.u32 %v1962_v9, %v8731_v30 }
 0x155   : > { %v3053_v4 = vpop.permute.xlu0 %3052 }
 0x156   : > { %3120 = vst.msk [vmem:[#allocation2 + $0x28] sm:$0xff] %vm3114_vm10, %v3053_v4  ;;  %v3369_v14 = vpop.permute.xlu1 %3368  ;;  %v1969_v22 = vsel %vm748_vm0, %v1964_v16, %v1968_v3  ;;  %v7444_v3 = vld [vmem:[%s7883_s19 + $0xc4] sm:$0xff]   ;;  %v7448_v16 = vld [vmem:[%s7883_s19 + $0xd0] sm:$0xff]  }
 0x157   : > { %2611 = vrot.lane.b32.xlu0 %v7412_v7, %s7773_s8  ;;  %3437 = vst.msk [vmem:[#allocation2 + $0x20] sm:$0xff] %vm3432_vm11, %v3369_v14  ;;  %v1974_v14 = vshll.u32 %v8785_v6, 16 }
 0x158   : > { %3074 = vrot.lane.b32.xlu1 %v2985_v12, %s7774_s10  ;;  %v3351_v12 = vsel %vm1214_vm1, %v3348_v0, %v3350_v5 }
 0x159   : > { %v3371_v19 = vpop.permute.xlu0 %3370  ;;  %v8809_v27 = vrot.slane %v1974_v14, 1  ;;  %v7441_v14 = vld [vmem:[%s7883_s19 + $0xc4] sm:$0xff]  }
 0x15a   : > { %3438 = vst.msk [vmem:[#allocation2 + $0x28] sm:$0xff] %vm3432_vm11, %v3371_v19  ;;  %v2007_v26 = vpop.permute.xlu1 %2006 }
 0x15b   : > { %3076 = vrot.lane.b32.xlu0 %v2993_v15, %s7774_s10  ;;  %2073 = vst.msk [vmem:[#allocation2 + $0x30] sm:$0xff] %vm2066_vm7, %v2007_v26  ;;  %v7428_v15 = vld [vmem:[%s7883_s19 + $0xac] sm:$0xff]   ;;  %v8812_v26 = vld [vmem:[%s7883_s19 + $0xbc] sm:$0xff]   ;;  %v1977_v29 = vsel %vm748_vm0, %v1972_v25, %v8809_v27 }
 0x15c   : > { %3392 = vrot.lane.b32.xlu1 %v3345_v21, %s7775_s12  ;;  %v2306_v30 = vrot.slane %v8812_v26, 1 }
 0x15d   : > { %v2009_v20 = vpop.permute.xlu0 %2008 }
 0x15e   : > { %2074 = vst.msk [vmem:[#allocation2 + $0x38] sm:$0xff] %vm2066_vm7, %v2009_v20  ;;  %v2325_v33 = vpop.permute.xlu1 %2324  ;;  %v3461_v37 = vld [vmem:[#allocation2 + $0x20] sm:$0xff]  ;;  %v2304_v20 = vrot.slane %v7432_v18, 1  ;;  %v7454_v18 = vld [vmem:[%s11182_s4 + $0x10] sm:$0xff]  }
 0x15f   : > { %3394 = vrot.lane.b32.xlu0 %v3347_v17, %s7775_s12  ;;  %2391 = vst.msk [vmem:[#allocation2 + $0x30] sm:$0xff] %vm2384_vm8, %v2325_v33  ;;  %7027 = vmatprep.mubr.msk.bf16.mxu0 %vm3508_vm12, %v3461_v37  ;;  %v7436_v17 = vld [vmem:[%s7883_s19 + $0xc0] sm:$0xff]   ;;  %v8824_v33 = vld [vmem:[%s7883_s19 + $0xc8] sm:$0xff]  }
 0x160   : > { %1567 = vrot.lane.b32.xlu1 %v7417_v28, %s7770_s22  ;;  %v3014_v32 = vshll.u32 %v7436_v17, 16  ;;  %v3018_v34 = vshrl.u32 %v7436_v17, 16  ;;  %v3022_v31 = vshll.u32 %v8824_v33, 16 }
 0x161   : > { %v2327_v41 = vpop.permute.xlu0 %2326  ;;  %v3462_v38 = vld [vmem:[#allocation2 + $0x28] sm:$0xff] }
 0x162   : > { %2392 = vst.msk [vmem:[#allocation2 + $0x38] sm:$0xff] %vm2384_vm8, %v2327_v41  ;;  %7028 = vmatmul.mubr.msk.bf16.gmra.mrb[8].mxu0 %vm3508_vm12, %v3462_v38  ;;  %v2590_v36 = vpop.permute.xlu1 %2589  ;;  %v2307_v38 = vsel %vm1214_vm1, %v2304_v20, %v2306_v30  ;;  %v8846_v51 = vrot.slane %v3022_v31, 1  ;;  %v7457_v31 = vld [vmem:[%s11182_s4 + $0x28] sm:$0xff]  }
 0x163   : > { %2030 = vrot.lane.b32.xlu0 %v1953_v39, %s7771_s23  ;;  %2656 = vst.msk [vmem:[#allocation2 + $0x30] sm:$0xff] %vm2649_vm9, %v2590_v36  ;;  %v2305_v39 = vsel %vm1214_vm1, %v2302_v35, %v2304_v20  ;;  %v7434_v35 = vld [vmem:[%s7883_s19 + $0xb8] sm:$0xff]  }
 0x164   : > { %2032 = vrot.lane.b32.xlu1 %v1961_v42, %s7771_s23  ;;  %v3016_v42 = vrot.slane %v3014_v32, 1  ;;  %v7455_v20 = vld [vmem:[%s11182_s4 + $0x18] sm:$0xff]   ;;  %v3026_v32 = vshrl.u32 %v8824_v33, 16 }
 0x165   : > { %v2592_v48 = vpop.permute.xlu0 %2591 }
 0x166   : > { %2657 = vst.msk [vmem:[#allocation2 + $0x38] sm:$0xff] %vm2649_vm9, %v2592_v48  ;;  %v3055_v55 = vpop.permute.xlu1 %3054  ;;  %v7435_v48 = vld [vmem:[%s7883_s19 + $0xc0] sm:$0xff]  }
 0x167   : > { %2348 = vrot.lane.b32.xlu0 %v2301_v44, %s7772_s30  ;;  %3121 = vst.msk [vmem:[#allocation2 + $0x30] sm:$0xff] %vm3114_vm10, %v3055_v55  ;;  %v7438_v44 = vld [vmem:[%s7883_s19 + $0xc0] sm:$0xff]  }
 0x168   : > { %2350 = vrot.lane.b32.xlu1 %v2303_v49, %s7772_s30  ;;  %v3020_v49 = vor.u32 %v3018_v34, %v3016_v42  ;;  %v3352_v57 = vrot.slane %v7438_v44, 1  ;;  %v7450_v34 = vld [vmem:[%s7883_s19 + $0xd0] sm:$0xff]  }
 0x169   : > { %v3057_v59 = vpop.permute.xlu0 %3056 }
 0x16a   : > { %3122 = vst.msk [vmem:[#allocation2 + $0x38] sm:$0xff] %vm3114_vm10, %v3057_v59  ;;  %v3373_v63 = vpop.permute.xlu1 %3372  ;;  %v3025_v59 = vsel %vm748_vm0, %v3020_v49, %v8846_v51  ;;  %v3353_v0 = vsel %vm1214_vm1, %v3350_v5, %v3352_v57  ;;  %v1986_v5 = vshrl.u32 %v7442_v45, 16  ;;  %v3356_v45 = vrot.slane %v7450_v34, 1 }
 0x16b   : > { %2613 = vrot.lane.b32.xlu0 %v7422_v54, %s7773_s8  ;;  %3439 = vst.msk [vmem:[#allocation2 + $0x30] sm:$0xff] %vm3432_vm11, %v3373_v63  ;;  %v3017_v54 = vsel %vm748_vm0, %v3012_v43, %v3016_v42  ;;  %v3028_v42 = vor.u32 %v3026_v32, %v8846_v51 }
 0x16c   : > { %2615 = vrot.lane.b32.xlu1 %v7423_v60, %s7773_s8  ;;  %v3354_v60 = vrot.slane %v8849_v50, 1 }
 0x16d   : > { %v3375_v1 = vpop.permute.xlu0 %3374 }
 0x16e   : > { %3440 = vst.msk [vmem:[#allocation2 + $0x38] sm:$0xff] %vm3432_vm11, %v3375_v1  ;;  %v2011_v7 = vpop.permute.xlu1 %2010  ;;  %v1978_v1 = vshrl.u32 %v8785_v6, 16  ;;  %v3355_v56 = vsel %vm1214_vm1, %v3352_v57, %v3354_v60  ;;  %v1990_v6 = vshll.u32 %v7443_v53, 16  ;;  %v3357_v53 = vsel %vm1214_vm1, %v3354_v60, %v3356_v45 }
 0x16f   : > { %3078 = vrot.lane.b32.xlu0 %v3001_v46, %s7774_s10  ;;  %2075 = vst.msk [vmem:[#allocation2 + $0x40] sm:$0xff] %vm2066_vm7, %v2011_v7  ;;  %v1984_v7 = vrot.slane %v1982_v52, 1 }
 0x170   : > { %3080 = vrot.lane.b32.xlu1 %v3009_v2, %s7774_s10 }
 0x171   : > { %v2013_v4 = vpop.permute.xlu0 %2012 }
 0x172   : > { %2076 = vst.msk [vmem:[#allocation2 + $0x48] sm:$0xff] %vm2066_vm7, %v2013_v4  ;;  %v2329_v10 = vpop.permute.xlu1 %2328  ;;  %v3463_v13 = vld [vmem:[#allocation2 + $0x30] sm:$0xff]  ;;  %v7440_v4 = vld [vmem:[%s7883_s19 + $0xbc] sm:$0xff]  }
 0x173   : > { %3396 = vrot.lane.b32.xlu0 %v3349_v8, %s7775_s12  ;;  %2393 = vst.msk [vmem:[#allocation2 + $0x40] sm:$0xff] %vm2384_vm8, %v2329_v10  ;;  %7031 = vmatprep.mubr.msk.bf16.mxu0 %vm3508_vm12, %v3463_v13  ;;  %v7453_v8 = vld [vmem:[%s11182_s4 + $0x8] sm:$0xff]   ;;  %v1988_v10 = vor.u32 %v1986_v5, %v1984_v7  ;;  %v1992_v13 = vrot.slane %v1990_v6, 1 }
 0x174   : > { %3398 = vrot.lane.b32.xlu1 %v3351_v12, %s7775_s12  ;;  %v1980_v12 = vor.u32 %v1978_v1, %v8809_v27  ;;  %7069 = vmatprep.subr.bf16.mxu0 %v7453_v8 }
 0x175   : > { %v2331_v19 = vpop.permute.xlu0 %2330  ;;  %v3464_v21 = vld [vmem:[#allocation2 + $0x38] sm:$0xff]  ;;  %7132 = vmatprep.subr.bf16.mxu1 %v7453_v8  ;;  %7070 = vmatpush3.bf16.msra.mxu0 %v7453_v8  ;;  %v1993_v27 = vsel %vm748_vm0, %v1988_v10, %v1992_v13 }
 0x176   : > { %2394 = vst.msk [vmem:[#allocation2 + $0x48] sm:$0xff] %vm2384_vm8, %v2331_v19  ;;  %7032 = vmatmul.mubr.msk.bf16.gmra.mrb[12].mxu0 %vm3508_vm12, %v3464_v21  ;;  %v2594_v23 = vpop.permute.xlu1 %2593  ;;  %7140 = vmatpush3.bf16.msra.mxu1 %v7453_v8  ;;  %v1985_v21 = vsel %vm748_vm0, %v1980_v12, %v1984_v7 }
 0x177   : > { %1569 = vrot.lane.b32.xlu0 %v7428_v15, %s7770_s22  ;;  %2658 = vst.msk [vmem:[#allocation2 + $0x40] sm:$0xff] %vm2649_vm9, %v2594_v23  ;;  %v7445_v15 = vld [vmem:[%s7883_s19 + $0xcc] ss:$0 sps:$4 sm:$0x11]   ;;  %7071 = vmatprep.subr.bf16.mxu0 %v7454_v18  ;;  %v3030_v23 = vshll.u32 %v7448_v16, 16 }
 0x178   : > { %1571 = vrot.lane.b32.xlu1 %v7429_v24, %s7770_s22  ;;  %v2308_v24 = vrot.slane %v7444_v3, 1  ;;  %7133 = vmatprep.subr.bf16.mxu1 %v7454_v18  ;;  %v2310_v17 = vrot.slane %v7445_v15, 1 }
 0x179   : > { %v2596_v28 = vpop.permute.xlu0 %2595  ;;  %7072 = vmatpush3.bf16.msra.mxu0 %v7454_v18  ;;  %v3032_v40 = vrot.slane %v3030_v23, 1 }
 0x17a   : > { %2659 = vst.msk [vmem:[#allocation2 + $0x48] sm:$0xff] %vm2649_vm9, %v2596_v28  ;;  %v3059_v37 = vpop.permute.xlu1 %3058  ;;  %7141 = vmatpush3.bf16.msra.mxu1 %v7454_v18  ;;  %7073 = vmatprep.subr.bf16.mxu0 %v7455_v20 }
 0x17b   : > { %2034 = vrot.lane.b32.xlu0 %v1969_v22, %s7771_s23  ;;  %3123 = vst.msk [vmem:[#allocation2 + $0x40] sm:$0xff] %vm3114_vm10, %v3059_v37  ;;  %v7449_v22 = vld [vmem:[%s7883_s19 + $0xd8] ss:$0 sps:$4 sm:$0x11]   ;;  %7134 = vmatprep.subr.bf16.mxu1 %v7455_v20  ;;  %v3033_v51 = vsel %vm748_vm0, %v3028_v42, %v3032_v40 }
 0x17c   : > { %2036 = vrot.lane.b32.xlu1 %v1977_v29, %s7771_s23  ;;  %v2309_v29 = vsel %vm1214_vm1, %v2306_v30, %v2308_v24  ;;  %v3038_v26 = vshll.u32 %v7449_v22, 16  ;;  %v7456_v30 = vld [vmem:[%s11182_s4 + $0x20] sm:$0xff]  }
 0x17d   : > { %v3061_v41 = vpop.permute.xlu0 %3060  ;;  %7074 = vmatpush3.bf16.msra.mxu0 %v7455_v20 }
 0x17e   : > { %3124 = vst.msk [vmem:[#allocation2 + $0x48] sm:$0xff] %vm3114_vm10, %v3061_v41  ;;  %v3377_v36 = vpop.permute.xlu1 %3376  ;;  %v3034_v41 = vshrl.u32 %v7448_v16, 16  ;;  %7142 = vmatpush3.bf16.msra.mxu1 %v7455_v20  ;;  %7075 = vmatprep.subr.bf16.mxu0 %v7456_v30  ;;  %v3040_v44 = vrot.slane %v3038_v26, 1 }
 0x17f   : > { %2352 = vrot.lane.b32.xlu0 %v2305_v39, %s7772_s30  ;;  %3441 = vst.msk [vmem:[#allocation2 + $0x40] sm:$0xff] %vm3432_vm11, %v3377_v36  ;;  %v2311_v39 = vsel %vm1214_vm1, %v2308_v24, %v2310_v17  ;;  %7135 = vmatprep.subr.bf16.mxu1 %v7456_v30 }
 0x180   : > { %2354 = vrot.lane.b32.xlu1 %v2307_v38, %s7772_s30  ;;  %v7446_v38 = vld [vmem:[%s7883_s19 + $0xc8] sm:$0xff]   ;;  %v3036_v43 = vor.u32 %v3034_v41, %v3032_v40 }
 0x181   : > { %v3379_v47 = vpop.permute.xlu0 %3378  ;;  %7076 = vmatpush3.bf16.msra.mxu0 %v7456_v30 }
 0x182   : > { %3442 = vst.msk [vmem:[#allocation2 + $0x48] sm:$0xff] %vm3432_vm11, %v3379_v47  ;;  %v2015_v55 = vpop.permute.xlu1 %2014  ;;  %v7451_v47 = vld [vmem:[%s7883_s19 + $0xd8] ss:$0 sps:$4 sm:$0x11]   ;;  %7077 = vmatprep.subr.bf16.mxu0 %v7457_v31  ;;  %7143 = vmatpush3.bf16.msra.mxu1 %v7456_v30  ;;  %v3041_v57 = vsel %vm748_vm0, %v3036_v43, %v3040_v44 }
 0x183   : > { %2617 = vrot.lane.b32.xlu0 %v7434_v35, %s7773_s8  ;;  %2077 = vst.msk [vmem:[#allocation2 + $0x50] sm:$0xff] %vm2066_vm7, %v2015_v55  ;;  %v7447_v35 = vld [vmem:[%s7883_s19 + $0xd0] sm:$0xff]   ;;  %7136 = vmatprep.subr.bf16.mxu1 %v7457_v31 }
 0x184   : > { %2619 = vrot.lane.b32.xlu1 %v7435_v48, %s7773_s8 }
 0x185   : > { %v2017_v58 = vpop.permute.xlu0 %2016  ;;  %7078 = vmatpush3.bf16.msra.mxu0 %v7457_v31 }
 0x186   : > { %2078 = vst.msk [vmem:[#allocation2 + $0x58] sm:$0xff] %vm2066_vm7, %v2017_v58  ;;  %v2333_v63 = vpop.permute.xlu1 %2332  ;;  %v3465_v46 = vld [vmem:[#allocation2 + $0x40] sm:$0xff]  ;;  %v3358_v58 = vrot.slane %v7451_v47, 1  ;;  %7144 = vmatpush3.bf16.msra.mxu1 %v7457_v31 }
 0x187   : > { %3082 = vrot.lane.b32.xlu0 %v3017_v54, %s7774_s10  ;;  %2395 = vst.msk [vmem:[#allocation2 + $0x50] sm:$0xff] %vm2384_vm8, %v2333_v63  ;;  %7035 = vmatprep.mubr.msk.bf16.mxu0 %vm3508_vm12, %v3465_v46  ;;  %v7459_v46 = vld [vmem:[%s11182_s4 + $0x38] sm:$0xff]  }
 0x188   : > { %3084 = vrot.lane.b32.xlu1 %v3025_v59, %s7774_s10  ;;  %v7458_v59 = vld [vmem:[%s11182_s4 + $0x30] sm:$0xff]   ;;  %v3359_v63 = vsel %vm1214_vm1, %v3356_v45, %v3358_v58 }
 0x189   : > { %v2335_v2 = vpop.permute.xlu0 %2334  ;;  %v3466_v62 = vld [vmem:[#allocation2 + $0x48] sm:$0xff]  ;;  %7079 = vmatprep.subr.bf16.mxu0 %v7458_v59  ;;  %7137 = vmatprep.subr.bf16.mxu1 %v7458_v59 }
 0x18a   : > { %2396 = vst.msk [vmem:[#allocation2 + $0x58] sm:$0xff] %vm2384_vm8, %v2335_v2  ;;  %7036 = vmatmul.mubr.msk.bf16.gmra.mrb[16].mxu0 %vm3508_vm12, %v3466_v62  ;;  %v2598_v9 = vpop.permute.xlu1 %2597  ;;  %7145 = vmatpush3.bf16.msra.mxu1 %v7458_v59 }
 0x18b   : > { %3400 = vrot.lane.b32.xlu0 %v3353_v0, %s7775_s12  ;;  %2660 = vst.msk [vmem:[#allocation2 + $0x50] sm:$0xff] %vm2649_vm9, %v2598_v9  ;;  %7080 = vmatpush3.bf16.msra.mxu0 %v7458_v59 }
 0x18c   : > { %3402 = vrot.lane.b32.xlu1 %v3355_v56, %s7775_s12  ;;  %7081 = vmatprep.subr.bf16.mxu0 %v7459_v46 }
 0x18d   : > { %v2600_v11 = vpop.permute.xlu0 %2599  ;;  %7138 = vmatprep.subr.bf16.mxu1 %v7459_v46 }
 0x18e   : > { %2661 = vst.msk [vmem:[#allocation2 + $0x58] sm:$0xff] %vm2649_vm9, %v2600_v11  ;;  %v3063_v19 = vpop.permute.xlu1 %3062  ;;  %7146 = vmatpush3.bf16.msra.mxu1 %v7459_v46 }
 0x18f   : > { %1573 = vrot.lane.b32.xlu0 %v7440_v4, %s7770_s22  ;;  %3125 = vst.msk [vmem:[#allocation2 + $0x50] sm:$0xff] %vm3114_vm10, %v3063_v19  ;;  %7082 = vmatpush3.bf16.msra.mxu0 %v7459_v46 }
 0x190   : > { %1575 = vrot.lane.b32.xlu1 %v7441_v14, %s7770_s22  ;;  %s11099_s22 = scalar_lea.hbm %s11184_s6, %s11266_s18 }
 0x191   : > { %v3065_v25 = vpop.permute.xlu0 %3064 }
 0x192   : > { %3126 = vst.msk [vmem:[#allocation2 + $0x58] sm:$0xff] %vm3114_vm10, %v3065_v25  ;;  %v3381_v28 = vpop.permute.xlu1 %3380 }
 0x193   : > { %2038 = vrot.lane.b32.xlu0 %v1985_v21, %s7771_s23  ;;  %3443 = vst.msk [vmem:[#allocation2 + $0x50] sm:$0xff] %vm3432_vm11, %v3381_v28 }
 0x194   : > { %2040 = vrot.lane.b32.xlu1 %v1993_v27, %s7771_s23 }
 0x195   : > { %v3383_v37 = vpop.permute.xlu0 %3382 }
 0x196   : > { %3444 = vst.msk [vmem:[#allocation2 + $0x58] sm:$0xff] %vm3432_vm11, %v3383_v37  ;;  %v2019_v33 = vpop.permute.xlu1 %2018 }
 0x197   : > { %2356 = vrot.lane.b32.xlu0 %v2309_v29, %s7772_s30  ;;  %2079 = vst.msk [vmem:[#allocation2 + $0x60] sm:$0xff] %vm2066_vm7, %v2019_v33 }
 0x198   : > { %2358 = vrot.lane.b32.xlu1 %v2311_v39, %s7772_s30 }
 0x199   : > { %v2021_v36 = vpop.permute.xlu0 %2020 }
 0x19a   : > { %2080 = vst.msk [vmem:[#allocation2 + $0x68] sm:$0xff] %vm2066_vm7, %v2021_v36  ;;  %v2337_v48 = vpop.permute.xlu1 %2336  ;;  %v3467_v49 = vld [vmem:[#allocation2 + $0x50] sm:$0xff] }
 0x19b   : > { %2621 = vrot.lane.b32.xlu0 %v7446_v38, %s7773_s8  ;;  %2397 = vst.msk [vmem:[#allocation2 + $0x60] sm:$0xff] %vm2384_vm8, %v2337_v48  ;;  %7039 = vmatprep.mubr.msk.bf16.mxu0 %vm3508_vm12, %v3467_v49  ;;  %v11186_v48 = vlaneseq }
 0x19c   : > { %2623 = vrot.lane.b32.xlu1 %v7447_v35, %s7773_s8  ;;  %s11085_s8 = sand.u32 1, %s7750_s25  }
 0x19d   : > { %v2339_v55 = vpop.permute.xlu0 %2338  ;;  %v3468_v54 = vld [vmem:[#allocation2 + $0x58] sm:$0xff]  ;;  %s6678_s17 = sshll.u32 %s11085_s8, 3  ;;  %s6516_s21 = scalar_lea.sflag [#allocation7], %s11085_s8 }
 0x19e   : > { %2398 = vst.msk [vmem:[#allocation2 + $0x68] sm:$0xff] %vm2384_vm8, %v2339_v55  ;;  %7040 = vmatmul.mubr.msk.bf16.gmra.mrb[20].mxu0 %vm3508_vm12, %v3468_v54  ;;  %v2602_v52 = vpop.permute.xlu1 %2601 }
 0x19f   : > { %3086 = vrot.lane.b32.xlu0 %v3033_v51, %s7774_s10  ;;  %2662 = vst.msk [vmem:[#allocation2 + $0x60] sm:$0xff] %vm2649_vm9, %v2602_v52  ;;  %v9002_v51 = vshrl.u32 %v11186_v48, 7 }
 0x1a0   : > { %3088 = vrot.lane.b32.xlu1 %v3041_v57, %s7774_s10  ;;  %s6953_s10 = sshll.u32 %s7877_s15, 4 }
 0x1a1   : > { %v2604_v61 = vpop.permute.xlu0 %2603  ;;  %11269 = vst [vmem:[#allocation12_spill] sm:$0xff] %v9002_v51  ;;  %s9009_s20 = scalar_lea.vmem %s11179_s1, %s6953_s10  ;;  %v9012_v55 = vsub.s32 0, %v9002_v51  ;;  %v4631_v59 = vsub.s32 1, %v9002_v51  ;;  %s323_s10 = scalar_lea.vmem [#allocation6], %s6678_s17 }
 0x1a2   : > { %2663 = vst.msk [vmem:[#allocation2 + $0x68] sm:$0xff] %vm2649_vm9, %v2604_v61  ;;  %v3067_v0 = vpop.permute.xlu1 %3066  ;;  %v9016_v54 = vld [vmem:[%s9009_s20] sm:$0xff] }
 0x1a3   : > { %3404 = vrot.lane.b32.xlu0 %v3357_v53, %s7775_s12  ;;  %3127 = vst.msk [vmem:[#allocation2 + $0x60] sm:$0xff] %vm3114_vm10, %v3067_v0  ;;  %11270 = vst [vmem:[#allocation13_spill] sm:$0xff] %v9012_v55  ;;  %v4617_v58 = vrot.slane %v9016_v54, %v9012_v55  ;;  %v4632_v61 = vrot.slane %v9016_v54, %v4631_v59 }
 0x1a4   : > { %3406 = vrot.lane.b32.xlu1 %v3359_v63, %s7775_s12  ;;  %s6534_s12 = sshll.u32 %s323_s10, 4  ;;  %s11092_s12 = int_to_ptr.vmem [resolvable:$true] %s6534_s12 }
 0x1a5   : > { %v3069_v50 = vpop.permute.xlu0 %3068  ;;  %s7656_s23 = scalar_lea.vmem %s11092_s12, 128 }
 0x1a6   : > { %3128 = vst.msk [vmem:[#allocation2 + $0x68] sm:$0xff] %vm3114_vm10, %v3069_v50  ;;  %v3385_v60 = vpop.permute.xlu1 %3384  ;;  %p7657_p12 = scmp.ne.s32.totalorder %s11092_s12, %s7656_s23 }
 0x1a7   : > { %3445 = vst.msk [vmem:[#allocation2 + $0x60] sm:$0xff] %vm3432_vm11, %v3385_v60  ;;  %4623 = vbcast.lane.b32.xlu0 %v4617_v58, 264 }
 0x1a8   : > { %4619 = vbcast.lane.b32.xlu1 %v4617_v58, 256  ;;  %p7658_p13 = pnand %p7657_p12, %p7860_p4 }
 0x1a9   : > { %v3387_v1 = vpop.permute.xlu0 %3386 }
 0x1aa   : > { %3446 = vst.msk [vmem:[#allocation2 + $0x68] sm:$0xff] %vm3432_vm11, %v3387_v1  ;;  %v2023_v2 = vpop.permute.xlu1 %2022  ;;  %p7659_p0 = pneg %p7658_p13 }
 0x1ab   : > { %2081 = vst.msk [vmem:[#allocation2 + $0x70] sm:$0xff] %vm2066_vm7, %v2023_v2  ;;  %4638 = vbcast.lane.b32.xlu0 %v4632_v61, 264 }
 0x1ac   : > { %4627 = vbcast.lane.b32.xlu1 %v4617_v58, 272 }
 0x1ad   : > { %v2025_v62 = vpop.permute.xlu0 %2024 }
 0x1ae   : > { %2082 = vst.msk [vmem:[#allocation2 + $0x78] sm:$0xff] %vm2066_vm7, %v2025_v62  ;;  %v2341_v56 = vpop.permute.xlu1 %2340  ;;  %v3469_v7 = vld [vmem:[#allocation2 + $0x60] sm:$0xff]  ;;  %v4646_v62 = vsub.s32 2, %v9002_v51 }
 0x1af   : > { %2399 = vst.msk [vmem:[#allocation2 + $0x70] sm:$0xff] %vm2384_vm8, %v2341_v56  ;;  %7043 = vmatprep.mubr.msk.bf16.mxu0 %vm3508_vm12, %v3469_v7  ;;  %v9038_v7 = vld [vmem:[%s11181_s3] ss:$0 sm:$0xff] }
 0x1b0   : > { %4634 = vbcast.lane.b32.xlu1 %v4632_v61, 256 }
 0x1b1   : > { %v2343_v5 = vpop.permute.xlu0 %2342  ;;  %v3470_v6 = vld [vmem:[#allocation2 + $0x68] sm:$0xff] }
 0x1b2   : > { %2400 = vst.msk [vmem:[#allocation2 + $0x78] sm:$0xff] %vm2384_vm8, %v2343_v5  ;;  %7044 = vmatmul.mubr.msk.bf16.gmra.mrb[24].mxu0 %vm3508_vm12, %v3470_v6  ;;  %v2606_v8 = vpop.permute.xlu1 %2605  ;;  %v4647_v5 = vrot.slane %v9016_v54, %v4646_v62 }
 0x1b3   : > { %2664 = vst.msk [vmem:[#allocation2 + $0x70] sm:$0xff] %vm2649_vm9, %v2606_v8 }
 0x1b4   : > { %4642 = vbcast.lane.b32.xlu1 %v4632_v61, 272  ;;  %4649 = vbcast.lane.b32.xlu0 %v4647_v5, 256 }
 0x1b5   : > { %v2608_v9 = vpop.permute.xlu0 %2607 }
 0x1b6   : > { %2665 = vst.msk [vmem:[#allocation2 + $0x78] sm:$0xff] %vm2649_vm9, %v2608_v9  ;;  %v3071_v4 = vpop.permute.xlu1 %3070  ;;  %v4661_v9 = vsub.s32 3, %v9002_v51 }
 0x1b7   : > { %3129 = vst.msk [vmem:[#allocation2 + $0x70] sm:$0xff] %vm3114_vm10, %v3071_v4 }
 0x1b8   : > { %4653 = vbcast.lane.b32.xlu1 %v4647_v5, 264  ;;  %4657 = vbcast.lane.b32.xlu0 %v4647_v5, 272 }
 0x1b9   : > { %v3073_v12 = vpop.permute.xlu0 %3072 }
 0x1ba   : > { %3130 = vst.msk [vmem:[#allocation2 + $0x78] sm:$0xff] %vm3114_vm10, %v3073_v12  ;;  %v3389_v3 = vpop.permute.xlu1 %3388 }
 0x1bb   : > { %3447 = vst.msk [vmem:[#allocation2 + $0x70] sm:$0xff] %vm3432_vm11, %v3389_v3 }
 0x1bd   : > { %v3391_v11 = vpop.permute.xlu0 %3390 }
 0x1be   : > { %3448 = vst.msk [vmem:[#allocation2 + $0x78] sm:$0xff] %vm3432_vm11, %v3391_v11  ;;  %v2027_v14 = vpop.permute.xlu1 %2026 }
 0x1bf   : > { %2083 = vst.msk [vmem:[#allocation2 + $0x80] sm:$0xff] %vm2066_vm7, %v2027_v14 }
 0x1c1   : > { %v2029_v10 = vpop.permute.xlu0 %2028 }
 0x1c2   : > { %2084 = vst.msk [vmem:[#allocation2 + $0x88] sm:$0xff] %vm2066_vm7, %v2029_v10  ;;  %v2345_v13 = vpop.permute.xlu1 %2344  ;;  %v3471_v15 = vld [vmem:[#allocation2 + $0x70] sm:$0xff]  ;;  %v4662_v10 = vrot.slane %v9016_v54, %v4661_v9 }
 0x1c3   : > { %2401 = vst.msk [vmem:[#allocation2 + $0x80] sm:$0xff] %vm2384_vm8, %v2345_v13  ;;  %7047 = vmatprep.mubr.msk.bf16.mxu0 %vm3508_vm12, %v3471_v15 }
 0x1c4   : > { %4664 = vbcast.lane.b32.xlu1 %v4662_v10, 256  ;;  %4668 = vbcast.lane.b32.xlu0 %v4662_v10, 264 }
 0x1c5   : > { %v2347_v16 = vpop.permute.xlu0 %2346  ;;  %v3472_v18 = vld [vmem:[#allocation2 + $0x78] sm:$0xff] }
 0x1c6   : > { %2402 = vst.msk [vmem:[#allocation2 + $0x88] sm:$0xff] %vm2384_vm8, %v2347_v16  ;;  %7048 = vmatmul.mubr.msk.bf16.gmra.mrb[28].mxu0 %vm3508_vm12, %v3472_v18  ;;  %v2610_v19 = vpop.permute.xlu1 %2609 }
 0x1c7   : > { %2666 = vst.msk [vmem:[#allocation2 + $0x80] sm:$0xff] %vm2649_vm9, %v2610_v19  ;;  %v4676_v19 = vsub.s32 4, %v9002_v51 }
 0x1c8   : > { %4672 = vbcast.lane.b32.xlu1 %v4662_v10, 272 }
 0x1c9   : > { %v2612_v21 = vpop.permute.xlu0 %2611 }
 0x1ca   : > { %2667 = vst.msk [vmem:[#allocation2 + $0x88] sm:$0xff] %vm2649_vm9, %v2612_v21  ;;  %v3075_v24 = vpop.permute.xlu1 %3074 }
 0x1cb   : > { %3131 = vst.msk [vmem:[#allocation2 + $0x80] sm:$0xff] %vm3114_vm10, %v3075_v24 }
 0x1cd   : > { %v3077_v25 = vpop.permute.xlu0 %3076 }
 0x1ce   : > { %3132 = vst.msk [vmem:[#allocation2 + $0x88] sm:$0xff] %vm3114_vm10, %v3077_v25  ;;  %v3393_v27 = vpop.permute.xlu1 %3392 }
 0x1cf   : > { %3449 = vst.msk [vmem:[#allocation2 + $0x80] sm:$0xff] %vm3432_vm11, %v3393_v27 }
 0x1d1   : > { %v3395_v17 = vpop.permute.xlu0 %3394 }
 0x1d2   : > { %3450 = vst.msk [vmem:[#allocation2 + $0x88] sm:$0xff] %vm3432_vm11, %v3395_v17  ;;  %v1568_v23 = vpop.permute.xlu1 %1567 }
 0x1d3   : > { %1621 = vst.msk [vmem:[#allocation2 + $0x98] sm:$0xff] %vm1601_vm6, %v1568_v23 }
 0x1d5   : > { %v2031_v22 = vpop.permute.xlu0 %2030 }
 0x1d6   : > { %2085 = vst.msk [vmem:[#allocation2 + $0x90] sm:$0xff] %vm2066_vm7, %v2031_v22  ;;  %v2033_v20 = vpop.permute.xlu1 %2032  ;;  %v3473_v28 = vld [vmem:[#allocation2 + $0x80] sm:$0xff] }
 0x1d7   : > { %2086 = vst.msk [vmem:[#allocation2 + $0x98] sm:$0xff] %vm2066_vm7, %v2033_v20  ;;  %7051 = vmatprep.mubr.msk.bf16.mxu0 %vm3508_vm12, %v3473_v28  ;;  %v4677_v28 = vrot.slane %v9016_v54, %v4676_v19 }
 0x1d9   : > { %v2349_v29 = vpop.permute.xlu0 %2348  ;;  %v3474_v32 = vld [vmem:[#allocation2 + $0x88] sm:$0xff]  ;;  %4683 = vbcast.lane.b32.xlu1 %v4677_v28, 264  ;;  %4679 = vbcast.lane.b32.xlu0 %v4677_v28, 256 }
 0x1da   : > { %2403 = vst.msk [vmem:[#allocation2 + $0x90] sm:$0xff] %vm2384_vm8, %v2349_v29  ;;  %7052 = vmatmul.mubr.msk.bf16.gmra.mrb[32].mxu0 %vm3508_vm12, %v3474_v32  ;;  %v2351_v37 = vpop.permute.xlu1 %2350  ;;  %v4691_v32 = vsub.s32 5, %v9002_v51 }
 0x1db   : > { %2404 = vst.msk [vmem:[#allocation2 + $0x98] sm:$0xff] %vm2384_vm8, %v2351_v37 }
 0x1dc   : > { %v4692_v37 = vrot.slane %v9016_v54, %v4691_v32 }
 0x1dd   : > { %v2614_v39 = vpop.permute.xlu0 %2613  ;;  %4687 = vbcast.lane.b32.xlu0 %v4677_v28, 272 }
 0x1de   : > { %2668 = vst.msk [vmem:[#allocation2 + $0x90] sm:$0xff] %vm2649_vm9, %v2614_v39  ;;  %v2616_v40 = vpop.permute.xlu1 %2615  ;;  %4694 = vbcast.lane.b32.xlu1 %v4692_v37, 256 }
 0x1df   : > { %2669 = vst.msk [vmem:[#allocation2 + $0x98] sm:$0xff] %vm2649_vm9, %v2616_v40 }
 0x1e1   : > { %v3079_v41 = vpop.permute.xlu0 %3078  ;;  %4698 = vbcast.lane.b32.xlu0 %v4692_v37, 264 }
 0x1e2   : > { %3133 = vst.msk [vmem:[#allocation2 + $0x90] sm:$0xff] %vm3114_vm10, %v3079_v41  ;;  %v3081_v26 = vpop.permute.xlu1 %3080  ;;  %4702 = vbcast.lane.b32.xlu1 %v4692_v37, 272 }
 0x1e3   : > { %3134 = vst.msk [vmem:[#allocation2 + $0x98] sm:$0xff] %vm3114_vm10, %v3081_v26  ;;  %v4706_v26 = vsub.s32 6, %v9002_v51 }
 0x1e5   : > { %v3397_v30 = vpop.permute.xlu0 %3396 }
 0x1e6   : > { %3451 = vst.msk [vmem:[#allocation2 + $0x90] sm:$0xff] %vm3432_vm11, %v3397_v30  ;;  %v3399_v33 = vpop.permute.xlu1 %3398 }
 0x1e7   : > { %3452 = vst.msk [vmem:[#allocation2 + $0x98] sm:$0xff] %vm3432_vm11, %v3399_v33 }
 0x1e9   : > { %v1570_v38 = vpop.permute.xlu0 %1569 }
 0x1ea   : > { %1622 = vst.msk [vmem:[#allocation2 + $0xa0] sm:$0xff] %vm1601_vm6, %v1570_v38  ;;  %v1572_v42 = vpop.permute.xlu1 %1571 }
 0x1eb   : > { %1623 = vst.msk [vmem:[#allocation2 + $0xa8] sm:$0xff] %vm1601_vm6, %v1572_v42 }
 0x1ed   : > { %v2035_v34 = vpop.permute.xlu0 %2034  ;;  %v3475_v31 = vld [vmem:[#allocation2 + $0x90] sm:$0xff] }
 0x1ee   : > { %2087 = vst.msk [vmem:[#allocation2 + $0xa0] sm:$0xff] %vm2066_vm7, %v2035_v34  ;;  %7055 = vmatprep.mubr.msk.bf16.mxu0 %vm3508_vm12, %v3475_v31  ;;  %v2037_v36 = vpop.permute.xlu1 %2036  ;;  %v3476_v35 = vld [vmem:[#allocation2 + $0x98] sm:$0xff]  ;;  %v4707_v34 = vrot.slane %v9016_v54, %v4706_v26 }
 0x1ef   : > { %2088 = vst.msk [vmem:[#allocation2 + $0xa8] sm:$0xff] %vm2066_vm7, %v2037_v36  ;;  %7056 = vmatmul.mubr.msk.bf16.gmra.mrb[36].mxu0 %vm3508_vm12, %v3476_v35  ;;  %v4721_v35 = vsub.s32 7, %v9002_v51 }
 0x1f0   : > { %4713 = vbcast.lane.b32.xlu1 %v4707_v34, 264  ;;  %4709 = vbcast.lane.b32.xlu0 %v4707_v34, 256 }
 0x1f1   : > { %v2353_v43 = vpop.permute.xlu0 %2352 }
 0x1f2   : > { %2405 = vst.msk [vmem:[#allocation2 + $0xa0] sm:$0xff] %vm2384_vm8, %v2353_v43  ;;  %v2355_v44 = vpop.permute.xlu1 %2354 }
 0x1f3   : > { %2406 = vst.msk [vmem:[#allocation2 + $0xa8] sm:$0xff] %vm2384_vm8, %v2355_v44 }
 0x1f4   : > { %4717 = vbcast.lane.b32.xlu0 %v4707_v34, 272 }
 0x1f5   : > { %v2618_v47 = vpop.permute.xlu0 %2617 }
 0x1f6   : > { %2670 = vst.msk [vmem:[#allocation2 + $0xa0] sm:$0xff] %vm2649_vm9, %v2618_v47  ;;  %v2620_v49 = vpop.permute.xlu1 %2619 }
 0x1f7   : > { %2671 = vst.msk [vmem:[#allocation2 + $0xa8] sm:$0xff] %vm2649_vm9, %v2620_v49  ;;  %v4722_v49 = vrot.slane %v9016_v54, %v4721_v35 }
 0x1f9   : > { %v3083_v45 = vpop.permute.xlu0 %3082  ;;  %4724 = vbcast.lane.b32.xlu1 %v4722_v49, 256  ;;  %4728 = vbcast.lane.b32.xlu0 %v4722_v49, 264 }
 0x1fa   : > { %3135 = vst.msk [vmem:[#allocation2 + $0xa0] sm:$0xff] %vm3114_vm10, %v3083_v45  ;;  %v3085_v57 = vpop.permute.xlu1 %3084 }
 0x1fb   : > { %3136 = vst.msk [vmem:[#allocation2 + $0xa8] sm:$0xff] %vm3114_vm10, %v3085_v57 }
 0x1fd   : > { %v3401_v52 = vpop.permute.xlu0 %3400  ;;  %4732 = vbcast.lane.b32.xlu1 %v4722_v49, 272 }
 0x1fe   : > { %3453 = vst.msk [vmem:[#allocation2 + $0xa0] sm:$0xff] %vm3432_vm11, %v3401_v52  ;;  %v3403_v53 = vpop.permute.xlu1 %3402 }
 0x1ff   : > { %3454 = vst.msk [vmem:[#allocation2 + $0xa8] sm:$0xff] %vm3432_vm11, %v3403_v53  ;;  %v4611_v53 = vld [vmem:[%s9009_s20 + $0x8] sm:$0xff] }
 0x200   : > { %v4737_v61 = vrot.slane %v4611_v53, %v9012_v55  ;;  %v4767_v5 = vrot.slane %v4611_v53, %v4646_v62  ;;  %v4797_v62 = vrot.slane %v4611_v53, %v4676_v19  ;;  %v4842_v28 = vrot.slane %v4611_v53, %v4721_v35 }
 0x201   : > { %v1574_v63 = vpop.permute.xlu0 %1573 }
 0x202   : > { %1624 = vst.msk [vmem:[#allocation2 + $0xb0] sm:$0xff] %vm1601_vm6, %v1574_v63  ;;  %v1576_v46 = vpop.permute.xlu1 %1575  ;;  %4743 = vbcast.lane.b32.xlu1 %v4737_v61, 264  ;;  %4739 = vbcast.lane.b32.xlu0 %v4737_v61, 256  ;;  %v4752_v63 = vrot.slane %v4611_v53, %v4631_v59 }
 0x203   : > { %1625 = vst.msk [vmem:[#allocation2 + $0xb8] sm:$0xff] %vm1601_vm6, %v1576_v46 }
 0x205   : > { %v2039_v0 = vpop.permute.xlu0 %2038  ;;  %v3477_v50 = vld [vmem:[#allocation2 + $0xa0] sm:$0xff] }
 0x206   : > { %2089 = vst.msk [vmem:[#allocation2 + $0xb0] sm:$0xff] %vm2066_vm7, %v2039_v0  ;;  %7059 = vmatprep.mubr.msk.bf16.mxu0 %vm3508_vm12, %v3477_v50  ;;  %v2041_v60 = vpop.permute.xlu1 %2040  ;;  %v3478_v1 = vld [vmem:[#allocation2 + $0xa8] sm:$0xff]  ;;  %4754 = vbcast.lane.b32.xlu1 %v4752_v63, 256 }
 0x207   : > { %2090 = vst.msk [vmem:[#allocation2 + $0xb8] sm:$0xff] %vm2066_vm7, %v2041_v60  ;;  %7060 = vmatmul.mubr.msk.bf16.gmra.mrb[40].mxu0 %vm3508_vm12, %v3478_v1  ;;  %4747 = vbcast.lane.b32.xlu0 %v4737_v61, 272 }
 0x209   : > { %v2357_v2 = vpop.permute.xlu0 %2356 }
 0x20a   : > { %2407 = vst.msk [vmem:[#allocation2 + $0xb0] sm:$0xff] %vm2384_vm8, %v2357_v2  ;;  %v2359_v56 = vpop.permute.xlu1 %2358  ;;  %4762 = vbcast.lane.b32.xlu1 %v4752_v63, 272 }
 0x20b   : > { %2408 = vst.msk [vmem:[#allocation2 + $0xb8] sm:$0xff] %vm2384_vm8, %v2359_v56  ;;  %4758 = vbcast.lane.b32.xlu0 %v4752_v63, 264 }
 0x20d   : > { %v2622_v6 = vpop.permute.xlu0 %2621  ;;  %v7021_v8 = vpop.f32.mrb[0].mxu0 }
 0x20e   : > { %2672 = vst.msk [vmem:[#allocation2 + $0xb0] sm:$0xff] %vm2649_vm9, %v2622_v6  ;;  %v3628_v4 = vadd.f32 %v7021_v8, %v9038_v7  ;;  %v3619_v12 = vpop.f32.mrb[1].mxu0  ;;  %v2624_v3 = vpop.permute.xlu1 %2623  ;;  %4773 = vbcast.lane.b32.xlu1 %v4767_v5, 264 }
 0x20f   : > { %v3620_v11 = vadd.f32 %v9038_v7, %v3619_v12  ;;  %v7022_v14 = vpop.f32.mrb[2].mxu0  ;;  %2673 = vst.msk [vmem:[#allocation2 + $0xb8] sm:$0xff] %vm2649_vm9, %v2624_v3  ;;  %4769 = vbcast.lane.b32.xlu0 %v4767_v5, 256 }
 0x210   : > { %v3631_v13 = vadd.f32 %v7022_v14, %v9038_v7  ;;  %v3622_v15 = vpop.f32.mrb[3].mxu0  ;;  %v3812_v21 = vmax.f32 %v3628_v4, 0.0 }
 0x211   : > { %v3623_v16 = vadd.f32 %v9038_v7, %v3622_v15  ;;  %v3087_v18 = vpop.permute.xlu0 %3086  ;;  %v3810_v25 = vmax.f32 %v3620_v11, 0.0  ;;  %v4782_v11 = vrot.slane %v4611_v53, %v4661_v9  ;;  %v4812_v9 = vrot.slane %v4611_v53, %v4691_v32 }
 0x212   : > { %v3813_v24 = vmax.f32 %v3631_v13, 0.0  ;;  %3137 = vst.msk [vmem:[#allocation2 + $0xb0] sm:$0xff] %vm3114_vm10, %v3087_v18  ;;  %v3089_v17 = vpop.permute.xlu1 %3088 }
 0x213   : > { %v3811_v27 = vmax.f32 %v3623_v16, 0.0  ;;  %3138 = vst.msk [vmem:[#allocation2 + $0xb8] sm:$0xff] %vm3114_vm10, %v3089_v17  ;;  %4784 = vbcast.lane.b32.xlu1 %v4782_v11, 256  ;;  %4777 = vbcast.lane.b32.xlu0 %v4767_v5, 272 }
 0x214   : > { %v3859_v23 = vpack.c.bf16 %v3813_v24, %v3812_v21 }
 0x215   : > { %v3858_v22 = vpack.c.bf16 %v3811_v27, %v3810_v25  ;;  %v3405_v20 = vpop.permute.xlu0 %3404 }
 0x216   : > { %3455 = vst.msk [vmem:[#allocation2 + $0xb0] sm:$0xff] %vm3432_vm11, %v3405_v20  ;;  %v3407_v29 = vpop.permute.xlu1 %3406  ;;  %v4827_v20 = vrot.slane %v4611_v53, %v4706_v26 }
 0x217   : > { %3456 = vst.msk [vmem:[#allocation2 + $0xb8] sm:$0xff] %vm3432_vm11, %v3407_v29  ;;  %4792 = vbcast.lane.b32.xlu1 %v4782_v11, 272  ;;  %4788 = vbcast.lane.b32.xlu0 %v4782_v11, 264 }
 0x21b   : > { %4803 = vbcast.lane.b32.xlu1 %v4797_v62, 264  ;;  %4799 = vbcast.lane.b32.xlu0 %v4797_v62, 256 }
 0x21d   : > { %v3479_v39 = vld [vmem:[#allocation2 + $0xb0] sm:$0xff] }
 0x21e   : > { %7063 = vmatprep.mubr.msk.bf16.mxu0 %vm3508_vm12, %v3479_v39  ;;  %v3480_v40 = vld [vmem:[#allocation2 + $0xb8] sm:$0xff] }
 0x21f   : > { %7064 = vmatmul.mubr.msk.bf16.gmra.mrb[44].mxu0 %vm3508_vm12, %v3480_v40  ;;  %4814 = vbcast.lane.b32.xlu1 %v4812_v9, 256 }
 0x220   : > { %7083 = vmatprep.mubr.bf16.mxu0 %v3858_v22  ;;  %4807 = vbcast.lane.b32.xlu0 %v4797_v62, 272 }
 0x221   : > { %v7025_v41 = vpop.f32.mrb[4].mxu0 }
 0x222   : > { %v3644_v30 = vadd.f32 %v7025_v41, %v9038_v7  ;;  %v3635_v33 = vpop.f32.mrb[5].mxu0 }
 0x223   : > { %v3636_v38 = vadd.f32 %v9038_v7, %v3635_v33  ;;  %v7026_v42 = vpop.f32.mrb[6].mxu0  ;;  %4822 = vbcast.lane.b32.xlu1 %v4812_v9, 272 }
 0x224   : > { %v3647_v31 = vadd.f32 %v7026_v42, %v9038_v7  ;;  %v3638_v36 = vpop.f32.mrb[7].mxu0  ;;  %v3816_v44 = vmax.f32 %v3644_v30, 0.0  ;;  %4818 = vbcast.lane.b32.xlu0 %v4812_v9, 264 }
 0x225   : > { %v3639_v43 = vadd.f32 %v9038_v7, %v3638_v36  ;;  %v3814_v45 = vmax.f32 %v3636_v38, 0.0 }
 0x226   : > { %v3817_v47 = vmax.f32 %v3647_v31, 0.0 }
 0x227   : > { %v3815_v57 = vmax.f32 %v3639_v43, 0.0  ;;  %7084 = vmatmul.mubr.bf16.vlgmr.msra.gmra.mrb[48].mxu0 %v3859_v23  ;;  %4833 = vbcast.lane.b32.xlu1 %v4827_v20, 264 }
 0x228   : > { %v3861_v58 = vpack.c.bf16 %v3817_v47, %v3816_v44  ;;  %4829 = vbcast.lane.b32.xlu0 %v4827_v20, 256 }
 0x229   : > { %v3860_v52 = vpack.c.bf16 %v3815_v57, %v3814_v45 }
 0x22b   : > { %7087 = vmatprep.mubr.bf16.mxu1 %v3860_v52  ;;  %4844 = vbcast.lane.b32.xlu1 %v4842_v28, 256 }
 0x22c   : > { %7088 = vmatmul.mubr.bf16.vlgmr.msra.gmra.mrb[0].mxu1 %v3861_v58  ;;  %4837 = vbcast.lane.b32.xlu0 %v4827_v20, 272 }
 0x22f   : > { %4852 = vbcast.lane.b32.xlu1 %v4842_v28, 272 }
 0x230   : > { %4848 = vbcast.lane.b32.xlu0 %v4842_v28, 264 }
 0x235   : > { %v7029_v54 = vpop.f32.mrb[8].mxu0 }
 0x236   : > { %v3660_v46 = vadd.f32 %v7029_v54, %v9038_v7  ;;  %v3651_v0 = vpop.f32.mrb[9].mxu0 }
 0x237   : > { %v3652_v50 = vadd.f32 %v9038_v7, %v3651_v0  ;;  %v7030_v60 = vpop.f32.mrb[10].mxu0 }
 0x238   : > { %v3663_v1 = vadd.f32 %v7030_v60, %v9038_v7  ;;  %v3654_v2 = vpop.f32.mrb[11].mxu0  ;;  %v3820_v6 = vmax.f32 %v3660_v46, 0.0 }
 0x239   : > { %v3655_v56 = vadd.f32 %v9038_v7, %v3654_v2  ;;  %v3818_v8 = vmax.f32 %v3652_v50, 0.0 }
 0x23a   : > { %v3821_v59 = vmax.f32 %v3663_v1, 0.0 }
 0x23b   : > { %v3819_v4 = vmax.f32 %v3655_v56, 0.0 }
 0x23c   : > { %v3863_v12 = vpack.c.bf16 %v3821_v59, %v3820_v6 }
 0x23d   : > { %v3862_v3 = vpack.c.bf16 %v3819_v4, %v3818_v8 }
 0x23f   : > { %7091 = vmatprep.mubr.bf16.mxu1 %v3862_v3 }
 0x240   : > { %7092 = vmatmul.mubr.bf16.gmra.mrb[4].mxu1 %v3863_v12 }
 0x249   : > { %v7033_v14 = vpop.f32.mrb[12].mxu0 }
 0x24a   : > { %v3676_v10 = vadd.f32 %v7033_v14, %v9038_v7  ;;  %v3667_v13 = vpop.f32.mrb[13].mxu0 }
 0x24b   : > { %v3668_v15 = vadd.f32 %v9038_v7, %v3667_v13  ;;  %v7034_v16 = vpop.f32.mrb[14].mxu0 }
 0x24c   : > { %v3679_v18 = vadd.f32 %v7034_v16, %v9038_v7  ;;  %v3670_v21 = vpop.f32.mrb[15].mxu0  ;;  %v3824_v25 = vmax.f32 %v3676_v10, 0.0 }
 0x24d   : > { %v3671_v24 = vadd.f32 %v9038_v7, %v3670_v21  ;;  %v3822_v27 = vmax.f32 %v3668_v15, 0.0 }
 0x24e   : > { %v3825_v19 = vmax.f32 %v3679_v18, 0.0 }
 0x24f   : > { %v3823_v17 = vmax.f32 %v3671_v24, 0.0 }
 0x250   : > { %v3865_v23 = vpack.c.bf16 %v3825_v19, %v3824_v25 }
 0x251   : > { %v3864_v22 = vpack.c.bf16 %v3823_v17, %v3822_v27 }
 0x253   : > { %7095 = vmatprep.mubr.bf16.mxu1 %v3864_v22 }
 0x254   : > { %7096 = vmatmul.mubr.bf16.gmra.mrb[8].mxu1 %v3865_v23 }
 0x25d   : > { %v7037_v29 = vpop.f32.mrb[16].mxu0 }
 0x25e   : > { %v3692_v32 = vadd.f32 %v7037_v29, %v9038_v7  ;;  %v3683_v37 = vpop.f32.mrb[17].mxu0 }
 0x25f   : > { %v3684_v39 = vadd.f32 %v9038_v7, %v3683_v37  ;;  %v7038_v40 = vpop.f32.mrb[18].mxu0 }
 0x260   : > { %v3695_v41 = vadd.f32 %v7038_v40, %v9038_v7  ;;  %v3686_v26 = vpop.f32.mrb[19].mxu0  ;;  %v3828_v33 = vmax.f32 %v3692_v32, 0.0 }
 0x261   : > { %v3687_v30 = vadd.f32 %v9038_v7, %v3686_v26  ;;  %v3826_v42 = vmax.f32 %v3684_v39, 0.0 }
 0x262   : > { %v3829_v38 = vmax.f32 %v3695_v41, 0.0 }
 0x263   : > { %v3827_v34 = vmax.f32 %v3687_v30, 0.0 }
 0x264   : > { %v3867_v31 = vpack.c.bf16 %v3829_v38, %v3828_v33 }
 0x265   : > { %v3866_v36 = vpack.c.bf16 %v3827_v34, %v3826_v42 }
 0x267   : > { %7099 = vmatprep.mubr.bf16.mxu1 %v3866_v36 }
 0x268   : > { %7100 = vmatmul.mubr.bf16.gmra.mrb[12].mxu1 %v3867_v31 }
 0x271   : > { %v7041_v35 = vpop.f32.mrb[20].mxu0 }
 0x272   : > { %v3708_v43 = vadd.f32 %v7041_v35, %v9038_v7  ;;  %v3699_v44 = vpop.f32.mrb[21].mxu0 }
 0x273   : > { %v3700_v47 = vadd.f32 %v9038_v7, %v3699_v44  ;;  %v7042_v49 = vpop.f32.mrb[22].mxu0 }
 0x274   : > { %v3711_v45 = vadd.f32 %v7042_v49, %v9038_v7  ;;  %v3702_v57 = vpop.f32.mrb[23].mxu0  ;;  %v3832_v52 = vmax.f32 %v3708_v43, 0.0 }
 0x275   : > { %v3703_v58 = vadd.f32 %v9038_v7, %v3702_v57  ;;  %v3830_v61 = vmax.f32 %v3700_v47, 0.0 }
 0x276   : > { %v3833_v53 = vmax.f32 %v3711_v45, 0.0 }
 0x277   : > { %v3831_v63 = vmax.f32 %v3703_v58, 0.0 }
 0x278   : > { %v3869_v54 = vpack.c.bf16 %v3833_v53, %v3832_v52 }
 0x279   : > { %v3868_v46 = vpack.c.bf16 %v3831_v63, %v3830_v61 }
 0x27b   : > { %7103 = vmatprep.mubr.bf16.mxu1 %v3868_v46 }
 0x27c   : > { %7104 = vmatmul.mubr.bf16.gmra.mrb[16].mxu1 %v3869_v54 }
 0x285   : > { %v7045_v0 = vpop.f32.mrb[24].mxu0 }
 0x286   : > { %v3724_v50 = vadd.f32 %v7045_v0, %v9038_v7  ;;  %v3715_v60 = vpop.f32.mrb[25].mxu0 }
 0x287   : > { %v3716_v1 = vadd.f32 %v9038_v7, %v3715_v60  ;;  %v7046_v2 = vpop.f32.mrb[26].mxu0 }
 0x288   : > { %v3727_v56 = vadd.f32 %v7046_v2, %v9038_v7  ;;  %v3718_v5 = vpop.f32.mrb[27].mxu0  ;;  %v3836_v59 = vmax.f32 %v3724_v50, 0.0 }
 0x289   : > { %v3719_v6 = vadd.f32 %v9038_v7, %v3718_v5  ;;  %v3834_v4 = vmax.f32 %v3716_v1, 0.0 }
 0x28a   : > { %v3837_v8 = vmax.f32 %v3727_v56, 0.0 }
 0x28b   : > { %v3835_v12 = vmax.f32 %v3719_v6, 0.0 }
 0x28c   : > { %v3871_v3 = vpack.c.bf16 %v3837_v8, %v3836_v59 }
 0x28d   : > { %v3870_v11 = vpack.c.bf16 %v3835_v12, %v3834_v4 }
 0x28f   : > { %7107 = vmatprep.mubr.bf16.mxu1 %v3870_v11 }
 0x290   : > { %7108 = vmatmul.mubr.bf16.gmra.mrb[20].mxu1 %v3871_v3 }
 0x299   : > { %v7049_v62 = vpop.f32.mrb[28].mxu0 }
 0x29a   : > { %v3740_v14 = vadd.f32 %v7049_v62, %v9038_v7  ;;  %v3731_v10 = vpop.f32.mrb[29].mxu0 }
 0x29b   : > { %v3732_v13 = vadd.f32 %v9038_v7, %v3731_v10  ;;  %v7050_v15 = vpop.f32.mrb[30].mxu0 }
 0x29c   : > { %v3743_v16 = vadd.f32 %v7050_v15, %v9038_v7  ;;  %v3734_v9 = vpop.f32.mrb[31].mxu0  ;;  %v3840_v21 = vmax.f32 %v3740_v14, 0.0 }
 0x29d   : > { %v3735_v18 = vadd.f32 %v9038_v7, %v3734_v9  ;;  %v3838_v25 = vmax.f32 %v3732_v13, 0.0 }
 0x29e   : > { %v3841_v24 = vmax.f32 %v3743_v16, 0.0 }
 0x29f   : > { %v3839_v19 = vmax.f32 %v3735_v18, 0.0 }
 0x2a0   : > { %v3873_v27 = vpack.c.bf16 %v3841_v24, %v3840_v21  ;;  %v9139_v21 = vld [vmem:[%s11183_s5] ss:$0 sm:$0xff] }
 0x2a1   : > { %v3872_v17 = vpack.c.bf16 %v3839_v19, %v3838_v25 }
 0x2a3   : > { %7111 = vmatprep.mubr.bf16.mxu1 %v3872_v17 }
 0x2a4   : > { %7112 = vmatmul.mubr.bf16.gmra.mrb[24].mxu1 %v3873_v27 }
 0x2ad   : > { %v7053_v23 = vpop.f32.mrb[32].mxu0 }
 0x2ae   : > { %v3756_v22 = vadd.f32 %v7053_v23, %v9038_v7  ;;  %v3747_v20 = vpop.f32.mrb[33].mxu0 }
 0x2af   : > { %v3748_v28 = vadd.f32 %v9038_v7, %v3747_v20  ;;  %v7054_v29 = vpop.f32.mrb[34].mxu0 }
 0x2b0   : > { %v3759_v32 = vadd.f32 %v7054_v29, %v9038_v7  ;;  %v3750_v37 = vpop.f32.mrb[35].mxu0  ;;  %v3844_v40 = vmax.f32 %v3756_v22, 0.0 }
 0x2b1   : > { %v3751_v39 = vadd.f32 %v9038_v7, %v3750_v37  ;;  %v3842_v26 = vmax.f32 %v3748_v28, 0.0 }
 0x2b2   : > { %v3845_v41 = vmax.f32 %v3759_v32, 0.0 }
 0x2b3   : > { %v3843_v30 = vmax.f32 %v3751_v39, 0.0 }
 0x2b4   : > { %v3875_v33 = vpack.c.bf16 %v3845_v41, %v3844_v40 }
 0x2b5   : > { %v3874_v38 = vpack.c.bf16 %v3843_v30, %v3842_v26 }
 0x2b7   : > { %7115 = vmatprep.mubr.bf16.mxu1 %v3874_v38 }
 0x2b8   : > { %7116 = vmatmul.mubr.bf16.gmra.mrb[28].mxu1 %v3875_v33 }
 0x2c2   : > { %v7057_v42 = vpop.f32.mrb[36].mxu0 }
 0x2c3   : > { %v3772_v34 = vadd.f32 %v7057_v42, %v9038_v7  ;;  %v3763_v31 = vpop.f32.mrb[37].mxu0 }
 0x2c4   : > { %v3764_v36 = vadd.f32 %v9038_v7, %v3763_v31  ;;  %v7058_v35 = vpop.f32.mrb[38].mxu0 }
 0x2c5   : > { %v3775_v43 = vadd.f32 %v7058_v35, %v9038_v7  ;;  %v3766_v44 = vpop.f32.mrb[39].mxu0  ;;  %v3848_v49 = vmax.f32 %v3772_v34, 0.0 }
 0x2c6   : > { %v3767_v47 = vadd.f32 %v9038_v7, %v3766_v44  ;;  %v3846_v57 = vmax.f32 %v3764_v36, 0.0 }
 0x2c7   : > { %v3849_v45 = vmax.f32 %v3775_v43, 0.0 }
 0x2c8   : > { %v3847_v58 = vmax.f32 %v3767_v47, 0.0 }
 0x2c9   : > { %v3877_v52 = vpack.c.bf16 %v3849_v45, %v3848_v49 }
 0x2ca   : > { %v3876_v53 = vpack.c.bf16 %v3847_v58, %v3846_v57 }
 0x2cc   : > { %7119 = vmatprep.mubr.bf16.mxu1 %v3876_v53 }
 0x2cd   : > { %7120 = vmatmul.mubr.bf16.gmra.mrb[32].mxu1 %v3877_v52 }
 0x2da   : > { %v7061_v61 = vpop.f32.mrb[40].mxu0 }
 0x2db   : > { %v3788_v63 = vadd.f32 %v7061_v61, %v9038_v7  ;;  %v3779_v54 = vpop.f32.mrb[41].mxu0  ;;  %v9205_v61 = vpop.permute.xlu1 %4619 }
 0x2dc   : > { %v3780_v46 = vadd.f32 %v9038_v7, %v3779_v54  ;;  %v7062_v0 = vpop.f32.mrb[42].mxu0 }
 0x2dd   : > { %v3791_v50 = vadd.f32 %v7062_v0, %v9038_v7  ;;  %v3782_v60 = vpop.f32.mrb[43].mxu0  ;;  %v3852_v2 = vmax.f32 %v3788_v63, 0.0 }
 0x2de   : > { %v3783_v1 = vadd.f32 %v9038_v7, %v3782_v60  ;;  %v3850_v5 = vmax.f32 %v3780_v46, 0.0 }
 0x2df   : > { %v3853_v56 = vmax.f32 %v3791_v50, 0.0 }
 0x2e0   : > { %v3851_v6 = vmax.f32 %v3783_v1, 0.0  ;;  %v9214_v1 = vpop.permute.xlu1 %4627 }
 0x2e1   : > { %v3879_v59 = vpack.c.bf16 %v3853_v56, %v3852_v2 }
 0x2e2   : > { %v3878_v8 = vpack.c.bf16 %v3851_v6, %v3850_v5  ;;  %v9224_v5 = vpop.permute.xlu0 %4623 }
 0x2e4   : > { %7123 = vmatprep.mubr.bf16.mxu1 %v3878_v8  ;;  %v9227_v6 = vpop.permute.xlu1 %4634 }
 0x2e5   : > { %7124 = vmatmul.mubr.bf16.gmra.mrb[36].mxu1 %v3879_v59 }
 0x2e6   : > { %v9229_v59 = vpop.permute.xlu0 %4638 }
 0x2e8   : > { %v9231_v8 = vpop.permute.xlu1 %4642 }
 0x2f2   : > { %v7065_v4 = vpop.f32.mrb[44].mxu0 }
 0x2f3   : > { %v3804_v12 = vadd.f32 %v7065_v4, %v9038_v7  ;;  %v3795_v3 = vpop.f32.mrb[45].mxu0 }
 0x2f4   : > { %v3796_v11 = vadd.f32 %v9038_v7, %v3795_v3  ;;  %v7066_v62 = vpop.f32.mrb[46].mxu0 }
 0x2f5   : > { %v3807_v14 = vadd.f32 %v7066_v62, %v9038_v7  ;;  %v3798_v10 = vpop.f32.mrb[47].mxu0  ;;  %v3856_v15 = vmax.f32 %v3804_v12, 0.0  ;;  %v9233_v12 = vpop.permute.xlu0 %4649 }
 0x2f6   : > { %v3799_v13 = vadd.f32 %v9038_v7, %v3798_v10  ;;  %v3854_v9 = vmax.f32 %v3796_v11, 0.0 }
 0x2f7   : > { %v3857_v16 = vmax.f32 %v3807_v14, 0.0  ;;  %v9238_v14 = vpop.permute.xlu1 %4653 }
 0x2f8   : > { %v3855_v18 = vmax.f32 %v3799_v13, 0.0 }
 0x2f9   : > { %v3881_v24 = vpack.c.bf16 %v3857_v16, %v3856_v15  ;;  %v9248_v16 = vpop.permute.xlu0 %4657 }
 0x2fa   : > { %v3880_v25 = vpack.c.bf16 %v3855_v18, %v3854_v9  ;;  %v7085_v19 = vpop.f32.mrb[48].mxu0 }
 0x2fb   : > { %v9142_v27 = vadd.f32 %v7085_v19, %v9139_v21  ;;  %v3987_v17 = vpop.f32.mrb[49].mxu0  ;;  %v9254_v18 = vpop.permute.xlu1 %4664 }
 0x2fc   : > { %v7086_v23 = vpop.f32.mrb[50].mxu0  ;;  %7127 = vmatprep.mubr.bf16.mxu1 %v3880_v25  ;;  %v9149_v28 = vadd.f32 %v9139_v21, %v3987_v17 }
 0x2fd   : > { %7128 = vmatmul.mubr.bf16.gmra.mrb[40].mxu1 %v3881_v24  ;;  %4182 = vmax.xlane.f32.xlu0 %v9142_v27  ;;  %v3990_v7 = vpop.f32.mrb[51].mxu0  ;;  %v9157_v40 = vadd.f32 %v7086_v23, %v9139_v21  ;;  %v9257_v24 = vpop.permute.xlu0 %4668 }
 0x2fe   : > { %v9146_v22 = vadd.f32 %v9139_v21, %v3990_v7 }
 0x2ff   : > { %v7089_v20 = vpop.f32.mrb[0].mxu1  ;;  %v9259_v25 = vpop.permute.xlu1 %4672 }
 0x300   : > { %v4003_v29 = vpop.f32.mrb[1].mxu1  ;;  %4180 = vmax.xlane.f32.xlu1 %v9146_v22  ;;  %v9154_v39 = vadd.f32 %v7089_v20, %v9139_v21 }
 0x301   : > { %v7090_v32 = vpop.f32.mrb[2].mxu1  ;;  %4178 = vmax.xlane.f32.xlu0 %v9149_v28  ;;  %v9162_v41 = vadd.f32 %v9139_v21, %v4003_v29  ;;  %v9261_v19 = vpop.permute.xlu0 %4679 }
 0x302   : > { %v4006_v37 = vpop.f32.mrb[3].mxu1  ;;  %v9165_v26 = vadd.f32 %v7090_v32, %v9139_v21 }
 0x303   : > { %v9170_v30 = vadd.f32 %v9139_v21, %v4006_v37  ;;  %v9263_v23 = vpop.permute.xlu1 %4683 }
 0x304   : > { %4190 = vmax.xlane.f32.xlu1 %v9154_v39 }
 0x305   : > { %4184 = vmax.xlane.f32.xlu0 %v9157_v40 }
 0x308   : > { %4186 = vmax.xlane.f32.xlu1 %v9162_v41 }
 0x309   : > { %4192 = vmax.xlane.f32.xlu0 %v9165_v26 }
 0x30d   : > { %4188 = vmax.xlane.f32.xlu0 %v9170_v30 }
 0x313   : > { %v7093_v33 = vpop.f32.mrb[4].mxu1 }
 0x314   : > { %v9174_v38 = vadd.f32 %v7093_v33, %v9139_v21  ;;  %v4019_v42 = vpop.f32.mrb[5].mxu1  ;;  %v9272_v33 = vpop.permute.xlu0 %4687 }
 0x315   : > { %v7094_v34 = vpop.f32.mrb[6].mxu1  ;;  %v9181_v35 = vadd.f32 %v9139_v21, %v4019_v42 }
 0x316   : > { %v9177_v31 = vadd.f32 %v7094_v34, %v9139_v21  ;;  %v4022_v36 = vpop.f32.mrb[7].mxu1  ;;  %4198 = vmax.xlane.f32.xlu1 %v9174_v38  ;;  %v9278_v34 = vpop.permute.xlu1 %4694 }
 0x317   : > { %v9185_v43 = vadd.f32 %v9139_v21, %v4022_v36 }
 0x318   : > { %4200 = vmax.xlane.f32.xlu0 %v9177_v31 }
 0x31a   : > { %4194 = vmax.xlane.f32.xlu1 %v9181_v35 }
 0x31c   : > { %4196 = vmax.xlane.f32.xlu0 %v9185_v43 }
 0x327   : > { %v7097_v44 = vpop.f32.mrb[8].mxu1 }
 0x328   : > { %v9190_v47 = vadd.f32 %v7097_v44, %v9139_v21  ;;  %v4035_v49 = vpop.f32.mrb[9].mxu1  ;;  %v9285_v44 = vpop.permute.xlu0 %4698 }
 0x329   : > { %v7098_v45 = vpop.f32.mrb[10].mxu1  ;;  %v9197_v52 = vadd.f32 %v9139_v21, %v4035_v49  ;;  %v9287_v49 = vpop.permute.xlu1 %4702 }
 0x32a   : > { %v9193_v57 = vadd.f32 %v7098_v45, %v9139_v21  ;;  %v4038_v58 = vpop.f32.mrb[11].mxu1  ;;  %4206 = vmax.xlane.f32.xlu1 %v9190_v47 }
 0x32b   : > { %v9201_v53 = vadd.f32 %v9139_v21, %v4038_v58 }
 0x32c   : > { %4208 = vmax.xlane.f32.xlu0 %v9193_v57  ;;  %v9289_v45 = vpop.permute.xlu0 %4709 }
 0x32d   : > { %v9291_v58 = vpop.permute.xlu1 %4713 }
 0x32e   : > { %4202 = vmax.xlane.f32.xlu1 %v9197_v52 }
 0x330   : > { %4204 = vmax.xlane.f32.xlu0 %v9201_v53 }
 0x33b   : > { %v7101_v63 = vpop.f32.mrb[12].mxu1 }
 0x33c   : > { %v9208_v54 = vadd.f32 %v7101_v63, %v9139_v21  ;;  %v4051_v46 = vpop.f32.mrb[13].mxu1 }
 0x33d   : > { %v7102_v0 = vpop.f32.mrb[14].mxu1  ;;  %v9217_v2 = vadd.f32 %v9139_v21, %v4051_v46 }
 0x33e   : > { %v9211_v50 = vadd.f32 %v7102_v0, %v9139_v21  ;;  %v4054_v60 = vpop.f32.mrb[15].mxu1  ;;  %4214 = vmax.xlane.f32.xlu1 %v9208_v54 }
 0x33f   : > { %v9221_v56 = vadd.f32 %v9139_v21, %v4054_v60 }
 0x340   : > { %4216 = vmax.xlane.f32.xlu0 %v9211_v50 }
 0x342   : > { %4210 = vmax.xlane.f32.xlu1 %v9217_v2 }
 0x344   : > { %4212 = vmax.xlane.f32.xlu0 %v9221_v56 }
 0x34f   : > { %v7105_v4 = vpop.f32.mrb[16].mxu1 }
 0x350   : > { %v9236_v3 = vadd.f32 %v7105_v4, %v9139_v21  ;;  %v4067_v11 = vpop.f32.mrb[17].mxu1  ;;  %v9296_v4 = vpop.permute.xlu0 %4717 }
 0x351   : > { %v7106_v62 = vpop.f32.mrb[18].mxu1  ;;  %v9245_v15 = vadd.f32 %v9139_v21, %v4067_v11 }
 0x352   : > { %v9241_v10 = vadd.f32 %v7106_v62, %v9139_v21  ;;  %v4070_v13 = vpop.f32.mrb[19].mxu1  ;;  %4222 = vmax.xlane.f32.xlu1 %v9236_v3 }
 0x353   : > { %v9251_v9 = vadd.f32 %v9139_v21, %v4070_v13  ;;  %v9302_v13 = vpop.permute.xlu1 %4724 }
 0x354   : > { %4224 = vmax.xlane.f32.xlu0 %v9241_v10 }
 0x356   : > { %4218 = vmax.xlane.f32.xlu1 %v9245_v15 }
 0x358   : > { %4220 = vmax.xlane.f32.xlu0 %v9251_v9 }
 0x363   : > { %v7109_v17 = vpop.f32.mrb[20].mxu1 }
 0x364   : > { %v9266_v7 = vadd.f32 %v7109_v17, %v9139_v21  ;;  %v4083_v20 = vpop.f32.mrb[21].mxu1 }
 0x365   : > { %v7110_v29 = vpop.f32.mrb[22].mxu1  ;;  %v9275_v42 = vadd.f32 %v9139_v21, %v4083_v20 }
 0x366   : > { %v9269_v32 = vadd.f32 %v7110_v29, %v9139_v21  ;;  %v4086_v37 = vpop.f32.mrb[23].mxu1  ;;  %4230 = vmax.xlane.f32.xlu1 %v9266_v7  ;;  %v9312_v29 = vpop.permute.xlu0 %4728 }
 0x367   : > { %11272 = vst [vmem:[#allocation15_spill] sm:$0xff] %v9275_v42  ;;  %v9281_v36 = vadd.f32 %v9139_v21, %v4086_v37  ;;  %v9315_v37 = vpop.permute.xlu1 %4732 }
 0x368   : > { %11271 = vst [vmem:[#allocation14_spill] sm:$0xff] %v9269_v32  ;;  %4232 = vmax.xlane.f32.xlu0 %v9269_v32 }
 0x369   : > { %11273 = vst [vmem:[#allocation16_spill] sm:$0xff] %v9281_v36 }
 0x36a   : > { %4226 = vmax.xlane.f32.xlu1 %v9275_v42 }
 0x36c   : > { %4228 = vmax.xlane.f32.xlu0 %v9281_v36 }
 0x377   : > { %v7113_v63 = vpop.f32.mrb[24].mxu1 }
 0x378   : > { %v9294_v46 = vadd.f32 %v7113_v63, %v9139_v21  ;;  %v4099_v0 = vpop.f32.mrb[25].mxu1  ;;  %v9317_v63 = vpop.permute.xlu0 %4739 }
 0x379   : > { %v7114_v60 = vpop.f32.mrb[26].mxu1  ;;  %v9305_v17 = vadd.f32 %v9139_v21, %v4099_v0  ;;  %11278 = vst [vmem:[#allocation21_spill] sm:$0xff] %v9317_v63 }
 0x37a   : > { %11274 = vst [vmem:[#allocation17_spill] sm:$0xff] %v9294_v46  ;;  %v9299_v11 = vadd.f32 %v7114_v60, %v9139_v21  ;;  %v4102_v62 = vpop.f32.mrb[27].mxu1  ;;  %4238 = vmax.xlane.f32.xlu1 %v9294_v46  ;;  %v9319_v60 = vpop.permute.xlu1 %4743 }
 0x37b   : > { %11276 = vst [vmem:[#allocation19_spill] sm:$0xff] %v9305_v17  ;;  %v9309_v20 = vadd.f32 %v9139_v21, %v4102_v62  ;;  %11279 = vst [vmem:[#allocation22_spill] sm:$0xff] %v9319_v60 }
 0x37c   : > { %11275 = vst [vmem:[#allocation18_spill] sm:$0xff] %v9299_v11  ;;  %4240 = vmax.xlane.f32.xlu0 %v9299_v11  ;;  %v9321_v0 = vpop.permute.xlu0 %4747 }
 0x37d   : > { %11277 = vst [vmem:[#allocation20_spill] sm:$0xff] %v9309_v20  ;;  %11280 = vst [vmem:[#allocation23_spill] sm:$0xff] %v9321_v0 }
 0x37e   : > { %4234 = vmax.xlane.f32.xlu1 %v9305_v17  ;;  %v9326_v11 = vpop.permute.xlu1 %4754 }
 0x37f   : > { %11282 = vst [vmem:[#allocation25_spill] sm:$0xff] %v9326_v11 }
 0x380   : > { %4236 = vmax.xlane.f32.xlu0 %v9309_v20  ;;  %v9336_v60 = vpop.permute.xlu0 %4758 }
 0x381   : > { %11285 = vst [vmem:[#allocation28_spill] sm:$0xff] %v9336_v60 }
 0x382   : > { %v9342_v36 = vpop.permute.xlu1 %4762 }
 0x383   : > { %11287 = vst [vmem:[#allocation30_spill] sm:$0xff] %v9342_v36 }
 0x386   : > { %v9347_v11 = vpop.permute.xlu1 %4773 }
 0x387   : > { %11289 = vst [vmem:[#allocation32_spill] sm:$0xff] %v9347_v11 }
 0x38b   : > { %v7117_v48 = vpop.f32.mrb[28].mxu1 }
 0x38c   : > { %v9324_v55 = vadd.f32 %v7117_v48, %v9139_v21  ;;  %v4115_v62 = vpop.f32.mrb[29].mxu1 }
 0x38d   : > { %v7118_v51 = vpop.f32.mrb[30].mxu1  ;;  %v9333_v46 = vadd.f32 %v9139_v21, %v4115_v62  ;;  %v9351_v62 = vpop.permute.xlu1 %4784 }
 0x38e   : > { %11281 = vst [vmem:[#allocation24_spill] sm:$0xff] %v9324_v55  ;;  %v9329_v17 = vadd.f32 %v7118_v51, %v9139_v21  ;;  %v4118_v20 = vpop.f32.mrb[31].mxu1  ;;  %4246 = vmax.xlane.f32.xlu1 %v9324_v55  ;;  %v9345_v51 = vpop.permute.xlu0 %4769  ;;  %11291 = vst [vmem:[#allocation34_spill] sm:$0xff] %v9351_v62 }
 0x38f   : > { %11284 = vst [vmem:[#allocation27_spill] sm:$0xff] %v9333_v46  ;;  %v9339_v48 = vadd.f32 %v9139_v21, %v4118_v20  ;;  %11288 = vst [vmem:[#allocation31_spill] sm:$0xff] %v9345_v51 }
 0x390   : > { %11283 = vst [vmem:[#allocation26_spill] sm:$0xff] %v9329_v17  ;;  %4248 = vmax.xlane.f32.xlu0 %v9329_v17 }
 0x391   : > { %11286 = vst [vmem:[#allocation29_spill] sm:$0xff] %v9339_v48  ;;  %v9362_v36 = vpop.permute.xlu1 %4792 }
 0x392   : > { %4242 = vmax.xlane.f32.xlu1 %v9333_v46  ;;  %v9349_v55 = vpop.permute.xlu0 %4777  ;;  %11295 = vst [vmem:[#allocation38_spill] sm:$0xff] %v9362_v36 }
 0x393   : > { %11290 = vst [vmem:[#allocation33_spill] sm:$0xff] %v9349_v55 }
 0x394   : > { %4244 = vmax.xlane.f32.xlu0 %v9339_v48 }
 0x396   : > { %v9356_v63 = vpop.permute.xlu0 %4788 }
 0x397   : > { %11293 = vst [vmem:[#allocation36_spill] sm:$0xff] %v9356_v63 }
 0x39a   : > { %v9372_v62 = vpop.permute.xlu0 %4799 }
 0x39b   : > { %11298 = vst [vmem:[#allocation41_spill] sm:$0xff] %v9372_v62 }
 0x39e   : > { %v9377_v63 = vpop.permute.xlu0 %4807 }
 0x39f   : > { %11300 = vst [vmem:[#allocation43_spill] sm:$0xff] %v9377_v63 }
 0x3a0   : > { %v7121_v17 = vpop.f32.mrb[32].mxu1 }
 0x3a1   : > { %v9354_v60 = vadd.f32 %v7121_v17, %v9139_v21  ;;  %v4131_v20 = vpop.f32.mrb[33].mxu1 }
 0x3a2   : > { %v7122_v32 = vpop.f32.mrb[34].mxu1  ;;  %v9365_v55 = vadd.f32 %v9139_v21, %v4131_v20  ;;  %v9381_v36 = vpop.permute.xlu0 %4818 }
 0x3a3   : > { %11292 = vst [vmem:[#allocation35_spill] sm:$0xff] %v9354_v60  ;;  %v9359_v46 = vadd.f32 %v7122_v32, %v9139_v21  ;;  %v4134_v48 = vpop.f32.mrb[35].mxu1  ;;  %4254 = vmax.xlane.f32.xlu1 %v9354_v60  ;;  %v9375_v32 = vpop.permute.xlu1 %4803  ;;  %11302 = vst [vmem:[#allocation45_spill] sm:$0xff] %v9381_v36 }
 0x3a4   : > { %11296 = vst [vmem:[#allocation39_spill] sm:$0xff] %v9365_v55  ;;  %v9369_v17 = vadd.f32 %v9139_v21, %v4134_v48  ;;  %11299 = vst [vmem:[#allocation42_spill] sm:$0xff] %v9375_v32 }
 0x3a5   : > { %11294 = vst [vmem:[#allocation37_spill] sm:$0xff] %v9359_v46  ;;  %4256 = vmax.xlane.f32.xlu0 %v9359_v46 }
 0x3a6   : > { %11297 = vst [vmem:[#allocation40_spill] sm:$0xff] %v9369_v17  ;;  %v9388_v51 = vpop.permute.xlu0 %4829 }
 0x3a7   : > { %4250 = vmax.xlane.f32.xlu1 %v9365_v55  ;;  %v9379_v60 = vpop.permute.xlu1 %4814  ;;  %11305 = vst [vmem:[#allocation48_spill] sm:$0xff] %v9388_v51 }
 0x3a8   : > { %11301 = vst [vmem:[#allocation44_spill] sm:$0xff] %v9379_v60 }
 0x3a9   : > { %4252 = vmax.xlane.f32.xlu0 %v9369_v17 }
 0x3ab   : > { %v9383_v20 = vpop.permute.xlu1 %4822 }
 0x3ac   : > { %11303 = vst [vmem:[#allocation46_spill] sm:$0xff] %v9383_v20  ;;  %v9404_v20 = vpop.permute.xlu0 %4837 }
 0x3ad   : > { %11310 = vst [vmem:[#allocation53_spill] sm:$0xff] %v9404_v20 }
 0x3af   : > { %v9394_v62 = vpop.permute.xlu1 %4833 }
 0x3b0   : > { %11307 = vst [vmem:[#allocation50_spill] sm:$0xff] %v9394_v62  ;;  %v9409_v51 = vpop.permute.xlu0 %4848 }
 0x3b1   : > { %11312 = vst [vmem:[#allocation55_spill] sm:$0xff] %v9409_v51  ;;  %v11314_v51 = vlaneseq }
 0x3b4   : > { %v4183_v62 = vpop.xlane.xlu0 %4182 }
 0x3b8   : > { %v7125_v46 = vpop.f32.mrb[36].mxu1  ;;  %v4179_v42 = vpop.xlane.xlu0 %4178 }
 0x3b9   : > { %v9386_v48 = vadd.f32 %v7125_v46, %v9139_v21  ;;  %v4147_v11 = vpop.f32.mrb[37].mxu1 }
 0x3ba   : > { %v7126_v55 = vpop.f32.mrb[38].mxu1  ;;  %v9397_v36 = vadd.f32 %v9139_v21, %v4147_v11 }
 0x3bb   : > { %11304 = vst [vmem:[#allocation47_spill] sm:$0xff] %v9386_v48  ;;  %v9391_v17 = vadd.f32 %v7126_v55, %v9139_v21  ;;  %v4150_v32 = vpop.f32.mrb[39].mxu1  ;;  %4262 = vmax.xlane.f32.xlu1 %v9386_v48  ;;  %v9407_v55 = vpop.permute.xlu1 %4844 }
 0x3bc   : > { %11308 = vst [vmem:[#allocation51_spill] sm:$0xff] %v9397_v36  ;;  %v9401_v46 = vadd.f32 %v9139_v21, %v4150_v32  ;;  %11311 = vst [vmem:[#allocation54_spill] sm:$0xff] %v9407_v55  ;;  %v9421_v55 = vsub.f32 %v9142_v27, %v4183_v62  ;;  %v9439_v62 = vsub.f32 %v9149_v28, %v4179_v42 }
 0x3bd   : > { %11306 = vst [vmem:[#allocation49_spill] sm:$0xff] %v9391_v17  ;;  %4264 = vmax.xlane.f32.xlu0 %v9391_v17 }
 0x3be   : > { %11309 = vst [vmem:[#allocation52_spill] sm:$0xff] %v9401_v46  ;;  %v4326_v27 = vmul.f32 1.442695, %v9421_v55  ;;  %v4322_v28 = vmul.f32 1.442695, %v9439_v62 }
 0x3bf   : > { %4258 = vmax.xlane.f32.xlu1 %v9397_v36  ;;  %v9411_v48 = vpop.permute.xlu1 %4852 }
 0x3c0   : > { %11313 = vst [vmem:[#allocation56_spill] sm:$0xff] %v9411_v48  ;;  %v9424_v48 = vand.u32 127, %v11314_v51  ;;  %v4185_v51 = vpop.xlane.xlu0 %4184  ;;  %7460 = vpow2.f32 %v4326_v27 }
 0x3c1   : > { %4260 = vmax.xlane.f32.xlu0 %v9401_v46  ;;  %7462 = vpow2.f32 %v4322_v28 }
 0x3c2   : > { %11315 = vst [vmem:[#allocation57_spill] sm:$0xff] %v9424_v48  ;;  %vm4855_vm13 = vcmp.eq.s32.totalorder %v9424_v48, %v9224_v5  ;;  %vm4856_vm14 = vcmp.eq.s32.totalorder %v9424_v48, %v9214_v1  ;;  %vm4860_vm15 = vcmp.eq.s32.totalorder %v9424_v48, %v9233_v12  ;;  %v9455_v5 = vsub.f32 %v9157_v40, %v4185_v51 }
 0x3c3   : > { %v4181_v11 = vpop.xlane.xlu1 %4180  ;;  %v4904_v42 = vsel %vm4856_vm14, %v9421_v55, 0.0  ;;  %vm4854_vm0 = vcmp.eq.s32.totalorder %v9424_v48, %v9205_v61  ;;  %vm4858_vm1 = vcmp.eq.s32.totalorder %v9424_v48, %v9229_v59  ;;  %vm4857_vm2 = vcmp.eq.s32.totalorder %v9424_v48, %v9227_v6 }
 0x3c4   : > { %v4193_v1 = vpop.xlane.xlu0 %4192  ;;  %v4328_v40 = vmul.f32 1.442695, %v9455_v5  ;;  %v4905_v61 = vsel %vm4857_vm2, %v9455_v5, 0.0  ;;  %vm4861_vm3 = vcmp.eq.s32.totalorder %v9424_v48, %v9238_v14  ;;  %vm4859_vm4 = vcmp.eq.s32.totalorder %v9424_v48, %v9231_v8 }
 0x3c5   : > { %vm4864_vm5 = vcmp.eq.s32.totalorder %v9424_v48, %v9257_v24  ;;  %vm4862_vm6 = vcmp.eq.s32.totalorder %v9424_v48, %v9248_v16  ;;  %vm4865_vm7 = vcmp.eq.s32.totalorder %v9424_v48, %v9259_v25  ;;  %vm4863_vm8 = vcmp.eq.s32.totalorder %v9424_v48, %v9254_v18 }
 0x3c6   : > { %7464 = vpow2.f32 %v4328_v40  ;;  %vm4868_vm9 = vcmp.eq.s32.totalorder %v9424_v48, %v9272_v33  ;;  %vm4866_vm10 = vcmp.eq.s32.totalorder %v9424_v48, %v9261_v19  ;;  %vm4869_vm11 = vcmp.eq.s32.totalorder %v9424_v48, %v9278_v34 }
 0x3c7   : > { %v4191_v46 = vpop.xlane.xlu1 %4190  ;;  %vm4867_vm12 = vcmp.eq.s32.totalorder %v9424_v48, %v9263_v23  ;;  %vm4870_vm14 = vcmp.eq.s32.totalorder %v9424_v48, %v9285_v44  ;;  %vm4874_vm2 = vcmp.eq.s32.totalorder %v9424_v48, %v9296_v4 }
 0x3ca   : > { %v7461_v51 = vpop.eup %7460 }
 0x3d0   : > { %v7129_v60 = vpop.f32.mrb[40].mxu1 }
 0x3d1   : > { %v9414_v17 = vadd.f32 %v7129_v60, %v9139_v21  ;;  %v4163_v32 = vpop.f32.mrb[41].mxu1  ;;  %v9431_v60 = vsub.f32 %v9146_v22, %v4181_v11  ;;  %v4189_v11 = vpop.xlane.xlu0 %4188 }
 0x3d2   : > { %v7130_v63 = vpop.f32.mrb[42].mxu1  ;;  %v9427_v0 = vadd.f32 %v9139_v21, %v4163_v32  ;;  %v9445_v32 = vsub.f32 %v9154_v39, %v4191_v46  ;;  %v4902_v46 = vsel %vm4854_vm0, %v9439_v62, 0.0  ;;  %v9479_v6 = vsub.f32 %v9170_v30, %v4189_v11 }
 0x3d3   : > { %v9417_v36 = vadd.f32 %v7130_v63, %v9139_v21  ;;  %v4166_v20 = vpop.f32.mrb[43].mxu1  ;;  %4270 = vmax.xlane.f32.xlu1 %v9414_v17  ;;  %v4903_v22 = vsel %vm4855_vm13, %v9431_v60, 0.0  ;;  %v4324_v59 = vmul.f32 1.442695, %v9431_v60  ;;  %vm4872_vm13 = vcmp.eq.s32.totalorder %v9424_v48, %v9289_v45 }
 0x3d4   : > { %v9434_v63 = vadd.f32 %v9139_v21, %v4166_v20  ;;  %v4187_v21 = vpop.xlane.xlu1 %4186  ;;  %v4908_v20 = vsel %vm4860_vm15, %v9445_v32, 0.0  ;;  %vm4873_vm15 = vcmp.eq.s32.totalorder %v9424_v48, %v9291_v58  ;;  %vm4871_vm0 = vcmp.eq.s32.totalorder %v9424_v48, %v9287_v49 }
 0x3d5   : > { %4272 = vmax.xlane.f32.xlu0 %v9417_v36  ;;  %v9458_v39 = vsub.f32 %v9162_v41, %v4187_v21  ;;  %v9471_v41 = vsub.f32 %v9165_v26, %v4193_v1  ;;  %v7463_v21 = vpop.eup %7462  ;;  %7466 = vpow2.f32 %v4324_v59 }
 0x3d6   : > { %v7465_v40 = vpop.eup %7464 }
 0x3d7   : > { %4266 = vmax.xlane.f32.xlu1 %v9427_v0  ;;  %v4906_v12 = vsel %vm4858_vm1, %v9458_v39, 0.0  ;;  %v4909_v26 = vsel %vm4861_vm3, %v9471_v41, 0.0  ;;  %v4330_v30 = vmul.f32 1.442695, %v9458_v39  ;;  %v4336_v8 = vmul.f32 1.442695, %v9471_v41 }
 0x3d8   : > { %v4199_v27 = vpop.xlane.xlu1 %4198  ;;  %vm4876_vm1 = vcmp.eq.s32.totalorder %v9424_v48, %v9312_v29  ;;  %vm4877_vm3 = vcmp.eq.s32.totalorder %v9424_v48, %v9315_v37 }
 0x3d9   : > { %4268 = vmax.xlane.f32.xlu0 %v9434_v63  ;;  %v9483_v28 = vsub.f32 %v9174_v38, %v4199_v27 }
 0x3db   : > { %4952 = vadd.xlane.f32.xlu1 %v4903_v22  ;;  %v4334_v22 = vmul.f32 1.442695, %v9445_v32  ;;  %v4912_v1 = vsel %vm4864_vm5, %v9483_v28, 0.0  ;;  %v4342_v16 = vmul.f32 1.442695, %v9483_v28 }
 0x3dc   : > { %v4195_v14 = vpop.xlane.xlu1 %4194 }
 0x3dd   : > { %4954 = vadd.xlane.f32.xlu0 %v4904_v42  ;;  %v11210_v42 = vmov 0   ;;  %7468 = vpow2.f32 %v4334_v22  ;;  %v9494_v38 = vsub.f32 %v9181_v35, %v4195_v14 }
 0x3de   : > { %7225 = vset.pattern.permute.xlu0 %v11210_v42  ;;  %7226 = vset.pattern.permute.xlu1 %v11210_v42  ;;  %7470 = vpow2.f32 %v4330_v30  ;;  %v5303_v42 = vadd.s32 4294967280, %v9424_v48 }
 0x3df   : > { %4962 = vadd.xlane.f32.xlu1 %v4908_v20  ;;  %v4907_v20 = vsel %vm4859_vm4, %v9479_v6, 0.0  ;;  %v7467_v24 = vpop.eup %7466  ;;  %7472 = vpow2.f32 %v4336_v8  ;;  %v4338_v25 = vmul.f32 1.442695, %v9494_v38  ;;  %vm4875_vm4 = vcmp.eq.s32.totalorder %v9424_v48, %v9302_v13  ;;  %v11328_v13 = vld [vmem:[#allocation21_spill] sm:$0xff] }
 0x3e0   : > { %v4207_v11 = vpop.xlane.xlu1 %4206 }
 0x3e1   : > { %4950 = vadd.xlane.f32.xlu0 %v4902_v46  ;;  %v4201_v46 = vpop.xlane.xlu0 %4200 }
 0x3e3   : > { %4958 = vadd.xlane.f32.xlu1 %v4906_v12  ;;  %v4910_v12 = vsel %vm4862_vm6, %v9494_v38, 0.0  ;;  %vm4878_vm6 = vcmp.eq.s32.totalorder %v9424_v48, %v11328_v13 }
 0x3e5   : > { %4956 = vadd.xlane.f32.xlu0 %v4905_v61  ;;  %v9502_v61 = vsub.f32 %v9177_v31, %v4201_v46  ;;  %v4197_v35 = vpop.xlane.xlu0 %4196 }
 0x3e6   : > { %v9509_v59 = vsub.f32 %v9185_v43, %v4197_v35 }
 0x3e7   : > { %4422 = vadd.xlane.f32.xlu1 %v7461_v51  ;;  %v7469_v27 = vpop.eup %7468  ;;  %v4332_v51 = vmul.f32 1.442695, %v9479_v6  ;;  %v4913_v22 = vsel %vm4865_vm7, %v9502_v61, 0.0  ;;  %v4344_v18 = vmul.f32 1.442695, %v9502_v61 }
 0x3e8   : > { %v7471_v31 = vpop.eup %7470  ;;  %v4911_v14 = vsel %vm4863_vm8, %v9509_v59, 0.0 }
 0x3e9   : > { %4964 = vadd.xlane.f32.xlu0 %v4909_v26  ;;  %7474 = vpow2.f32 %v4332_v51  ;;  %v9513_v26 = vsub.f32 %v9190_v47, %v4207_v11  ;;  %v4209_v30 = vpop.xlane.xlu0 %4208 }
 0x3ea   : > { %7476 = vpow2.f32 %v4342_v16  ;;  %v9530_v46 = vsub.f32 %v9193_v57, %v4209_v30 }
 0x3eb   : > { %4418 = vadd.xlane.f32.xlu1 %v7463_v21  ;;  %11316 = vst [vmem:[#allocation58_spill] sm:$0xff] %v9513_v26  ;;  %v4203_v21 = vpop.xlane.xlu1 %4202  ;;  %v4916_v47 = vsel %vm4868_vm9, %v9513_v26, 0.0  ;;  %7478 = vpow2.f32 %v4338_v25  ;;  %v4350_v19 = vmul.f32 1.442695, %v9513_v26 }
 0x3ec   : > { %v9522_v43 = vsub.f32 %v9197_v52, %v4203_v21  ;;  %11317 = vst [vmem:[#allocation59_spill] sm:$0xff] %v9530_v46  ;;  %7480 = vpow2.f32 %v4344_v18  ;;  %v4917_v35 = vsel %vm4869_vm11, %v9530_v46, 0.0  ;;  %v4352_v23 = vmul.f32 1.442695, %v9530_v46 }
 0x3ed   : > { %4960 = vadd.xlane.f32.xlu0 %v4907_v20  ;;  %v7473_v20 = vpop.eup %7472  ;;  %v4205_v52 = vpop.xlane.xlu0 %4204 }
 0x3ee   : > { %v4346_v34 = vmul.f32 1.442695, %v9522_v43 }
 0x3ef   : > { %4970 = vadd.xlane.f32.xlu1 %v4912_v1  ;;  %v4914_v1 = vsel %vm4866_vm10, %v9522_v43, 0.0 }
 0x3f1   : > { %4424 = vadd.xlane.f32.xlu0 %v7465_v40  ;;  %v4215_v40 = vpop.xlane.xlu1 %4214  ;;  %v4217_v16 = vpop.xlane.xlu0 %4216 }
 0x3f2   : > { %v9541_v11 = vsub.f32 %v9208_v54, %v4215_v40  ;;  %v9558_v21 = vsub.f32 %v9211_v50, %v4217_v16 }
 0x3f3   : > { %4966 = vadd.xlane.f32.xlu1 %v4910_v12  ;;  %v7475_v33 = vpop.eup %7474  ;;  %v4340_v12 = vmul.f32 1.442695, %v9509_v59 }
 0x3f4   : > { %v7477_v8 = vpop.eup %7476  ;;  %11318 = vst [vmem:[#allocation60_spill] sm:$0xff] %v9541_v11  ;;  %v4920_v54 = vsel %vm4872_vm13, %v9541_v11, 0.0  ;;  %11320 = vst [vmem:[#allocation62_spill] sm:$0xff] %v9558_v21  ;;  %v4358_v44 = vmul.f32 1.442695, %v9541_v11 }
 0x3f5   : > { %4420 = vadd.xlane.f32.xlu0 %v7467_v24  ;;  %v9537_v24 = vsub.f32 %v9201_v53, %v4205_v52  ;;  %v7479_v57 = vpop.eup %7478  ;;  %7482 = vpow2.f32 %v4340_v12  ;;  %v4360_v49 = vmul.f32 1.442695, %v9558_v21 }
 0x3f6   : > { %7484 = vpow2.f32 %v4350_v19 }
 0x3f7   : > { %4430 = vadd.xlane.f32.xlu1 %v7469_v27  ;;  %v4211_v27 = vpop.xlane.xlu1 %4210  ;;  %v4915_v51 = vsel %vm4867_vm12, %v9537_v24, 0.0  ;;  %7486 = vpow2.f32 %v4346_v34 }
 0x3f8   : > { %v9550_v53 = vsub.f32 %v9217_v2, %v4211_v27  ;;  %v4213_v2 = vpop.xlane.xlu0 %4212  ;;  %7488 = vpow2.f32 %v4352_v23 }
 0x3f9   : > { %4972 = vadd.xlane.f32.xlu0 %v4913_v22  ;;  %v7481_v22 = vpop.eup %7480  ;;  %v9565_v30 = vsub.f32 %v9221_v56, %v4213_v2 }
 0x3fa   : > { %11319 = vst [vmem:[#allocation61_spill] sm:$0xff] %v9550_v53  ;;  %v4354_v58 = vmul.f32 1.442695, %v9550_v53 }
 0x3fb   : > { %4426 = vadd.xlane.f32.xlu1 %v7471_v31  ;;  %v4918_v31 = vsel %vm4870_vm14, %v9550_v53, 0.0  ;;  %v4223_v25 = vpop.xlane.xlu1 %4222  ;;  %11321 = vst [vmem:[#allocation63_spill] sm:$0xff] %v9565_v30 }
 0x3fc   : > { %v9569_v18 = vsub.f32 %v9236_v3, %v4223_v25  ;;  %v4225_v52 = vpop.xlane.xlu0 %4224 }
 0x3fd   : > { %4968 = vadd.xlane.f32.xlu0 %v4911_v14  ;;  %v9586_v12 = vsub.f32 %v9241_v10, %v4225_v52  ;;  %v11331_v52 = vld [vmem:[#allocation16_spill] sm:$0xff] }
 0x3fe   : > { %11322 = vst [vmem:[#allocation64_spill] sm:$0xff] %v9569_v18  ;;  %v4924_v3 = vsel %vm4876_vm1, %v9569_v18, 0.0  ;;  %v4366_v4 = vmul.f32 1.442695, %v9569_v18 }
 0x3ff   : > { %4978 = vadd.xlane.f32.xlu1 %v4916_v47  ;;  %v7483_v45 = vpop.eup %7482  ;;  %v4348_v47 = vmul.f32 1.442695, %v9537_v24  ;;  %11324 = vst [vmem:[#allocation66_spill] sm:$0xff] %v9586_v12  ;;  %v4925_v34 = vsel %vm4877_vm3, %v9586_v12, 0.0  ;;  %v4368_v2 = vmul.f32 1.442695, %v9586_v12 }
 0x400   : > { %v7485_v14 = vpop.eup %7484  ;;  %v11360_v12 = vld [vmem:[#allocation47_spill] sm:$0xff] }
 0x401   : > { %4432 = vadd.xlane.f32.xlu0 %v7473_v20  ;;  %v4921_v20 = vsel %vm4873_vm15, %v9558_v21, 0.0  ;;  %v7487_v50 = vpop.eup %7486  ;;  %7490 = vpow2.f32 %v4348_v47  ;;  %v11329_v47 = vld [vmem:[#allocation14_spill] sm:$0xff] }
 0x402   : > { %7492 = vpow2.f32 %v4358_v44  ;;  %v7489_v40 = vpop.eup %7488 }
 0x403   : > { %4974 = vadd.xlane.f32.xlu1 %v4914_v1  ;;  %v4219_v1 = vpop.xlane.xlu1 %4218  ;;  %7494 = vpow2.f32 %v4354_v58 }
 0x404   : > { %v9578_v56 = vsub.f32 %v9245_v15, %v4219_v1  ;;  %v4221_v15 = vpop.xlane.xlu0 %4220  ;;  %7496 = vpow2.f32 %v4360_v49 }
 0x405   : > { %4428 = vadd.xlane.f32.xlu0 %v7475_v33  ;;  %v4919_v33 = vsel %vm4871_vm0, %v9565_v30, 0.0  ;;  %v9593_v27 = vsub.f32 %v9251_v9, %v4221_v15  ;;  %v11326_v9 = vld [vmem:[#allocation23_spill] sm:$0xff] }
 0x406   : > { %11323 = vst [vmem:[#allocation65_spill] sm:$0xff] %v9578_v56  ;;  %v4362_v37 = vmul.f32 1.442695, %v9578_v56  ;;  %vm4880_vm5 = vcmp.eq.s32.totalorder %v9424_v48, %v11326_v9 }
 0x407   : > { %4438 = vadd.xlane.f32.xlu1 %v7477_v8  ;;  %v4922_v8 = vsel %vm4874_vm2, %v9578_v56, 0.0  ;;  %v4231_v19 = vpop.xlane.xlu1 %4230  ;;  %11325 = vst [vmem:[#allocation67_spill] sm:$0xff] %v9593_v27  ;;  %v4923_v16 = vsel %vm4875_vm4, %v9593_v27, 0.0  ;;  %v4364_v58 = vmul.f32 1.442695, %v9593_v27  ;;  %v11369_v56 = vmov 0  }
 0x409   : > { %4980 = vadd.xlane.f32.xlu0 %v4917_v35 }
 0x40b   : > { %4434 = vadd.xlane.f32.xlu1 %v7479_v57  ;;  %v7491_v29 = vpop.eup %7490  ;;  %v4356_v57 = vmul.f32 1.442695, %v9565_v30  ;;  %v11370_v30 = vld [vmem:[#allocation45_spill] sm:$0xff] }
 0x40c   : > { %v7493_v35 = vpop.eup %7492 }
 0x40d   : > { %4976 = vadd.xlane.f32.xlu0 %v4915_v51  ;;  %v7495_v10 = vpop.eup %7494  ;;  %7498 = vpow2.f32 %v4356_v57  ;;  %v9597_v51 = vsub.f32 %v9266_v7, %v4231_v19 }
 0x40e   : > { %7500 = vpow2.f32 %v4366_v4 }
 0x40f   : > { %4986 = vadd.xlane.f32.xlu1 %v4920_v54  ;;  %v4227_v54 = vpop.xlane.xlu1 %4226  ;;  %v4928_v7 = vsel %vm4880_vm5, %v9597_v51, 0.0  ;;  %7502 = vpow2.f32 %v4362_v37 }
 0x410   : > { %7504 = vpow2.f32 %v4368_v2 }
 0x411   : > { %4440 = vadd.xlane.f32.xlu0 %v7481_v22  ;;  %v11327_v22 = vld [vmem:[#allocation15_spill] sm:$0xff]  ;;  %7506 = vpow2.f32 %v4364_v58 }
 0x412   : > { %v9606_v23 = vsub.f32 %v11327_v22, %v4227_v54  ;;  %v11335_v54 = vld [vmem:[#allocation19_spill] sm:$0xff] }
 0x413   : > { %4982 = vadd.xlane.f32.xlu1 %v4918_v31  ;;  %v4233_v31 = vpop.xlane.xlu0 %4232 }
 0x414   : > { %v4926_v25 = vsel %vm4878_vm6, %v9606_v23, 0.0  ;;  %v9614_v44 = vsub.f32 %v11329_v47, %v4233_v31  ;;  %v4370_v4 = vmul.f32 1.442695, %v9606_v23 }
 0x415   : > { %4436 = vadd.xlane.f32.xlu0 %v7483_v45  ;;  %v7497_v45 = vpop.eup %7496 }
 0x416   : > { %v4376_v31 = vmul.f32 1.442695, %v9614_v44 }
 0x417   : > { %4446 = vadd.xlane.f32.xlu1 %v7485_v14  ;;  %v7499_v14 = vpop.eup %7498 }
 0x418   : > { %v7501_v1 = vpop.eup %7500 }
 0x419   : > { %4988 = vadd.xlane.f32.xlu0 %v4921_v20  ;;  %v4229_v20 = vpop.xlane.xlu0 %4228 }
 0x41b   : > { %4442 = vadd.xlane.f32.xlu1 %v7487_v50  ;;  %v4239_v50 = vpop.xlane.xlu1 %4238 }
 0x41d   : > { %4984 = vadd.xlane.f32.xlu0 %v4919_v33  ;;  %v11330_v33 = vld [vmem:[#allocation25_spill] sm:$0xff]  ;;  %v4241_v19 = vpop.xlane.xlu0 %4240 }
 0x41e   : > { %vm4881_vm7 = vcmp.eq.s32.totalorder %v9424_v48, %v11330_v33  ;;  %v11339_v33 = vld [vmem:[#allocation20_spill] sm:$0xff] }
 0x41f   : > { %4994 = vadd.xlane.f32.xlu1 %v4924_v3  ;;  %v4374_v3 = vmul.f32 1.442695, %v9597_v51  ;;  %v4929_v49 = vsel %vm4881_vm7, %v9614_v44, 0.0  ;;  %v4235_v57 = vpop.xlane.xlu1 %4234 }
 0x420   : > { %v9634_v37 = vsub.f32 %v11335_v54, %v4235_v57  ;;  %v11341_v57 = vld [vmem:[#allocation30_spill] sm:$0xff]  ;;  %v11342_v54 = vld [vmem:[#allocation36_spill] sm:$0xff] }
 0x421   : > { %4448 = vadd.xlane.f32.xlu0 %v7489_v40  ;;  %v9621_v40 = vsub.f32 %v11331_v52, %v4229_v20  ;;  %7508 = vpow2.f32 %v4374_v3  ;;  %v4237_v22 = vpop.xlane.xlu0 %4236  ;;  %vm4883_vm12 = vcmp.eq.s32.totalorder %v9424_v48, %v11341_v57  ;;  %vm4888_vm13 = vcmp.eq.s32.totalorder %v9424_v48, %v11342_v54  ;;  %v11348_v57 = vld [vmem:[#allocation29_spill] sm:$0xff] }
 0x422   : > { %7510 = vpow2.f32 %v4370_v4  ;;  %v9649_v3 = vsub.f32 %v11339_v33, %v4237_v22  ;;  %v4378_v4 = vmul.f32 1.442695, %v9634_v37 }
 0x423   : > { %4990 = vadd.xlane.f32.xlu1 %v4922_v8  ;;  %v7503_v8 = vpop.eup %7502  ;;  %7512 = vpow2.f32 %v4376_v31 }
 0x424   : > { %v7505_v9 = vpop.eup %7504 }
 0x425   : > { %4444 = vadd.xlane.f32.xlu0 %v7491_v29  ;;  %v11332_v29 = vld [vmem:[#allocation17_spill] sm:$0xff]  ;;  %v7507_v2 = vpop.eup %7506  ;;  %v4249_v47 = vpop.xlane.xlu0 %4248 }
 0x426   : > { %v9625_v15 = vsub.f32 %v11332_v29, %v4239_v50  ;;  %v4372_v50 = vmul.f32 1.442695, %v9621_v40  ;;  %v11340_v29 = vld [vmem:[#allocation24_spill] sm:$0xff] }
 0x427   : > { %4454 = vadd.xlane.f32.xlu1 %v7493_v35  ;;  %v11333_v35 = vld [vmem:[#allocation22_spill] sm:$0xff] }
 0x428   : > { %vm4879_vm8 = vcmp.eq.s32.totalorder %v9424_v48, %v11333_v35  ;;  %v4382_v58 = vmul.f32 1.442695, %v9625_v15  ;;  %7514 = vpow2.f32 %v4372_v50  ;;  %v11345_v50 = vld [vmem:[#allocation26_spill] sm:$0xff] }
 0x429   : > { %4996 = vadd.xlane.f32.xlu0 %v4925_v34  ;;  %v4927_v34 = vsel %vm4879_vm8, %v9621_v40, 0.0  ;;  %v4245_v35 = vpop.xlane.xlu0 %4244  ;;  %vm4894_vm8 = vcmp.eq.s32.totalorder %v9424_v48, %v11370_v30 }
 0x42a   : > { %7516 = vpow2.f32 %v4382_v58 }
 0x42b   : > { %4450 = vadd.xlane.f32.xlu1 %v7495_v10  ;;  %v11334_v10 = vld [vmem:[#allocation31_spill] sm:$0xff]  ;;  %v7509_v20 = vpop.eup %7508  ;;  %7518 = vpow2.f32 %v4378_v4  ;;  %v9677_v4 = vsub.f32 %v11348_v57, %v4245_v35 }
 0x42c   : > { %vm4884_vm9 = vcmp.eq.s32.totalorder %v9424_v48, %v11334_v10  ;;  %v4931_v10 = vsel %vm4883_vm12, %v9649_v3, 0.0 }
 0x42d   : > { %4992 = vadd.xlane.f32.xlu0 %v4923_v16  ;;  %v4932_v16 = vsel %vm4884_vm9, %v9625_v15, 0.0 }
 0x42f   : > { %5002 = vadd.xlane.f32.xlu1 %v4928_v7  ;;  %v11336_v7 = vld [vmem:[#allocation28_spill] sm:$0xff] }
 0x430   : > { %vm4882_vm10 = vcmp.eq.s32.totalorder %v9424_v48, %v11336_v7 }
 0x431   : > { %4456 = vadd.xlane.f32.xlu0 %v7497_v45  ;;  %v4247_v45 = vpop.xlane.xlu1 %4246  ;;  %v4930_v13 = vsel %vm4882_vm10, %v9634_v37, 0.0  ;;  %vm11262_vm10 = vcmask 130112  }
 0x432   : > { %v4257_v22 = vpop.xlane.xlu0 %4256 }
 0x433   : > { %4998 = vadd.xlane.f32.xlu1 %v4926_v25  ;;  %v11337_v25 = vld [vmem:[#allocation18_spill] sm:$0xff] }
 0x435   : > { %4452 = vadd.xlane.f32.xlu0 %v7499_v14  ;;  %v9642_v14 = vsub.f32 %v11337_v25, %v4241_v19  ;;  %v4243_v52 = vpop.xlane.xlu1 %4242  ;;  %v9653_v19 = vsub.f32 %v11340_v29, %v4247_v45  ;;  %v11344_v45 = vld [vmem:[#allocation33_spill] sm:$0xff] }
 0x436   : > { %vm4886_vm14 = vcmp.eq.s32.totalorder %v9424_v48, %v11344_v45  ;;  %v4253_v58 = vpop.xlane.xlu0 %4252 }
 0x437   : > { %4462 = vadd.xlane.f32.xlu1 %v7501_v1  ;;  %v11338_v1 = vld [vmem:[#allocation32_spill] sm:$0xff]  ;;  %v4936_v7 = vsel %vm4888_vm13, %v9653_v19, 0.0  ;;  %v4390_v29 = vmul.f32 1.442695, %v9653_v19 }
 0x438   : > { %vm4885_vm11 = vcmp.eq.s32.totalorder %v9424_v48, %v11338_v1  ;;  %v9670_v1 = vsub.f32 %v11345_v50, %v4249_v47 }
 0x439   : > { %5004 = vadd.xlane.f32.xlu0 %v4929_v49  ;;  %v4933_v49 = vsel %vm4885_vm11, %v9642_v14, 0.0  ;;  %vm11261_vm11 = vcmask 195712  }
 0x43a   : > { %11346 = vst [vmem:[#allocation23_spill] sm:$0xff] %v9670_v1  ;;  %v4392_v57 = vmul.f32 1.442695, %v9670_v1 }
 0x43b   : > { %4458 = vadd.xlane.f32.xlu1 %v7503_v8  ;;  %v7511_v8 = vpop.eup %7510 }
 0x43c   : > { %v7513_v31 = vpop.eup %7512 }
 0x43d   : > { %5000 = vadd.xlane.f32.xlu0 %v4927_v34  ;;  %v4255_v34 = vpop.xlane.xlu1 %4254 }
 0x43f   : > { %5010 = vadd.xlane.f32.xlu1 %v4932_v16  ;;  %v11343_v16 = vld [vmem:[#allocation27_spill] sm:$0xff] }
 0x441   : > { %4464 = vadd.xlane.f32.xlu0 %v7505_v9  ;;  %v9662_v9 = vsub.f32 %v11343_v16, %v4243_v52  ;;  %v4380_v52 = vmul.f32 1.442695, %v9649_v3  ;;  %v11349_v16 = vld [vmem:[#allocation35_spill] sm:$0xff] }
 0x443   : > { %5006 = vadd.xlane.f32.xlu1 %v4930_v13  ;;  %v4384_v13 = vmul.f32 1.442695, %v9642_v14  ;;  %v4934_v25 = vsel %vm4886_vm14, %v9662_v9, 0.0  ;;  %v4386_v45 = vmul.f32 1.442695, %v9662_v9 }
 0x445   : > { %4460 = vadd.xlane.f32.xlu0 %v7507_v2  ;;  %v4251_v2 = vpop.xlane.xlu1 %4250  ;;  %7520 = vpow2.f32 %v4384_v13 }
 0x446   : > { %7522 = vpow2.f32 %v4380_v52 }
 0x447   : > { %4470 = vadd.xlane.f32.xlu1 %v7509_v20  ;;  %v7515_v20 = vpop.eup %7514  ;;  %7524 = vpow2.f32 %v4390_v29  ;;  %v11354_v29 = vld [vmem:[#allocation41_spill] sm:$0xff] }
 0x448   : > { %v7517_v33 = vpop.eup %7516  ;;  %7526 = vpow2.f32 %v4386_v45  ;;  %vm4890_vm2 = vcmp.eq.s32.totalorder %v9424_v48, %v11354_v29  ;;  %v11358_v29 = vld [vmem:[#allocation40_spill] sm:$0xff] }
 0x449   : > { %5012 = vadd.xlane.f32.xlu0 %v4933_v49  ;;  %v4263_v49 = vpop.xlane.xlu1 %4262  ;;  %v7519_v54 = vpop.eup %7518  ;;  %7528 = vpow2.f32 %v4392_v57 }
 0x44a   : > { %v9725_v27 = vsub.f32 %v11360_v12, %v4263_v49 }
 0x44b   : > { %4466 = vadd.xlane.f32.xlu1 %v7511_v8  ;;  %v11347_v8 = vld [vmem:[#allocation38_spill] sm:$0xff] }
 0x44c   : > { %vm4889_vm15 = vcmp.eq.s32.totalorder %v9424_v48, %v11347_v8  ;;  %11361 = vst [vmem:[#allocation25_spill] sm:$0xff] %v9725_v27 }
 0x44d   : > { %5008 = vadd.xlane.f32.xlu0 %v4931_v10  ;;  %v9679_v10 = vpop.xlane.xlu0 %4264  ;;  %v4937_v47 = vsel %vm4889_vm15, %v9670_v1, 0.0  ;;  %v4259_v13 = vpop.xlane.xlu1 %4258 }
 0x44f   : > { %5018 = vadd.xlane.f32.xlu1 %v4936_v7  ;;  %v9683_v7 = vsub.f32 %v11349_v16, %v4255_v34  ;;  %v7521_v52 = vpop.eup %7520  ;;  %v11355_v16 = vld [vmem:[#allocation37_spill] sm:$0xff] }
 0x451   : > { %4472 = vadd.xlane.f32.xlu0 %v7513_v31  ;;  %11350 = vst [vmem:[#allocation15_spill] sm:$0xff] %v9683_v7  ;;  %v11351_v31 = vld [vmem:[#allocation34_spill] sm:$0xff] }
 0x452   : > { %vm4887_vm0 = vcmp.eq.s32.totalorder %v9424_v48, %v11351_v31  ;;  %v9706_v31 = vsub.f32 %v11355_v16, %v4257_v22 }
 0x453   : > { %5014 = vadd.xlane.f32.xlu1 %v4934_v25  ;;  %v4935_v35 = vsel %vm4887_vm0, %v9677_v4, 0.0  ;;  %v11352_v25 = vld [vmem:[#allocation43_spill] sm:$0xff] }
 0x454   : > { %vm4892_vm1 = vcmp.eq.s32.totalorder %v9424_v48, %v11352_v25  ;;  %11356 = vst [vmem:[#allocation21_spill] sm:$0xff] %v9706_v31  ;;  %v4388_v25 = vmul.f32 1.442695, %v9677_v4 }
 0x455   : > { %4468 = vadd.xlane.f32.xlu0 %v7515_v20  ;;  %v11353_v20 = vld [vmem:[#allocation39_spill] sm:$0xff]  ;;  %v4940_v34 = vsel %vm4892_vm1, %v9683_v7, 0.0 }
 0x456   : > { %v9692_v50 = vsub.f32 %v11353_v20, %v4251_v2  ;;  %7530 = vpow2.f32 %v4388_v25 }
 0x457   : > { %4478 = vadd.xlane.f32.xlu1 %v7517_v33  ;;  %v9694_v33 = vpop.xlane.xlu0 %4260 }
 0x458   : > { %v4938_v2 = vsel %vm4890_vm2, %v9692_v50, 0.0 }
 0x459   : > { %5020 = vadd.xlane.f32.xlu0 %v4937_v47 }
 0x45b   : > { %4474 = vadd.xlane.f32.xlu1 %v7519_v54  ;;  %v7523_v54 = vpop.eup %7522 }
 0x45c   : > { %v7525_v45 = vpop.eup %7524 }
 0x45d   : > { %5016 = vadd.xlane.f32.xlu0 %v4935_v35  ;;  %v7527_v57 = vpop.eup %7526 }
 0x45f   : > { %5026 = vadd.xlane.f32.xlu1 %v4940_v34  ;;  %v11357_v34 = vld [vmem:[#allocation44_spill] sm:$0xff] }
 0x460   : > { %v9697_v8 = vpop.xlane.xlu1 %4270  ;;  %vm4893_vm3 = vcmp.eq.s32.totalorder %v9424_v48, %v11357_v34  ;;  %v11362_v34 = vld [vmem:[#allocation42_spill] sm:$0xff] }
 0x461   : > { %4480 = vadd.xlane.f32.xlu0 %v7521_v52  ;;  %v4398_v52 = vmul.f32 1.442695, %v9683_v7  ;;  %v4941_v16 = vsel %vm4893_vm3, %v9706_v31, 0.0  ;;  %vm4891_vm4 = vcmp.eq.s32.totalorder %v9424_v48, %v11362_v34  ;;  %v11365_v34 = vld [vmem:[#allocation48_spill] sm:$0xff]  ;;  %vm11260_vm3 = vcmask 1041409  }
 0x462   : > { %v9702_v47 = vpop.xlane.xlu0 %4272  ;;  %vm4896_vm7 = vcmp.eq.s32.totalorder %v9424_v48, %v11365_v34 }
 0x463   : > { %5022 = vadd.xlane.f32.xlu1 %v4938_v2  ;;  %v9717_v2 = vsub.f32 %v11358_v29, %v4253_v58  ;;  %7532 = vpow2.f32 %v4398_v52  ;;  %v4394_v58 = vmul.f32 1.442695, %v9692_v50  ;;  %v4944_v7 = vsel %vm4896_vm7, %v9725_v27, 0.0 }
 0x464   : > { %v9708_v35 = vpop.xlane.xlu1 %4266 }
 0x465   : > { %4476 = vadd.xlane.f32.xlu0 %v7523_v54  ;;  %11359 = vst [vmem:[#allocation14_spill] sm:$0xff] %v9717_v2  ;;  %v5296_v54 = vadd.s32 4294967288, %v9424_v48  ;;  %v4939_v25 = vsel %vm4891_vm4, %v9717_v2, 0.0  ;;  %7534 = vpow2.f32 %v4394_v58 }
 0x466   : > { %v9711_v20 = vpop.xlane.xlu0 %4268 }
 0x467   : > { %4486 = vadd.xlane.f32.xlu1 %v7525_v45 }
 0x468   : > { %v9719_v22 = vpop.xlane.xlu1 %4952 }
 0x469   : > { %5028 = vadd.xlane.f32.xlu0 %v4941_v16  ;;  %vm5197_vm5 = vcmp.ge.f32.partialorder %v9719_v22, 0.0  ;;  %v11363_v16 = vld [vmem:[#allocation12_spill] sm:$0xff] }
 0x46a   : > { %v9727_v45 = vpop.xlane.xlu0 %4954  ;;  %v9739_v12 = vsub.s32 %v9424_v48, %v11363_v16  ;;  %v9742_v49 = vsub.s32 %v5296_v54, %v11363_v16  ;;  %v9747_v52 = vsub.s32 %v5303_v42, %v11363_v16  ;;  %v5245_v11 = vsel %vm5197_vm5, 1, %v11369_v56  ;;  %v7529_v42 = vpop.eup %7528 }
 0x46b   : > { %4482 = vadd.xlane.f32.xlu1 %v7527_v57  ;;  %vm5198_vm6 = vcmp.ge.f32.partialorder %v9727_v45, 0.0  ;;  %v11367_v57 = vld [vmem:[#allocation51_spill] sm:$0xff]  ;;  %v4406_v54 = vmul.f32 1.442695, %v9725_v27  ;;  %v4400_v16 = vmul.f32 1.442695, %v9706_v31 }
 0x46c   : > { %v9734_v29 = vpop.xlane.xlu1 %4962  ;;  %11364 = vst [vmem:[#allocation16_spill] sm:$0xff] %v9739_v12  ;;  %11366 = vst [vmem:[#allocation17_spill] sm:$0xff] %v9747_v52  ;;  %v9750_v18 = vsub.f32 %v11367_v57, %v4259_v13  ;;  %v5246_v34 = vsel %vm5198_vm6, 1, %v11369_v56  ;;  %v5300_v57 = vrot.slane %v5245_v11, %v9742_v49  ;;  %v11371_v27 = vld [vmem:[#allocation49_spill] sm:$0xff]  ;;  %vm11259_vm5 = vcmask 1042434  }
 0x46d   : > { %5024 = vadd.xlane.f32.xlu0 %v4939_v25  ;;  %v5307_v58 = vrot.slane %v5246_v34, %v9747_v52  ;;  %7536 = vpow2.f32 %v4406_v54  ;;  %vm5202_vm13 = vcmp.ge.f32.partialorder %v9734_v29, 0.0  ;;  %v9786_v34 = vsub.f32 %v9414_v17, %v9697_v8 }
 0x46e   : > { %11368 = vst [vmem:[#allocation22_spill] sm:$0xff] %v9750_v18  ;;  %v9753_v21 = vpop.xlane.xlu0 %4950  ;;  %v4942_v11 = vsel %vm4894_vm8, %v9750_v18, 0.0  ;;  %v5250_v17 = vsel %vm5202_vm13, 1, %v11369_v56  ;;  %vm5046_vm13 = vcmp.lt.s32.totalorder %v9424_v48, 50 }
 0x46f   : > { %vm5196_vm9 = vcmp.ge.f32.partialorder %v9753_v21, 0.0  ;;  %5034 = vadd.xlane.f32.xlu1 %v4944_v7  ;;  %v9770_v7 = vsub.f32 %v11371_v27, %v9679_v10  ;;  %v7531_v27 = vpop.eup %7530  ;;  %v4402_v10 = vmul.f32 1.442695, %v9750_v18  ;;  %11373 = vst [vmem:[#allocation19_spill] sm:$0xff] %v9786_v34 }
 0x470   : > { %v5244_v13 = vsel %vm5196_vm9, 1, %v11369_v56  ;;  %v9762_v25 = vpop.xlane.xlu1 %4958 }
 0x471   : > { %v5295_v46 = vrot.slane %v5244_v13, %v9739_v12  ;;  %vm5200_vm12 = vcmp.ge.f32.partialorder %v9762_v25, 0.0  ;;  %4488 = vadd.xlane.f32.xlu0 %v7529_v42  ;;  %11372 = vst [vmem:[#allocation31_spill] sm:$0xff] %v9770_v7 }
 0x472   : > { %v5248_v53 = vsel %vm5200_vm12, 1, %v11369_v56  ;;  %v9774_v1 = vpop.xlane.xlu0 %4956  ;;  %vm11258_vm12 = vcmask 1043459  }
 0x473   : > { %v5302_v42 = vsel %vm11262_vm10, %v5300_v57, %v5295_v46  ;;  %vm5199_vm14 = vcmp.ge.f32.partialorder %v9774_v1, 0.0  ;;  %5030 = vadd.xlane.f32.xlu1 %v4942_v11  ;;  %v5317_v54 = vrot.slane %v5248_v53, %v9742_v49  ;;  %v7533_v46 = vpop.eup %7532  ;;  %v11374_v57 = vld [vmem:[#allocation50_spill] sm:$0xff]  ;;  %v4396_v11 = vmul.f32 1.442695, %v9717_v2 }
 0x474   : > { %v5309_v13 = vsel %vm11261_vm11, %v5307_v58, %v5302_v42  ;;  %v5247_v30 = vsel %vm5199_vm14, 1, %v11369_v56  ;;  %v4423_v31 = vpop.xlane.xlu1 %4422  ;;  %vm4897_vm15 = vcmp.eq.s32.totalorder %v9424_v48, %v11374_v57  ;;  %v11375_v58 = vld [vmem:[#allocation52_spill] sm:$0xff] }
 0x475   : > { %v5313_v26 = vrot.slane %v5247_v30, %v9739_v12  ;;  %7538 = vlog2.f32 %v4423_v31  ;;  %4484 = vadd.xlane.f32.xlu0 %v7531_v27  ;;  %v9802_v53 = vsub.f32 %v11375_v58, %v9694_v33  ;;  %v4945_v42 = vsel %vm4897_vm15, %v9770_v7, 0.0 }
 0x476   : > { %7540 = vpow2.f32 %v4400_v16  ;;  %v9798_v8 = vpop.xlane.xlu0 %4964  ;;  %v4414_v16 = vmul.f32 1.442695, %v9786_v34  ;;  %v9810_v27 = vsub.f32 %v9427_v0, %v9708_v35  ;;  %v5327_v33 = vrot.slane %v5250_v17, %v9739_v12 }
 0x477   : > { %11376 = vst [vmem:[#allocation28_spill] sm:$0xff] %v9802_v53  ;;  %v5318_v31 = vsel %vm11262_vm10, %v5317_v54, %v5313_v26  ;;  %vm5203_vm0 = vcmp.ge.f32.partialorder %v9798_v8, 0.0  ;;  %4494 = vadd.xlane.f32.xlu1 %v7533_v46  ;;  %7542 = vpow2.f32 %v4402_v10  ;;  %v7535_v26 = vpop.eup %7534  ;;  %v4408_v54 = vmul.f32 1.442695, %v9770_v7  ;;  %v11377_v46 = vld [vmem:[#allocation46_spill] sm:$0xff] }
 0x478   : > { %v5251_v30 = vsel %vm5203_vm0, 1, %v11369_v56  ;;  %v4419_v57 = vpop.xlane.xlu1 %4418  ;;  %vm4895_vm1 = vcmp.eq.s32.totalorder %v9424_v48, %v11377_v46  ;;  %v4410_v35 = vmul.f32 1.442695, %v9810_v27 }
 0x479   : > { %v5331_v58 = vrot.slane %v5251_v30, %v9742_v49  ;;  %7544 = vlog2.f32 %v4419_v57  ;;  %5036 = vadd.xlane.f32.xlu0 %v4945_v42  ;;  %v7537_v30 = vpop.eup %7536  ;;  %v4404_v57 = vmul.f32 1.442695, %v9802_v53 }
 0x47a   : > { %7546 = vpow2.f32 %v4396_v11  ;;  %v9816_v10 = vpop.xlane.xlu0 %4960  ;;  %v4943_v11 = vsel %vm4895_vm1, %v9802_v53, 0.0 }
 0x47b   : > { %v5332_v0 = vsel %vm11262_vm10, %v5331_v58, %v5327_v33  ;;  %vm5201_vm2 = vcmp.ge.f32.partialorder %v9816_v10, 0.0  ;;  %4490 = vadd.xlane.f32.xlu1 %v7535_v26  ;;  %7548 = vpow2.f32 %v4414_v16  ;;  %v9831_v33 = vsub.f32 %v9417_v36, %v9702_v47 }
 0x47c   : > { %v5249_v17 = vsel %vm5201_vm2, 1, %v11369_v56  ;;  %v9824_v42 = vpop.xlane.xlu1 %4970  ;;  %7550 = vpow2.f32 %v4408_v54 }
 0x47d   : > { %v5322_v46 = vrot.slane %v5249_v17, %v9747_v52  ;;  %5032 = vadd.xlane.f32.xlu0 %v4943_v11  ;;  %11378 = vst [vmem:[#allocation18_spill] sm:$0xff] %v9831_v33  ;;  %v4416_v47 = vmul.f32 1.442695, %v9831_v33  ;;  %vm5206_vm6 = vcmp.ge.f32.partialorder %v9824_v42, 0.0 }
 0x47e   : > { %v4425_v16 = vpop.xlane.xlu0 %4424 }
 0x47f   : > { %v7539_v58 = vpop.eup %7538  ;;  %v5323_v26 = vsel %vm11261_vm11, %v5322_v46, %v5318_v31  ;;  %7552 = vlog2.f32 %v4425_v16  ;;  %4502 = vadd.xlane.f32.xlu1 %v7537_v30  ;;  %v9843_v31 = vsub.f32 %v9434_v63, %v9711_v20 }
 0x480   : > { %v7541_v34 = vpop.eup %7540  ;;  %7554 = vpow2.f32 %v4410_v35  ;;  %v9834_v7 = vmul.f32 0.6931472, %v7539_v58  ;;  %v5521_v53 = vsel %vm11260_vm3, %v5323_v26, %v5309_v13  ;;  %v9837_v18 = vpop.xlane.xlu1 %4966 }
 0x481   : > { %7556 = vpow2.f32 %v4404_v57  ;;  %vm5204_vm4 = vcmp.ge.f32.partialorder %v9837_v18, 0.0  ;;  %4496 = vadd.xlane.f32.xlu0 %v7541_v34  ;;  %v7543_v36 = vpop.eup %7542  ;;  %v4412_v20 = vmul.f32 1.442695, %v9843_v31 }
 0x482   : > { %v5252_v35 = vsel %vm5204_vm4, 1, %v11369_v56  ;;  %v4421_v17 = vpop.xlane.xlu0 %4420  ;;  %vm11257_vm4 = vcmask 1044484  }
 0x483   : > { %v7545_v13 = vpop.eup %7544  ;;  %v5336_v11 = vrot.slane %v5252_v35, %v9747_v52  ;;  %7558 = vlog2.f32 %v4421_v17  ;;  %4498 = vadd.xlane.f32.xlu1 %v7543_v36 }
 0x484   : > { %v7547_v34 = vpop.eup %7546  ;;  %v4515_v30 = vmul.f32 0.6931472, %v7545_v13  ;;  %v4431_v57 = vpop.xlane.xlu1 %4430 }
 0x485   : > { %v5337_v46 = vsel %vm11261_vm11, %v5336_v11, %v5332_v0  ;;  %7560 = vlog2.f32 %v4431_v57  ;;  %4492 = vadd.xlane.f32.xlu0 %v7547_v34  ;;  %v7549_v63 = vpop.eup %7548 }
 0x486   : > { %7562 = vpow2.f32 %v4416_v47  ;;  %v5656_v16 = vsub.f32 %v4515_v30, %v9753_v21  ;;  %v5523_v58 = vsel %vm11259_vm5, %v5337_v46, %v5521_v53  ;;  %v9853_v26 = vpop.xlane.xlu0 %4972  ;;  %v7551_v36 = vpop.eup %7550  ;;  %v5254_v47 = vsel %vm5206_vm6, 1, %v11369_v56 }
 0x487   : > { %4510 = vadd.xlane.f32.xlu1 %v7549_v63  ;;  %vm5207_vm7 = vcmp.ge.f32.partialorder %v9853_v26, 0.0  ;;  %v11379_v63 = vld [vmem:[#allocation53_spill] sm:$0xff] }
 0x488   : > { %v4427_v35 = vpop.xlane.xlu1 %4426  ;;  %v5255_v11 = vsel %vm5207_vm7, 1, %v11369_v56  ;;  %vm4898_vm9 = vcmp.eq.s32.totalorder %v9424_v48, %v11379_v63 }
 0x489   : > { %v7553_v0 = vpop.eup %7552  ;;  %7564 = vlog2.f32 %v4427_v35  ;;  %4504 = vadd.xlane.f32.xlu0 %v7551_v36 }
 0x48a   : > { %v7555_v17 = vpop.eup %7554  ;;  %7566 = vpow2.f32 %v4412_v20  ;;  %v4521_v13 = vmul.f32 0.6931472, %v7553_v0  ;;  %v9858_v21 = vpop.xlane.xlu0 %4968  ;;  %v5345_v20 = vrot.slane %v5254_v47, %v9742_v49  ;;  %v5350_v0 = vrot.slane %v5255_v11, %v9747_v52 }
 0x48b   : > { %v7557_v53 = vpop.eup %7556  ;;  %vm5205_vm8 = vcmp.ge.f32.partialorder %v9858_v21, 0.0  ;;  %4506 = vadd.xlane.f32.xlu1 %v7555_v17  ;;  %v5755_v11 = vrot.slane %v5656_v16, %v9739_v12 }
 0x48c   : > { %v5659_v34 = vsub.f32 %v4521_v13, %v9774_v1  ;;  %v5253_v30 = vsel %vm5205_vm8, 1, %v11369_v56  ;;  %v9864_v57 = vpop.xlane.xlu1 %4978  ;;  %v4946_v1 = vsel %vm4898_vm9, %v9810_v27, 0.0 }
 0x48d   : > { %v7559_v46 = vpop.eup %7558  ;;  %v5341_v36 = vrot.slane %v5253_v30, %v9739_v12  ;;  %4500 = vadd.xlane.f32.xlu0 %v7557_v53  ;;  %vm5210_vm0 = vcmp.ge.f32.partialorder %v9864_v57, 0.0 }
 0x48e   : > { %v4517_v35 = vmul.f32 0.6931472, %v7559_v46  ;;  %v4433_v17 = vpop.xlane.xlu0 %4432 }
 0x48f   : > { %v7561_v13 = vpop.eup %7560  ;;  %v5346_v54 = vsel %vm11262_vm10, %v5345_v20, %v5341_v36  ;;  %7568 = vlog2.f32 %v4433_v17  ;;  %5038 = vadd.xlane.f32.xlu1 %v4946_v1  ;;  %v5769_v1 = vrot.slane %v5659_v34, %v9739_v12  ;;  %v5071_v34 = vsel %vm5046_vm13, %v9606_v23, -1e+30 }
 0x490   : > { %v7563_v33 = vpop.eup %7562  ;;  %v5657_v63 = vsub.f32 %v4517_v35, %v9719_v22  ;;  %v4527_v2 = vmul.f32 0.6931472, %v7561_v13  ;;  %v5351_v47 = vsel %vm11261_vm11, %v5350_v0, %v5346_v54  ;;  %v9875_v30 = vpop.xlane.xlu1 %4974  ;;  %v5047_v22 = vsel %vm5046_vm13, %v9439_v62, -1e+30 }
 0x491   : > { %v9878_v53 = vsel %vm11258_vm12, %v5351_v47, %v5523_v58  ;;  %4512 = vadd.xlane.f32.xlu0 %v7563_v33  ;;  %v11380_v58 = vsub.f32 %v9834_v7, %v9727_v45  ;;  %v5050_v45 = vsel %vm5046_vm13, %v9455_v5, -1e+30  ;;  %v11381_v7 = vld [vmem:[#allocation54_spill] sm:$0xff]  ;;  %vm5208_vm15 = vcmp.ge.f32.partialorder %v9875_v30, 0.0 }
 0x492   : > { %v5759_v46 = vrot.slane %v5657_v63, %v9742_v49  ;;  %v5662_v20 = vsub.f32 %v4527_v2, %v9734_v29  ;;  %v4429_v36 = vpop.xlane.xlu0 %4428  ;;  %vm4899_vm14 = vcmp.eq.s32.totalorder %v9424_v48, %v11381_v7 }
 0x493   : > { %v7565_v54 = vpop.eup %7564  ;;  %v5764_v35 = vrot.slane %v11380_v58, %v9747_v52  ;;  %7570 = vlog2.f32 %v4429_v36  ;;  %5095 = vmax.xlane.f32.xlu1 %v5047_v22  ;;  %v5258_v22 = vsel %vm5210_vm0, 1, %v11369_v56  ;;  %vm11255_vm0 = vcmask 1046534  }
 0x494   : > { %v7567_v33 = vpop.eup %7566  ;;  %v5760_v16 = vsel %vm11262_vm10, %v5759_v46, %v5755_v11  ;;  %v4523_v0 = vmul.f32 0.6931472, %v7565_v54  ;;  %v4439_v17 = vpop.xlane.xlu1 %4438  ;;  %v5256_v46 = vsel %vm5208_vm15, 1, %v11369_v56 }
 0x495   : > { %v9893_v2 = vsel %vm11261_vm11, %v5764_v35, %v5760_v16  ;;  %7572 = vlog2.f32 %v4439_v17  ;;  %4508 = vadd.xlane.f32.xlu0 %v7567_v33  ;;  %v5048_v33 = vsel %vm5046_vm13, %v9431_v60, -1e+30  ;;  %v5355_v23 = vrot.slane %v5256_v46, %v9739_v12 }
 0x496   : > { %v5660_v62 = vsub.f32 %v4523_v0, %v9762_v25  ;;  %v9896_v29 = vpop.xlane.xlu0 %4980  ;;  %v4947_v25 = vsel %vm4899_vm14, %v9843_v31, 0.0  ;;  %v5783_v17 = vrot.slane %v5662_v20, %v9739_v12  ;;  %vm11256_vm14 = vcmask 1045509  }
 0x497   : > { %5101 = vmax.xlane.f32.xlu1 %v5050_v45  ;;  %vm5211_vm2 = vcmp.ge.f32.partialorder %v9896_v29, 0.0 }
 0x498   : > { %v5773_v13 = vrot.slane %v5660_v62, %v9742_v49  ;;  %v4435_v63 = vpop.xlane.xlu1 %4434  ;;  %v5364_v62 = vrot.slane %v5258_v22, %v9747_v52 }
 0x499   : > { %v7569_v47 = vpop.eup %7568  ;;  %7574 = vlog2.f32 %v4435_v63  ;;  %5040 = vadd.xlane.f32.xlu0 %v4947_v25 }
 0x49a   : > { %v5774_v5 = vsel %vm11262_vm10, %v5773_v13, %v5769_v1  ;;  %v4529_v11 = vmul.f32 0.6931472, %v7569_v47  ;;  %v9910_v36 = vpop.xlane.xlu0 %4976  ;;  %v5259_v13 = vsel %vm5211_vm2, 1, %v11369_v56 }
 0x49b   : > { %vm5209_vm1 = vcmp.ge.f32.partialorder %v9910_v36, 0.0  ;;  %5143 = vmax.xlane.f32.xlu1 %v5071_v34 }
 0x49c   : > { %v5663_v54 = vsub.f32 %v4529_v11, %v9798_v8  ;;  %v5257_v58 = vsel %vm5209_vm1, 1, %v11369_v56  ;;  %v9920_v35 = vpop.xlane.xlu1 %4986  ;;  %v5074_v8 = vsel %vm5046_vm13, %v9614_v44, -1e+30  ;;  %v5051_v44 = vsel %vm5046_vm13, %v9458_v39, -1e+30 }
 0x49d   : > { %v7571_v16 = vpop.eup %7570  ;;  %v5359_v0 = vrot.slane %v5257_v58, %v9742_v49  ;;  %5097 = vmax.xlane.f32.xlu0 %v5048_v33  ;;  %v5049_v58 = vsel %vm5046_vm13, %v9421_v55, -1e+30  ;;  %vm5214_vm7 = vcmp.ge.f32.partialorder %v9920_v35, 0.0 }
 0x49e   : > { %v5787_v45 = vrot.slane %v5663_v54, %v9742_v49  ;;  %v4525_v7 = vmul.f32 0.6931472, %v7571_v16  ;;  %v4441_v1 = vpop.xlane.xlu0 %4440  ;;  %v5369_v16 = vrot.slane %v5259_v13, %v9739_v12 }
 0x49f   : > { %v7573_v60 = vpop.eup %7572  ;;  %v5360_v63 = vsel %vm11262_vm10, %v5359_v0, %v5355_v23  ;;  %7576 = vlog2.f32 %v4441_v1  ;;  %5149 = vmax.xlane.f32.xlu1 %v5074_v8 }
 0x4a0   : > { %v5788_v20 = vsel %vm11262_vm10, %v5787_v45, %v5783_v17  ;;  %v5661_v25 = vsub.f32 %v4525_v7, %v9816_v10  ;;  %v9942_v47 = vmul.f32 0.6931472, %v7573_v60  ;;  %v5365_v11 = vsel %vm11261_vm11, %v5364_v62, %v5360_v63  ;;  %v9945_v46 = vpop.xlane.xlu1 %4982 }
 0x4a1   : > { %vm5212_vm6 = vcmp.ge.f32.partialorder %v9945_v46, 0.0  ;;  %5103 = vmax.xlane.f32.xlu0 %v5051_v44  ;;  %v5527_v34 = vsel %vm11257_vm4, %v5365_v11, %v9878_v53  ;;  %v5072_v17 = vsel %vm5046_vm13, %v9621_v40, -1e+30  ;;  %v5262_v7 = vsel %vm5214_vm7, 1, %v11369_v56 }
 0x4a2   : > { %v5778_v22 = vrot.slane %v5661_v25, %v9747_v52  ;;  %v5666_v39 = vsub.f32 %v9942_v47, %v9824_v42  ;;  %v5260_v54 = vsel %vm5212_vm6, 1, %v11369_v56  ;;  %v4437_v10 = vpop.xlane.xlu0 %4436  ;;  %v5383_v63 = vrot.slane %v5262_v7, %v9739_v12 }
 0x4a3   : > { %v7575_v33 = vpop.eup %7574  ;;  %v5373_v23 = vrot.slane %v5260_v54, %v9742_v49  ;;  %7578 = vlog2.f32 %v4437_v10  ;;  %5099 = vmax.xlane.f32.xlu1 %v5049_v58  ;;  %v5054_v7 = vsel %vm5046_vm13, %v9471_v41, -1e+30  ;;  %vm11250_vm7 = vcmask 1047559  }
 0x4a4   : > { %v5779_v53 = vsel %vm11261_vm11, %v5778_v22, %v5774_v5  ;;  %v4531_v0 = vmul.f32 0.6931472, %v7575_v33  ;;  %v4447_v8 = vpop.xlane.xlu1 %4446  ;;  %v5053_v5 = vsel %vm5046_vm13, %v9445_v32, -1e+30  ;;  %v5073_v22 = vsel %vm5046_vm13, %v9597_v51, -1e+30 }
 0x4a5   : > { %v5976_v55 = vsel %vm11260_vm3, %v5779_v53, %v9893_v2  ;;  %v5374_v62 = vsel %vm11262_vm10, %v5373_v23, %v5369_v16  ;;  %7580 = vlog2.f32 %v4447_v8  ;;  %5145 = vmax.xlane.f32.xlu0 %v5072_v17 }
 0x4a6   : > { %v5664_v45 = vsub.f32 %v4531_v0, %v9837_v18  ;;  %v9969_v1 = vpop.xlane.xlu0 %4988  ;;  %v5075_v18 = vsel %vm5046_vm13, %v9634_v37, -1e+30  ;;  %v5077_v0 = vsel %vm5046_vm13, %v9625_v15, -1e+30  ;;  %v5055_v15 = vsel %vm5046_vm13, %v9494_v38, -1e+30 }
 0x4a7   : > { %vm5215_vm8 = vcmp.ge.f32.partialorder %v9969_v1, 0.0  ;;  %5107 = vmax.xlane.f32.xlu1 %v5053_v5 }
 0x4a8   : > { %v5792_v40 = vrot.slane %v5664_v45, %v9747_v52  ;;  %v5263_v2 = vsel %vm5215_vm8, 1, %v11369_v56  ;;  %v4443_v60 = vpop.xlane.xlu1 %4442  ;;  %vm11249_vm8 = vcmp.lt.s32.totalorder %v9424_v48, 16 }
 0x4a9   : > { %v7577_v13 = vpop.eup %7576  ;;  %v5387_v44 = vrot.slane %v5263_v2, %v9742_v49  ;;  %7582 = vlog2.f32 %v4443_v60  ;;  %5151 = vmax.xlane.f32.xlu0 %v5075_v18 }
 0x4aa   : > { %v5793_v32 = vsel %vm11261_vm11, %v5792_v40, %v5788_v20  ;;  %v4537_v25 = vmul.f32 0.6931472, %v7577_v13  ;;  %v9983_v11 = vpop.xlane.xlu0 %4984  ;;  %v5052_v20 = vsel %vm5046_vm13, %v9479_v6, -1e+30 }
 0x4ab   : > { %v5977_v54 = vsel %vm11259_vm5, %v5793_v32, %v5976_v55  ;;  %v5388_v37 = vsel %vm11262_vm10, %v5387_v44, %v5383_v63  ;;  %vm5213_vm9 = vcmp.ge.f32.partialorder %v9983_v11, 0.0  ;;  %5147 = vmax.xlane.f32.xlu1 %v5073_v22  ;;  %v5057_v32 = vsel %vm5046_vm13, %v9483_v28, -1e+30 }
 0x4ac   : > { %v5667_v10 = vsub.f32 %v4537_v25, %v9853_v26  ;;  %v5261_v58 = vsel %vm5213_vm9, 1, %v11369_v56  ;;  %v9993_v33 = vpop.xlane.xlu1 %4994 }
 0x4ad   : > { %v7579_v16 = vpop.eup %7578  ;;  %v5378_v51 = vrot.slane %v5261_v58, %v9747_v52  ;;  %5105 = vmax.xlane.f32.xlu0 %v5052_v20  ;;  %vm5218_vm1 = vcmp.ge.f32.partialorder %v9993_v33, 0.0 }
 0x4ae   : > { %v4533_v23 = vmul.f32 0.6931472, %v7579_v16  ;;  %v4449_v53 = vpop.xlane.xlu0 %4448  ;;  %v5806_v2 = vrot.slane %v5667_v10, %v9747_v52  ;;  %v5266_v10 = vsel %vm5218_vm1, 1, %v11369_v56 }
 0x4af   : > { %v7581_v26 = vpop.eup %7580  ;;  %v5379_v8 = vsel %vm11261_vm11, %v5378_v51, %v5374_v62  ;;  %7584 = vlog2.f32 %v4449_v53  ;;  %5155 = vmax.xlane.f32.xlu1 %v5077_v0  ;;  %v5401_v0 = vrot.slane %v5266_v10, %v9742_v49 }
 0x4b0   : > { %v5665_v17 = vsub.f32 %v4533_v23, %v9858_v21  ;;  %v10004_v55 = vmul.f32 0.6931472, %v7581_v26  ;;  %v5529_v6 = vsel %vm11256_vm14, %v5379_v8, %v5527_v34  ;;  %v10007_v45 = vpop.xlane.xlu1 %4990  ;;  %v5801_v21 = vrot.slane %v5666_v39, %v9742_v49 }
 0x4b1   : > { %vm5216_vm15 = vcmp.ge.f32.partialorder %v10007_v45, 0.0  ;;  %5109 = vmax.xlane.f32.xlu0 %v5054_v7  ;;  %v5076_v39 = vsel %vm5046_vm13, %v9649_v3, -1e+30  ;;  %v5056_v23 = vsel %vm5046_vm13, %v9509_v59, -1e+30 }
 0x4b2   : > { %v5797_v34 = vrot.slane %v5665_v17, %v9739_v12  ;;  %v5670_v62 = vsub.f32 %v10004_v55, %v9864_v57  ;;  %v5264_v5 = vsel %vm5216_vm15, 1, %v11369_v56  ;;  %v4445_v41 = vpop.xlane.xlu0 %4444  ;;  %v5083_v57 = vsel %vm5046_vm13, %v9692_v50, -1e+30  ;;  %v11383_v50 = vld [vmem:[#allocation58_spill] sm:$0xff] }
 0x4b3   : > { %v7583_v40 = vpop.eup %7582  ;;  %v5392_v60 = vrot.slane %v5264_v5, %v9747_v52  ;;  %7586 = vlog2.f32 %v4445_v41  ;;  %5111 = vmax.xlane.f32.xlu1 %v5055_v15 }
 0x4b4   : > { %v5802_v38 = vsel %vm11262_vm10, %v5801_v21, %v5797_v34  ;;  %v4539_v42 = vmul.f32 0.6931472, %v7583_v40  ;;  %v4455_v47 = vpop.xlane.xlu1 %4454  ;;  %v5079_v34 = vsel %vm5046_vm13, %v9662_v9, -1e+30  ;;  %v5820_v9 = vrot.slane %v5670_v62, %v9747_v52 }
 0x4b5   : > { %v5807_v18 = vsel %vm11261_vm11, %v5806_v2, %v5802_v38  ;;  %v5393_v13 = vsel %vm11261_vm11, %v5392_v60, %v5388_v37  ;;  %7588 = vlog2.f32 %v4455_v47  ;;  %5153 = vmax.xlane.f32.xlu0 %v5076_v39  ;;  %v5060_v60 = vsel %vm5046_vm13, %v9537_v24, -1e+30 }
 0x4b6   : > { %v5668_v63 = vsub.f32 %v4539_v42, %v9875_v30  ;;  %v10033_v44 = vpop.xlane.xlu0 %4996  ;;  %v5531_v25 = vsel %vm11255_vm0, %v5393_v13, %v5529_v6  ;;  %v5978_v22 = vsel %vm11258_vm12, %v5807_v18, %v5977_v54  ;;  %v5078_v30 = vsel %vm5046_vm13, %v9642_v14, -1e+30 }
 0x4b7   : > { %5115 = vmax.xlane.f32.xlu1 %v5057_v32  ;;  %vm5219_vm2 = vcmp.ge.f32.partialorder %v10033_v44, 0.0  ;;  %v5080_v54 = vsel %vm5046_vm13, %v9677_v4, -1e+30 }
 0x4b8   : > { %v4451_v3 = vpop.xlane.xlu1 %4450  ;;  %v5267_v20 = vsel %vm5219_vm2, 1, %v11369_v56  ;;  %v5811_v41 = vrot.slane %v5668_v63, %v9739_v12 }
 0x4b9   : > { %v7585_v37 = vpop.eup %7584  ;;  %7590 = vlog2.f32 %v4451_v3  ;;  %5157 = vmax.xlane.f32.xlu0 %v5078_v30  ;;  %v5406_v8 = vrot.slane %v5267_v20, %v9747_v52 }
 0x4ba   : > { %v4545_v28 = vmul.f32 0.6931472, %v7585_v37  ;;  %v10046_v58 = vpop.xlane.xlu0 %4992 }
 0x4bb   : > { %vm5217_vm6 = vcmp.ge.f32.partialorder %v10046_v58, 0.0  ;;  %5161 = vmax.xlane.f32.xlu1 %v5080_v54 }
 0x4bc   : > { %v5671_v16 = vsub.f32 %v4545_v28, %v9896_v29  ;;  %v5265_v14 = vsel %vm5217_vm6, 1, %v11369_v56  ;;  %v10055_v51 = vpop.xlane.xlu1 %5002  ;;  %v5058_v29 = vsel %vm5046_vm13, %v9502_v61, -1e+30  ;;  %v11384_v28 = vld [vmem:[#allocation23_spill] sm:$0xff] }
 0x4bd   : > { %v7587_v53 = vpop.eup %7586  ;;  %v5397_v4 = vrot.slane %v5265_v14, %v9739_v12  ;;  %5113 = vmax.xlane.f32.xlu0 %v5056_v23 }
 0x4be   : > { %v4541_v26 = vmul.f32 0.6931472, %v7587_v53  ;;  %v4457_v17 = vpop.xlane.xlu0 %4456  ;;  %v5825_v62 = vrot.slane %v5671_v16, %v9739_v12  ;;  %v11385_v53 = vld [vmem:[#allocation61_spill] sm:$0xff] }
 0x4bf   : > { %v7589_v6 = vpop.eup %7588  ;;  %v5402_v7 = vsel %vm11262_vm10, %v5401_v0, %v5397_v4  ;;  %7592 = vlog2.f32 %v4457_v17  ;;  %5117 = vmax.xlane.f32.xlu1 %v5058_v29  ;;  %v5063_v0 = vsel %vm5046_vm13, %v11385_v53, -1e+30 }
 0x4c0   : > { %v5669_v59 = vsub.f32 %v4541_v26, %v9910_v36  ;;  %v4551_v15 = vmul.f32 0.6931472, %v7589_v6  ;;  %v10068_v21 = vpop.xlane.xlu1 %4998  ;;  %v5407_v5 = vsel %vm11261_vm11, %v5406_v8, %v5402_v7  ;;  %v11386_v8 = vld [vmem:[#allocation14_spill] sm:$0xff]  ;;  %v11387_v7 = vld [vmem:[#allocation21_spill] sm:$0xff] }
 0x4c1   : > { %5159 = vmax.xlane.f32.xlu0 %v5079_v34  ;;  %v10075_v61 = vsel %vm11250_vm7, %v5407_v5, %v5531_v25  ;;  %v5084_v17 = vsel %vm5046_vm13, %v11386_v8, -1e+30 }
 0x4c2   : > { %11382 = vst [vmem:[#allocation32_spill] sm:$0xff] %v10075_v61  ;;  %v5815_v40 = vrot.slane %v5669_v59, %v9742_v49  ;;  %v5674_v2 = vsub.f32 %v4551_v15, %v9920_v35  ;;  %v4453_v36 = vpop.xlane.xlu0 %4452  ;;  %v5081_v35 = vsel %vm5046_vm13, %v9653_v19, -1e+30  ;;  %v5059_v19 = vsel %vm5046_vm13, %v9522_v43, -1e+30 }
 0x4c3   : > { %v7591_v38 = vpop.eup %7590  ;;  %7594 = vlog2.f32 %v4453_v36  ;;  %5121 = vmax.xlane.f32.xlu1 %v5060_v60  ;;  %v5082_v43 = vsel %vm5046_vm13, %v11384_v28, -1e+30  ;;  %v5086_v59 = vsel %vm5046_vm13, %v11387_v7, -1e+30 }
 0x4c4   : > { %v5816_v42 = vsel %vm11262_vm10, %v5815_v40, %v5811_v41  ;;  %v4547_v47 = vmul.f32 0.6931472, %v7591_v38  ;;  %v4463_v39 = vpop.xlane.xlu1 %4462  ;;  %v5839_v20 = vrot.slane %v5674_v2, %v9739_v12  ;;  %v11389_v41 = vld [vmem:[#allocation59_spill] sm:$0xff] }
 0x4c5   : > { %v5821_v18 = vsel %vm11261_vm11, %v5820_v9, %v5816_v42  ;;  %5163 = vmax.xlane.f32.xlu0 %v5081_v35  ;;  %v5062_v40 = vsel %vm5046_vm13, %v11389_v41, -1e+30  ;;  %v11390_v38 = vld [vmem:[#allocation63_spill] sm:$0xff] }
 0x4c6   : > { %v5672_v24 = vsub.f32 %v4547_v47, %v9945_v46  ;;  %v10093_v13 = vpop.xlane.xlu0 %5004  ;;  %v5979_v55 = vsel %vm11257_vm4, %v5821_v18, %v5978_v22  ;;  %v5061_v22 = vsel %vm5046_vm13, %v11383_v50, -1e+30  ;;  %v5064_v9 = vsel %vm5046_vm13, %v11390_v38, -1e+30  ;;  %v11392_v35 = vld [vmem:[#allocation15_spill] sm:$0xff] }
 0x4c7   : > { %5167 = vmax.xlane.f32.xlu1 %v5083_v57  ;;  %v5085_v18 = vsel %vm5046_vm13, %v11392_v35, -1e+30  ;;  %v5092_v38 = vsel %vm5046_vm13, %v9843_v31, -1e+30  ;;  %v5091_v31 = vsel %vm5046_vm13, %v9810_v27, -1e+30 }
 0x4c8   : > { %v5829_v63 = vrot.slane %v5672_v24, %v9742_v49  ;;  %v4459_v32 = vpop.xlane.xlu1 %4458 }
 0x4c9   : > { %v7593_v25 = vpop.eup %7592  ;;  %7596 = vlog2.f32 %v4459_v32  ;;  %5119 = vmax.xlane.f32.xlu0 %v5059_v19 }
 0x4ca   : > { %v5830_v46 = vsel %vm11262_vm10, %v5829_v63, %v5825_v62  ;;  %v4553_v3 = vmul.f32 0.6931472, %v7593_v25  ;;  %v10105_v30 = vpop.xlane.xlu0 %5000  ;;  %7598 = vlog2.f32 %v4463_v39 }
 0x4cb   : > { %5123 = vmax.xlane.f32.xlu1 %v5061_v22 }
 0x4cc   : > { %v5675_v37 = vsub.f32 %v4553_v3, %v9969_v1  ;;  %v10111_v10 = vpop.xlane.xlu1 %5010 }
 0x4cd   : > { %v7595_v54 = vpop.eup %7594  ;;  %5165 = vmax.xlane.f32.xlu0 %v5082_v43  ;;  %v11397_v43 = vld [vmem:[#allocation25_spill] sm:$0xff] }
 0x4ce   : > { %v5843_v16 = vrot.slane %v5675_v37, %v9742_v49  ;;  %v4549_v14 = vmul.f32 0.6931472, %v7595_v54  ;;  %v4465_v23 = vpop.xlane.xlu0 %4464  ;;  %v5089_v54 = vsel %vm5046_vm13, %v11397_v43, -1e+30 }
 0x4cf   : > { %7600 = vlog2.f32 %v4465_v23  ;;  %5127 = vmax.xlane.f32.xlu1 %v5063_v0  ;;  %v11398_v23 = vld [vmem:[#allocation60_spill] sm:$0xff] }
 0x4d0   : > { %v5844_v1 = vsel %vm11262_vm10, %v5843_v16, %v5839_v20  ;;  %v5673_v4 = vsub.f32 %v4549_v14, %v9983_v11  ;;  %v10123_v26 = vpop.xlane.xlu1 %5006  ;;  %v5065_v53 = vsel %vm5046_vm13, %v11398_v23, -1e+30 }
 0x4d1   : > { %5169 = vmax.xlane.f32.xlu0 %v5084_v17  ;;  %v11402_v17 = vld [vmem:[#allocation28_spill] sm:$0xff] }
 0x4d2   : > { %v5834_v29 = vrot.slane %v5673_v4, %v9747_v52  ;;  %v4461_v6 = vpop.xlane.xlu0 %4460  ;;  %v11400_v4 = vld [vmem:[#allocation65_spill] sm:$0xff] }
 0x4d3   : > { %v7597_v15 = vpop.eup %7596  ;;  %7602 = vlog2.f32 %v4461_v6  ;;  %5173 = vmax.xlane.f32.xlu1 %v5086_v59 }
 0x4d4   : > { %v5835_v34 = vsel %vm11261_vm11, %v5834_v29, %v5830_v46  ;;  %v4555_v11 = vmul.f32 0.6931472, %v7597_v15  ;;  %v10133_v5 = vpop.xlane.xlu1 %4470  ;;  %v7599_v42 = vpop.eup %7598  ;;  %v11395_v46 = vld [vmem:[#allocation22_spill] sm:$0xff]  ;;  %v5088_v29 = vsel %vm5046_vm13, %v11402_v17, -1e+30  ;;  %v11404_v15 = vld [vmem:[#allocation64_spill] sm:$0xff] }
 0x4d5   : > { %11388 = vst [vmem:[#allocation20_spill] sm:$0xff] %v10133_v5  ;;  %5125 = vmax.xlane.f32.xlu0 %v5062_v40  ;;  %v5980_v2 = vsel %vm11256_vm14, %v5835_v34, %v5979_v55  ;;  %v4559_v57 = vmul.f32 0.6931472, %v7599_v42  ;;  %v11393_v55 = vld [vmem:[#allocation62_spill] sm:$0xff]  ;;  %v5087_v3 = vsel %vm5046_vm13, %v11395_v46, -1e+30 }
 0x4d6   : > { %v5676_v36 = vsub.f32 %v4555_v11, %v10007_v45  ;;  %v10140_v60 = vpop.xlane.xlu0 %5012  ;;  %v5066_v62 = vsel %vm5046_vm13, %v11393_v55, -1e+30  ;;  %v5069_v34 = vsel %vm5046_vm13, %v11404_v15, -1e+30  ;;  %v11407_v40 = vld [vmem:[#allocation31_spill] sm:$0xff] }
 0x4d7   : > { %5129 = vmax.xlane.f32.xlu1 %v5064_v9  ;;  %v5678_v22 = vsub.f32 %v4559_v57, %v9993_v33  ;;  %v11410_v42 = vld [vmem:[#allocation67_spill] sm:$0xff] }
 0x4d8   : > { %v5848_v47 = vrot.slane %v5676_v36, %v9747_v52  ;;  %v10146_v39 = vpop.xlane.xlu1 %4466 }
 0x4d9   : > { %11391 = vst [vmem:[#allocation24_spill] sm:$0xff] %v10146_v39  ;;  %v7601_v24 = vpop.eup %7600  ;;  %5171 = vmax.xlane.f32.xlu0 %v5085_v18  ;;  %v5857_v33 = vrot.slane %v5678_v22, %v9742_v49  ;;  %v11412_v18 = vld [vmem:[#allocation66_spill] sm:$0xff] }
 0x4da   : > { %v10151_v45 = vpop.xlane.xlu0 %5008  ;;  %v5849_v63 = vsel %vm11261_vm11, %v5848_v47, %v5844_v1  ;;  %v4561_v32 = vmul.f32 0.6931472, %v7601_v24  ;;  %v5068_v47 = vsel %vm5046_vm13, %v11410_v42, -1e+30  ;;  %v5070_v24 = vsel %vm5046_vm13, %v11412_v18, -1e+30 }
 0x4db   : > { %5133 = vmax.xlane.f32.xlu1 %v5066_v62  ;;  %v5981_v19 = vsel %vm11255_vm0, %v5849_v63, %v5980_v2  ;;  %v5090_v2 = vsel %vm5046_vm13, %v11407_v40, -1e+30  ;;  %v11416_v63 = vld [vmem:[#allocation19_spill] sm:$0xff] }
 0x4dc   : > { %v10158_v25 = vpop.xlane.xlu1 %5018  ;;  %v5679_v20 = vsub.f32 %v4561_v32, %v10033_v44  ;;  %v5067_v44 = vsel %vm5046_vm13, %v11400_v4, -1e+30  ;;  %v5093_v32 = vsel %vm5046_vm13, %v11416_v63, -1e+30  ;;  %v11440_v42 = vld [vmem:[#allocation55_spill] sm:$0xff] }
 0x4dd   : > { %11394 = vst [vmem:[#allocation30_spill] sm:$0xff] %v10158_v25  ;;  %v7603_v50 = vpop.eup %7602  ;;  %5175 = vmax.xlane.f32.xlu0 %v5087_v3  ;;  %v11419_v3 = vld [vmem:[#allocation18_spill] sm:$0xff] }
 0x4de   : > { %v4557_v37 = vmul.f32 0.6931472, %v7603_v50  ;;  %v10164_v28 = vpop.xlane.xlu0 %4472  ;;  %v5862_v8 = vrot.slane %v5679_v20, %v9747_v52  ;;  %v5094_v50 = vsel %vm5046_vm13, %v11419_v3, -1e+30  ;;  %vm4900_vm13 = vcmp.eq.s32.totalorder %v9424_v48, %v11440_v42 }
 0x4df   : > { %11396 = vst [vmem:[#allocation36_spill] sm:$0xff] %v10164_v28  ;;  %5179 = vmax.xlane.f32.xlu1 %v5089_v54  ;;  %v4948_v18 = vsel %vm4900_vm13, %v11416_v63, 0.0 }
 0x4e0   : > { %v5677_v16 = vsub.f32 %v4557_v37, %v10046_v58  ;;  %v10171_v14 = vpop.xlane.xlu1 %5014  ;;  %v5593_v37 = vsel %vm11249_vm8, 1, %v11369_v56 }
 0x4e1   : > { %5131 = vmax.xlane.f32.xlu0 %v5065_v53 }
 0x4e2   : > { %v5853_v0 = vrot.slane %v5677_v16, %v9739_v12  ;;  %v10178_v1 = vpop.xlane.xlu0 %4468  ;;  %v11443_v12 = vmov 0 }
 0x4e3   : > { %11399 = vst [vmem:[#allocation27_spill] sm:$0xff] %v10178_v1  ;;  %5135 = vmax.xlane.f32.xlu1 %v5067_v44 }
 0x4e4   : > { %v10184_v58 = vpop.xlane.xlu1 %4478  ;;  %v5858_v6 = vsel %vm11262_vm10, %v5857_v33, %v5853_v0 }
 0x4e5   : > { %11401 = vst [vmem:[#allocation33_spill] sm:$0xff] %v10184_v58  ;;  %5177 = vmax.xlane.f32.xlu0 %v5088_v29  ;;  %v5863_v7 = vsel %vm11261_vm11, %v5862_v8, %v5858_v6 }
 0x4e6   : > { %v10191_v59 = vpop.xlane.xlu0 %5020  ;;  %v10197_v11 = vsel %vm11250_vm7, %v5863_v7, %v5981_v19 }
 0x4e7   : > { %11403 = vst [vmem:[#allocation26_spill] sm:$0xff] %v10191_v59  ;;  %11405 = vst [vmem:[#allocation38_spill] sm:$0xff] %v10197_v11  ;;  %5139 = vmax.xlane.f32.xlu1 %v5069_v34 }
 0x4e8   : > { %v10199_v41 = vpop.xlane.xlu1 %4474 }
 0x4e9   : > { %11406 = vst [vmem:[#allocation29_spill] sm:$0xff] %v10199_v41  ;;  %5181 = vmax.xlane.f32.xlu0 %v5090_v2 }
 0x4ea   : > { %v10204_v36 = vpop.xlane.xlu0 %5016 }
 0x4eb   : > { %11408 = vst [vmem:[#allocation35_spill] sm:$0xff] %v10204_v36  ;;  %5185 = vmax.xlane.f32.xlu1 %v5092_v38 }
 0x4ec   : > { %v10209_v9 = vpop.xlane.xlu1 %5026 }
 0x4ed   : > { %11409 = vst [vmem:[#allocation34_spill] sm:$0xff] %v10209_v9  ;;  %5137 = vmax.xlane.f32.xlu0 %v5068_v47 }
 0x4ee   : > { %v10214_v35 = vpop.xlane.xlu0 %4480 }
 0x4ef   : > { %11411 = vst [vmem:[#allocation43_spill] sm:$0xff] %v10214_v35  ;;  %5141 = vmax.xlane.f32.xlu1 %v5070_v24 }
 0x4f0   : > { %v10219_v57 = vpop.xlane.xlu1 %5022 }
 0x4f1   : > { %11413 = vst [vmem:[#allocation39_spill] sm:$0xff] %v10219_v57  ;;  %5183 = vmax.xlane.f32.xlu0 %v5091_v31 }
 0x4f2   : > { %v10224_v55 = vpop.xlane.xlu0 %4476 }
 0x4f3   : > { %11414 = vst [vmem:[#allocation41_spill] sm:$0xff] %v10224_v55 }
 0x4f4   : > { %v10226_v62 = vpop.xlane.xlu1 %4486 }
 0x4f5   : > { %11415 = vst [vmem:[#allocation37_spill] sm:$0xff] %v10226_v62  ;;  %5187 = vmax.xlane.f32.xlu0 %v5093_v32  ;;  %v11442_v32 = vld [vmem:[#allocation56_spill] sm:$0xff] }
 0x4f6   : > { %v10231_v19 = vpop.xlane.xlu0 %5028  ;;  %vm4901_vm9 = vcmp.eq.s32.totalorder %v9424_v48, %v11442_v32 }
 0x4f7   : > { %11417 = vst [vmem:[#allocation44_spill] sm:$0xff] %v10231_v19 }
 0x4f8   : > { %v10233_v46 = vpop.xlane.xlu1 %4482 }
 0x4f9   : > { %11418 = vst [vmem:[#allocation40_spill] sm:$0xff] %v10233_v46  ;;  %5189 = vmax.xlane.f32.xlu0 %v5094_v50 }
 0x4fa   : > { %v10238_v27 = vpop.xlane.xlu0 %5024 }
 0x4fb   : > { %11420 = vst [vmem:[#allocation47_spill] sm:$0xff] %v10238_v27 }
 0x4fc   : > { %v10240_v22 = vpop.xlane.xlu1 %5034 }
 0x4fd   : > { %11421 = vst [vmem:[#allocation42_spill] sm:$0xff] %v10240_v22 }
 0x4fe   : > { %v10246_v43 = vpop.xlane.xlu0 %4488 }
 0x4ff   : > { %11422 = vst [vmem:[#allocation12_spill] sm:$0xff] %v10246_v43 }
 0x500   : > { %v10248_v54 = vpop.xlane.xlu1 %5030  ;;  %5595 = vbcast.lane.b32.xlu1 %v5593_v37, 256 }
 0x501   : > { %11423 = vst [vmem:[#allocation48_spill] sm:$0xff] %v10248_v54 }
 0x502   : > { %v10250_v20 = vpop.xlane.xlu0 %4484 }
 0x503   : > { %11424 = vst [vmem:[#allocation51_spill] sm:$0xff] %v10250_v20 }
 0x504   : > { %v10252_v16 = vpop.xlane.xlu1 %4494  ;;  %5603 = vbcast.lane.b32.xlu1 %v5593_v37, 272 }
 0x505   : > { %11425 = vst [vmem:[#allocation45_spill] sm:$0xff] %v10252_v16 }
 0x506   : > { %v10254_v23 = vpop.xlane.xlu0 %5036 }
 0x507   : > { %11426 = vst [vmem:[#allocation49_spill] sm:$0xff] %v10254_v23 }
 0x508   : > { %v10256_v53 = vpop.xlane.xlu1 %4490 }
 0x509   : > { %11427 = vst [vmem:[#allocation50_spill] sm:$0xff] %v10256_v53 }
 0x50a   : > { %v10258_v33 = vpop.xlane.xlu0 %5032 }
 0x50b   : > { %11428 = vst [vmem:[#allocation52_spill] sm:$0xff] %v10258_v33 }
 0x50c   : > { %v10260_v0 = vpop.xlane.xlu1 %4502 }
 0x50d   : > { %11429 = vst [vmem:[#allocation46_spill] sm:$0xff] %v10260_v0 }
 0x50e   : > { %v10262_v4 = vpop.xlane.xlu0 %4496 }
 0x50f   : > { %11430 = vst [vmem:[#allocation53_spill] sm:$0xff] %v10262_v4  ;;  %5599 = vbcast.lane.b32.xlu0 %v5593_v37, 264  ;;  %v4949_v37 = vsel %vm4901_vm9, %v11419_v3, 0.0 }
 0x510   : > { %v10264_v44 = vpop.xlane.xlu1 %4498 }
 0x511   : > { %11431 = vst [vmem:[#allocation54_spill] sm:$0xff] %v10264_v44 }
 0x512   : > { %v10266_v8 = vpop.xlane.xlu0 %4492 }
 0x513   : > { %11432 = vst [vmem:[#allocation58_spill] sm:$0xff] %v10266_v8 }
 0x514   : > { %v10268_v17 = vpop.xlane.xlu1 %4510 }
 0x515   : > { %11433 = vst [vmem:[#allocation23_spill] sm:$0xff] %v10268_v17 }
 0x516   : > { %v10270_v29 = vpop.xlane.xlu0 %4504 }
 0x517   : > { %11434 = vst [vmem:[#allocation61_spill] sm:$0xff] %v10270_v29 }
 0x518   : > { %v10272_v6 = vpop.xlane.xlu1 %4506 }
 0x519   : > { %11435 = vst [vmem:[#allocation14_spill] sm:$0xff] %v10272_v6 }
 0x51a   : > { %v10274_v7 = vpop.xlane.xlu0 %4500 }
 0x51b   : > { %11436 = vst [vmem:[#allocation21_spill] sm:$0xff] %v10274_v7 }
 0x51c   : > { %v10276_v15 = vpop.xlane.xlu1 %5038 }
 0x51d   : > { %11437 = vst [vmem:[#allocation59_spill] sm:$0xff] %v10276_v15 }
 0x51e   : > { %v10278_v34 = vpop.xlane.xlu0 %4512 }
 0x51f   : > { %11438 = vst [vmem:[#allocation63_spill] sm:$0xff] %v10278_v34 }
 0x520   : > { %v5096_v40 = vpop.xlane.xlu1 %5095 }
 0x521   : > { %vm5545_vm15 = vcmp.ge.f32.partialorder %v5096_v40, 0.0 }
 0x522   : > { %v10280_v2 = vpop.xlane.xlu0 %4508 }
 0x523   : > { %11439 = vst [vmem:[#allocation15_spill] sm:$0xff] %v10280_v2 }
 0x524   : > { %v10282_v38 = vpop.xlane.xlu1 %5101 }
 0x526   : > { %v10286_v47 = vpop.xlane.xlu0 %5040 }
 0x527   : > { %11441 = vst [vmem:[#allocation62_spill] sm:$0xff] %v10286_v47 }
 0x528   : > { %v10289_v24 = vpop.xlane.xlu1 %5143  ;;  %5042 = vadd.xlane.f32.xlu1 %v4948_v18 }
 0x52a   : > { %v10291_v31 = vpop.xlane.xlu0 %5097 }
 0x52b   : > { %vm5546_vm0 = vcmp.ge.f32.partialorder %v10291_v31, 0.0 }
 0x52c   : > { %v10295_v50 = vpop.xlane.xlu1 %5149 }
 0x52e   : > { %5044 = vadd.xlane.f32.xlu0 %v4949_v37  ;;  %v10298_v11 = vpop.xlane.xlu0 %5103 }
 0x530   : > { %v10300_v42 = vpop.xlane.xlu1 %5099 }
 0x532   : > { %v10302_v34 = vpop.xlane.xlu0 %5145 }
 0x534   : > { %v10304_v63 = vpop.xlane.xlu1 %5107 }
 0x536   : > { %v10306_v2 = vpop.xlane.xlu0 %5151 }
 0x538   : > { %v10308_v18 = vpop.xlane.xlu1 %5147 }
 0x53a   : > { %v5106_v6 = vpop.xlane.xlu0 %5105 }
 0x53b   : > { %vm5550_vm6 = vcmp.ge.f32.partialorder %v5106_v6, 0.0 }
 0x53c   : > { %v10310_v17 = vpop.xlane.xlu1 %5155 }
 0x53e   : > { %v5110_v32 = vpop.xlane.xlu0 %5109 }
 0x540   : > { %v10312_v29 = vpop.xlane.xlu1 %5111 }
 0x542   : > { %v5154_v3 = vpop.xlane.xlu0 %5153 }
 0x543   : > { %vm5574_vm14 = vcmp.ge.f32.partialorder %v5154_v3, 0.0  ;;  %v11461_v3 = vmov 0 }
 0x544   : > { %v10314_v37 = vpop.xlane.xlu1 %5115 }
 0x546   : > { %v10316_v4 = vpop.xlane.xlu0 %5157 }
 0x548   : > { %v10318_v7 = vpop.xlane.xlu1 %5161 }
 0x54a   : > { %v10320_v44 = vpop.xlane.xlu0 %5113 }
 0x54c   : > { %v10322_v0 = vpop.xlane.xlu1 %5117 }
 0x54e   : > { %v10324_v53 = vpop.xlane.xlu0 %5159 }
 0x550   : > { %v10326_v8 = vpop.xlane.xlu1 %5121 }
 0x552   : > { %v10328_v16 = vpop.xlane.xlu0 %5163 }
 0x554   : > { %v10330_v20 = vpop.xlane.xlu1 %5167 }
 0x556   : > { %v10332_v43 = vpop.xlane.xlu0 %5119 }
 0x558   : > { %v10334_v46 = vpop.xlane.xlu1 %5123 }
 0x55a   : > { %v10336_v62 = vpop.xlane.xlu0 %5165 }
 0x55c   : > { %v10338_v61 = vpop.xlane.xlu1 %5127 }
 0x55e   : > { %v10340_v48 = vpop.xlane.xlu0 %5169 }
 0x560   : > { %v10342_v55 = vpop.xlane.xlu1 %5173 }
 0x562   : > { %v10344_v35 = vpop.xlane.xlu0 %5125 }
 0x563   : > { %vm5560_vm10 = vcmp.ge.f32.partialorder %v10344_v35, 0.0 }
 0x564   : > { %v10346_v41 = vpop.xlane.xlu1 %5129 }
 0x566   : > { %v10348_v58 = vpop.xlane.xlu0 %5171 }
 0x568   : > { %v10350_v1 = vpop.xlane.xlu1 %5133 }
 0x56a   : > { %v10352_v28 = vpop.xlane.xlu0 %5175 }
 0x56c   : > { %v10354_v39 = vpop.xlane.xlu1 %5179 }
 0x56e   : > { %v10356_v5 = vpop.xlane.xlu0 %5131 }
 0x570   : > { %v10358_v47 = vpop.xlane.xlu1 %5135 }
 0x572   : > { %v10360_v22 = vpop.xlane.xlu0 %5177 }
 0x574   : > { %v10362_v15 = vpop.xlane.xlu1 %5139 }
 0x576   : > { %v10364_v19 = vpop.xlane.xlu0 %5181 }
 0x578   : > { %v10366_v33 = vpop.xlane.xlu1 %5185 }
 0x57a   : > { %v10368_v23 = vpop.xlane.xlu0 %5137 }
 0x57c   : > { %v10370_v54 = vpop.xlane.xlu1 %5141 }
 0x57e   : > { %v10372_v57 = vpop.xlane.xlu0 %5183 }
 0x57f   : > { %vm5589_vm11 = vcmp.ge.f32.partialorder %v10372_v57, 0.0 }
 0x580   : > { %v10374_v27 = vpop.permute.xlu1 %5595 }
 0x581   : > { %vm11264_vm1 = vcmp.ne.s32.totalorder %v10374_v27, 0 }
 0x582   : > { %v10377_v9 = vpop.xlane.xlu0 %5187  ;;  %vm5608_vm2 = vmand %vm5545_vm15, %vm11264_vm1  ;;  %vm5552_vm15 = vcmp.ge.f32.partialorder %v5110_v32, 0.0 }
 0x583   : > { %v6023_v36 = vsel %vm5608_vm2, 1, %v11369_v56 }
 0x584   : > { %v10382_v59 = vpop.permute.xlu1 %5603  ;;  %6072 = vperm.xlu0 %7225, %v6023_v36  }
 0x585   : > { %vm11265_vm13 = vcmp.ne.s32.totalorder %v10382_v59, 0 }
 0x586   : > { %v5190_v25 = vpop.xlane.xlu0 %5189  ;;  %vm5613_vm9 = vmand %vm5550_vm6, %vm11265_vm13 }
 0x587   : > { %vm5592_vm8 = vcmp.ge.f32.partialorder %v5190_v25, 0.0  ;;  %v6028_v40 = vsel %vm5613_vm9, 1, %v11369_v56  ;;  %vm5548_vm9 = vcmp.ge.f32.partialorder %v10282_v38, 0.0  ;;  %vm5637_vm4 = vmand %vm5574_vm14, %vm11265_vm13 }
 0x588   : > { %vm10390_vm7 = vmand %vm5592_vm8, %vm11265_vm13  ;;  %6087 = vperm.xlu0 %7225, %v6028_v40   ;;  %v6052_v6 = vsel %vm5637_vm4, 1, %v11369_v56  ;;  %v11472_v40 = vmov 0 }
 0x589   : > { %v11444_v12 = vsel %vm10390_vm7, 4294967295, %v11443_v12  ;;  %vm5611_vm12 = vmand %vm5548_vm9, %vm11264_vm1  ;;  %vm5569_vm9 = vcmp.ge.f32.partialorder %v10289_v24, 0.0 }
 0x58a   : > { %v10394_v52 = vpop.permute.xlu0 %5599  ;;  %v6026_v31 = vsel %vm5611_vm12, 1, %v11369_v56  ;;  %vm5632_vm12 = vmand %vm5569_vm9, %vm11264_vm1  ;;  %vm5557_vm9 = vcmp.ge.f32.partialorder %v10332_v43, 0.0 }
 0x58b   : > { %vm11263_vm2 = vcmp.ne.s32.totalorder %v10394_v52, 0  ;;  %vm10517_vm7 = vmand %vm5560_vm10, %vm11264_vm1  ;;  %vm11469_vm10 = vcmp.ne.s32.totalorder %v10394_v52, 0 }
 0x58c   : > { %vm5615_vm6 = vmand %vm5552_vm15, %vm11263_vm2  ;;  %vm5576_vm15 = vcmp.ge.f32.partialorder %v10316_v4, 0.0 }
 0x58d   : > { %v6030_v25 = vsel %vm5615_vm6, 1, %v11369_v56  ;;  %vm5609_vm8 = vmand %vm5546_vm0, %vm11263_vm2  ;;  %vm5549_vm6 = vcmp.ge.f32.partialorder %v10298_v11, 0.0 }
 0x58e   : > { %6093 = vperm.xlu0 %7225, %v6030_v25   ;;  %v6024_v36 = vsel %vm5609_vm8, 1, %v11369_v56  ;;  %vm5639_vm0 = vmand %vm5576_vm15, %vm11263_vm2  ;;  %vm5554_vm8 = vcmp.ge.f32.partialorder %v10320_v44, 0.0  ;;  %vm5577_vm15 = vcmp.ge.f32.partialorder %v10324_v53, 0.0  ;;  %v6047_v44 = vsel %vm5632_vm12, 1, %v11369_v56 }
 0x58f   : > { %6075 = vperm.xlu1 %7226, %v6024_v36   ;;  %vm5612_vm14 = vmand %vm5549_vm6, %vm11263_vm2  ;;  %v6054_v38 = vsel %vm5639_vm0, 1, %v11369_v56  ;;  %vm5570_vm6 = vcmp.ge.f32.partialorder %v10302_v34, 0.0  ;;  %v11475_v25 = vmov 0 }
 0x590   : > { %v6027_v4 = vsel %vm5612_vm14, 1, %v11369_v56  ;;  %vm5617_vm4 = vmand %vm5554_vm8, %vm11264_vm1  ;;  %vm5572_vm14 = vcmp.ge.f32.partialorder %v10295_v50, 0.0 }
 0x591   : > { %v6032_v11 = vsel %vm5617_vm4, 1, %v11369_v56  ;;  %vm5640_vm0 = vmand %vm5577_vm15, %vm11265_vm13  ;;  %vm5579_vm4 = vcmp.ge.f32.partialorder %v10328_v16, 0.0  ;;  %vm5573_vm15 = vcmp.ge.f32.partialorder %v10306_v2, 0.0 }
 0x592   : > { %6159 = vperm.xlu0 %7225, %v6052_v6   ;;  %vm5633_vm8 = vmand %vm5570_vm6, %vm11263_vm2  ;;  %v6055_v34 = vsel %vm5640_vm0, 1, %v11369_v56  ;;  %v11486_v6 = vmov 0 }
 0x593   : > { %6081 = vperm.xlu1 %7226, %v6026_v31   ;;  %vm10437_vm5 = vmand %vm5572_vm14, %vm11264_vm1  ;;  %v6048_v43 = vsel %vm5633_vm8, 1, %v11369_v56  ;;  %vm5580_vm14 = vcmp.ge.f32.partialorder %v10336_v62, 0.0  ;;  %vm5582_vm8 = vcmp.ge.f32.partialorder %v10340_v48, 0.0  ;;  %v11492_v31 = vmov 0  ;;  %v11512_v48 = vld [vmem:[#allocation30_spill] sm:$0xff] }
 0x594   : > { %vm10445_vm12 = vmand %vm5557_vm9, %vm11264_vm1  ;;  %vm5547_vm9 = vcmp.ge.f32.partialorder %v10300_v42, 0.0  ;;  %v6050_v42 = vsel %vm10437_vm5, 1, %v11369_v56 }
 0x595   : > { %vm5642_vm6 = vmand %vm5579_vm4, %vm11263_vm2 }
 0x596   : > { %6165 = vperm.xlu0 %7225, %v6054_v38   ;;  %vm10456_vm0 = vmand %vm5573_vm15, %vm11263_vm2  ;;  %v6057_v50 = vsel %vm5642_vm6, 1, %v11369_v56  ;;  %vm5566_vm15 = vcmp.ge.f32.partialorder %v10368_v23, 0.0  ;;  %vm5551_vm6 = vcmp.ge.f32.partialorder %v10304_v63, 0.0  ;;  %v6035_v63 = vsel %vm10445_vm12, 1, %v11369_v56  ;;  %v11513_v23 = vld [vmem:[#allocation26_spill] sm:$0xff] }
 0x597   : > { %6084 = vperm.xlu1 %7226, %v6027_v4   ;;  %vm10463_vm3 = vmand %vm5580_vm14, %vm11265_vm13  ;;  %v6051_v57 = vsel %vm10456_vm0, 1, %v11369_v56  ;;  %vm5559_vm12 = vcmp.ge.f32.partialorder %v10334_v46, 0.0  ;;  %v11497_v38 = vmov 0 }
 0x598   : > { %vm10471_vm4 = vmand %vm5547_vm9, %vm11265_vm13  ;;  %v6058_v46 = vsel %vm10463_vm3, 1, %v11369_v56  ;;  %vm5564_vm3 = vcmp.ge.f32.partialorder %v10350_v1, 0.0 }
 0x599   : > { %vm10481_vm14 = vmand %vm5582_vm8, %vm11263_vm2  ;;  %vm5581_vm8 = vcmp.ge.f32.partialorder %v10330_v20, 0.0  ;;  %vm5571_vm2 = vcmp.ge.f32.partialorder %v10308_v18, 0.0  ;;  %v11465_v20 = vmov 0 }
 0x59a   : > { %6099 = vperm.xlu0 %7225, %v6032_v11   ;;  %vm10488_vm9 = vmand %vm5566_vm15, %vm11264_vm1  ;;  %v6060_v1 = vsel %vm10481_vm14, 1, %v11369_v56  ;;  %vm5590_vm14 = vcmp.ge.f32.partialorder %v10366_v33, 0.0  ;;  %v6038_v33 = vsel %vm10517_vm7, 1, %v11369_v56 }
 0x59b   : > { %6144 = vperm.xlu1 %7226, %v6047_v44   ;;  %vm10495_vm5 = vmand %vm5551_vm6, %vm11264_vm1  ;;  %vm5591_vm6 = vcmp.ge.f32.partialorder %v10377_v9, 0.0  ;;  %v11509_v44 = vld [vmem:[#allocation17_spill] sm:$0xff]  ;;  %v11515_v9 = vld [vmem:[#allocation35_spill] sm:$0xff] }
 0x59c   : > { %vm10506_vm15 = vmand %vm5589_vm11, %vm11265_vm13 }
 0x59d   : > { %v11462_v3 = vsel %vm10506_vm15, 4294967295, %v11461_v3  ;;  %vm10523_vm11 = vmand %vm5581_vm8, %vm11264_vm1  ;;  %vm5561_vm8 = vcmp.ge.f32.partialorder %v10338_v61, 0.0  ;;  %v6025_v61 = vsel %vm10471_vm4, 1, %v11369_v56 }
 0x59e   : > { %6168 = vperm.xlu0 %7225, %v6055_v34   ;;  %v11466_v20 = vsel %vm10523_vm11, 4294967295, %v11465_v20  ;;  %vm10530_vm15 = vmand %vm5571_vm2, %vm11265_vm13  ;;  %vm5584_vm11 = vcmp.ge.f32.partialorder %v10342_v55, 0.0  ;;  %v11510_v34 = vld [vmem:[#allocation16_spill] sm:$0xff] }
 0x59f   : > { %6147 = vperm.xlu1 %7226, %v6048_v43   ;;  %vm10536_vm0 = vmand %vm5591_vm6, %vm11469_vm10 }
 0x5a0   : > { %vm10543_vm1 = vmand %vm5559_vm12, %vm11265_vm13  ;;  %vm11477_vm12 = vcmp.ne.s32.totalorder %v10374_v27, 0 }
 0x5a1   : > { %v11473_v40 = vsel %vm10543_vm1, 4294967295, %v11472_v40  ;;  %vm11474_vm2 = vmmov %vm11469_vm10  ;;  %vm5562_vm10 = vcmp.ge.f32.partialorder %v10346_v41, 0.0  ;;  %vm11483_vm1 = vcmp.ne.s32.totalorder %v10394_v52, 0  ;;  %v11484_v41 = vmov 0 }
 0x5a2   : > { %6174 = vperm.xlu0 %7225, %v6057_v50   ;;  %vm10553_vm6 = vmand %vm5561_vm8, %vm11474_vm2  ;;  %vm11480_vm8 = vcmp.ne.s32.totalorder %v10382_v59, 0 }
 0x5a3   : > { %6153 = vperm.xlu1 %7226, %v6050_v42   ;;  %v11476_v25 = vsel %vm10553_vm6, 4294967295, %v11475_v25  ;;  %vm10563_vm13 = vmand %vm5584_vm11, %vm11477_vm12  ;;  %vm5587_vm6 = vcmp.ge.f32.partialorder %v10354_v39, 0.0  ;;  %vm5565_vm11 = vcmp.ge.f32.partialorder %v10358_v47, 0.0  ;;  %v6029_v39 = vsel %vm10495_vm5, 1, %v11369_v56 }
 0x5a4   : > { %vm10570_vm2 = vmand %vm5562_vm10, %vm11480_vm8  ;;  %vm5567_vm8 = vcmp.ge.f32.partialorder %v10362_v15, 0.0  ;;  %v11495_v15 = vmov 0 }
 0x5a5   : > { %vm10577_vm4 = vmand %vm5564_vm3, %vm11483_vm1  ;;  %vm11488_vm1 = vcmp.ne.s32.totalorder %v10382_v59, 0 }
 0x5a6   : > { %6108 = vperm.xlu0 %7225, %v6035_v63   ;;  %v11485_v41 = vsel %vm10577_vm4, 4294967295, %v11484_v41  ;;  %vm10587_vm10 = vmand %vm5587_vm6, %vm11477_vm12  ;;  %vm11491_vm6 = vcmp.ne.s32.totalorder %v10394_v52, 0  ;;  %vm11494_vm4 = vcmp.ne.s32.totalorder %v10374_v27, 0 }
 0x5a7   : > { %6156 = vperm.xlu1 %7226, %v6051_v57   ;;  %v11487_v6 = vsel %vm10587_vm10, 4294967295, %v11486_v6  ;;  %vm10597_vm3 = vmand %vm5565_vm11, %vm11488_vm1  ;;  %vm5568_vm10 = vcmp.ge.f32.partialorder %v10370_v54, 0.0  ;;  %vm5583_vm11 = vcmp.ge.f32.partialorder %v10348_v58, 0.0  ;;  %v6049_v54 = vsel %vm10530_vm15, 1, %v11369_v56 }
 0x5a8   : > { %vm10604_vm12 = vmand %vm5567_vm8, %vm11491_vm6  ;;  %vm5575_vm6 = vcmp.ge.f32.partialorder %v10310_v17, 0.0 }
 0x5a9   : > { %v11493_v31 = vsel %vm10604_vm12, 4294967295, %v11492_v31  ;;  %vm10611_vm5 = vmand %vm5590_vm14, %vm11494_vm4  ;;  %vm5585_vm12 = vcmp.ge.f32.partialorder %v10352_v28, 0.0 }
 0x5aa   : > { %6177 = vperm.xlu0 %7225, %v6058_v46   ;;  %v11496_v15 = vsel %vm10611_vm5, 4294967295, %v11495_v15  ;;  %vm10621_vm8 = vmand %vm5568_vm10, %vm11488_vm1  ;;  %vm11500_vm5 = vcmp.ne.s32.totalorder %v10374_v27, 0  ;;  %vm5553_vm10 = vcmp.ge.f32.partialorder %v10312_v29, 0.0 }
 0x5ab   : > { %6078 = vperm.xlu1 %7226, %v6025_v61   ;;  %v11498_v38 = vsel %vm10621_vm8, 4294967295, %v11497_v38  ;;  %vm11499_vm4 = vmmov %vm11488_vm1  ;;  %vm11501_vm1 = vcmp.ne.s32.totalorder %v10394_v52, 0 }
 0x5ac   : > { %vm5646_vm14 = vmand %vm5583_vm11, %vm11499_vm4 }
 0x5ad   : > { %vm5638_vm7 = vmand %vm5575_vm6, %vm11500_vm5  ;;  %v6061_v58 = vsel %vm5646_vm14, 1, %v11369_v56  ;;  %vm5555_vm5 = vcmp.ge.f32.partialorder %v10314_v37, 0.0  ;;  %vm11503_vm6 = vcmp.ne.s32.totalorder %v10374_v27, 0 }
 0x5ae   : > { %6183 = vperm.xlu0 %7225, %v6060_v1   ;;  %v6053_v17 = vsel %vm5638_vm7, 1, %v11369_v56  ;;  %vm5648_vm8 = vmand %vm5585_vm12, %vm11501_vm1 }
 0x5af   : > { %6090 = vperm.xlu1 %7226, %v6029_v39   ;;  %vm11502_vm15 = vmmov %vm11499_vm4  ;;  %vm5563_vm4 = vcmp.ge.f32.partialorder %v10356_v5, 0.0  ;;  %v6063_v4 = vsel %vm5648_vm8, 1, %v11369_v56 }
 0x5b0   : > { %vm5616_vm11 = vmand %vm5553_vm10, %vm11502_vm15  ;;  %vm5578_vm10 = vcmp.ge.f32.partialorder %v10318_v7, 0.0 }
 0x5b1   : > { %v6031_v28 = vsel %vm5616_vm11, 1, %v11369_v56  ;;  %vm5626_vm14 = vmand %vm5563_vm4, %vm11503_vm6 }
 0x5b2   : > { %6117 = vperm.xlu0 %7225, %v6038_v33   ;;  %vm11504_vm7 = vmmov %vm11501_vm1  ;;  %vm5586_vm1 = vcmp.ge.f32.partialorder %v10360_v22, 0.0  ;;  %v6041_v29 = vsel %vm5626_vm14, 1, %v11369_v56  ;;  %vm5556_vm14 = vcmp.ge.f32.partialorder %v10322_v0, 0.0 }
 0x5b3   : > { %6150 = vperm.xlu1 %7226, %v6049_v54   ;;  %vm5618_vm12 = vmand %vm5555_vm5, %vm11504_vm7  ;;  %vm5221_vm5 = vcmp.ge.f32.partialorder %v10105_v30, 0.0 }
 0x5b4   : > { %v6033_v5 = vsel %vm5618_vm12, 1, %v11369_v56  ;;  %vm11505_vm8 = vmmov %vm11502_vm15 }
 0x5b5   : > { %vm5649_vm15 = vmand %vm5586_vm1, %vm11505_vm8 }
 0x5b6   : > { %6186 = vperm.xlu0 %7225, %v6061_v58   ;;  %vm11506_vm11 = vmmov %vm11503_vm6  ;;  %vm5588_vm6 = vcmp.ge.f32.partialorder %v10364_v19, 0.0  ;;  %v6064_v37 = vsel %vm5649_vm15, 1, %v11369_v56  ;;  %v5269_v19 = vsel %vm5221_vm5, 1, %v11369_v56  ;;  %vm5558_vm15 = vcmp.ge.f32.partialorder %v10326_v8, 0.0 }
 0x5b7   : > { %6162 = vperm.xlu1 %7226, %v6053_v17   ;;  %vm5641_vm4 = vmand %vm5578_vm10, %vm11506_vm11  ;;  %vm5222_vm10 = vcmp.ge.f32.partialorder %v10055_v51, 0.0  ;;  %vm5220_vm11 = vcmp.ge.f32.partialorder %v10068_v21, 0.0  ;;  %v5415_v59 = vrot.slane %v5269_v19, %v9742_v49  ;;  %vm5224_vm5 = vcmp.ge.f32.partialorder %v10123_v26, 0.0 }
 0x5b8   : > { %v6056_v22 = vsel %vm5641_vm4, 1, %v11369_v56  ;;  %vm5651_vm12 = vmand %vm5588_vm6, %vm11504_vm7  ;;  %v5270_v7 = vsel %vm5222_vm10, 1, %v11369_v56  ;;  %v5268_v11 = vsel %vm5220_vm11, 1, %v11369_v56  ;;  %v6044_v8 = vsel %vm10488_vm9, 1, %v11369_v56 }
 0x5b9   : > { %vm11507_vm1 = vmmov %vm11505_vm8  ;;  %v6066_v27 = vsel %vm5651_vm12, 1, %v11369_v56  ;;  %vm5226_vm12 = vcmp.ge.f32.partialorder %v10111_v10, 0.0  ;;  %v5420_v53 = vrot.slane %v5270_v7, %v11509_v44  ;;  %v5411_v24 = vrot.slane %v5268_v11, %v11510_v34  ;;  %v10730_v7 = vpop.xlane.xlu1 %5042 }
 0x5ba   : > { %6192 = vperm.xlu0 %7225, %v6063_v4   ;;  %vm5619_vm8 = vmand %vm5556_vm14, %vm11507_vm1  ;;  %vm5223_vm14 = vcmp.ge.f32.partialorder %v10093_v13, 0.0  ;;  %vm5225_vm1 = vcmp.ge.f32.partialorder %v10151_v45, 0.0  ;;  %v5272_v43 = vsel %vm5224_vm5, 1, %v11369_v56  ;;  %v5274_v50 = vsel %vm5226_vm12, 1, %v11369_v56  ;;  %v11518_v4 = vld [vmem:[#allocation34_spill] sm:$0xff] }
 0x5bb   : > { %6096 = vperm.xlu1 %7226, %v6031_v28   ;;  %v6034_v0 = vsel %vm5619_vm8, 1, %v11369_v56  ;;  %vm11508_vm4 = vmmov %vm11504_vm7  ;;  %vm5227_vm7 = vcmp.ge.f32.partialorder %v10140_v60, 0.0  ;;  %vm5228_vm8 = vcmp.ge.f32.partialorder %v10171_v14, 0.0  ;;  %v5271_v2 = vsel %vm5223_vm14, 1, %v11369_v56 }
 0x5bc   : > { %vm5621_vm6 = vmand %vm5558_vm15, %vm11508_vm4  ;;  %v5275_v16 = vsel %vm5227_vm7, 1, %v11369_v56  ;;  %v5273_v62 = vsel %vm5225_vm1, 1, %v11369_v56  ;;  %v5276_v42 = vsel %vm5228_vm8, 1, %v11369_v56  ;;  %vm11511_vm9 = vcmask 130112  }
 0x5bd   : > { %v6036_v52 = vsel %vm5621_vm6, 1, %v11369_v56  ;;  %v5416_v32 = vsel %vm11511_vm9, %v5415_v59, %v5411_v24  ;;  %vm5230_vm10 = vcmp.ge.f32.partialorder %v11512_v48, 0.0  ;;  %vm5231_vm11 = vcmp.ge.f32.partialorder %v11513_v23, 0.0  ;;  %vm11520_vm12 = vmmov %vm11511_vm9  ;;  %v11527_v24 = vld [vmem:[#allocation49_spill] sm:$0xff] }
 0x5be   : > { %6126 = vperm.xlu0 %7225, %v6041_v29   ;;  %vm11514_vm15 = vnez %v11462_v3  ;;  %v5429_v57 = vrot.slane %v5272_v43, %v9742_v49  ;;  %v5443_v35 = vrot.slane %v5275_v16, %v9742_v49  ;;  %vm5229_vm4 = vcmp.ge.f32.partialorder %v11515_v9, 0.0  ;;  %vm11521_vm1 = vmmov %vm11511_vm9  ;;  %v11528_v43 = vld [vmem:[#allocation52_spill] sm:$0xff] }
 0x5bf   : > { %6102 = vperm.xlu1 %7226, %v6033_v5   ;;  %v6067_v63 = vsel %vm11514_vm15, 1, %v11369_v56  ;;  %vm11516_vm6 = vnez %v11466_v20  ;;  %v5425_v61 = vrot.slane %v5271_v2, %v11510_v34  ;;  %v5434_v1 = vrot.slane %v5273_v62, %v11509_v44  ;;  %v11519_v20 = vld [vmem:[#allocation47_spill] sm:$0xff]  ;;  %v11530_v2 = vld [vmem:[#allocation44_spill] sm:$0xff] }
 0x5c0   : > { %v6059_v46 = vsel %vm11516_vm6, 1, %v11369_v56  ;;  %v5448_v39 = vrot.slane %v5276_v42, %v11509_v44  ;;  %vm11517_vm14 = vcmask 195712   ;;  %v5439_v33 = vrot.slane %v5274_v50, %v11510_v34  ;;  %v11531_v50 = vld [vmem:[#allocation59_spill] sm:$0xff] }
 0x5c1   : > { %v5421_v3 = vsel %vm11517_vm14, %v5420_v53, %v5416_v32  ;;  %v5278_v54 = vsel %vm5230_vm10, 1, %v11369_v56  ;;  %v5279_v58 = vsel %vm5231_vm11, 1, %v11369_v56  ;;  %v5277_v17 = vsel %vm5229_vm4, 1, %v11369_v56  ;;  %vm11524_vm10 = vmmov %vm11517_vm14  ;;  %v11533_v32 = vld [vmem:[#allocation42_spill] sm:$0xff] }
 0x5c2   : > { %6195 = vperm.xlu0 %7225, %v6064_v37   ;;  %vm5234_vm5 = vcmp.ge.f32.partialorder %v11518_v4, 0.0  ;;  %vm5233_vm7 = vcmp.ge.f32.partialorder %v11519_v20, 0.0  ;;  %v6069_v28 = vsel %vm10536_vm0, 1, %v11369_v56  ;;  %v5430_v29 = vsel %vm11520_vm12, %v5429_v57, %v5425_v61  ;;  %v11522_v37 = vld [vmem:[#allocation39_spill] sm:$0xff]  ;;  %vm11525_vm11 = vmmov %vm11524_vm10 }
 0x5c3   : > { %6171 = vperm.xlu1 %7226, %v6056_v22   ;;  %v5444_v5 = vsel %vm11521_vm1, %v5443_v35, %v5439_v33  ;;  %vm5232_vm8 = vcmp.ge.f32.partialorder %v11522_v37, 0.0  ;;  %vm11523_vm9 = vnez %v11473_v40  ;;  %v5435_v19 = vsel %vm11524_vm10, %v5434_v1, %v5430_v29  ;;  %v10736_v40 = vpop.xlane.xlu0 %5044 }
 0x5c4   : > { %v6037_v22 = vsel %vm11523_vm9, 1, %v11369_v56  ;;  %v5462_v18 = vrot.slane %v5279_v58, %v11509_v44  ;;  %v5453_v11 = vrot.slane %v5277_v17, %v11510_v34  ;;  %v5282_v59 = vsel %vm5234_vm5, 1, %v11369_v56 }
 0x5c5   : > { %v5280_v53 = vsel %vm5232_vm8, 1, %v11369_v56  ;;  %vm5239_vm15 = vcmp.ge.f32.partialorder %v11527_v24, 0.0  ;;  %vm5237_vm4 = vcmp.ge.f32.partialorder %v11528_v43, 0.0  ;;  %vm11529_vm6 = vnez %v11444_v12 }
 0x5c6   : > { %6201 = vperm.xlu0 %7225, %v6066_v27   ;;  %v5457_v27 = vrot.slane %v5278_v54, %v9742_v49  ;;  %v6070_v16 = vsel %vm11529_vm6, 1, %v11369_v56  ;;  %vm5235_vm14 = vcmp.ge.f32.partialorder %v11530_v2, 0.0  ;;  %vm5240_vm5 = vcmp.ge.f32.partialorder %v11531_v50, 0.0 }
 0x5c7   : > { %6105 = vperm.xlu1 %7226, %v6034_v0   ;;  %v5449_v0 = vsel %vm11525_vm11, %v5448_v39, %v5444_v5  ;;  %vm11532_vm12 = vnez %v11476_v25  ;;  %vm5238_vm1 = vcmp.ge.f32.partialorder %v11533_v32, 0.0  ;;  %vm5243_vm8 = vcmp.ge.f32.partialorder %v10736_v40, 0.0 }
 0x5c8   : > { %v6039_v62 = vsel %vm11532_vm12, 1, %v11369_v56  ;;  %vm11534_vm9 = vcmask 130112   ;;  %v5287_v57 = vsel %vm5239_vm15, 1, %v11369_v56  ;;  %v5285_v35 = vsel %vm5237_vm4, 1, %v11369_v56 }
 0x5c9   : > { %v5458_v12 = vsel %vm11534_vm9, %v5457_v27, %v5453_v11  ;;  %v5467_v25 = vrot.slane %v5280_v53, %v11510_v34  ;;  %v5283_v61 = vsel %vm5235_vm14, 1, %v11369_v56  ;;  %v5288_v1 = vsel %vm5240_vm5, 1, %v11369_v56  ;;  %vm11536_vm11 = vmmov %vm11534_vm9 }
 0x5ca   : > { %6135 = vperm.xlu0 %7225, %v6044_v8   ;;  %v5281_v8 = vsel %vm5233_vm7, 1, %v11369_v56  ;;  %vm5242_vm7 = vcmp.ge.f32.partialorder %v10730_v7, 0.0  ;;  %v5286_v33 = vsel %vm5238_vm1, 1, %v11369_v56  ;;  %v5291_v58 = vsel %vm5243_vm8, 1, %v11369_v56  ;;  %vm11540_vm4 = vmmov %vm11534_vm9 }
 0x5cb   : > { %6111 = vperm.xlu1 %7226, %v6036_v52   ;;  %v11526_v52 = vld [vmem:[#allocation48_spill] sm:$0xff]  ;;  %v5471_v42 = vrot.slane %v5281_v8, %v9742_v49  ;;  %v5290_v39 = vsel %vm5242_vm7, 1, %v11369_v56  ;;  %v6062_v17 = vsel %vm10563_vm13, 1, %v11369_v56  ;;  %v5499_v29 = vrot.slane %v5287_v57, %v9742_v49  ;;  %vm11543_vm14 = vmmov %vm11540_vm4 }
 0x5cc   : > { %vm5236_vm0 = vcmp.ge.f32.partialorder %v11526_v52, 0.0  ;;  %v5490_v5 = vrot.slane %v5285_v35, %v11509_v44  ;;  %v5476_v27 = vrot.slane %v5282_v59, %v11509_v44  ;;  %v5481_v11 = vrot.slane %v5283_v61, %v11510_v34  ;;  %vm11548_vm1 = vmmov %vm11540_vm4 }
 0x5cd   : > { %v5504_v8 = vrot.slane %v5288_v1, %v11509_v44  ;;  %v5513_v53 = vrot.slane %v5290_v39, %v9742_v49  ;;  %vm11538_vm13 = vcmask 195712   ;;  %v6040_v35 = vsel %vm10570_vm2, 1, %v11369_v56  ;;  %v11549_v39 = vld [vmem:[#allocation36_spill] sm:$0xff] }
 0x5ce   : > { %6204 = vperm.xlu0 %7225, %v6067_v63   ;;  %v5284_v63 = vsel %vm5236_vm0, 1, %v11369_v56  ;;  %vm11537_vm0 = vcmask 1041409   ;;  %vm11539_vm15 = vmmov %vm11538_vm13  ;;  %vm11542_vm6 = vcmask 1042434   ;;  %vm11546_vm7 = vcmask 1043459  }
 0x5cf   : > { %6180 = vperm.xlu1 %7226, %v6059_v46   ;;  %v11535_v46 = vld [vmem:[#allocation62_spill] sm:$0xff]  ;;  %v5485_v54 = vrot.slane %v5284_v63, %v9742_v49  ;;  %v5534_v55 = vsel %vm11537_vm0, %v5435_v19, %v5421_v3  ;;  %vm11544_vm5 = vmmov %vm11538_vm13  ;;  %vm11550_vm2 = vcmask 1044484   ;;  %vm11553_vm9 = vcmask 1045509  }
 0x5d0   : > { %vm5241_vm10 = vcmp.ge.f32.partialorder %v11535_v46, 0.0  ;;  %v5535_v3 = vsel %vm11542_vm6, %v5449_v0, %v5534_v55  ;;  %vm11547_vm12 = vmmov %vm11544_vm5  ;;  %vm11556_vm0 = vcmask 1046534   ;;  %v11562_v55 = vld [vmem:[#allocation57_spill] sm:$0xff] }
 0x5d1   : > { %v5486_v57 = vsel %vm11540_vm4, %v5485_v54, %v5481_v11  ;;  %vm11551_vm8 = vmmov %vm11544_vm5  ;;  %v11552_v54 = vld [vmem:[#allocation27_spill] sm:$0xff]  ;;  %vm11561_vm4 = vnez %v11487_v6  ;;  %vm11563_vm6 = vcmp.lt.s32.totalorder %v11562_v55, 16  ;;  %v11571_v6 = vld [vmem:[#allocation40_spill] sm:$0xff] }
 0x5d2   : > { %6210 = vperm.xlu0 %7225, %v6069_v28   ;;  %v5472_v28 = vsel %vm11536_vm11, %v5471_v42, %v5467_v25  ;;  %v5518_v42 = vrot.slane %v5291_v58, %v11509_v44  ;;  %v11541_v25 = vld [vmem:[#allocation20_spill] sm:$0xff] }
 0x5d3   : > { %6114 = vperm.xlu1 %7226, %v6037_v22   ;;  %v5289_v22 = vsel %vm5241_vm10, 1, %v11369_v56  ;;  %v5477_v63 = vsel %vm11539_vm15, %v5476_v27, %v5472_v28  ;;  %7604 = vlog2.f32 %v11541_v25  ;;  %vm11554_vm10 = vnez %v11485_v41  ;;  %v11555_v28 = vld [vmem:[#allocation33_spill] sm:$0xff]  ;;  %v11573_v25 = vld [vmem:[#allocation51_spill] sm:$0xff] }
 0x5d4   : > { %v5509_v59 = vrot.slane %v5289_v22, %v11510_v34  ;;  %v11557_v22 = vld [vmem:[#allocation29_spill] sm:$0xff]  ;;  %vm11558_vm15 = vcmask 1047559   ;;  %v6065_v41 = vsel %vm11561_vm4, 1, %v11369_v56  ;;  %vm11592_vm4 = vcmask 195712  }
 0x5d5   : > { %v7655_v27 = vld [vmem:[%s9009_s20 + $0x8] sm:$0xff] }
 0x5d6   : > { %6213 = vperm.xlu0 %7225, %v6070_v16   ;;  %v5463_v16 = vsel %vm11538_vm13, %v5462_v18, %v5458_v12  ;;  %v5491_v18 = vsel %vm11544_vm5, %v5490_v5, %v5486_v57  ;;  %v11545_v12 = vld [vmem:[#allocation24_spill] sm:$0xff]  ;;  %v5514_v36 = vsel %vm11548_vm1, %v5513_v53, %v5509_v59  ;;  %vm5193_vm13 = vcmp.lt.s32.totalorder %v7655_v27, 50  ;;  %v11560_v53 = vld [vmem:[#allocation41_spill] sm:$0xff] }
 0x5d7   : > { %6120 = vperm.xlu1 %7226, %v6039_v62   ;;  %v5495_v62 = vrot.slane %v5286_v33, %v11510_v34  ;;  %7606 = vlog2.f32 %v11545_v12  ;;  %v5536_v61 = vsel %vm11546_vm7, %v5463_v16, %v5535_v3  ;;  %v5519_v0 = vsel %vm11551_vm8, %v5518_v42, %v5514_v36  ;;  %v11567_v42 = vld [vmem:[#allocation37_spill] sm:$0xff]  ;;  %vm11568_vm7 = vmmov %vm11563_vm6  ;;  %v11572_v59 = vld [vmem:[#allocation12_spill] sm:$0xff] }
 0x5d8   : > { %7608 = vlog2.f32 %v11549_v39  ;;  %v5537_v33 = vsel %vm11550_vm2, %v5477_v63, %v5536_v61  ;;  %v6043_v3 = vsel %vm10597_vm3, 1, %v11369_v56  ;;  %v11575_v61 = vld [vmem:[#allocation58_spill] sm:$0xff]  ;;  %v7777_v39 = vmov 0.0  }
 0x5d9   : > { %v5500_v19 = vsel %vm11543_vm14, %v5499_v29, %v5495_v62  ;;  %7610 = vlog2.f32 %v11552_v54  ;;  %v5538_v58 = vsel %vm11553_vm9, %v5491_v18, %v5537_v33  ;;  %v7654_v29 = vld [vmem:[%s9009_s20] sm:$0xff]  ;;  %v11574_v18 = vld [vmem:[#allocation45_spill] sm:$0xff]  ;;  %v11576_v36 = vld [vmem:[#allocation50_spill] sm:$0xff]  ;;  %vm5994_vm9 = vcmask 195584  }
 0x5da   : > { %v5505_v1 = vsel %vm11547_vm12, %v5504_v8, %v5500_v19  ;;  %7612 = vlog2.f32 %v11555_v28  ;;  %vm5192_vm11 = vcmp.lt.s32.totalorder %v7654_v29, 50  ;;  %v11559_v8 = vld [vmem:[#allocation43_spill] sm:$0xff]  ;;  %v11566_v62 = vld [vmem:[#allocation32_spill] sm:$0xff]  ;;  %vm10823_vm12 = vmand %vm5193_vm13, %vm11568_vm7  ;;  %vm11578_vm3 = vnez %v11493_v31 }
 0x5db   : > { %6189 = vperm.xlu1 %7226, %v6062_v17   ;;  %v6042_v17 = vsel %vm11554_vm10, 1, %v11369_v56  ;;  %v5539_v5 = vsel %vm11556_vm0, %v5505_v1, %v5538_v58  ;;  %7614 = vlog2.f32 %v11557_v22  ;;  %vm10815_vm14 = vmand %vm5192_vm11, %vm11563_vm6  ;;  %vm5541_vm5 = vcmp.ne.s32.totalorder %v11566_v62, 0  ;;  %v11577_v54 = vld [vmem:[#allocation46_spill] sm:$0xff]  ;;  %v11581_v62 = vld [vmem:[#allocation53_spill] sm:$0xff] }
 0x5dc   : > { %v5540_v11 = vsel %vm11558_vm15, %v5519_v0, %v5539_v5  ;;  %7616 = vlog2.f32 %v11559_v8  ;;  %vm5543_vm2 = vmand %vm10815_vm14, %vm5541_vm5  ;;  %v6045_v58 = vsel %vm11578_vm3, 1, %v11369_v56  ;;  %v11579_v28 = vld [vmem:[#allocation54_spill] sm:$0xff]  ;;  %v11580_v5 = vld [vmem:[#allocation21_spill] sm:$0xff]  ;;  %vm11583_vm10 = vnez %v11496_v15 }
 0x5dd   : > { %7618 = vlog2.f32 %v11560_v53  ;;  %vm5542_vm1 = vcmp.ne.s32.totalorder %v5540_v11, 0  ;;  %v7605_v57 = vpop.eup %7604  ;;  %v6942_v33 = vsel %vm5543_vm2, 1.0, %v7777_v39  ;;  %v11586_v15 = vld [vmem:[#allocation15_spill] sm:$0xff]  ;;  %vm11588_vm11 = vnez %v11498_v38  ;;  %vm11593_vm6 = vmmov %vm11592_vm4 }
 0x5de   : > { %7620 = vlog2.f32 %v11567_v42  ;;  %vm5544_vm8 = vmand %vm10823_vm12, %vm5542_vm1  ;;  %v6011_v22 = vsel %vm5994_vm9, %v6942_v33, 0.0  ;;  %v11585_v33 = vld [vmem:[#allocation14_spill] sm:$0xff]  ;;  %vm11589_vm0 = vcmask 130112  }
 0x5df   : > { %6123 = vperm.xlu1 %7226, %v6040_v35   ;;  %7622 = vlog2.f32 %v11571_v6  ;;  %v6943_v47 = vsel %vm5544_vm8, 1.0, %v7777_v39  ;;  %vm11590_vm13 = vmmov %vm11589_vm0  ;;  %vm11598_vm8 = vcmask 1041409  }
 0x5e0   : > { %7624 = vlog2.f32 %v11572_v59  ;;  %v6012_v27 = vsel %vm5994_vm9, %v6943_v47, 0.0  ;;  %v11582_v59 = vld [vmem:[#allocation61_spill] sm:$0xff]  ;;  %vm11591_vm15 = vmmov %vm11589_vm0 }
 0x5e1   : > { %v7607_v35 = vpop.eup %7606  ;;  %7626 = vlog2.f32 %v11573_v25  ;;  %v6068_v25 = vsel %vm11583_vm10, 1, %v11369_v56  ;;  %vm11594_vm5 = vmmov %vm11589_vm0 }
 0x5e2   : > { %v7609_v19 = vpop.eup %7608  ;;  %7628 = vlog2.f32 %v11574_v18  ;;  %v4563_v8 = vmul.f32 0.6931472, %v7607_v35  ;;  %v6013_v35 = vadd.f32 %v6012_v27, %v6011_v22  ;;  %vm11595_vm7 = vmmov %vm11589_vm0 }
 0x5e3   : > { %6129 = vperm.xlu1 %7226, %v6042_v17   ;;  %v7611_v12 = vpop.eup %7610  ;;  %7630 = vlog2.f32 %v11575_v61  ;;  %v4569_v53 = vmul.f32 0.6931472, %v7609_v19  ;;  %vm11596_vm1 = vmmov %vm11592_vm4 }
 0x5e4   : > { %v7613_v1 = vpop.eup %7612  ;;  %7632 = vlog2.f32 %v11576_v36  ;;  %v11584_v36 = vld [vmem:[#allocation23_spill] sm:$0xff]  ;;  %vm11597_vm2 = vmmov %vm11596_vm1 }
 0x5e5   : > { %v7615_v0 = vpop.eup %7614  ;;  %7634 = vlog2.f32 %v11577_v54  ;;  %v4575_v18 = vmul.f32 0.6931472, %v7613_v1  ;;  %v5683_v54 = vsub.f32 %v4569_v53, %v10093_v13  ;;  %vm11599_vm3 = vmmov %vm11589_vm0 }
 0x5e6   : > { %v7617_v17 = vpop.eup %7616  ;;  %7636 = vlog2.f32 %v11579_v28  ;;  %v4571_v31 = vmul.f32 0.6931472, %v7615_v0  ;;  %v5680_v0 = vsub.f32 %v4563_v8, %v10068_v21  ;;  %vm11600_vm10 = vmmov %vm11596_vm1 }
 0x5e7   : > { %6198 = vperm.xlu1 %7226, %v6065_v41   ;;  %v7619_v29 = vpop.eup %7618  ;;  %7638 = vlog2.f32 %v11580_v5  ;;  %v4565_v41 = vmul.f32 0.6931472, %v7611_v12  ;;  %v4577_v6 = vmul.f32 0.6931472, %v7617_v17  ;;  %v4567_v12 = vmul.f32 0.6931472, %v7605_v57 }
 0x5e8   : > { %v7621_v11 = vpop.eup %7620  ;;  %7640 = vlog2.f32 %v11581_v62  ;;  %v4573_v61 = vmul.f32 0.6931472, %v7619_v29  ;;  %v5684_v17 = vsub.f32 %v4571_v31, %v10123_v26  ;;  %v11587_v29 = vld [vmem:[#allocation63_spill] sm:$0xff]  ;;  %v6046_v57 = vsel %vm11588_vm11, 1, %v11369_v56 }
 0x5e9   : > { %v7623_v42 = vpop.eup %7622  ;;  %7642 = vlog2.f32 %v11582_v59  ;;  %v5687_v28 = vsub.f32 %v4577_v6, %v10140_v60  ;;  %v5686_v21 = vsub.f32 %v4575_v18, %v10111_v10  ;;  %v4583_v27 = vmul.f32 0.6931472, %v7621_v11 }
 0x5ea   : > { %7644 = vlog2.f32 %v11584_v36  ;;  %v5685_v13 = vsub.f32 %v4573_v61, %v10151_v45  ;;  %v5682_v26 = vsub.f32 %v4567_v12, %v10055_v51  ;;  %v5867_v60 = vrot.slane %v5680_v0, %v11510_v34 }
 0x5eb   : > { %6132 = vperm.xlu1 %7226, %v6043_v3   ;;  %v7625_v3 = vpop.eup %7624  ;;  %7646 = vlog2.f32 %v11585_v33  ;;  %v5881_v38 = vrot.slane %v5683_v54, %v11510_v34  ;;  %v5885_v10 = vrot.slane %v5684_v17, %v9742_v49  ;;  %v5899_v45 = vrot.slane %v5687_v28, %v9742_v49 }
 0x5ec   : > { %v7627_v19 = vpop.eup %7626  ;;  %7648 = vlog2.f32 %v11586_v15  ;;  %v5895_v31 = vrot.slane %v5686_v21, %v11510_v34  ;;  %v5890_v11 = vrot.slane %v5685_v13, %v11509_v44  ;;  %v4585_v18 = vmul.f32 0.6931472, %v7625_v3 }
 0x5ed   : > { %v7629_v47 = vpop.eup %7628  ;;  %7650 = vlog2.f32 %v11587_v29  ;;  %v4581_v8 = vmul.f32 0.6931472, %v7627_v19  ;;  %v5876_v19 = vrot.slane %v5682_v26, %v11509_v44  ;;  %vm11601_vm11 = vcmask 1042434  }
 0x5ee   : > { %v7631_v1 = vpop.eup %7630  ;;  %v4591_v12 = vmul.f32 0.6931472, %v7629_v47  ;;  %v5900_v15 = vsel %vm11591_vm15, %v5899_v45, %v5895_v31  ;;  %v5691_v29 = vsub.f32 %v4585_v18, %v11513_v23  ;;  %vm11604_vm15 = vmmov %vm11599_vm3 }
 0x5ef   : > { %6138 = vperm.xlu1 %7226, %v6045_v58   ;;  %v5681_v58 = vsub.f32 %v4565_v41, %v10105_v30  ;;  %v7633_v5 = vpop.eup %7632  ;;  %v4579_v30 = vmul.f32 0.6931472, %v7623_v42  ;;  %v4589_v41 = vmul.f32 0.6931472, %v7631_v1  ;;  %v5689_v61 = vsub.f32 %v4581_v8, %v11515_v9 }
 0x5f0   : > { %v7635_v22 = vpop.eup %7634  ;;  %v4587_v51 = vmul.f32 0.6931472, %v7633_v5  ;;  %v5694_v21 = vsub.f32 %v4591_v12, %v11518_v4  ;;  %v5918_v4 = vrot.slane %v5691_v29, %v11509_v44 }
 0x5f1   : > { %v7637_v53 = vpop.eup %7636  ;;  %v5871_v56 = vrot.slane %v5681_v58, %v9742_v49  ;;  %v5688_v6 = vsub.f32 %v4579_v30, %v10171_v14  ;;  %v5693_v33 = vsub.f32 %v4589_v41, %v11519_v20  ;;  %v5886_v14 = vsel %vm11590_vm13, %v5885_v10, %v5881_v38 }
 0x5f2   : > { %v7639_v62 = vpop.eup %7638  ;;  %v4595_v36 = vmul.f32 0.6931472, %v7637_v53  ;;  %v5891_v3 = vsel %vm11592_vm4, %v5890_v11, %v5886_v14  ;;  %v5692_v17 = vsub.f32 %v4587_v51, %v11522_v37  ;;  %v4599_v13 = vmul.f32 0.6931472, %v7635_v22 }
 0x5f3   : > { %6207 = vperm.xlu1 %7226, %v6068_v25   ;;  %v7641_v42 = vpop.eup %7640  ;;  %v5690_v25 = vsub.f32 %v4583_v27, %v11512_v48  ;;  %v4597_v0 = vmul.f32 0.6931472, %v7639_v62  ;;  %v5872_v58 = vsel %vm11589_vm0, %v5871_v56, %v5867_v60  ;;  %v5904_v9 = vrot.slane %v5688_v6, %v11509_v44  ;;  %vm11602_vm0 = vmmov %vm11596_vm1 }
 0x5f4   : > { %v7643_v59 = vpop.eup %7642  ;;  %v4593_v1 = vmul.f32 0.6931472, %v7641_v42  ;;  %v5696_v5 = vsub.f32 %v4595_v36, %v11526_v52  ;;  %v5927_v30 = vrot.slane %v5693_v33, %v9742_v49  ;;  %v5923_v23 = vrot.slane %v5692_v17, %v11510_v34 }
 0x5f5   : > { %6014 = vadd.xlane.f32.xlu0 %v6013_v35  ;;  %v7645_v35 = vpop.eup %7644  ;;  %v4601_v28 = vmul.f32 0.6931472, %v7643_v59  ;;  %v5913_v20 = vrot.slane %v5690_v25, %v9742_v49  ;;  %v5697_v27 = vsub.f32 %v4597_v0, %v11528_v43  ;;  %v5905_v60 = vsel %vm11593_vm6, %v5904_v9, %v5900_v15  ;;  %vm11606_vm6 = vmmov %vm11599_vm3 }
 0x5f6   : > { %v7647_v54 = vpop.eup %7646  ;;  %v5695_v8 = vsub.f32 %v4593_v1, %v11530_v2  ;;  %v4607_v26 = vmul.f32 0.6931472, %v7645_v35  ;;  %v5941_v38 = vrot.slane %v5696_v5, %v9742_v49  ;;  %v5698_v2 = vsub.f32 %v4599_v13, %v11533_v32 }
 0x5f7   : > { %6141 = vperm.xlu1 %7226, %v6046_v57   ;;  %v7649_v48 = vpop.eup %7648  ;;  %v5909_v57 = vrot.slane %v5689_v61, %v11510_v34  ;;  %v4603_v37 = vmul.f32 0.6931472, %v7647_v54  ;;  %v5699_v41 = vsub.f32 %v4601_v28, %v11527_v24  ;;  %v5928_v56 = vsel %vm11595_vm7, %v5927_v30, %v5923_v23  ;;  %vm11608_vm7 = vmmov %vm11602_vm0 }
 0x5f8   : > { %v7651_v47 = vpop.eup %7650  ;;  %v4605_v53 = vmul.f32 0.6931472, %v7649_v48  ;;  %v5702_v43 = vsub.f32 %v4607_v26, %v10730_v7  ;;  %v5946_v10 = vrot.slane %v5697_v27, %v11509_v44  ;;  %v5932_v24 = vrot.slane %v5694_v21, %v11509_v44  ;;  %v11613_v21 = vld [vmem:[#allocation38_spill] sm:$0xff] }
 0x5f9   : > { %v4609_v62 = vmul.f32 0.6931472, %v7651_v47  ;;  %v5914_v22 = vsel %vm11594_vm5, %v5913_v20, %v5909_v57  ;;  %v5937_v42 = vrot.slane %v5695_v8, %v11510_v34  ;;  %v5700_v31 = vsub.f32 %v4603_v37, %v11531_v50 }
 0x5fa   : > { %v5701_v11 = vsub.f32 %v4605_v53, %v11535_v46  ;;  %v5877_v6 = vsel %vm11596_vm1, %v5876_v19, %v5872_v58  ;;  %v5919_v7 = vsel %vm11597_vm2, %v5918_v4, %v5914_v22  ;;  %v5955_v32 = vrot.slane %v5699_v41, %v9742_v49  ;;  %vm11609_vm1 = vmmov %vm11602_vm0 }
 0x5fb   : > { %v5703_v45 = vsub.f32 %v4609_v62, %v10736_v40  ;;  %v5983_v51 = vsel %vm11598_vm8, %v5891_v3, %v5877_v6  ;;  %v5942_v59 = vsel %vm11599_vm3, %v5941_v38, %v5937_v42  ;;  %v5933_v40 = vsel %vm11600_vm10, %v5932_v24, %v5928_v56 }
 0x5fc   : > { %v5969_v25 = vrot.slane %v5702_v43, %v9742_v49  ;;  %v5984_v18 = vsel %vm11601_vm11, %v5905_v60, %v5983_v51  ;;  %v5951_v50 = vrot.slane %v5698_v2, %v11510_v34  ;;  %v5947_v46 = vsel %vm11602_vm0, %v5946_v10, %v5942_v59  ;;  %vm11615_vm0 = vmmov %vm11599_vm3 }
 0x5fd   : > { %v5974_v61 = vrot.slane %v5703_v45, %v11509_v44  ;;  %v5960_v35 = vrot.slane %v5700_v31, %v11509_v44  ;;  %v5965_v19 = vrot.slane %v5701_v11, %v11510_v34  ;;  %vm11603_vm13 = vcmask 1043459  }
 0x5fe   : > { %v5985_v12 = vsel %vm11603_vm13, %v5919_v7, %v5984_v18  ;;  %v5956_v33 = vsel %vm11604_vm15, %v5955_v32, %v5951_v50  ;;  %vm11605_vm4 = vcmask 1044484   ;;  %vm11607_vm5 = vcmask 1045509   ;;  %vm11616_vm13 = vmmov %vm11609_vm1 }
 0x5ff   : > { %v5986_v0 = vsel %vm11605_vm4, %v5933_v40, %v5985_v12  ;;  %v5970_v54 = vsel %vm11606_vm6, %v5969_v25, %v5965_v19  ;;  %v5961_v1 = vsel %vm11609_vm1, %v5960_v35, %v5956_v33  ;;  %vm11610_vm2 = vcmask 1046534   ;;  %vm11617_vm15 = vmmov %vm11615_vm0 }
 0x600   : > { %v5987_v58 = vsel %vm11607_vm5, %v5947_v46, %v5986_v0  ;;  %v5975_v14 = vsel %vm11608_vm7, %v5974_v61, %v5970_v54  ;;  %vm11611_vm8 = vcmask 1047559   ;;  %vm11612_vm10 = vcmp.lt.s32.totalorder %v11562_v55, 16  ;;  %vm11618_vm4 = vmmov %vm11615_vm0 }
 0x601   : > { %v5988_v17 = vsel %vm11610_vm2, %v5961_v1, %v5987_v58  ;;  %vm11614_vm11 = vmmov %vm11612_vm10  ;;  %vm11620_vm5 = vcmask 1041409  }
 0x602   : > { %v5989_v28 = vsel %vm11611_vm8, %v5975_v14, %v5988_v17  ;;  %v5992_v13 = vsel %vm11614_vm11, %v11613_v21, 0.0  ;;  %vm11619_vm6 = vmmov %vm11609_vm1  ;;  %vm11625_vm11 = vcmask 1042434  }
 0x603   : > { %v6073_v52 = vpop.permute.xlu0 %6072  ;;  %v5993_v57 = vsel %vm11612_vm10, %v5989_v28, 0.0  ;;  %v5995_v26 = vsel %vm5994_vm9, %v5992_v13, 0.0  ;;  %vm11621_vm7 = vmmov %vm11615_vm0 }
 0x604   : > { %v6218_v3 = vrot.slane %v6073_v52, %v11510_v34  ;;  %v5996_v27 = vsel %vm5994_vm9, %v5993_v57, 0.0  ;;  %vm11622_vm2 = vmmov %vm11609_vm1 }
 0x605   : > { %v5997_v41 = vadd.f32 %v5996_v27, %v5995_v26  ;;  %vm11623_vm8 = vmmov %vm11620_vm5 }
 0x606   : > { %vm11624_vm10 = vmmov %vm11609_vm1 }
 0x607   : > { %v6088_v36 = vpop.permute.xlu0 %6087 }
 0x608   : > { %v6241_v53 = vrot.slane %v6088_v36, %v11509_v44 }
 0x60d   : > { %v6094_v15 = vpop.permute.xlu0 %6093 }
 0x60e   : > { %v6076_v48 = vpop.permute.xlu1 %6075  ;;  %v6250_v59 = vrot.slane %v6094_v15, %v9742_v49 }
 0x60f   : > { %v6222_v9 = vrot.slane %v6076_v48, %v9742_v49 }
 0x611   : > { %v6223_v47 = vsel %vm11599_vm3, %v6222_v9, %v6218_v3  ;;  %v6160_v20 = vpop.permute.xlu0 %6159  ;;  %vm355_vm3 = vcmask 0  }
 0x612   : > { %v6082_v29 = vpop.permute.xlu1 %6081  ;;  %v6353_v46 = vrot.slane %v6160_v20, %v11509_v44  ;;  %356 = vst.msk [vmem:[#allocation3] sm:$0x1] %vm355_vm3, %v7777_v39  ;;  %357 = vst.msk [vmem:[#allocation4] sm:$0x1] %vm355_vm3, %v7777_v39 }
 0x613   : > { %v6232_v8 = vrot.slane %v6082_v29, %v11510_v34  ;;  %358 = vst.msk [vmem:[#allocation5] sm:$0x1] %vm355_vm3, %v7777_v39 }
 0x615   : > { %v10938_v5 = vpop.permute.xlu0 %6165 }
 0x616   : > { %v6085_v30 = vpop.permute.xlu1 %6084  ;;  %v6362_v26 = vrot.slane %v10938_v5, %v9742_v49 }
 0x617   : > { %v6236_v37 = vrot.slane %v6085_v30, %v9742_v49 }
 0x619   : > { %v6237_v60 = vsel %vm11615_vm0, %v6236_v37, %v6232_v8  ;;  %v10949_v23 = vpop.permute.xlu0 %6099 }
 0x61a   : > { %v6242_v62 = vsel %vm11616_vm13, %v6241_v53, %v6237_v60  ;;  %v6145_v55 = vpop.permute.xlu1 %6144  ;;  %vm11626_vm13 = vmmov %vm11609_vm1 }
 0x61b   : > { %5998 = vadd.xlane.f32.xlu1 %v5997_v41  ;;  %v6330_v22 = vrot.slane %v6145_v55, %v11510_v34 }
 0x61d   : > { %v10952_v52 = vpop.permute.xlu0 %6168 }
 0x61e   : > { %v6148_v4 = vpop.permute.xlu1 %6147 }
 0x61f   : > { %v6334_v38 = vrot.slane %v6148_v4, %v9742_v49  ;;  %v6367_v4 = vrot.slane %v10952_v52, %v11509_v44 }
 0x621   : > { %v6335_v43 = vsel %vm11617_vm15, %v6334_v38, %v6330_v22  ;;  %v10957_v56 = vpop.permute.xlu0 %6174  ;;  %vm11627_vm15 = vmmov %vm11615_vm0 }
 0x622   : > { %v6154_v2 = vpop.permute.xlu1 %6153  ;;  %v6376_v22 = vrot.slane %v10957_v56, %v9742_v49 }
 0x623   : > { %v6344_v45 = vrot.slane %v6154_v2, %v11510_v34 }
 0x625   : > { %v10962_v31 = vpop.permute.xlu0 %6108 }
 0x626   : > { %v6157_v10 = vpop.permute.xlu1 %6156  ;;  %v6274_v56 = vrot.slane %v10962_v31, %v11510_v34 }
 0x627   : > { %v6348_v24 = vrot.slane %v6157_v10, %v9742_v49 }
 0x629   : > { %v6349_v42 = vsel %vm11618_vm4, %v6348_v24, %v6344_v45  ;;  %v10968_v40 = vpop.permute.xlu0 %6177  ;;  %vm11628_vm4 = vmmov %vm11625_vm11 }
 0x62a   : > { %v6079_v11 = vpop.permute.xlu1 %6078  ;;  %v6354_v36 = vsel %vm11609_vm1, %v6353_v46, %v6349_v42 }
 0x62b   : > { %v6227_v6 = vrot.slane %v6079_v11, %v11509_v44 }
 0x62d   : > { %v6228_v7 = vsel %vm11619_vm6, %v6227_v6, %v6223_v47  ;;  %v6184_v35 = vpop.permute.xlu0 %6183  ;;  %vm11629_vm6 = vmmov %vm11615_vm0 }
 0x62e   : > { %v6439_v32 = vsel %vm11620_vm5, %v6242_v62, %v6228_v7  ;;  %v6091_v51 = vpop.permute.xlu1 %6090  ;;  %v6390_v45 = vrot.slane %v6184_v35, %v9742_v49  ;;  %vm11630_vm5 = vmmov %vm11615_vm0 }
 0x62f   : > { %v6246_v25 = vrot.slane %v6091_v51, %v11510_v34 }
 0x631   : > { %v6251_v18 = vsel %vm11621_vm7, %v6250_v59, %v6246_v25  ;;  %v10983_v54 = vpop.permute.xlu0 %6117  ;;  %vm11631_vm7 = vmmov %vm11609_vm1 }
 0x632   : > { %v6151_v50 = vpop.permute.xlu1 %6150  ;;  %v6288_v6 = vrot.slane %v10983_v54, %v11510_v34 }
 0x633   : > { %v6339_v61 = vrot.slane %v6151_v50, %v11509_v44 }
 0x635   : > { %v6340_v19 = vsel %vm11622_vm2, %v6339_v61, %v6335_v43  ;;  %v6187_v48 = vpop.permute.xlu0 %6186  ;;  %v6260_v43 = vrot.slane %v10949_v23, %v11510_v34  ;;  %v6381_v23 = vrot.slane %v10968_v40, %v11509_v44  ;;  %vm11632_vm2 = vmmov %vm11615_vm0 }
 0x636   : > { %v6446_v12 = vsel %vm11623_vm8, %v6354_v36, %v6340_v19  ;;  %v6163_v33 = vpop.permute.xlu1 %6162  ;;  %v6395_v51 = vrot.slane %v6187_v48, %v11509_v44  ;;  %vm11633_vm8 = vmmov %vm11609_vm1 }
 0x637   : > { %v6358_v53 = vrot.slane %v6163_v33, %v11510_v34 }
 0x639   : > { %v6193_v17 = vpop.permute.xlu0 %6192  ;;  %v6363_v62 = vsel %vm11615_vm0, %v6362_v26, %v6358_v53 }
 0x63a   : > { %v6097_v0 = vpop.permute.xlu1 %6096  ;;  %v6368_v2 = vsel %vm11626_vm13, %v6367_v4, %v6363_v62  ;;  %v6404_v59 = vrot.slane %v6193_v17, %v9742_v49  ;;  %vm11637_vm13 = vmmov %vm11632_vm2 }
 0x63b   : > { %v6255_v58 = vrot.slane %v6097_v0, %v11509_v44 }
 0x63d   : > { %v6256_v14 = vsel %vm11624_vm10, %v6255_v58, %v6251_v18  ;;  %v10988_v47 = vpop.permute.xlu0 %6126  ;;  %vm11634_vm10 = vmmov %vm11615_vm0 }
 0x63e   : > { %v6440_v15 = vsel %vm11625_vm11, %v6256_v14, %v6439_v32  ;;  %v6103_v1 = vpop.permute.xlu1 %6102  ;;  %v6447_v32 = vsel %vm11628_vm4, %v6368_v2, %v6446_v12  ;;  %v6302_v61 = vrot.slane %v10988_v47, %v11510_v34  ;;  %vm11635_vm11 = vcmask 1043459  }
 0x63f   : > { %v6264_v5 = vrot.slane %v6103_v1, %v9742_v49  ;;  %vm11636_vm0 = vmmov %vm11635_vm11  ;;  %vm11639_vm4 = vcmask 1044484  }
 0x641   : > { %v6196_v57 = vpop.permute.xlu0 %6195  ;;  %v6265_v18 = vsel %vm11630_vm5, %v6264_v5, %v6260_v43  ;;  %vm11641_vm5 = vmmov %vm11609_vm1 }
 0x642   : > { %v6172_v3 = vpop.permute.xlu1 %6171  ;;  %v6409_v36 = vrot.slane %v6196_v57, %v11509_v44 }
 0x643   : > { %v6372_v55 = vrot.slane %v6172_v3, %v11510_v34 }
 0x645   : > { %v6202_v13 = vpop.permute.xlu0 %6201  ;;  %v6377_v24 = vsel %vm11627_vm15, %v6376_v22, %v6372_v55  ;;  %vm11638_vm15 = vmmov %vm11609_vm1 }
 0x646   : > { %v6106_v9 = vpop.permute.xlu1 %6105  ;;  %v6382_v31 = vsel %vm11631_vm7, %v6381_v23, %v6377_v24  ;;  %v6418_v50 = vrot.slane %v6202_v13, %v9742_v49  ;;  %vm11642_vm7 = vmmov %vm11632_vm2 }
 0x647   : > { %v6269_v42 = vrot.slane %v6106_v9, %v11509_v44  ;;  %v6448_v58 = vsel %vm11635_vm11, %v6382_v31, %v6447_v32  ;;  %vm11647_vm11 = vcmask 1046534  }
 0x649   : > { %v10994_v8 = vpop.permute.xlu0 %6135  ;;  %v6270_v35 = vsel %vm11609_vm1, %v6269_v42, %v6265_v18 }
 0x64a   : > { %v6112_v28 = vpop.permute.xlu1 %6111  ;;  %v6441_v9 = vsel %vm11636_vm0, %v6270_v35, %v6440_v15  ;;  %v6316_v62 = vrot.slane %v10994_v8, %v11510_v34 }
 0x64b   : > { %v6278_v40 = vrot.slane %v6112_v28, %v9742_v49 }
 0x64d   : > { %v6205_v60 = vpop.permute.xlu0 %6204  ;;  %v6279_v17 = vsel %vm11637_vm13, %v6278_v40, %v6274_v56  ;;  %v6473_v40 = vld [vmem:[#allocation3] sm:$0x1] }
 0x64e   : > { %v6181_v20 = vpop.permute.xlu1 %6180  ;;  %v6423_v14 = vrot.slane %v6205_v60, %v11509_v44 }
 0x64f   : > { %v6386_v38 = vrot.slane %v6181_v20, %v11510_v34 }
 0x651   : > { %v6211_v52 = vpop.permute.xlu0 %6210  ;;  %v6391_v25 = vsel %vm11629_vm6, %v6390_v45, %v6386_v38  ;;  %vm11640_vm6 = vmmov %vm11609_vm1  ;;  %vm11643_vm1 = vcmask 1045509  }
 0x652   : > { %v10990_v29 = vpop.permute.xlu1 %6114  ;;  %v6396_v12 = vsel %vm11633_vm8, %v6395_v51, %v6391_v25  ;;  %v6432_v57 = vrot.slane %v6211_v52, %v9742_v49  ;;  %vm11645_vm8 = vmmov %vm11642_vm7 }
 0x653   : > { %v6283_v33 = vrot.slane %v10990_v29, %v11509_v44  ;;  %v6449_v29 = vsel %vm11639_vm4, %v6396_v12, %v6448_v58 }
 0x655   : > { %v6214_v1 = vpop.permute.xlu0 %6213 }
 0x656   : > { %v6121_v21 = vpop.permute.xlu1 %6120  ;;  %v6437_v15 = vrot.slane %v6214_v1, %v11509_v44 }
 0x657   : > { %v6292_v0 = vrot.slane %v6121_v21, %v9742_v49 }
 0x65a   : > { %v6190_v30 = vpop.permute.xlu1 %6189 }
 0x65b   : > { %v6400_v11 = vrot.slane %v6190_v30, %v11510_v34  ;;  %v6284_v30 = vsel %vm11641_vm5, %v6283_v33, %v6279_v17 }
 0x65d   : > { %v6405_v19 = vsel %vm11632_vm2, %v6404_v59, %v6400_v11  ;;  %vm11644_vm2 = vmmov %vm11641_vm5 }
 0x65e   : > { %v10992_v27 = vpop.permute.xlu1 %6123  ;;  %v6410_v28 = vsel %vm11638_vm15, %v6409_v36, %v6405_v19  ;;  %vm11648_vm0 = vmmov %vm11644_vm2 }
 0x65f   : > { %v6297_v48 = vrot.slane %v10992_v27, %v11509_v44  ;;  %v6293_v27 = vsel %vm11642_vm7, %v6292_v0, %v6288_v6  ;;  %v6450_v53 = vsel %vm11643_vm1, %v6410_v28, %v6449_v29  ;;  %vm11649_vm13 = vmmov %vm11648_vm0 }
 0x660   : > { %vm11650_vm15 = vmmov %vm11639_vm4  ;;  %vm11651_vm4 = vcmask 1047559  }
 0x661   : > { %v6298_v26 = vsel %vm11644_vm2, %v6297_v48, %v6293_v27  ;;  %vm11653_vm5 = vmmov %vm11642_vm7 }
 0x662   : > { %v6130_v37 = vpop.permute.xlu1 %6129  ;;  %vm11655_vm2 = vmmov %vm11648_vm0 }
 0x663   : > { %v6306_v3 = vrot.slane %v6130_v37, %v9742_v49 }
 0x665   : > { %v6307_v60 = vsel %vm11645_vm8, %v6306_v3, %v6302_v61  ;;  %v6482_v3 = vld [vmem:[#allocation5] sm:$0x1] }
 0x666   : > { %v6199_v41 = vpop.permute.xlu1 %6198 }
 0x667   : > { %v6414_v7 = vrot.slane %v6199_v41, %v11510_v34 }
 0x669   : > { %v6419_v54 = vsel %vm11634_vm10, %v6418_v50, %v6414_v7  ;;  %vm11646_vm10 = vmmov %vm11642_vm7 }
 0x66a   : > { %v6133_v10 = vpop.permute.xlu1 %6132  ;;  %v6424_v21 = vsel %vm11640_vm6, %v6423_v14, %v6419_v54  ;;  %vm11652_vm6 = vmmov %vm11643_vm1 }
 0x66b   : > { %v6311_v47 = vrot.slane %v6133_v10, %v11509_v44  ;;  %v6451_v55 = vsel %vm11647_vm11, %v6424_v21, %v6450_v53  ;;  %vm11654_vm1 = vmmov %vm11647_vm11  ;;  %v11657_v21 = vld [vmem:[#allocation13_spill] sm:$0xff] }
 0x66d   : > { %v6312_v4 = vsel %vm11648_vm0, %v6311_v47, %v6307_v60 }
 0x66e   : > { %v6139_v46 = vpop.permute.xlu1 %6138 }
 0x66f   : > { %v6320_v37 = vrot.slane %v6139_v46, %v9742_v49  ;;  %v6442_v49 = vsel %vm11650_vm15, %v6284_v30, %v6441_v9  ;;  %v6478_v46 = vld [vmem:[#allocation4] sm:$0x1] }
 0x670   : > { %v6443_v5 = vsel %vm11652_vm6, %v6298_v26, %v6442_v49 }
 0x671   : > { %v6321_v10 = vsel %vm11653_vm5, %v6320_v37, %v6316_v62 }
 0x672   : > { %v6208_v20 = vpop.permute.xlu1 %6207 }
 0x673   : > { %v6428_v13 = vrot.slane %v6208_v20, %v11510_v34  ;;  %v6444_v34 = vsel %vm11654_vm1, %v6312_v4, %v6443_v5 }
 0x675   : > { %v6433_v41 = vsel %vm11646_vm10, %v6432_v57, %v6428_v13  ;;  %vm11656_vm10 = vmmov %vm11651_vm4 }
 0x676   : > { %v6438_v22 = vsel %vm11649_vm13, %v6437_v15, %v6433_v41  ;;  %v6142_v38 = vpop.permute.xlu1 %6141 }
 0x677   : > { %v6325_v43 = vrot.slane %v6142_v38, %v11509_v44  ;;  %v6452_v2 = vsel %vm11651_vm4, %v6438_v22, %v6451_v55 }
 0x678   : > { %vm6454_vm7 = vcmp.ne.s32.totalorder %v6452_v2, 0 }
 0x679   : > { %v6326_v8 = vsel %vm11655_vm2, %v6325_v43, %v6321_v10  ;;  %vm6456_vm8 = vmor %vm10823_vm12, %vm6454_vm7 }
 0x67a   : > { %v6445_v45 = vsel %vm11656_vm10, %v6326_v8, %v6444_v34  ;;  %v6945_v24 = vsel %vm6456_vm8, 1.0, %v7777_v39 }
 0x67b   : > { %vm6453_vm11 = vcmp.ne.s32.totalorder %v6445_v45, 0  ;;  %v6462_v52 = vsel %vm5994_vm9, %v6945_v24, 0.0 }
 0x67c   : > { %vm6455_vm0 = vmor %vm10815_vm14, %vm6453_vm11 }
 0x67d   : > { %v6944_v44 = vsel %vm6455_vm0, 1.0, %v7777_v39 }
 0x67e   : > { %v6461_v42 = vsel %vm5994_vm9, %v6944_v44, 0.0 }
 0x67f   : > { %v6463_v11 = vadd.f32 %v6462_v52, %v6461_v42 }
 0x681   : > { %6464 = vadd.xlane.f32.xlu0 %v6463_v11 }
 0x682   : > { %v6015_v56 = vpop.xlane.xlu0 %6014 }
 0x683   : > { %v6016_v23 = vrot.slane %v6015_v56, 4 }
 0x685   : > { %v6017_v63 = vadd.f32 %v6016_v23, %v6015_v56 }
 0x687   : > { %v6018_v6 = vrot.slane %v6017_v63, 2 }
 0x689   : > { %v6019_v59 = vadd.f32 %v6018_v6, %v6017_v63 }
 0x68b   : > { %v6020_v16 = vrot.slane %v6019_v59, 1 }
 0x68d   : > { %v6021_v39 = vadd.f32 %v6020_v16, %v6019_v59 }
 0x6a8   : > { %v5999_v7 = vpop.xlane.xlu1 %5998 }
 0x6a9   : > { %v6000_v32 = vrot.slane %v5999_v7, 4 }
 0x6ab   : > { %v6001_v51 = vadd.f32 %v6000_v32, %v5999_v7 }
 0x6ad   : > { %v6002_v25 = vrot.slane %v6001_v51, 2 }
 0x6af   : > { %v6003_v18 = vadd.f32 %v6002_v25, %v6001_v51 }
 0x6b1   : > { %v6004_v31 = vrot.slane %v6003_v18, 1 }
 0x6b3   : > { %v6005_v50 = vadd.f32 %v6004_v31, %v6003_v18 }
 0x6b5   : > { %7149 = vpush %v6005_v50 }
 0x6b6   : > { %7151 = vpush %v6021_v39 }
 0x6e6   : > { %s7150_s16 = spop %7149 }
 0x6e7   : > { %v6474_v61 = vstv %s7150_s16  ;;  %s7152_s19 = spop %7151  ;;  %s7778_s16 = smov [#allocation6]  }
 0x6e8   : > { %v6475_v36 = vadd.f32 %v6474_v61, %v6473_v40  ;;  %v6479_v35 = vstv %s7152_s19  ;;  %s7660_s19 = sshll.u32 %s7778_s16, 4  ;;  %s7661_s19 = int_to_ptr.vmem [resolvable:$false] %s7660_s19 }
 0x6e9   : > { %v6480_v19 = vadd.f32 %v6479_v35, %v6478_v46  ;;  %p7663_p1 = scmp.lt.s32.totalorder %s11092_s12, %s7661_s19 }
 0x6ea   : > { %6477 = vst.msk [vmem:[#allocation3] sm:$0x1] %vm355_vm3, %v6475_v36 }
 0x6eb   : > { %6481 = vst.msk [vmem:[#allocation4] sm:$0x1] %vm355_vm3, %v6480_v19 }
 0x6f1   : > { %v6946_v12 = vld [vmem:[#allocation3] ss:$0 sm:$0xff] }
 0x6f2   : > { %6496 = vperm.xlu1 %7226, %v6946_v12   ;;  %v6500_v29 = vld [vmem:[#allocation4] sm:$0x1] }
 0x70e   : > { %v6465_v33 = vpop.xlane.xlu0 %6464 }
 0x70f   : > { %v6466_v0 = vrot.slane %v6465_v33, 4 }
 0x711   : > { %v6467_v54 = vadd.f32 %v6466_v0, %v6465_v33 }
 0x713   : > { %v6468_v58 = vrot.slane %v6467_v54, 2 }
 0x715   : > { %v6469_v14 = vadd.f32 %v6468_v58, %v6467_v54 }
 0x717   : > { %v6470_v1 = vrot.slane %v6469_v14, 1 }
 0x719   : > { %v6471_v48 = vadd.f32 %v6470_v1, %v6469_v14 }
 0x71b   : > { %7153 = vpush %v6471_v48 }
 0x74c   : > { %s7154_s30 = spop %7153 }
 0x74d   : > { %v6483_v9 = vstv %s7154_s30  ;;  %s7662_s30 = scalar_lea.vmem %s7661_s19, 256 }
 0x74e   : > { %v6484_v17 = vadd.f32 %v6483_v9, %v6482_v3  ;;  %p7664_p2 = scmp.lt.s32.totalorder %s7662_s30, %s7656_s23 }
 0x750   : > { %6485 = vst.msk [vmem:[#allocation5] sm:$0x1] %vm355_vm3, %v6484_v17  ;;  %p7665_p3 = por %p7664_p2, %p7663_p1 }
 0x752   : > { %p7666_p5 = pnand %p7665_p3, %p7659_p0 }
 0x757   : > { %v6501_v28 = vld [vmem:[#allocation5] sm:$0x1] }
 0x758   : > { %v6502_v47 = vadd.f32 1e-10, %v6501_v28 }
 0x75a   : > { %7652 = vrcp.f32 %v6502_v47 }
 0x764   : > { %v7653_v20 = vpop.eup %7652 }
 0x765   : > { %v6504_v57 = vmul.f32 %v7653_v20, %v6500_v29 }
 0x767   : > { %v6509_v13 = vrot.slane %v6504_v57, %v11657_v21 }
 0x769   : > { %6511 = vperm.xlu0 %7225, %v6509_v13  }
 0x771   : > { %v6497_v30 = vpop.permute.xlu1 %6496 }
 0x772   : > { %6499 = vst [vmem:[%s323_s10] sm:$0xff] %v6497_v30 }
 0x773   : > { %7669 = shalt.err (!%p7666_p5)
}
 0x774   : > { %s7670_s10 = scalar_lea.hbm %s11099_s22, 128  ;;  %s7674_s16 = scalar_lea.hbm %s11184_s6, 256 }
 0x775   : > { %p7671_p6 = scmp.ne.s32.totalorder %s11099_s22, %s7670_s10  ;;  %p7675_p10 = scmp.lt.u32.totalorder %s11099_s22, %s11184_s6 }
 0x776   : > { %p7676_p11 = scmp.lt.u32.totalorder %s7674_s16, %s7670_s10  ;;  %p7678_p13 = scmp.lt.u32.totalorder %s7670_s10, %s11099_s22 }
 0x777   : > { %p7672_p7 = pnand %p7671_p6, %p7860_p4 }
 0x778   : > { %p7677_p12 = por %p7676_p11, %p7675_p10 }
 0x779   : > { %p7673_p9 = pneg %p7672_p7 }
 0x77a   : > { %p7679_p0 = por %p7678_p13, %p7677_p12 }
 0x77c   : > { %p7680_p1 = pnand %p7679_p0, %p7673_p9 }
 0x77e   : > { %7683 = shalt.err (!%p7680_p1)
}
 0x77f   : > { %7155 = dma.vmem_to_hbm [thread:$0]  (%p7860_p4), %s11092_s12, 128, %s11099_s22, %s6516_s21  }
 0x780   : > { %s330_s23 = scalar_lea.vmem [#allocation8], %s6678_s17  ;;  %s11658_s18 = sshll.u32 %s7758_s27, 7 }
 0x781   : > { %s6547_s30 = sshll.u32 %s330_s23, 4  ;;  %s11132_s15 = scalar_lea.hbm %s11185_s7, %s11658_s18  ;;  %s11125_s30 = int_to_ptr.vmem [resolvable:$true] %s6547_s30 }
 0x782   : > { %s6521_s16 = scalar_lea.sflag [#allocation9], %s11085_s8  ;;  %s7684_s19 = scalar_lea.vmem %s11125_s30, 128 }
 0x783   : > { %p7685_p2 = scmp.ne.s32.totalorder %s11125_s30, %s7684_s19  ;;  %s7779_s17 = smov [#allocation8]  }
 0x784   : > { %s7688_s12 = sshll.u32 %s7779_s17, 4  ;;  %s7689_s12 = int_to_ptr.vmem [resolvable:$false] %s7688_s12 }
 0x785   : > { %p7686_p3 = pnand %p7685_p2, %p7860_p4  ;;  %s7690_s27 = scalar_lea.vmem %s7689_s12, 256 }
 0x786   : > { %p7691_p6 = scmp.lt.s32.totalorder %s11125_s30, %s7689_s12  ;;  %p7692_p7 = scmp.lt.s32.totalorder %s7690_s27, %s7684_s19 }
 0x787   : > { %p7687_p5 = pneg %p7686_p3 }
 0x788   : > { %p7693_p9 = por %p7692_p7, %p7691_p6 }
 0x78a   : > { %p7694_p10 = pnand %p7693_p9, %p7687_p5 }
 0x7e8   : > { %v6512_v27 = vpop.permute.xlu0 %6511 }
 0x7e9   : > { %6514 = vst [vmem:[%s330_s23] sm:$0xff] %v6512_v27 }
 0x7ea   : > { %7697 = shalt.err (!%p7694_p10)
}
 0x7eb   : > { %s7698_s8 = scalar_lea.hbm %s11132_s15, 128  ;;  %s7702_s23 = scalar_lea.hbm %s11185_s7, 256 }
 0x7ec   : > { %p7699_p11 = scmp.ne.s32.totalorder %s11132_s15, %s7698_s8  ;;  %p7703_p0 = scmp.lt.u32.totalorder %s11132_s15, %s11185_s7 }
 0x7ed   : > { %p7704_p1 = scmp.lt.u32.totalorder %s7702_s23, %s7698_s8  ;;  %p7706_p3 = scmp.lt.u32.totalorder %s7698_s8, %s11132_s15 }
 0x7ee   : > { %p7700_p12 = pnand %p7699_p11, %p7860_p4 }
 0x7ef   : > { %p7705_p2 = por %p7704_p1, %p7703_p0 }
 0x7f0   : > { %p7701_p13 = pneg %p7700_p12 }
 0x7f1   : > { %p7707_p5 = por %p7706_p3, %p7705_p2 }
 0x7f3   : > { %p7708_p6 = pnand %p7707_p5, %p7701_p13 }
 0x7f5   : > { %7711 = shalt.err (!%p7708_p6)
}
 0x7f6   : > { %7156 = dma.vmem_to_hbm [thread:$0]  (%p7860_p4), %s11125_s30, 128, %s11132_s15, %s6521_s16  }
 0x7f7 PF: > { %p7166_p7 = scmp.ge.s32.totalorder %s7766_s29, 2  ;;  %s6559_s10 = sand.u32 1, %s7746_s24  }
 0x7f8   : > { %s6560_s19 = scalar_lea.sflag [#allocation7], %s6559_s10 }
 0x7f9   : > { %p7160_p9 = pnand %p7166_p7, %p7867_p8 }
 0x7fb   : > { %7737 = dma.done.wait (!%p7160_p9), %s6560_s19, 128  }
 0x7fc   : > { %7739 = vsyncadd (!%p7160_p9), %s6560_s19, 4294967168  ;;  %s6569_s17 = scalar_lea.sflag [#allocation9], %s6559_s10 }
 0x7fd   : > { %7741 = dma.done.wait (!%p7160_p9), %s6569_s17, 128  }
 0x7fe   : > { %7743 = vsyncadd (!%p7160_p9), %s6569_s17, 4294967168  ;;  %s24_s29 = sadd.s32 1, %s7766_s29   ;;  %s11659_s24 = smov %s7750_s25 }
 0x7ff   : > { %p21_p10 = scmp.ge.s32.totalorder %s24_s29, 4   ;;  %s11660_s25 = smov %s7754_s26 }
 0x800   : > { %s11661_s26 = smov %s7873_s14  ;;  %s11662_s27 = smov %s7762_s28 }
 0x801   : > { %s11663_s28 = smov %s11665_s9  ;;  %23 = sbr.rel (!%p21_p10) target bundleno = 6 (0x6), region = 107 }
 0x808   :  { %6574 = vsyncpa [#allocation7], 1 }
 0x809   :  { %6576 = vsyncpa [#allocation7 + $0x1], 1 }
 0x80a   :  { %6577 = vsyncpa [#allocation9], 1 }
 0x80b   :  { %6579 = vsyncpa [#allocation9 + $0x1], 1 }

</bundles_post_ra>
